<compile_context>
chip_gen: v7x
topology: tpu7x:2x2x1
jax: 0.10.0
libtpu: 0.0.40
codegen_flags: <defaults>
</compile_context>

<pallas_src>
import functools

import jax
import jax.numpy as jnp
from jax import lax
from jax.experimental import pallas as pl
from jax.experimental.pallas import tpu as pltpu


ROW_PAD = 8           # tail rows on the flattened (H*Wp) axis; must be >= 1 (see note)
_WEIGHT_BUF_BUDGET = 16 * 1024 * 1024   # bytes for the pipelined linear weight buffers
_X_BUF_BUDGET = 16 * 1024 * 1024        # bytes for the double-buffered linear x blocks


def _round_up(x, m):
    return ((x + m - 1) // m) * m


def _conv_row_chunk(rows, cout):
    """Rows per accumulator chunk so a (ch, cout) f32 accumulator stays ~<=24 vregs."""
    cpad = max(cout, 128)
    ch = max(8, ((24 * 1024) // cpad) // 8 * 8)
    return min(rows, ch)


# ---------------------------------------------------------------------------
# Fused Conv2d(2x2, valid) + folded BatchNorm2d stack (shift-and-matmul).
# Input : (B, H*Wp + ROW_PAD, 1) flattened NHWC, width zero-padded to Wp.
# Output: (B, (H-4)*(W-4), C_last) -- margin-dropped, NHWC (y, x, c) order.
# ---------------------------------------------------------------------------
def _conv_stack_kernel(x_ref, *refs, H, W, Wp, chans):
    n_layers = len(chans) - 1
    w_refs = refs[:3 * n_layers]
    o_ref = refs[3 * n_layers]
    bufs = refs[3 * n_layers + 1:]
    h4 = H - n_layers
    w4 = W - n_layers

    def read_input(off, sz):
        return x_ref[0, pl.ds(off, sz), :]

    def make_read(buf):
        return lambda off, sz: buf[pl.ds(off, sz), :]

    read = read_input
    hin = H
    for layer in range(n_layers):
        cin, cout = chans[layer], chans[layer + 1]
        wk_ref = w_refs[3 * layer]                     # (4, cin, cout)
        scale = w_refs[3 * layer + 1][...]             # (1, cout)
        shift = w_refs[3 * layer + 2][...]             # (1, cout)
        out_buf = bufs[layer]
        rows = (hin - 1) * Wp
        ch = _conv_row_chunk(rows, cout)
        for r0 in range(0, rows, ch):                  # static unroll, small trip count
            sz = min(ch, rows - r0)
            acc = jnp.zeros((sz, cout), jnp.float32)
            for t, (dy, dx) in enumerate(((0, 0), (0, 1), (1, 0), (1, 1))):
                # dy offsets (0, Wp) are sublane aligned thanks to the width pad.
                xwin = read(r0 + dy * Wp + dx, sz)     # (sz, cin)
                w_tap = wk_ref[t]                      # (cin, cout)
                if cin == 1:
                    # First layer: contraction depth 1 -> broadcast multiply (VPU).
                    acc = acc + xwin * w_tap
                else:
                    acc = acc + jnp.dot(xwin, w_tap,
                                        preferred_element_type=jnp.float32)
            # Store only the rows produced (no zero-fill + overwrite).
            out_buf[pl.ds(r0, sz), :] = acc * scale + shift
        read = make_read(out_buf)
        hin -= 1

    # Margin drop + NHWC flatten: valid (y < h4, x < w4) rows of the last buffer
    # land at output row y*w4 + x, giving feature index (y*w4 + x)*c + channel.
    last = bufs[n_layers - 1]
    for y in range(h4):
        o_ref[0, pl.ds(y * w4, w4), :] = last[pl.ds(y * Wp, w4), :]


def conv_stack(x_flat, conv_params, *, H, W, Wp):
    B, rows_in, cin0 = x_flat.shape
    n_layers = len(conv_params)
    chans = [cin0] + [wk.shape[2] for wk, _, _ in conv_params]
    assert rows_in == H * Wp + ROW_PAD, (rows_in, H, Wp)
    assert ROW_PAD >= 1
    h4, w4 = H - n_layers, W - n_layers
    c_last = chans[-1]

    in_specs = [pl.BlockSpec((1, rows_in, cin0), lambda b: (b, 0, 0))]
    operands = [x_flat]
    for wk, scale, shift in conv_params:
        cin, cout = wk.shape[1], wk.shape[2]
        in_specs.append(pl.BlockSpec((4, cin, cout), lambda b: (0, 0, 0)))
        in_specs.append(pl.BlockSpec((1, cout), lambda b: (0, 0)))
        in_specs.append(pl.BlockSpec((1, cout), lambda b: (0, 0)))
        operands.extend([wk, scale, shift])

    scratch = []
    hin = H
    for wk, _, _ in conv_params:
        cout = wk.shape[2]
        scratch.append(pltpu.VMEM(((hin - 1) * Wp + ROW_PAD, cout), jnp.float32))
        hin -= 1

    kernel = functools.partial(_conv_stack_kernel, H=H, W=W, Wp=Wp,
                               chans=tuple(chans))
    return pl.pallas_call(
        kernel,
        out_shape=jax.ShapeDtypeStruct((B, h4 * w4, c_last), jnp.float32),
        grid_spec=pltpu.PrefetchScalarGridSpec(
            num_scalar_prefetch=0,
            grid=(B,),
            in_specs=in_specs,
            out_specs=pl.BlockSpec((1, h4 * w4, c_last), lambda b: (b, 0, 0)),
            scratch_shapes=scratch,
        ),
        compiler_params=pltpu.CompilerParams(
            dimension_semantics=("parallel",),
            vmem_limit_bytes=32 * 1024 * 1024,
        ),
    )(*operands)


# ---------------------------------------------------------------------------
# Tiled GEMM + per-column affine (+ReLU) for the Linear layers.
#     out = maybe_relu((x @ w) * scale + shift), f32 accumulation in the
#     resident output block; weights may be bf16.
# ---------------------------------------------------------------------------
def _matmul_affine_kernel(x_ref, w_ref, scale_ref, shift_ref, o_ref, *,
                          relu, cast_dtype):
    @pl.when(pl.program_id(2) == 0)
    def _():
        o_ref[...] = jnp.zeros_like(o_ref)

    xv = x_ref[...]
    if cast_dtype is not None:
        xv = xv.astype(cast_dtype)
    o_ref[...] += jnp.dot(xv, w_ref[...], preferred_element_type=jnp.float32)

    @pl.when(pl.program_id(2) == pl.num_programs(2) - 1)
    def _():
        out = o_ref[...] * scale_ref[...] + shift_ref[...]
        if relu:
            out = jnp.maximum(out, 0.0)
        o_ref[...] = out


def matmul_affine(x, w, scale, shift, *, relu=False):
    """x: (M, K) f32; w: (Kp, Np) pre-padded (Kp >= K, both mult of 128), possibly
    bf16; scale/shift: (1, Np) f32.  Returns (M, Np) f32."""
    M, K = x.shape
    Kp, Np = w.shape
    assert Kp >= K and Kp % 128 == 0 and Np % 128 == 0, (K, Kp, Np)
    assert scale.shape == (1, Np) and shift.shape == (1, Np)
    if Kp > K:
        x = jnp.pad(x, ((0, 0), (0, Kp - K)))

    # M tiling / padding.
    if M > 256:
        tm = 256
        Mp = _round_up(M, tm)
    else:
        Mp = _round_up(M, 8)
        tm = Mp
    if Mp > M:
        x = jnp.pad(x, ((0, Mp - M), (0, 0)))

    # N tiling: keep the j ("parallel") axis extent >= 2 where possible so v7x's
    # two TensorCores split the weight stream.
    if Np % 512 == 0 and Np > 512:
        tn = 512
    elif Np % 256 == 0 and Np > 256:
        tn = 256
    elif Np > 128:
        tn = 128
    else:
        tn = Np

    # K tiling: few, multi-MiB weight tiles -- largest divisor of Kp that is a
    # multiple of 128 and keeps the 3x-buffered weight block and the 2x-buffered
    # x block within budget (<= ~48 MiB total incl. output -> fits v7x VMEM).
    wbytes = jnp.dtype(w.dtype).itemsize
    n_wbuf = 3
    tk = 128
    for cand in range(128, Kp + 1, 128):
        if (Kp % cand == 0
                and n_wbuf * cand * tn * wbytes <= _WEIGHT_BUF_BUDGET
                and 2 * tm * cand * 4 <= _X_BUF_BUDGET):
            tk = cand
    k_steps = Kp // tk

    w_spec = pl.BlockSpec((tk, tn), lambda i, j, k: (k, j))
    if k_steps >= 3:
        # Deeper weight pipelining keeps the HBM pull continuous on the
        # bandwidth-bound linear1 (only meaningful with a real K loop).
        w_spec = pl.BlockSpec((tk, tn), lambda i, j, k: (k, j),
                              pipeline_mode=pl.Buffered(3))

    cast_dtype = w.dtype if w.dtype != x.dtype else None
    kernel = functools.partial(_matmul_affine_kernel, relu=relu,
                               cast_dtype=cast_dtype)
    cost = pl.CostEstimate(
        flops=2 * Mp * Kp * Np,
        transcendentals=0,
        bytes_accessed=4 * Mp * Kp + wbytes * Kp * Np + 4 * Mp * Np,
    )
    out = pl.pallas_call(
        kernel,
        out_shape=jax.ShapeDtypeStruct((Mp, Np), jnp.float32),
        grid_spec=pltpu.PrefetchScalarGridSpec(
            num_scalar_prefetch=0,
            grid=(Mp // tm, Np // tn, k_steps),
            in_specs=[
                pl.BlockSpec((tm, tk), lambda i, j, k: (i, k)),
                w_spec,
                pl.BlockSpec((1, tn), lambda i, j, k: (0, j)),
                pl.BlockSpec((1, tn), lambda i, j, k: (0, j)),
            ],
            out_specs=pl.BlockSpec((tm, tn), lambda i, j, k: (i, j)),
        ),
        compiler_params=pltpu.CompilerParams(
            dimension_semantics=("parallel", "parallel", "arbitrary"),
            vmem_limit_bytes=48 * 1024 * 1024,
        ),
        cost_estimate=cost,
    )(x, w, scale, shift)
    return out[:M] if Mp > M else out


# ---------------------------------------------------------------------------
# Parameters: PyTorch-style params, then one-time kernel-layout preparation.
# ---------------------------------------------------------------------------
def build_params(key, board_height, board_width, nf=32, number_of_moves=361,
                 hidden=1024):
    chans = [1, nf, nf * 2, nf * 4, nf * 8]
    keys = jax.random.split(key, 20)
    ki = 0
    convs, bns = [], []
    for layer in range(4):
        cin, cout = chans[layer], chans[layer + 1]
        bound = 1.0 / float(cin * 2 * 2) ** 0.5
        w = jax.random.uniform(keys[ki], (cout, cin, 2, 2), jnp.float32,
                               -bound, bound); ki += 1
        b = jax.random.uniform(keys[ki], (cout,), jnp.float32,
                               -bound, bound); ki += 1
        convs.append((w, b))
        gamma = 1.0 + 0.1 * jax.random.normal(keys[ki], (cout,), jnp.float32); ki += 1
        beta = 0.1 * jax.random.normal(keys[ki], (cout,), jnp.float32); ki += 1
        run_mean = 0.05 * jnp.arange(cout, dtype=jnp.float32) / cout
        run_var = 1.0 + 0.5 * jnp.arange(cout, dtype=jnp.float32) / cout
        bns.append((gamma, beta, run_mean, run_var))

    in_features = nf * 8 * (board_height - 4) * (board_width - 4)
    b1 = 1.0 / float(in_features) ** 0.5
    w_l1 = jax.random.uniform(keys[ki], (hidden, in_features), jnp.float32,
                              -b1, b1); ki += 1
    bias_l1 = jax.random.uniform(keys[ki], (hidden,), jnp.float32, -b1, b1); ki += 1
    b2 = 1.0 / float(hidden) ** 0.5
    w_l2 = jax.random.uniform(keys[ki], (number_of_moves, hidden), jnp.float32,
                              -b2, b2); ki += 1
    bias_l2 = jax.random.uniform(keys[ki], (number_of_moves,), jnp.float32,
                                 -b2, b2); ki += 1

    return {"convs": convs, "bns": bns,
            "linears": [(w_l1, bias_l1), (w_l2, bias_l2)]}


def prepare_kernel_params(params, board_height, board_width, eps=1e-5,
                          linear_weight_dtype=jnp.bfloat16):
    """One-time layout work: conv weight reshape + BN fold, linear transposes,
    NCHW-flatten permutation folded into w1, K/N padding, bf16 weight storage."""
    H, W = board_height, board_width
    convs_k = []
    for (w, b), (gamma, beta, rm, rv) in zip(params["convs"], params["bns"]):
        cout, cin = w.shape[0], w.shape[1]
        # (Cout, Cin, kh, kw) -> (4, Cin, Cout), tap order (dy,dx)=(0,0),(0,1),(1,0),(1,1)
        wk = jnp.transpose(w, (2, 3, 1, 0)).reshape(4, cin, cout)
        a = gamma / jnp.sqrt(rv + eps)
        shift = a * (b - rm) + beta
        convs_k.append((wk, a.reshape(1, cout), shift.reshape(1, cout)))

    (w1, b1), (w2, b2) = params["linears"]
    hidden, in_features = w1.shape
    moves = w2.shape[0]
    n_layers = len(convs_k)
    c_last = convs_k[-1][0].shape[-1]
    h4, w4 = H - n_layers, W - n_layers
    assert in_features == c_last * h4 * w4, (in_features, c_last, h4, w4)

    # Fold PyTorch's NCHW flatten into a row permutation of w1 (rows re-ordered to
    # the kernel's NHWC (y, x, c) flatten), transpose to (K, N), pad K/N to
    # multiples of 128, and store in bf16 (f32 accumulation in-kernel).
    perm = jnp.transpose(jnp.arange(in_features).reshape(c_last, h4, w4),
                         (1, 2, 0)).reshape(-1)
    w1k = jnp.take(w1, perm, axis=1).T                         # (K, hidden)
    kp1 = _round_up(in_features, 128)
    np1 = _round_up(hidden, 128)
    w1k = jnp.pad(w1k, ((0, kp1 - in_features), (0, np1 - hidden)))
    w1k = w1k.astype(linear_weight_dtype)
    s1 = jnp.ones((1, np1), jnp.float32)
    sh1 = jnp.pad(b1, (0, np1 - hidden)).reshape(1, np1)

    w2k = w2.T                                                 # (hidden, moves)
    kp2 = _round_up(hidden, 128)
    np2 = _round_up(moves, 128)                                # 361 -> 384 lane-dense
    w2k = jnp.pad(w2k, ((0, kp2 - hidden), (0, np2 - moves)))
    w2k = w2k.astype(linear_weight_dtype)
    s2 = jnp.ones((1, np2), jnp.float32)
    sh2 = jnp.pad(b2, (0, np2 - moves)).reshape(1, np2)

    return {"convs": convs_k, "l1": (w1k, s1, sh1), "l2": (w2k, s2, sh2)}


# ---------------------------------------------------------------------------
# Forward pass
# ---------------------------------------------------------------------------
def alphago_policy_forward(kparams, x_nchw, *, num_moves):
    B, cin, H, W = x_nchw.shape
    assert cin == 1
    Wp = _round_up(W, 8)   # width pad -> sublane-aligned dy shifts in the conv kernel

    # (B,1,H,W) -> flattened NHWC (B, H*Wp + ROW_PAD, 1) with zero width/tail pads.
    x = x_nchw.reshape(B, H, W).astype(jnp.float32)
    x = jnp.pad(x, ((0, 0), (0, 0), (0, Wp - W))).reshape(B, H * Wp, 1)
    x = jnp.pad(x, ((0, 0), (0, ROW_PAD), (0, 0)))

    # Fused conv(2x2)+BN stack: one pallas_call, intermediates in VMEM, output
    # already margin-dropped and NHWC-flattened per (y, x) position.
    feat = conv_stack(x, kparams["convs"], H=H, W=W, Wp=Wp)
    Bf, P, C = feat.shape
    feat = feat.reshape(Bf, P * C)   # trailing-dim merge of contiguous dims: free

    w1k, s1, sh1 = kparams["l1"]
    w2k, s2, sh2 = kparams["l2"]
    h = matmul_affine(feat, w1k, s1, sh1, relu=True)
    out = matmul_affine(h, w2k, s2, sh2, relu=False)
    return out[:, :num_moves]


# Pure-JAX reference (NCHW, like PyTorch) used only for correctness checking.
def reference_forward(params, x_nchw, eps=1e-5):
    x = x_nchw
    for (w, b), (gamma, beta, rm, rv) in zip(params["convs"], params["bns"]):
        x = lax.conv_general_dilated(
            x, w, (1, 1), "VALID",
            dimension_numbers=("NCHW", "OIHW", "NCHW"))
        x = x + b[None, :, None, None]
        x = (gamma[None, :, None, None] * (x - rm[None, :, None, None])
             / jnp.sqrt(rv + eps)[None, :, None, None]
             + beta[None, :, None, None])
    B = x.shape[0]
    x = x.reshape(B, -1)
    (w1, b1), (w2, b2) = params["linears"]
    x = jnp.maximum(x @ w1.T + b1, 0.0)
    return x @ w2.T + b2


if __name__ == "__main__":
    # Small shapes consistent with the module's structure (the PyTorch module
    # hardcodes Linear(256*15*15, 1024) i.e. board=19x19/nf=32; here
    # in_features = nf*8*(H-4)*(W-4) so a small config runs the same code path).
    batch = 2
    board_height = board_width = 12
    nf = 8
    number_of_moves = 361
    hidden = 1024

    key = jax.random.PRNGKey(0)
    pkey, xkey = jax.random.split(key)
    params = build_params(pkey, board_height, board_width, nf,
                          number_of_moves, hidden)
    kparams = prepare_kernel_params(params, board_height, board_width)
    x = jax.random.normal(xkey, (batch, 1, board_height, board_width),
                          jnp.float32)

    fwd = jax.jit(functools.partial(alphago_policy_forward,
                                    num_moves=number_of_moves))
    out = jax.block_until_ready(fwd(kparams, x))
    assert out.shape == (batch, number_of_moves), out.shape

    ref = reference_forward(params, x)
    max_err = float(jnp.max(jnp.abs(out - ref)))
    ref_scale = float(jnp.max(jnp.abs(ref)))
    # Linear weights are stored in bf16 (f32 accumulation) -> loosened tolerance.
    assert max_err <= 2e-2 + 2e-2 * ref_scale, (max_err, ref_scale)

    print("KERNEL_OK")
</pallas_src>

<mosaic_0001>
module attributes {stable_mosaic.version = 11 : i64} {
  func.func @_matmul_affine_kernel(%arg0: i32, %arg1: i32, %arg2: i32, %arg3: memref<8x4096xf32, #tpu.memory_space<vmem>>, %arg4: memref<4096x512xbf16, #tpu.memory_space<vmem>>, %arg5: memref<1x512xf32, #tpu.memory_space<vmem>>, %arg6: memref<1x512xf32, #tpu.memory_space<vmem>>, %arg7: memref<8x512xf32, #tpu.memory_space<vmem>>) attributes {dimension_semantics = [#tpu.dimension_semantics<parallel>, #tpu.dimension_semantics<parallel>, #tpu.dimension_semantics<arbitrary>], iteration_bounds = array<i64: 1, 2, 1>, scalar_prefetch = 0 : i64, scratch_operands = 0 : i64, tpu.core_type = #tpu.core_type<tc>, window_params = [{transform_indices = @transform_0, window_bounds = array<i64: 8, 4096>}, {transform_indices = @transform_1, window_bounds = array<i64: 4096, 512>}, {transform_indices = @transform_2, window_bounds = array<i64: 1, 512>}, {transform_indices = @transform_3, window_bounds = array<i64: 1, 512>}, {transform_indices = @transform_4, window_bounds = array<i64: 8, 512>}]} {
    %c0_i32 = arith.constant 0 : i32
    %0 = arith.cmpi eq, %arg2, %c0_i32 : i32
    %1 = arith.extui %0 : i1 to i32
    %c0_i32_0 = arith.constant 0 : i32
    %2 = arith.cmpi ne, %1, %c0_i32_0 : i32
    scf.if %2 {
      %cst_10 = arith.constant 0.000000e+00 : f32
      %13 = vector.broadcast %cst_10 : f32 to vector<8x512xf32>
      %c0_11 = arith.constant 0 : index
      %c0_12 = arith.constant 0 : index
      %14 = vector.load %arg7[%c0_11, %c0_12] : memref<8x512xf32, #tpu.memory_space<vmem>>, vector<8x512xf32>
      tpu.vector_store %arg7[%c0_11, %c0_12], %13 {strides = array<i32>} : memref<8x512xf32, #tpu.memory_space<vmem>>, vector<8x512xf32>,
    } else {
    }
    %c0 = arith.constant 0 : index
    %c0_1 = arith.constant 0 : index
    %3 = vector.load %arg3[%c0, %c0_1] : memref<8x4096xf32, #tpu.memory_space<vmem>>, vector<8x4096xf32>
    %4 = arith.truncf %3 : vector<8x4096xf32> to vector<8x4096xbf16>
    %c0_2 = arith.constant 0 : index
    %c0_3 = arith.constant 0 : index
    %5 = vector.load %arg7[%c0_2, %c0_3] : memref<8x512xf32, #tpu.memory_space<vmem>>, vector<8x512xf32>
    %c0_4 = arith.constant 0 : index
    %c0_5 = arith.constant 0 : index
    %6 = vector.load %arg4[%c0_4, %c0_5] : memref<4096x512xbf16, #tpu.memory_space<vmem>>, vector<4096x512xbf16>
    %cst = arith.constant dense<0.000000e+00> : vector<8x512xf32>
    %7 = tpu.matmul %4, %6, %cst {dimension_numbers = #tpu.dot_dimension_numbers<[1], [0], [0], [1], [0, 0, 1, 1], [], []>} : vector<8x4096xbf16>, vector<4096x512xbf16>, vector<8x512xf32> -> vector<8x512xf32>
    %8 = arith.addf %5, %7 : vector<8x512xf32>
    %c0_6 = arith.constant 0 : index
    %c0_7 = arith.constant 0 : index
    %9 = vector.load %arg7[%c0_6, %c0_7] : memref<8x512xf32, #tpu.memory_space<vmem>>, vector<8x512xf32>
    tpu.vector_store %arg7[%c0_6, %c0_7], %8 {strides = array<i32>} : memref<8x512xf32, #tpu.memory_space<vmem>>, vector<8x512xf32>,
    %c0_i32_8 = arith.constant 0 : i32
    %10 = arith.cmpi eq, %arg2, %c0_i32_8 : i32
    %11 = arith.extui %10 : i1 to i32
    %c0_i32_9 = arith.constant 0 : i32
    %12 = arith.cmpi ne, %11, %c0_i32_9 : i32
    scf.if %12 {
      %c0_10 = arith.constant 0 : index
      %c0_11 = arith.constant 0 : index
      %13 = vector.load %arg7[%c0_10, %c0_11] : memref<8x512xf32, #tpu.memory_space<vmem>>, vector<8x512xf32>
      %c0_12 = arith.constant 0 : index
      %c0_13 = arith.constant 0 : index
      %14 = vector.load %arg5[%c0_12, %c0_13] : memref<1x512xf32, #tpu.memory_space<vmem>>, vector<1x512xf32>
      %15 = vector.broadcast %14 : vector<1x512xf32> to vector<8x512xf32>
      %16 = arith.mulf %13, %15 : vector<8x512xf32>
      %c0_14 = arith.constant 0 : index
      %c0_15 = arith.constant 0 : index
      %17 = vector.load %arg6[%c0_14, %c0_15] : memref<1x512xf32, #tpu.memory_space<vmem>>, vector<1x512xf32>
      %18 = vector.broadcast %17 : vector<1x512xf32> to vector<8x512xf32>
      %19 = arith.addf %16, %18 : vector<8x512xf32>
      %cst_16 = arith.constant 0.000000e+00 : f32
      %20 = vector.broadcast %cst_16 : f32 to vector<8x512xf32>
      %21 = arith.maximumf %19, %20 : vector<8x512xf32>
      %c0_17 = arith.constant 0 : index
      %c0_18 = arith.constant 0 : index
      %22 = vector.load %arg7[%c0_17, %c0_18] : memref<8x512xf32, #tpu.memory_space<vmem>>, vector<8x512xf32>
      tpu.vector_store %arg7[%c0_17, %c0_18], %21 {strides = array<i32>} : memref<8x512xf32, #tpu.memory_space<vmem>>, vector<8x512xf32>,
    } else {
    }
    return
  }
  func.func @transform_0(%arg0: i32, %arg1: i32, %arg2: i32) -> (i32, i32) {
    %c0_i32 = arith.constant 0 : i32
    return %arg0, %arg2 : i32, i32
  }
  func.func @transform_1(%arg0: i32, %arg1: i32, %arg2: i32) -> (i32, i32) {
    %c0_i32 = arith.constant 0 : i32
    return %arg2, %arg1 : i32, i32
  }
  func.func @transform_2(%arg0: i32, %arg1: i32, %arg2: i32) -> (i32, i32) {
    %c0_i32 = arith.constant 0 : i32
    %c0_i32_0 = arith.constant 0 : i32
    return %c0_i32, %arg1 : i32, i32
  }
  func.func @transform_3(%arg0: i32, %arg1: i32, %arg2: i32) -> (i32, i32) {
    %c0_i32 = arith.constant 0 : i32
    %c0_i32_0 = arith.constant 0 : i32
    return %c0_i32, %arg1 : i32, i32
  }
  func.func @transform_4(%arg0: i32, %arg1: i32, %arg2: i32) -> (i32, i32) {
    %c0_i32 = arith.constant 0 : i32
    return %arg0, %arg1 : i32, i32
  }
}

module attributes {stable_mosaic.version = 11 : i64} {
  func.func @_conv_stack_kernel(%arg0: i32, %arg1: memref<1x200x1xf32, #tpu.memory_space<vmem>>, %arg2: memref<4x1x8xf32, #tpu.memory_space<vmem>>, %arg3: memref<1x8xf32, #tpu.memory_space<vmem>>, %arg4: memref<1x8xf32, #tpu.memory_space<vmem>>, %arg5: memref<4x8x16xf32, #tpu.memory_space<vmem>>, %arg6: memref<1x16xf32, #tpu.memory_space<vmem>>, %arg7: memref<1x16xf32, #tpu.memory_space<vmem>>, %arg8: memref<4x16x32xf32, #tpu.memory_space<vmem>>, %arg9: memref<1x32xf32, #tpu.memory_space<vmem>>, %arg10: memref<1x32xf32, #tpu.memory_space<vmem>>, %arg11: memref<4x32x64xf32, #tpu.memory_space<vmem>>, %arg12: memref<1x64xf32, #tpu.memory_space<vmem>>, %arg13: memref<1x64xf32, #tpu.memory_space<vmem>>, %arg14: memref<1x64x64xf32, #tpu.memory_space<vmem>>, %arg15: memref<184x8xf32, #tpu.memory_space<vmem>>, %arg16: memref<168x16xf32, #tpu.memory_space<vmem>>, %arg17: memref<152x32xf32, #tpu.memory_space<vmem>>, %arg18: memref<136x64xf32, #tpu.memory_space<vmem>>) attributes {dimension_semantics = [#tpu.dimension_semantics<parallel>], iteration_bounds = array<i64: 2>, scalar_prefetch = 0 : i64, scratch_operands = 4 : i64, tpu.core_type = #tpu.core_type<tc>, window_params = [{transform_indices = @transform_0, window_bounds = array<i64: 1, 200, 1>}, {pipeline_mode = #tpu.pipeline_mode<synchronous>, transform_indices = @transform_1, window_bounds = array<i64: 4, 1, 8>}, {pipeline_mode = #tpu.pipeline_mode<synchronous>, transform_indices = @transform_2, window_bounds = array<i64: 1, 8>}, {pipeline_mode = #tpu.pipeline_mode<synchronous>, transform_indices = @transform_3, window_bounds = array<i64: 1, 8>}, {pipeline_mode = #tpu.pipeline_mode<synchronous>, transform_indices = @transform_4, window_bounds = array<i64: 4, 8, 16>}, {pipeline_mode = #tpu.pipeline_mode<synchronous>, transform_indices = @transform_5, window_bounds = array<i64: 1, 16>}, {pipeline_mode = #tpu.pipeline_mode<synchronous>, transform_indices = @transform_6, window_bounds = array<i64: 1, 16>}, {pipeline_mode = #tpu.pipeline_mode<synchronous>, transform_indices = @transform_7, window_bounds = array<i64: 4, 16, 32>}, {pipeline_mode = #tpu.pipeline_mode<synchronous>, transform_indices = @transform_8, window_bounds = array<i64: 1, 32>}, {pipeline_mode = #tpu.pipeline_mode<synchronous>, transform_indices = @transform_9, window_bounds = array<i64: 1, 32>}, {pipeline_mode = #tpu.pipeline_mode<synchronous>, transform_indices = @transform_10, window_bounds = array<i64: 4, 32, 64>}, {pipeline_mode = #tpu.pipeline_mode<synchronous>, transform_indices = @transform_11, window_bounds = array<i64: 1, 64>}, {pipeline_mode = #tpu.pipeline_mode<synchronous>, transform_indices = @transform_12, window_bounds = array<i64: 1, 64>}, {transform_indices = @transform_13, window_bounds = array<i64: 1, 64, 64>}]} {
    %c0 = arith.constant 0 : index
    %c0_0 = arith.constant 0 : index
    %0 = vector.load %arg3[%c0, %c0_0] : memref<1x8xf32, #tpu.memory_space<vmem>>, vector<1x8xf32>
    %c0_1 = arith.constant 0 : index
    %c0_2 = arith.constant 0 : index
    %1 = vector.load %arg4[%c0_1, %c0_2] : memref<1x8xf32, #tpu.memory_space<vmem>>, vector<1x8xf32>
    %cst = arith.constant 0.000000e+00 : f32
    %2 = vector.broadcast %cst : f32 to vector<176x8xf32>
    %c0_3 = arith.constant 0 : index
    %c0_4 = arith.constant 0 : index
    %c0_5 = arith.constant 0 : index
    %3 = vector.load %arg1[%c0_3, %c0_4, %c0_5] : memref<1x200x1xf32, #tpu.memory_space<vmem>>, vector<1x176x1xf32>
    %4 = vector.shape_cast %3 : vector<1x176x1xf32> to vector<176x1xf32>
    %c0_6 = arith.constant 0 : index
    %c0_7 = arith.constant 0 : index
    %c0_8 = arith.constant 0 : index
    %5 = vector.load %arg2[%c0_6, %c0_7, %c0_8] : memref<4x1x8xf32, #tpu.memory_space<vmem>>, vector<1x1x8xf32>
    %6 = vector.shape_cast %5 : vector<1x1x8xf32> to vector<1x8xf32>
    %7 = vector.broadcast %4 : vector<176x1xf32> to vector<176x8xf32>
    %8 = vector.broadcast %6 : vector<1x8xf32> to vector<176x8xf32>
    %9 = arith.mulf %7, %8 : vector<176x8xf32>
    %10 = arith.addf %2, %9 : vector<176x8xf32>
    %c0_9 = arith.constant 0 : index
    %c1 = arith.constant 1 : index
    %c0_10 = arith.constant 0 : index
    %11 = vector.load %arg1[%c0_9, %c1, %c0_10] : memref<1x200x1xf32, #tpu.memory_space<vmem>>, vector<1x176x1xf32>
    %12 = vector.shape_cast %11 : vector<1x176x1xf32> to vector<176x1xf32>
    %c1_11 = arith.constant 1 : index
    %c0_12 = arith.constant 0 : index
    %c0_13 = arith.constant 0 : index
    %13 = vector.load %arg2[%c1_11, %c0_12, %c0_13] : memref<4x1x8xf32, #tpu.memory_space<vmem>>, vector<1x1x8xf32>
    %14 = vector.shape_cast %13 : vector<1x1x8xf32> to vector<1x8xf32>
    %15 = vector.broadcast %12 : vector<176x1xf32> to vector<176x8xf32>
    %16 = vector.broadcast %14 : vector<1x8xf32> to vector<176x8xf32>
    %17 = arith.mulf %15, %16 : vector<176x8xf32>
    %18 = arith.addf %10, %17 : vector<176x8xf32>
    %c0_14 = arith.constant 0 : index
    %c16 = arith.constant 16 : index
    %c0_15 = arith.constant 0 : index
    %19 = vector.load %arg1[%c0_14, %c16, %c0_15] : memref<1x200x1xf32, #tpu.memory_space<vmem>>, vector<1x176x1xf32>
    %20 = vector.shape_cast %19 : vector<1x176x1xf32> to vector<176x1xf32>
    %c2 = arith.constant 2 : index
    %c0_16 = arith.constant 0 : index
    %c0_17 = arith.constant 0 : index
    %21 = vector.load %arg2[%c2, %c0_16, %c0_17] : memref<4x1x8xf32, #tpu.memory_space<vmem>>, vector<1x1x8xf32>
    %22 = vector.shape_cast %21 : vector<1x1x8xf32> to vector<1x8xf32>
    %23 = vector.broadcast %20 : vector<176x1xf32> to vector<176x8xf32>
    %24 = vector.broadcast %22 : vector<1x8xf32> to vector<176x8xf32>
    %25 = arith.mulf %23, %24 : vector<176x8xf32>
    %26 = arith.addf %18, %25 : vector<176x8xf32>
    %c0_18 = arith.constant 0 : index
    %c17 = arith.constant 17 : index
    %c0_19 = arith.constant 0 : index
    %27 = vector.load %arg1[%c0_18, %c17, %c0_19] : memref<1x200x1xf32, #tpu.memory_space<vmem>>, vector<1x176x1xf32>
    %28 = vector.shape_cast %27 : vector<1x176x1xf32> to vector<176x1xf32>
    %c3 = arith.constant 3 : index
    %c0_20 = arith.constant 0 : index
    %c0_21 = arith.constant 0 : index
    %29 = vector.load %arg2[%c3, %c0_20, %c0_21] : memref<4x1x8xf32, #tpu.memory_space<vmem>>, vector<1x1x8xf32>
    %30 = vector.shape_cast %29 : vector<1x1x8xf32> to vector<1x8xf32>
    %31 = vector.broadcast %28 : vector<176x1xf32> to vector<176x8xf32>
    %32 = vector.broadcast %30 : vector<1x8xf32> to vector<176x8xf32>
    %33 = arith.mulf %31, %32 : vector<176x8xf32>
    %34 = arith.addf %26, %33 : vector<176x8xf32>
    %35 = vector.broadcast %0 : vector<1x8xf32> to vector<176x8xf32>
    %36 = arith.mulf %34, %35 : vector<176x8xf32>
    %37 = vector.broadcast %1 : vector<1x8xf32> to vector<176x8xf32>
    %38 = arith.addf %36, %37 : vector<176x8xf32>
    %c0_22 = arith.constant 0 : index
    %c0_23 = arith.constant 0 : index
    %39 = vector.load %arg15[%c0_22, %c0_23] : memref<184x8xf32, #tpu.memory_space<vmem>>, vector<176x8xf32>
    tpu.vector_store %arg15[%c0_22, %c0_23], %38 {strides = array<i32>} : memref<184x8xf32, #tpu.memory_space<vmem>>, vector<176x8xf32>,
    %c0_24 = arith.constant 0 : index
    %c0_25 = arith.constant 0 : index
    %40 = vector.load %arg6[%c0_24, %c0_25] : memref<1x16xf32, #tpu.memory_space<vmem>>, vector<1x16xf32>
    %c0_26 = arith.constant 0 : index
    %c0_27 = arith.constant 0 : index
    %41 = vector.load %arg7[%c0_26, %c0_27] : memref<1x16xf32, #tpu.memory_space<vmem>>, vector<1x16xf32>
    %cst_28 = arith.constant 0.000000e+00 : f32
    %42 = vector.broadcast %cst_28 : f32 to vector<160x16xf32>
    %c0_29 = arith.constant 0 : index
    %c0_30 = arith.constant 0 : index
    %43 = vector.load %arg15[%c0_29, %c0_30] : memref<184x8xf32, #tpu.memory_space<vmem>>, vector<160x8xf32>
    %c0_31 = arith.constant 0 : index
    %c0_32 = arith.constant 0 : index
    %c0_33 = arith.constant 0 : index
    %44 = vector.load %arg5[%c0_31, %c0_32, %c0_33] : memref<4x8x16xf32, #tpu.memory_space<vmem>>, vector<1x8x16xf32>
    %45 = vector.shape_cast %44 : vector<1x8x16xf32> to vector<8x16xf32>
    %cst_34 = arith.constant dense<0.000000e+00> : vector<160x16xf32>
    %46 = tpu.matmul %43, %45, %cst_34 {dimension_numbers = #tpu.dot_dimension_numbers<[1], [0], [0], [1], [0, 0, 1, 1], [], []>} : vector<160x8xf32>, vector<8x16xf32>, vector<160x16xf32> -> vector<160x16xf32>
    %47 = arith.addf %42, %46 : vector<160x16xf32>
    %c1_35 = arith.constant 1 : index
    %c0_36 = arith.constant 0 : index
    %48 = vector.load %arg15[%c1_35, %c0_36] : memref<184x8xf32, #tpu.memory_space<vmem>>, vector<160x8xf32>
    %c1_37 = arith.constant 1 : index
    %c0_38 = arith.constant 0 : index
    %c0_39 = arith.constant 0 : index
    %49 = vector.load %arg5[%c1_37, %c0_38, %c0_39] : memref<4x8x16xf32, #tpu.memory_space<vmem>>, vector<1x8x16xf32>
    %50 = vector.shape_cast %49 : vector<1x8x16xf32> to vector<8x16xf32>
    %cst_40 = arith.constant dense<0.000000e+00> : vector<160x16xf32>
    %51 = tpu.matmul %48, %50, %cst_40 {dimension_numbers = #tpu.dot_dimension_numbers<[1], [0], [0], [1], [0, 0, 1, 1], [], []>} : vector<160x8xf32>, vector<8x16xf32>, vector<160x16xf32> -> vector<160x16xf32>
    %52 = arith.addf %47, %51 : vector<160x16xf32>
    %c16_41 = arith.constant 16 : index
    %c0_42 = arith.constant 0 : index
    %53 = vector.load %arg15[%c16_41, %c0_42] : memref<184x8xf32, #tpu.memory_space<vmem>>, vector<160x8xf32>
    %c2_43 = arith.constant 2 : index
    %c0_44 = arith.constant 0 : index
    %c0_45 = arith.constant 0 : index
    %54 = vector.load %arg5[%c2_43, %c0_44, %c0_45] : memref<4x8x16xf32, #tpu.memory_space<vmem>>, vector<1x8x16xf32>
    %55 = vector.shape_cast %54 : vector<1x8x16xf32> to vector<8x16xf32>
    %cst_46 = arith.constant dense<0.000000e+00> : vector<160x16xf32>
    %56 = tpu.matmul %53, %55, %cst_46 {dimension_numbers = #tpu.dot_dimension_numbers<[1], [0], [0], [1], [0, 0, 1, 1], [], []>} : vector<160x8xf32>, vector<8x16xf32>, vector<160x16xf32> -> vector<160x16xf32>
    %57 = arith.addf %52, %56 : vector<160x16xf32>
    %c17_47 = arith.constant 17 : index
    %c0_48 = arith.constant 0 : index
    %58 = vector.load %arg15[%c17_47, %c0_48] : memref<184x8xf32, #tpu.memory_space<vmem>>, vector<160x8xf32>
    %c3_49 = arith.constant 3 : index
    %c0_50 = arith.constant 0 : index
    %c0_51 = arith.constant 0 : index
    %59 = vector.load %arg5[%c3_49, %c0_50, %c0_51] : memref<4x8x16xf32, #tpu.memory_space<vmem>>, vector<1x8x16xf32>
    %60 = vector.shape_cast %59 : vector<1x8x16xf32> to vector<8x16xf32>
    %cst_52 = arith.constant dense<0.000000e+00> : vector<160x16xf32>
    %61 = tpu.matmul %58, %60, %cst_52 {dimension_numbers = #tpu.dot_dimension_numbers<[1], [0], [0], [1], [0, 0, 1, 1], [], []>} : vector<160x8xf32>, vector<8x16xf32>, vector<160x16xf32> -> vector<160x16xf32>
    %62 = arith.addf %57, %61 : vector<160x16xf32>
    %63 = vector.broadcast %40 : vector<1x16xf32> to vector<160x16xf32>
    %64 = arith.mulf %62, %63 : vector<160x16xf32>
    %65 = vector.broadcast %41 : vector<1x16xf32> to vector<160x16xf32>
    %66 = arith.addf %64, %65 : vector<160x16xf32>
    %c0_53 = arith.constant 0 : index
    %c0_54 = arith.constant 0 : index
    %67 = vector.load %arg16[%c0_53, %c0_54] : memref<168x16xf32, #tpu.memory_space<vmem>>, vector<160x16xf32>
    tpu.vector_store %arg16[%c0_53, %c0_54], %66 {strides = array<i32>} : memref<168x16xf32, #tpu.memory_space<vmem>>, vector<160x16xf32>,
    %c0_55 = arith.constant 0 : index
    %c0_56 = arith.constant 0 : index
    %68 = vector.load %arg9[%c0_55, %c0_56] : memref<1x32xf32, #tpu.memory_space<vmem>>, vector<1x32xf32>
    %c0_57 = arith.constant 0 : index
    %c0_58 = arith.constant 0 : index
    %69 = vector.load %arg10[%c0_57, %c0_58] : memref<1x32xf32, #tpu.memory_space<vmem>>, vector<1x32xf32>
    %cst_59 = arith.constant 0.000000e+00 : f32
    %70 = vector.broadcast %cst_59 : f32 to vector<144x32xf32>
    %c0_60 = arith.constant 0 : index
    %c0_61 = arith.constant 0 : index
    %71 = vector.load %arg16[%c0_60, %c0_61] : memref<168x16xf32, #tpu.memory_space<vmem>>, vector<144x16xf32>
    %c0_62 = arith.constant 0 : index
    %c0_63 = arith.constant 0 : index
    %c0_64 = arith.constant 0 : index
    %72 = vector.load %arg8[%c0_62, %c0_63, %c0_64] : memref<4x16x32xf32, #tpu.memory_space<vmem>>, vector<1x16x32xf32>
    %73 = vector.shape_cast %72 : vector<1x16x32xf32> to vector<16x32xf32>
    %cst_65 = arith.constant dense<0.000000e+00> : vector<144x32xf32>
    %74 = tpu.matmul %71, %73, %cst_65 {dimension_numbers = #tpu.dot_dimension_numbers<[1], [0], [0], [1], [0, 0, 1, 1], [], []>} : vector<144x16xf32>, vector<16x32xf32>, vector<144x32xf32> -> vector<144x32xf32>
    %75 = arith.addf %70, %74 : vector<144x32xf32>
    %c1_66 = arith.constant 1 : index
    %c0_67 = arith.constant 0 : index
    %76 = vector.load %arg16[%c1_66, %c0_67] : memref<168x16xf32, #tpu.memory_space<vmem>>, vector<144x16xf32>
    %c1_68 = arith.constant 1 : index
    %c0_69 = arith.constant 0 : index
    %c0_70 = arith.constant 0 : index
    %77 = vector.load %arg8[%c1_68, %c0_69, %c0_70] : memref<4x16x32xf32, #tpu.memory_space<vmem>>, vector<1x16x32xf32>
    %78 = vector.shape_cast %77 : vector<1x16x32xf32> to vector<16x32xf32>
    %cst_71 = arith.constant dense<0.000000e+00> : vector<144x32xf32>
    %79 = tpu.matmul %76, %78, %cst_71 {dimension_numbers = #tpu.dot_dimension_numbers<[1], [0], [0], [1], [0, 0, 1, 1], [], []>} : vector<144x16xf32>, vector<16x32xf32>, vector<144x32xf32> -> vector<144x32xf32>
    %80 = arith.addf %75, %79 : vector<144x32xf32>
    %c16_72 = arith.constant 16 : index
    %c0_73 = arith.constant 0 : index
    %81 = vector.load %arg16[%c16_72, %c0_73] : memref<168x16xf32, #tpu.memory_space<vmem>>, vector<144x16xf32>
    %c2_74 = arith.constant 2 : index
    %c0_75 = arith.constant 0 : index
    %c0_76 = arith.constant 0 : index
    %82 = vector.load %arg8[%c2_74, %c0_75, %c0_76] : memref<4x16x32xf32, #tpu.memory_space<vmem>>, vector<1x16x32xf32>
    %83 = vector.shape_cast %82 : vector<1x16x32xf32> to vector<16x32xf32>
    %cst_77 = arith.constant dense<0.000000e+00> : vector<144x32xf32>
    %84 = tpu.matmul %81, %83, %cst_77 {dimension_numbers = #tpu.dot_dimension_numbers<[1], [0], [0], [1], [0, 0, 1, 1], [], []>} : vector<144x16xf32>, vector<16x32xf32>, vector<144x32xf32> -> vector<144x32xf32>
    %85 = arith.addf %80, %84 : vector<144x32xf32>
    %c17_78 = arith.constant 17 : index
    %c0_79 = arith.constant 0 : index
    %86 = vector.load %arg16[%c17_78, %c0_79] : memref<168x16xf32, #tpu.memory_space<vmem>>, vector<144x16xf32>
    %c3_80 = arith.constant 3 : index
    %c0_81 = arith.constant 0 : index
    %c0_82 = arith.constant 0 : index
    %87 = vector.load %arg8[%c3_80, %c0_81, %c0_82] : memref<4x16x32xf32, #tpu.memory_space<vmem>>, vector<1x16x32xf32>
    %88 = vector.shape_cast %87 : vector<1x16x32xf32> to vector<16x32xf32>
    %cst_83 = arith.constant dense<0.000000e+00> : vector<144x32xf32>
    %89 = tpu.matmul %86, %88, %cst_83 {dimension_numbers = #tpu.dot_dimension_numbers<[1], [0], [0], [1], [0, 0, 1, 1], [], []>} : vector<144x16xf32>, vector<16x32xf32>, vector<144x32xf32> -> vector<144x32xf32>
    %90 = arith.addf %85, %89 : vector<144x32xf32>
    %91 = vector.broadcast %68 : vector<1x32xf32> to vector<144x32xf32>
    %92 = arith.mulf %90, %91 : vector<144x32xf32>
    %93 = vector.broadcast %69 : vector<1x32xf32> to vector<144x32xf32>
    %94 = arith.addf %92, %93 : vector<144x32xf32>
    %c0_84 = arith.constant 0 : index
    %c0_85 = arith.constant 0 : index
    %95 = vector.load %arg17[%c0_84, %c0_85] : memref<152x32xf32, #tpu.memory_space<vmem>>, vector<144x32xf32>
    tpu.vector_store %arg17[%c0_84, %c0_85], %94 {strides = array<i32>} : memref<152x32xf32, #tpu.memory_space<vmem>>, vector<144x32xf32>,
    %c0_86 = arith.constant 0 : index
    %c0_87 = arith.constant 0 : index
    %96 = vector.load %arg12[%c0_86, %c0_87] : memref<1x64xf32, #tpu.memory_space<vmem>>, vector<1x64xf32>
    %c0_88 = arith.constant 0 : index
    %c0_89 = arith.constant 0 : index
    %97 = vector.load %arg13[%c0_88, %c0_89] : memref<1x64xf32, #tpu.memory_space<vmem>>, vector<1x64xf32>
    %cst_90 = arith.constant 0.000000e+00 : f32
    %98 = vector.broadcast %cst_90 : f32 to vector<128x64xf32>
    %c0_91 = arith.constant 0 : index
    %c0_92 = arith.constant 0 : index
    %99 = vector.load %arg17[%c0_91, %c0_92] : memref<152x32xf32, #tpu.memory_space<vmem>>, vector<128x32xf32>
    %c0_93 = arith.constant 0 : index
    %c0_94 = arith.constant 0 : index
    %c0_95 = arith.constant 0 : index
    %100 = vector.load %arg11[%c0_93, %c0_94, %c0_95] : memref<4x32x64xf32, #tpu.memory_space<vmem>>, vector<1x32x64xf32>
    %101 = vector.shape_cast %100 : vector<1x32x64xf32> to vector<32x64xf32>
    %cst_96 = arith.constant dense<0.000000e+00> : vector<128x64xf32>
    %102 = tpu.matmul %99, %101, %cst_96 {dimension_numbers = #tpu.dot_dimension_numbers<[1], [0], [0], [1], [0, 0, 1, 1], [], []>} : vector<128x32xf32>, vector<32x64xf32>, vector<128x64xf32> -> vector<128x64xf32>
    %103 = arith.addf %98, %102 : vector<128x64xf32>
    %c1_97 = arith.constant 1 : index
    %c0_98 = arith.constant 0 : index
    %104 = vector.load %arg17[%c1_97, %c0_98] : memref<152x32xf32, #tpu.memory_space<vmem>>, vector<128x32xf32>
    %c1_99 = arith.constant 1 : index
    %c0_100 = arith.constant 0 : index
    %c0_101 = arith.constant 0 : index
    %105 = vector.load %arg11[%c1_99, %c0_100, %c0_101] : memref<4x32x64xf32, #tpu.memory_space<vmem>>, vector<1x32x64xf32>
    %106 = vector.shape_cast %105 : vector<1x32x64xf32> to vector<32x64xf32>
    %cst_102 = arith.constant dense<0.000000e+00> : vector<128x64xf32>
    %107 = tpu.matmul %104, %106, %cst_102 {dimension_numbers = #tpu.dot_dimension_numbers<[1], [0], [0], [1], [0, 0, 1, 1], [], []>} : vector<128x32xf32>, vector<32x64xf32>, vector<128x64xf32> -> vector<128x64xf32>
    %108 = arith.addf %103, %107 : vector<128x64xf32>
    %c16_103 = arith.constant 16 : index
    %c0_104 = arith.constant 0 : index
    %109 = vector.load %arg17[%c16_103, %c0_104] : memref<152x32xf32, #tpu.memory_space<vmem>>, vector<128x32xf32>
    %c2_105 = arith.constant 2 : index
    %c0_106 = arith.constant 0 : index
    %c0_107 = arith.constant 0 : index
    %110 = vector.load %arg11[%c2_105, %c0_106, %c0_107] : memref<4x32x64xf32, #tpu.memory_space<vmem>>, vector<1x32x64xf32>
    %111 = vector.shape_cast %110 : vector<1x32x64xf32> to vector<32x64xf32>
    %cst_108 = arith.constant dense<0.000000e+00> : vector<128x64xf32>
    %112 = tpu.matmul %109, %111, %cst_108 {dimension_numbers = #tpu.dot_dimension_numbers<[1], [0], [0], [1], [0, 0, 1, 1], [], []>} : vector<128x32xf32>, vector<32x64xf32>, vector<128x64xf32> -> vector<128x64xf32>
    %113 = arith.addf %108, %112 : vector<128x64xf32>
    %c17_109 = arith.constant 17 : index
    %c0_110 = arith.constant 0 : index
    %114 = vector.load %arg17[%c17_109, %c0_110] : memref<152x32xf32, #tpu.memory_space<vmem>>, vector<128x32xf32>
    %c3_111 = arith.constant 3 : index
    %c0_112 = arith.constant 0 : index
    %c0_113 = arith.constant 0 : index
    %115 = vector.load %arg11[%c3_111, %c0_112, %c0_113] : memref<4x32x64xf32, #tpu.memory_space<vmem>>, vector<1x32x64xf32>
    %116 = vector.shape_cast %115 : vector<1x32x64xf32> to vector<32x64xf32>
    %cst_114 = arith.constant dense<0.000000e+00> : vector<128x64xf32>
    %117 = tpu.matmul %114, %116, %cst_114 {dimension_numbers = #tpu.dot_dimension_numbers<[1], [0], [0], [1], [0, 0, 1, 1], [], []>} : vector<128x32xf32>, vector<32x64xf32>, vector<128x64xf32> -> vector<128x64xf32>
    %118 = arith.addf %113, %117 : vector<128x64xf32>
    %119 = vector.broadcast %96 : vector<1x64xf32> to vector<128x64xf32>
    %120 = arith.mulf %118, %119 : vector<128x64xf32>
    %121 = vector.broadcast %97 : vector<1x64xf32> to vector<128x64xf32>
    %122 = arith.addf %120, %121 : vector<128x64xf32>
    %c0_115 = arith.constant 0 : index
    %c0_116 = arith.constant 0 : index
    %123 = vector.load %arg18[%c0_115, %c0_116] : memref<136x64xf32, #tpu.memory_space<vmem>>, vector<128x64xf32>
    tpu.vector_store %arg18[%c0_115, %c0_116], %122 {strides = array<i32>} : memref<136x64xf32, #tpu.memory_space<vmem>>, vector<128x64xf32>,
    %c0_117 = arith.constant 0 : index
    %c0_118 = arith.constant 0 : index
    %124 = vector.load %arg18[%c0_117, %c0_118] : memref<136x64xf32, #tpu.memory_space<vmem>>, vector<8x64xf32>
    %c0_119 = arith.constant 0 : index
    %c0_120 = arith.constant 0 : index
    %c0_121 = arith.constant 0 : index
    %125 = vector.load %arg14[%c0_119, %c0_120, %c0_121] : memref<1x64x64xf32, #tpu.memory_space<vmem>>, vector<1x8x64xf32>
    %126 = vector.shape_cast %125 : vector<1x8x64xf32> to vector<8x64xf32>
    %127 = vector.shape_cast %124 : vector<8x64xf32> to vector<1x8x64xf32>
    tpu.vector_store %arg14[%c0_119, %c0_120, %c0_121], %127 {strides = array<i32>} : memref<1x64x64xf32, #tpu.memory_space<vmem>>, vector<1x8x64xf32>,
    %c16_122 = arith.constant 16 : index
    %c0_123 = arith.constant 0 : index
    %128 = vector.load %arg18[%c16_122, %c0_123] : memref<136x64xf32, #tpu.memory_space<vmem>>, vector<8x64xf32>
    %c0_124 = arith.constant 0 : index
    %c8 = arith.constant 8 : index
    %c0_125 = arith.constant 0 : index
    %129 = vector.load %arg14[%c0_124, %c8, %c0_125] : memref<1x64x64xf32, #tpu.memory_space<vmem>>, vector<1x8x64xf32>
    %130 = vector.shape_cast %129 : vector<1x8x64xf32> to vector<8x64xf32>
    %131 = vector.shape_cast %128 : vector<8x64xf32> to vector<1x8x64xf32>
    tpu.vector_store %arg14[%c0_124, %c8, %c0_125], %131 {strides = array<i32>} : memref<1x64x64xf32, #tpu.memory_space<vmem>>, vector<1x8x64xf32>,
    %c32 = arith.constant 32 : index
    %c0_126 = arith.constant 0 : index
    %132 = vector.load %arg18[%c32, %c0_126] : memref<136x64xf32, #tpu.memory_space<vmem>>, vector<8x64xf32>
    %c0_127 = arith.constant 0 : index
    %c16_128 = arith.constant 16 : index
    %c0_129 = arith.constant 0 : index
    %133 = vector.load %arg14[%c0_127, %c16_128, %c0_129] : memref<1x64x64xf32, #tpu.memory_space<vmem>>, vector<1x8x64xf32>
    %134 = vector.shape_cast %133 : vector<1x8x64xf32> to vector<8x64xf32>
    %135 = vector.shape_cast %132 : vector<8x64xf32> to vector<1x8x64xf32>
    tpu.vector_store %arg14[%c0_127, %c16_128, %c0_129], %135 {strides = array<i32>} : memref<1x64x64xf32, #tpu.memory_space<vmem>>, vector<1x8x64xf32>,
    %c48 = arith.constant 48 : index
    %c0_130 = arith.constant 0 : index
    %136 = vector.load %arg18[%c48, %c0_130] : memref<136x64xf32, #tpu.memory_space<vmem>>, vector<8x64xf32>
    %c0_131 = arith.constant 0 : index
    %c24 = arith.constant 24 : index
    %c0_132 = arith.constant 0 : index
    %137 = vector.load %arg14[%c0_131, %c24, %c0_132] : memref<1x64x64xf32, #tpu.memory_space<vmem>>, vector<1x8x64xf32>
    %138 = vector.shape_cast %137 : vector<1x8x64xf32> to vector<8x64xf32>
    %139 = vector.shape_cast %136 : vector<8x64xf32> to vector<1x8x64xf32>
    tpu.vector_store %arg14[%c0_131, %c24, %c0_132], %139 {strides = array<i32>} : memref<1x64x64xf32, #tpu.memory_space<vmem>>, vector<1x8x64xf32>,
    %c64 = arith.constant 64 : index
    %c0_133 = arith.constant 0 : index
    %140 = vector.load %arg18[%c64, %c0_133] : memref<136x64xf32, #tpu.memory_space<vmem>>, vector<8x64xf32>
    %c0_134 = arith.constant 0 : index
    %c32_135 = arith.constant 32 : index
    %c0_136 = arith.constant 0 : index
    %141 = vector.load %arg14[%c0_134, %c32_135, %c0_136] : memref<1x64x64xf32, #tpu.memory_space<vmem>>, vector<1x8x64xf32>
    %142 = vector.shape_cast %141 : vector<1x8x64xf32> to vector<8x64xf32>
    %143 = vector.shape_cast %140 : vector<8x64xf32> to vector<1x8x64xf32>
    tpu.vector_store %arg14[%c0_134, %c32_135, %c0_136], %143 {strides = array<i32>} : memref<1x64x64xf32, #tpu.memory_space<vmem>>, vector<1x8x64xf32>,
    %c80 = arith.constant 80 : index
    %c0_137 = arith.constant 0 : index
    %144 = vector.load %arg18[%c80, %c0_137] : memref<136x64xf32, #tpu.memory_space<vmem>>, vector<8x64xf32>
    %c0_138 = arith.constant 0 : index
    %c40 = arith.constant 40 : index
    %c0_139 = arith.constant 0 : index
    %145 = vector.load %arg14[%c0_138, %c40, %c0_139] : memref<1x64x64xf32, #tpu.memory_space<vmem>>, vector<1x8x64xf32>
    %146 = vector.shape_cast %145 : vector<1x8x64xf32> to vector<8x64xf32>
    %147 = vector.shape_cast %144 : vector<8x64xf32> to vector<1x8x64xf32>
    tpu.vector_store %arg14[%c0_138, %c40, %c0_139], %147 {strides = array<i32>} : memref<1x64x64xf32, #tpu.memory_space<vmem>>, vector<1x8x64xf32>,
    %c96 = arith.constant 96 : index
    %c0_140 = arith.constant 0 : index
    %148 = vector.load %arg18[%c96, %c0_140] : memref<136x64xf32, #tpu.memory_space<vmem>>, vector<8x64xf32>
    %c0_141 = arith.constant 0 : index
    %c48_142 = arith.constant 48 : index
    %c0_143 = arith.constant 0 : index
    %149 = vector.load %arg14[%c0_141, %c48_142, %c0_143] : memref<1x64x64xf32, #tpu.memory_space<vmem>>, vector<1x8x64xf32>
    %150 = vector.shape_cast %149 : vector<1x8x64xf32> to vector<8x64xf32>
    %151 = vector.shape_cast %148 : vector<8x64xf32> to vector<1x8x64xf32>
    tpu.vector_store %arg14[%c0_141, %c48_142, %c0_143], %151 {strides = array<i32>} : memref<1x64x64xf32, #tpu.memory_space<vmem>>, vector<1x8x64xf32>,
    %c112 = arith.constant 112 : index
    %c0_144 = arith.constant 0 : index
    %152 = vector.load %arg18[%c112, %c0_144] : memref<136x64xf32, #tpu.memory_space<vmem>>, vector<8x64xf32>
    %c0_145 = arith.constant 0 : index
    %c56 = arith.constant 56 : index
    %c0_146 = arith.constant 0 : index
    %153 = vector.load %arg14[%c0_145, %c56, %c0_146] : memref<1x64x64xf32, #tpu.memory_space<vmem>>, vector<1x8x64xf32>
    %154 = vector.shape_cast %153 : vector<1x8x64xf32> to vector<8x64xf32>
    %155 = vector.shape_cast %152 : vector<8x64xf32> to vector<1x8x64xf32>
    tpu.vector_store %arg14[%c0_145, %c56, %c0_146], %155 {strides = array<i32>} : memref<1x64x64xf32, #tpu.memory_space<vmem>>, vector<1x8x64xf32>,
    return
  }
  func.func @transform_0(%arg0: i32) -> (i32, i32, i32) {
    %c0_i32 = arith.constant 0 : i32
    %c0_i32_0 = arith.constant 0 : i32
    %c0_i32_1 = arith.constant 0 : i32
    return %arg0, %c0_i32, %c0_i32_0 : i32, i32, i32
  }
  func.func @transform_1(%arg0: i32) -> (i32, i32, i32) {
    %c0_i32 = arith.constant 0 : i32
    %c0_i32_0 = arith.constant 0 : i32
    %c0_i32_1 = arith.constant 0 : i32
    %c0_i32_2 = arith.constant 0 : i32
    return %c0_i32, %c0_i32_0, %c0_i32_1 : i32, i32, i32
  }
  func.func @transform_2(%arg0: i32) -> (i32, i32) {
    %c0_i32 = arith.constant 0 : i32
    %c0_i32_0 = arith.constant 0 : i32
    %c0_i32_1 = arith.constant 0 : i32
    return %c0_i32, %c0_i32_0 : i32, i32
  }
  func.func @transform_3(%arg0: i32) -> (i32, i32) {
    %c0_i32 = arith.constant 0 : i32
    %c0_i32_0 = arith.constant 0 : i32
    %c0_i32_1 = arith.constant 0 : i32
    return %c0_i32, %c0_i32_0 : i32, i32
  }
  func.func @transform_4(%arg0: i32) -> (i32, i32, i32) {
    %c0_i32 = arith.constant 0 : i32
    %c0_i32_0 = arith.constant 0 : i32
    %c0_i32_1 = arith.constant 0 : i32
    %c0_i32_2 = arith.constant 0 : i32
    return %c0_i32, %c0_i32_0, %c0_i32_1 : i32, i32, i32
  }
  func.func @transform_5(%arg0: i32) -> (i32, i32) {
    %c0_i32 = arith.constant 0 : i32
    %c0_i32_0 = arith.constant 0 : i32
    %c0_i32_1 = arith.constant 0 : i32
    return %c0_i32, %c0_i32_0 : i32, i32
  }
  func.func @transform_6(%arg0: i32) -> (i32, i32) {
    %c0_i32 = arith.constant 0 : i32
    %c0_i32_0 = arith.constant 0 : i32
    %c0_i32_1 = arith.constant 0 : i32
    return %c0_i32, %c0_i32_0 : i32, i32
  }
  func.func @transform_7(%arg0: i32) -> (i32, i32, i32) {
    %c0_i32 = arith.constant 0 : i32
    %c0_i32_0 = arith.constant 0 : i32
    %c0_i32_1 = arith.constant 0 : i32
    %c0_i32_2 = arith.constant 0 : i32
    return %c0_i32, %c0_i32_0, %c0_i32_1 : i32, i32, i32
  }
  func.func @transform_8(%arg0: i32) -> (i32, i32) {
    %c0_i32 = arith.constant 0 : i32
    %c0_i32_0 = arith.constant 0 : i32
    %c0_i32_1 = arith.constant 0 : i32
    return %c0_i32, %c0_i32_0 : i32, i32
  }
  func.func @transform_9(%arg0: i32) -> (i32, i32) {
    %c0_i32 = arith.constant 0 : i32
    %c0_i32_0 = arith.constant 0 : i32
    %c0_i32_1 = arith.constant 0 : i32
    return %c0_i32, %c0_i32_0 : i32, i32
  }
  func.func @transform_10(%arg0: i32) -> (i32, i32, i32) {
    %c0_i32 = arith.constant 0 : i32
    %c0_i32_0 = arith.constant 0 : i32
    %c0_i32_1 = arith.constant 0 : i32
    %c0_i32_2 = arith.constant 0 : i32
    return %c0_i32, %c0_i32_0, %c0_i32_1 : i32, i32, i32
  }
  func.func @transform_11(%arg0: i32) -> (i32, i32) {
    %c0_i32 = arith.constant 0 : i32
    %c0_i32_0 = arith.constant 0 : i32
    %c0_i32_1 = arith.constant 0 : i32
    return %c0_i32, %c0_i32_0 : i32, i32
  }
  func.func @transform_12(%arg0: i32) -> (i32, i32) {
    %c0_i32 = arith.constant 0 : i32
    %c0_i32_0 = arith.constant 0 : i32
    %c0_i32_1 = arith.constant 0 : i32
    return %c0_i32, %c0_i32_0 : i32, i32
  }
  func.func @transform_13(%arg0: i32) -> (i32, i32, i32) {
    %c0_i32 = arith.constant 0 : i32
    %c0_i32_0 = arith.constant 0 : i32
    %c0_i32_1 = arith.constant 0 : i32
    return %arg0, %c0_i32, %c0_i32_0 : i32, i32, i32
  }
}

module attributes {stable_mosaic.version = 11 : i64} {
  func.func @_matmul_affine_kernel(%arg0: i32, %arg1: i32, %arg2: i32, %arg3: memref<8x1024xf32, #tpu.memory_space<vmem>>, %arg4: memref<1024x128xbf16, #tpu.memory_space<vmem>>, %arg5: memref<1x128xf32, #tpu.memory_space<vmem>>, %arg6: memref<1x128xf32, #tpu.memory_space<vmem>>, %arg7: memref<8x128xf32, #tpu.memory_space<vmem>>) attributes {dimension_semantics = [#tpu.dimension_semantics<parallel>, #tpu.dimension_semantics<parallel>, #tpu.dimension_semantics<arbitrary>], iteration_bounds = array<i64: 1, 3, 1>, scalar_prefetch = 0 : i64, scratch_operands = 0 : i64, tpu.core_type = #tpu.core_type<tc>, window_params = [{transform_indices = @transform_0, window_bounds = array<i64: 8, 1024>}, {transform_indices = @transform_1, window_bounds = array<i64: 1024, 128>}, {transform_indices = @transform_2, window_bounds = array<i64: 1, 128>}, {transform_indices = @transform_3, window_bounds = array<i64: 1, 128>}, {transform_indices = @transform_4, window_bounds = array<i64: 8, 128>}]} {
    %c0_i32 = arith.constant 0 : i32
    %0 = arith.cmpi eq, %arg2, %c0_i32 : i32
    %1 = arith.extui %0 : i1 to i32
    %c0_i32_0 = arith.constant 0 : i32
    %2 = arith.cmpi ne, %1, %c0_i32_0 : i32
    scf.if %2 {
      %cst_10 = arith.constant 0.000000e+00 : f32
      %13 = vector.broadcast %cst_10 : f32 to vector<8x128xf32>
      %c0_11 = arith.constant 0 : index
      %c0_12 = arith.constant 0 : index
      %14 = vector.load %arg7[%c0_11, %c0_12] : memref<8x128xf32, #tpu.memory_space<vmem>>, vector<8x128xf32>
      tpu.vector_store %arg7[%c0_11, %c0_12], %13 {strides = array<i32>} : memref<8x128xf32, #tpu.memory_space<vmem>>, vector<8x128xf32>,
    } else {
    }
    %c0 = arith.constant 0 : index
    %c0_1 = arith.constant 0 : index
    %3 = vector.load %arg3[%c0, %c0_1] : memref<8x1024xf32, #tpu.memory_space<vmem>>, vector<8x1024xf32>
    %4 = arith.truncf %3 : vector<8x1024xf32> to vector<8x1024xbf16>
    %c0_2 = arith.constant 0 : index
    %c0_3 = arith.constant 0 : index
    %5 = vector.load %arg7[%c0_2, %c0_3] : memref<8x128xf32, #tpu.memory_space<vmem>>, vector<8x128xf32>
    %c0_4 = arith.constant 0 : index
    %c0_5 = arith.constant 0 : index
    %6 = vector.load %arg4[%c0_4, %c0_5] : memref<1024x128xbf16, #tpu.memory_space<vmem>>, vector<1024x128xbf16>
    %cst = arith.constant dense<0.000000e+00> : vector<8x128xf32>
    %7 = tpu.matmul %4, %6, %cst {dimension_numbers = #tpu.dot_dimension_numbers<[1], [0], [0], [1], [0, 0, 1, 1], [], []>} : vector<8x1024xbf16>, vector<1024x128xbf16>, vector<8x128xf32> -> vector<8x128xf32>
    %8 = arith.addf %5, %7 : vector<8x128xf32>
    %c0_6 = arith.constant 0 : index
    %c0_7 = arith.constant 0 : index
    %9 = vector.load %arg7[%c0_6, %c0_7] : memref<8x128xf32, #tpu.memory_space<vmem>>, vector<8x128xf32>
    tpu.vector_store %arg7[%c0_6, %c0_7], %8 {strides = array<i32>} : memref<8x128xf32, #tpu.memory_space<vmem>>, vector<8x128xf32>,
    %c0_i32_8 = arith.constant 0 : i32
    %10 = arith.cmpi eq, %arg2, %c0_i32_8 : i32
    %11 = arith.extui %10 : i1 to i32
    %c0_i32_9 = arith.constant 0 : i32
    %12 = arith.cmpi ne, %11, %c0_i32_9 : i32
    scf.if %12 {
      %c0_10 = arith.constant 0 : index
      %c0_11 = arith.constant 0 : index
      %13 = vector.load %arg7[%c0_10, %c0_11] : memref<8x128xf32, #tpu.memory_space<vmem>>, vector<8x128xf32>
      %c0_12 = arith.constant 0 : index
      %c0_13 = arith.constant 0 : index
      %14 = vector.load %arg5[%c0_12, %c0_13] : memref<1x128xf32, #tpu.memory_space<vmem>>, vector<1x128xf32>
      %15 = vector.broadcast %14 : vector<1x128xf32> to vector<8x128xf32>
      %16 = arith.mulf %13, %15 : vector<8x128xf32>
      %c0_14 = arith.constant 0 : index
      %c0_15 = arith.constant 0 : index
      %17 = vector.load %arg6[%c0_14, %c0_15] : memref<1x128xf32, #tpu.memory_space<vmem>>, vector<1x128xf32>
      %18 = vector.broadcast %17 : vector<1x128xf32> to vector<8x128xf32>
      %19 = arith.addf %16, %18 : vector<8x128xf32>
      %c0_16 = arith.constant 0 : index
      %c0_17 = arith.constant 0 : index
      %20 = vector.load %arg7[%c0_16, %c0_17] : memref<8x128xf32, #tpu.memory_space<vmem>>, vector<8x128xf32>
      tpu.vector_store %arg7[%c0_16, %c0_17], %19 {strides = array<i32>} : memref<8x128xf32, #tpu.memory_space<vmem>>, vector<8x128xf32>,
    } else {
    }
    return
  }
  func.func @transform_0(%arg0: i32, %arg1: i32, %arg2: i32) -> (i32, i32) {
    %c0_i32 = arith.constant 0 : i32
    return %arg0, %arg2 : i32, i32
  }
  func.func @transform_1(%arg0: i32, %arg1: i32, %arg2: i32) -> (i32, i32) {
    %c0_i32 = arith.constant 0 : i32
    return %arg2, %arg1 : i32, i32
  }
  func.func @transform_2(%arg0: i32, %arg1: i32, %arg2: i32) -> (i32, i32) {
    %c0_i32 = arith.constant 0 : i32
    %c0_i32_0 = arith.constant 0 : i32
    return %c0_i32, %arg1 : i32, i32
  }
  func.func @transform_3(%arg0: i32, %arg1: i32, %arg2: i32) -> (i32, i32) {
    %c0_i32 = arith.constant 0 : i32
    %c0_i32_0 = arith.constant 0 : i32
    return %c0_i32, %arg1 : i32, i32
  }
  func.func @transform_4(%arg0: i32, %arg1: i32, %arg2: i32) -> (i32, i32) {
    %c0_i32 = arith.constant 0 : i32
    return %arg0, %arg1 : i32, i32
  }
}

</mosaic_0001>

<bundles_post_ra>
// kernel: alphago_policy_forward.5
= control target key start
LH: loop header
LB: loop body
LE: loop exit
PB: predicated region body
PF: predicated region fallthrough
CT: control target
= control target key end

     0   :  { %s2026_s15 = smov 0   ;;  %s2028_s16 = smov 0   ;;  %s2448_s0 = inlined_call_operand.vmem [shape: f32[8,1024], index: 0, kind: input, shape index: {}]   ;;  %s2449_s1 = inlined_call_operand.vmem [shape: bf16[1024,384], index: 1, kind: input, shape index: {}]   ;;  %s2450_s2 = inlined_call_operand.vmem [shape: f32[1,384], index: 2, kind: input, shape index: {}]   ;;  %s2451_s3 = inlined_call_operand.vmem [shape: f32[1,384], index: 3, kind: input, shape index: {}]   ;;  %s2452_s4 = inlined_call_operand.vmem [shape: f32[8,384], index: 4, kind: output, shape index: {}]  }
   0x1   :  { %s2030_s17 = smov 0   ;;  %s2032_s18 = smov 0  }
   0x2   :  { %s2034_s19 = smov 0  }
   0x3 LB: > { %s29_s20 = sadd.s32 1, %s1995_s18  ;;  %p77_p1 = scmp.ne.s32.totalorder %s1987_s16, %s1983_s15  ;;  %s1999_s19 = sphi %s2034_s19, %s14_s19   ;;  %s1995_s18 = sphi %s2032_s18, %s2456_s18   ;;  %s1991_s17 = sphi %s2030_s17, %s2455_s17   ;;  %s1987_s16 = sphi %s2028_s16, %s2454_s16   ;;  %s1983_s15 = sphi %s2026_s15, %s2453_s15  }
   0x4   : > { %p31_p0 = scmp.ge.s32.totalorder %s29_s20, 3  ;;  %p78_p2 = scmp.eq.s32.totalorder %s1999_s19, 0 }
   0x5   : > { %s70_s22 = sadd.s32 1, %s1987_s16  ;;  %p1694_p5 = scmp.ge.s32.totalorder %s1999_s19, 3 }
   0x6   : > { %s2458_s20 = smov (%p31_p0, %s29_s20), 0  ;;  %p79_p3 = por %p78_p2, %p77_p1 }
   0x7   : > { %s66_s21 = ssub.s32 %s1995_s18, %s2458_s20  ;;  %196 = sbr.rel (%p1694_p5) target bundleno = 103 (0x67), region = 20 }
   0x8   : > { %p68_p4 = scmp.eq.s32.totalorder %s66_s21, 0 }
   0xa   : > { %s2061_s23 = scalar_select %p68_p4, %s1987_s16, %s70_s22  }
   0xe   : > { %199 = sbr.rel (!%p79_p3) target bundleno = 103 (0x67), region = 24  ;;  %s201_s24 = sand.u32 (%p79_p3), 1, %s1987_s16  }
   0xf   : > { %s1696_s25 = sshll.u32 (%p79_p3), %s1995_s18, 2  ;;  %s1695_s26 = sshll.u32 (%p79_p3), %s201_s24, 9 }
  0x10   : > { %s2069_s29 = scalar_lea.vmem (%p79_p3), %s2449_s1, %s1696_s25  ;;  %s2073_s30 = scalar_lea.vmem (%p79_p3), [#allocation2], %s1695_s26 }
  0x11   : > { %v224_v0 = vld [vmem:[%s2069_s29] sm:$0xf] (%p79_p3)  ;;  %v226_v1 = vld [vmem:[%s2069_s29 + $0xc] sm:$0xf] (%p79_p3)  ;;  %v228_v2 = vld [vmem:[%s2069_s29 + $0x18] sm:$0xf] (%p79_p3) }
  0x12   : > { %225 = vst [vmem:[%s2073_s30] sm:$0xf] (%p79_p3), %v224_v0  ;;  %227 = vst [vmem:[%s2073_s30 + $0x4] sm:$0xf] (%p79_p3), %v226_v1  ;;  %v230_v3 = vld [vmem:[%s2069_s29 + $0x24] sm:$0xf] (%p79_p3) }
  0x13   : > { %v232_v4 = vld [vmem:[%s2069_s29 + $0x30] sm:$0xf] (%p79_p3)  ;;  %229 = vst [vmem:[%s2073_s30 + $0x8] sm:$0xf] (%p79_p3), %v228_v2  ;;  %231 = vst [vmem:[%s2073_s30 + $0xc] sm:$0xf] (%p79_p3), %v230_v3 }
  0x14   : > { %233 = vst [vmem:[%s2073_s30 + $0x10] sm:$0xf] (%p79_p3), %v232_v4  ;;  %v234_v5 = vld [vmem:[%s2069_s29 + $0x3c] sm:$0xf] (%p79_p3)  ;;  %v236_v6 = vld [vmem:[%s2069_s29 + $0x48] sm:$0xf] (%p79_p3) }
  0x15   : > { %v238_v7 = vld [vmem:[%s2069_s29 + $0x54] sm:$0xf]  ;;  %235 = vst [vmem:[%s2073_s30 + $0x14] sm:$0xf] %v234_v5  ;;  %237 = vst [vmem:[%s2073_s30 + $0x18] sm:$0xf] %v236_v6 }
  0x16   : > { %239 = vst [vmem:[%s2073_s30 + $0x1c] sm:$0xf] %v238_v7  ;;  %v240_v8 = vld [vmem:[%s2069_s29 + $0x60] sm:$0xf]  ;;  %v242_v9 = vld [vmem:[%s2069_s29 + $0x6c] sm:$0xf] }
  0x17   : > { %v244_v10 = vld [vmem:[%s2069_s29 + $0x78] sm:$0xf]  ;;  %241 = vst [vmem:[%s2073_s30 + $0x20] sm:$0xf] %v240_v8  ;;  %243 = vst [vmem:[%s2073_s30 + $0x24] sm:$0xf] %v242_v9 }
  0x18   : > { %245 = vst [vmem:[%s2073_s30 + $0x28] sm:$0xf] %v244_v10  ;;  %v246_v11 = vld [vmem:[%s2069_s29 + $0x84] sm:$0xf]  ;;  %v248_v12 = vld [vmem:[%s2069_s29 + $0x90] sm:$0xf] }
  0x19   : > { %v250_v13 = vld [vmem:[%s2069_s29 + $0x9c] sm:$0xf]  ;;  %247 = vst [vmem:[%s2073_s30 + $0x2c] sm:$0xf] %v246_v11  ;;  %249 = vst [vmem:[%s2073_s30 + $0x30] sm:$0xf] %v248_v12 }
  0x1a   : > { %251 = vst [vmem:[%s2073_s30 + $0x34] sm:$0xf] %v250_v13  ;;  %v252_v14 = vld [vmem:[%s2069_s29 + $0xa8] sm:$0xf]  ;;  %v254_v15 = vld [vmem:[%s2069_s29 + $0xb4] sm:$0xf] }
  0x1b   : > { %v256_v16 = vld [vmem:[%s2069_s29 + $0xc0] sm:$0xf]  ;;  %253 = vst [vmem:[%s2073_s30 + $0x38] sm:$0xf] %v252_v14  ;;  %255 = vst [vmem:[%s2073_s30 + $0x3c] sm:$0xf] %v254_v15 }
  0x1c   : > { %257 = vst [vmem:[%s2073_s30 + $0x40] sm:$0xf] %v256_v16  ;;  %v258_v17 = vld [vmem:[%s2069_s29 + $0xcc] sm:$0xf]  ;;  %v260_v18 = vld [vmem:[%s2069_s29 + $0xd8] sm:$0xf] }
  0x1d   : > { %v262_v19 = vld [vmem:[%s2069_s29 + $0xe4] sm:$0xf]  ;;  %259 = vst [vmem:[%s2073_s30 + $0x44] sm:$0xf] %v258_v17  ;;  %261 = vst [vmem:[%s2073_s30 + $0x48] sm:$0xf] %v260_v18 }
  0x1e   : > { %263 = vst [vmem:[%s2073_s30 + $0x4c] sm:$0xf] %v262_v19  ;;  %v264_v20 = vld [vmem:[%s2069_s29 + $0xf0] sm:$0xf]  ;;  %v266_v21 = vld [vmem:[%s2069_s29 + $0xfc] sm:$0xf] }
  0x1f   : > { %v268_v22 = vld [vmem:[%s2069_s29 + $0x108] sm:$0xf]  ;;  %265 = vst [vmem:[%s2073_s30 + $0x50] sm:$0xf] %v264_v20  ;;  %267 = vst [vmem:[%s2073_s30 + $0x54] sm:$0xf] %v266_v21 }
  0x20   : > { %269 = vst [vmem:[%s2073_s30 + $0x58] sm:$0xf] %v268_v22  ;;  %v270_v23 = vld [vmem:[%s2069_s29 + $0x114] sm:$0xf]  ;;  %v272_v24 = vld [vmem:[%s2069_s29 + $0x120] sm:$0xf] }
  0x21   : > { %v274_v25 = vld [vmem:[%s2069_s29 + $0x12c] sm:$0xf]  ;;  %271 = vst [vmem:[%s2073_s30 + $0x5c] sm:$0xf] %v270_v23  ;;  %273 = vst [vmem:[%s2073_s30 + $0x60] sm:$0xf] %v272_v24 }
  0x22   : > { %275 = vst [vmem:[%s2073_s30 + $0x64] sm:$0xf] %v274_v25  ;;  %v276_v26 = vld [vmem:[%s2069_s29 + $0x138] sm:$0xf]  ;;  %v278_v27 = vld [vmem:[%s2069_s29 + $0x144] sm:$0xf] }
  0x23   : > { %v280_v28 = vld [vmem:[%s2069_s29 + $0x150] sm:$0xf]  ;;  %277 = vst [vmem:[%s2073_s30 + $0x68] sm:$0xf] %v276_v26  ;;  %279 = vst [vmem:[%s2073_s30 + $0x6c] sm:$0xf] %v278_v27 }
  0x24   : > { %281 = vst [vmem:[%s2073_s30 + $0x70] sm:$0xf] %v280_v28  ;;  %v282_v29 = vld [vmem:[%s2069_s29 + $0x15c] sm:$0xf]  ;;  %v284_v30 = vld [vmem:[%s2069_s29 + $0x168] sm:$0xf] }
  0x25   : > { %v286_v31 = vld [vmem:[%s2069_s29 + $0x174] sm:$0xf]  ;;  %283 = vst [vmem:[%s2073_s30 + $0x74] sm:$0xf] %v282_v29  ;;  %285 = vst [vmem:[%s2073_s30 + $0x78] sm:$0xf] %v284_v30 }
  0x26   : > { %287 = vst [vmem:[%s2073_s30 + $0x7c] sm:$0xf] %v286_v31  ;;  %v288_v32 = vld [vmem:[%s2069_s29 + $0x180] sm:$0xf]  ;;  %v290_v33 = vld [vmem:[%s2069_s29 + $0x18c] sm:$0xf] }
  0x27   : > { %v292_v34 = vld [vmem:[%s2069_s29 + $0x198] sm:$0xf]  ;;  %289 = vst [vmem:[%s2073_s30 + $0x80] sm:$0xf] %v288_v32  ;;  %291 = vst [vmem:[%s2073_s30 + $0x84] sm:$0xf] %v290_v33 }
  0x28   : > { %293 = vst [vmem:[%s2073_s30 + $0x88] sm:$0xf] %v292_v34  ;;  %v294_v35 = vld [vmem:[%s2069_s29 + $0x1a4] sm:$0xf]  ;;  %v296_v36 = vld [vmem:[%s2069_s29 + $0x1b0] sm:$0xf] }
  0x29   : > { %v298_v37 = vld [vmem:[%s2069_s29 + $0x1bc] sm:$0xf]  ;;  %295 = vst [vmem:[%s2073_s30 + $0x8c] sm:$0xf] %v294_v35  ;;  %297 = vst [vmem:[%s2073_s30 + $0x90] sm:$0xf] %v296_v36 }
  0x2a   : > { %299 = vst [vmem:[%s2073_s30 + $0x94] sm:$0xf] %v298_v37  ;;  %v300_v38 = vld [vmem:[%s2069_s29 + $0x1c8] sm:$0xf]  ;;  %v302_v39 = vld [vmem:[%s2069_s29 + $0x1d4] sm:$0xf] }
  0x2b   : > { %v304_v40 = vld [vmem:[%s2069_s29 + $0x1e0] sm:$0xf]  ;;  %301 = vst [vmem:[%s2073_s30 + $0x98] sm:$0xf] %v300_v38  ;;  %303 = vst [vmem:[%s2073_s30 + $0x9c] sm:$0xf] %v302_v39 }
  0x2c   : > { %305 = vst [vmem:[%s2073_s30 + $0xa0] sm:$0xf] %v304_v40  ;;  %v306_v41 = vld [vmem:[%s2069_s29 + $0x1ec] sm:$0xf]  ;;  %v308_v42 = vld [vmem:[%s2069_s29 + $0x1f8] sm:$0xf] }
  0x2d   : > { %v310_v43 = vld [vmem:[%s2069_s29 + $0x204] sm:$0xf]  ;;  %307 = vst [vmem:[%s2073_s30 + $0xa4] sm:$0xf] %v306_v41  ;;  %309 = vst [vmem:[%s2073_s30 + $0xa8] sm:$0xf] %v308_v42 }
  0x2e   : > { %311 = vst [vmem:[%s2073_s30 + $0xac] sm:$0xf] %v310_v43  ;;  %v312_v44 = vld [vmem:[%s2069_s29 + $0x210] sm:$0xf]  ;;  %v314_v45 = vld [vmem:[%s2069_s29 + $0x21c] sm:$0xf] }
  0x2f   : > { %v316_v46 = vld [vmem:[%s2069_s29 + $0x228] sm:$0xf]  ;;  %313 = vst [vmem:[%s2073_s30 + $0xb0] sm:$0xf] %v312_v44  ;;  %315 = vst [vmem:[%s2073_s30 + $0xb4] sm:$0xf] %v314_v45 }
  0x30   : > { %317 = vst [vmem:[%s2073_s30 + $0xb8] sm:$0xf] %v316_v46  ;;  %v318_v47 = vld [vmem:[%s2069_s29 + $0x234] sm:$0xf]  ;;  %v320_v48 = vld [vmem:[%s2069_s29 + $0x240] sm:$0xf] }
  0x31   : > { %v322_v49 = vld [vmem:[%s2069_s29 + $0x24c] sm:$0xf]  ;;  %319 = vst [vmem:[%s2073_s30 + $0xbc] sm:$0xf] %v318_v47  ;;  %321 = vst [vmem:[%s2073_s30 + $0xc0] sm:$0xf] %v320_v48 }
  0x32   : > { %323 = vst [vmem:[%s2073_s30 + $0xc4] sm:$0xf] %v322_v49  ;;  %v324_v50 = vld [vmem:[%s2069_s29 + $0x258] sm:$0xf]  ;;  %v326_v51 = vld [vmem:[%s2069_s29 + $0x264] sm:$0xf] }
  0x33   : > { %v328_v52 = vld [vmem:[%s2069_s29 + $0x270] sm:$0xf]  ;;  %325 = vst [vmem:[%s2073_s30 + $0xc8] sm:$0xf] %v324_v50  ;;  %327 = vst [vmem:[%s2073_s30 + $0xcc] sm:$0xf] %v326_v51 }
  0x34   : > { %329 = vst [vmem:[%s2073_s30 + $0xd0] sm:$0xf] %v328_v52  ;;  %v330_v53 = vld [vmem:[%s2069_s29 + $0x27c] sm:$0xf]  ;;  %v332_v54 = vld [vmem:[%s2069_s29 + $0x288] sm:$0xf] }
  0x35   : > { %v334_v55 = vld [vmem:[%s2069_s29 + $0x294] sm:$0xf]  ;;  %331 = vst [vmem:[%s2073_s30 + $0xd4] sm:$0xf] %v330_v53  ;;  %333 = vst [vmem:[%s2073_s30 + $0xd8] sm:$0xf] %v332_v54 }
  0x36   : > { %335 = vst [vmem:[%s2073_s30 + $0xdc] sm:$0xf] %v334_v55  ;;  %v336_v56 = vld [vmem:[%s2069_s29 + $0x2a0] sm:$0xf]  ;;  %v338_v57 = vld [vmem:[%s2069_s29 + $0x2ac] sm:$0xf] }
  0x37   : > { %v340_v58 = vld [vmem:[%s2069_s29 + $0x2b8] sm:$0xf]  ;;  %337 = vst [vmem:[%s2073_s30 + $0xe0] sm:$0xf] %v336_v56  ;;  %339 = vst [vmem:[%s2073_s30 + $0xe4] sm:$0xf] %v338_v57 }
  0x38   : > { %341 = vst [vmem:[%s2073_s30 + $0xe8] sm:$0xf] %v340_v58  ;;  %v342_v59 = vld [vmem:[%s2069_s29 + $0x2c4] sm:$0xf]  ;;  %v344_v60 = vld [vmem:[%s2069_s29 + $0x2d0] sm:$0xf] }
  0x39   : > { %v346_v61 = vld [vmem:[%s2069_s29 + $0x2dc] sm:$0xf]  ;;  %343 = vst [vmem:[%s2073_s30 + $0xec] sm:$0xf] %v342_v59  ;;  %345 = vst [vmem:[%s2073_s30 + $0xf0] sm:$0xf] %v344_v60 }
  0x3a   : > { %347 = vst [vmem:[%s2073_s30 + $0xf4] sm:$0xf] %v346_v61  ;;  %v348_v62 = vld [vmem:[%s2069_s29 + $0x2e8] sm:$0xf]  ;;  %v350_v63 = vld [vmem:[%s2069_s29 + $0x2f4] sm:$0xf] }
  0x3b   : > { %v352_v0 = vld [vmem:[%s2069_s29 + $0x300] sm:$0xf]  ;;  %349 = vst [vmem:[%s2073_s30 + $0xf8] sm:$0xf] %v348_v62  ;;  %351 = vst [vmem:[%s2073_s30 + $0xfc] sm:$0xf] %v350_v63 }
  0x3c   : > { %353 = vst [vmem:[%s2073_s30 + $0x100] sm:$0xf] %v352_v0  ;;  %v354_v1 = vld [vmem:[%s2069_s29 + $0x30c] sm:$0xf]  ;;  %v356_v2 = vld [vmem:[%s2069_s29 + $0x318] sm:$0xf] }
  0x3d   : > { %v358_v3 = vld [vmem:[%s2069_s29 + $0x324] sm:$0xf]  ;;  %355 = vst [vmem:[%s2073_s30 + $0x104] sm:$0xf] %v354_v1  ;;  %357 = vst [vmem:[%s2073_s30 + $0x108] sm:$0xf] %v356_v2 }
  0x3e   : > { %359 = vst [vmem:[%s2073_s30 + $0x10c] sm:$0xf] %v358_v3  ;;  %v360_v4 = vld [vmem:[%s2069_s29 + $0x330] sm:$0xf]  ;;  %v362_v5 = vld [vmem:[%s2069_s29 + $0x33c] sm:$0xf] }
  0x3f   : > { %v364_v6 = vld [vmem:[%s2069_s29 + $0x348] sm:$0xf]  ;;  %361 = vst [vmem:[%s2073_s30 + $0x110] sm:$0xf] %v360_v4  ;;  %363 = vst [vmem:[%s2073_s30 + $0x114] sm:$0xf] %v362_v5 }
  0x40   : > { %365 = vst [vmem:[%s2073_s30 + $0x118] sm:$0xf] %v364_v6  ;;  %v366_v7 = vld [vmem:[%s2069_s29 + $0x354] sm:$0xf]  ;;  %v368_v8 = vld [vmem:[%s2069_s29 + $0x360] sm:$0xf] }
  0x41   : > { %v370_v9 = vld [vmem:[%s2069_s29 + $0x36c] sm:$0xf]  ;;  %367 = vst [vmem:[%s2073_s30 + $0x11c] sm:$0xf] %v366_v7  ;;  %369 = vst [vmem:[%s2073_s30 + $0x120] sm:$0xf] %v368_v8 }
  0x42   : > { %371 = vst [vmem:[%s2073_s30 + $0x124] sm:$0xf] %v370_v9  ;;  %v372_v10 = vld [vmem:[%s2069_s29 + $0x378] sm:$0xf]  ;;  %v374_v11 = vld [vmem:[%s2069_s29 + $0x384] sm:$0xf] }
  0x43   : > { %v376_v12 = vld [vmem:[%s2069_s29 + $0x390] sm:$0xf]  ;;  %373 = vst [vmem:[%s2073_s30 + $0x128] sm:$0xf] %v372_v10  ;;  %375 = vst [vmem:[%s2073_s30 + $0x12c] sm:$0xf] %v374_v11 }
  0x44   : > { %377 = vst [vmem:[%s2073_s30 + $0x130] sm:$0xf] %v376_v12  ;;  %v378_v13 = vld [vmem:[%s2069_s29 + $0x39c] sm:$0xf]  ;;  %v380_v14 = vld [vmem:[%s2069_s29 + $0x3a8] sm:$0xf] }
  0x45   : > { %v382_v15 = vld [vmem:[%s2069_s29 + $0x3b4] sm:$0xf]  ;;  %379 = vst [vmem:[%s2073_s30 + $0x134] sm:$0xf] %v378_v13  ;;  %381 = vst [vmem:[%s2073_s30 + $0x138] sm:$0xf] %v380_v14 }
  0x46   : > { %383 = vst [vmem:[%s2073_s30 + $0x13c] sm:$0xf] %v382_v15  ;;  %v384_v16 = vld [vmem:[%s2069_s29 + $0x3c0] sm:$0xf]  ;;  %v386_v17 = vld [vmem:[%s2069_s29 + $0x3cc] sm:$0xf] }
  0x47   : > { %v388_v18 = vld [vmem:[%s2069_s29 + $0x3d8] sm:$0xf]  ;;  %385 = vst [vmem:[%s2073_s30 + $0x140] sm:$0xf] %v384_v16  ;;  %387 = vst [vmem:[%s2073_s30 + $0x144] sm:$0xf] %v386_v17 }
  0x48   : > { %389 = vst [vmem:[%s2073_s30 + $0x148] sm:$0xf] %v388_v18  ;;  %v390_v19 = vld [vmem:[%s2069_s29 + $0x3e4] sm:$0xf]  ;;  %v392_v20 = vld [vmem:[%s2069_s29 + $0x3f0] sm:$0xf] }
  0x49   : > { %v394_v21 = vld [vmem:[%s2069_s29 + $0x3fc] sm:$0xf]  ;;  %391 = vst [vmem:[%s2073_s30 + $0x14c] sm:$0xf] %v390_v19  ;;  %393 = vst [vmem:[%s2073_s30 + $0x150] sm:$0xf] %v392_v20 }
  0x4a   : > { %395 = vst [vmem:[%s2073_s30 + $0x154] sm:$0xf] %v394_v21  ;;  %v396_v22 = vld [vmem:[%s2069_s29 + $0x408] sm:$0xf]  ;;  %v398_v23 = vld [vmem:[%s2069_s29 + $0x414] sm:$0xf] }
  0x4b   : > { %v400_v24 = vld [vmem:[%s2069_s29 + $0x420] sm:$0xf]  ;;  %397 = vst [vmem:[%s2073_s30 + $0x158] sm:$0xf] %v396_v22  ;;  %399 = vst [vmem:[%s2073_s30 + $0x15c] sm:$0xf] %v398_v23 }
  0x4c   : > { %401 = vst [vmem:[%s2073_s30 + $0x160] sm:$0xf] %v400_v24  ;;  %v402_v25 = vld [vmem:[%s2069_s29 + $0x42c] sm:$0xf]  ;;  %v404_v26 = vld [vmem:[%s2069_s29 + $0x438] sm:$0xf] }
  0x4d   : > { %v406_v27 = vld [vmem:[%s2069_s29 + $0x444] sm:$0xf]  ;;  %403 = vst [vmem:[%s2073_s30 + $0x164] sm:$0xf] %v402_v25  ;;  %405 = vst [vmem:[%s2073_s30 + $0x168] sm:$0xf] %v404_v26 }
  0x4e   : > { %407 = vst [vmem:[%s2073_s30 + $0x16c] sm:$0xf] %v406_v27  ;;  %v408_v28 = vld [vmem:[%s2069_s29 + $0x450] sm:$0xf]  ;;  %v410_v29 = vld [vmem:[%s2069_s29 + $0x45c] sm:$0xf] }
  0x4f   : > { %v412_v30 = vld [vmem:[%s2069_s29 + $0x468] sm:$0xf]  ;;  %409 = vst [vmem:[%s2073_s30 + $0x170] sm:$0xf] %v408_v28  ;;  %411 = vst [vmem:[%s2073_s30 + $0x174] sm:$0xf] %v410_v29 }
  0x50   : > { %413 = vst [vmem:[%s2073_s30 + $0x178] sm:$0xf] %v412_v30  ;;  %v414_v31 = vld [vmem:[%s2069_s29 + $0x474] sm:$0xf]  ;;  %v416_v32 = vld [vmem:[%s2069_s29 + $0x480] sm:$0xf] }
  0x51   : > { %v418_v33 = vld [vmem:[%s2069_s29 + $0x48c] sm:$0xf]  ;;  %415 = vst [vmem:[%s2073_s30 + $0x17c] sm:$0xf] %v414_v31  ;;  %417 = vst [vmem:[%s2073_s30 + $0x180] sm:$0xf] %v416_v32 }
  0x52   : > { %419 = vst [vmem:[%s2073_s30 + $0x184] sm:$0xf] %v418_v33  ;;  %v420_v34 = vld [vmem:[%s2069_s29 + $0x498] sm:$0xf]  ;;  %v422_v35 = vld [vmem:[%s2069_s29 + $0x4a4] sm:$0xf] }
  0x53   : > { %v424_v36 = vld [vmem:[%s2069_s29 + $0x4b0] sm:$0xf]  ;;  %421 = vst [vmem:[%s2073_s30 + $0x188] sm:$0xf] %v420_v34  ;;  %423 = vst [vmem:[%s2073_s30 + $0x18c] sm:$0xf] %v422_v35 }
  0x54   : > { %425 = vst [vmem:[%s2073_s30 + $0x190] sm:$0xf] %v424_v36  ;;  %v426_v37 = vld [vmem:[%s2069_s29 + $0x4bc] sm:$0xf]  ;;  %v428_v38 = vld [vmem:[%s2069_s29 + $0x4c8] sm:$0xf] }
  0x55   : > { %v430_v39 = vld [vmem:[%s2069_s29 + $0x4d4] sm:$0xf]  ;;  %427 = vst [vmem:[%s2073_s30 + $0x194] sm:$0xf] %v426_v37  ;;  %429 = vst [vmem:[%s2073_s30 + $0x198] sm:$0xf] %v428_v38 }
  0x56   : > { %431 = vst [vmem:[%s2073_s30 + $0x19c] sm:$0xf] %v430_v39  ;;  %v432_v40 = vld [vmem:[%s2069_s29 + $0x4e0] sm:$0xf]  ;;  %v434_v41 = vld [vmem:[%s2069_s29 + $0x4ec] sm:$0xf] }
  0x57   : > { %v436_v42 = vld [vmem:[%s2069_s29 + $0x4f8] sm:$0xf]  ;;  %433 = vst [vmem:[%s2073_s30 + $0x1a0] sm:$0xf] %v432_v40  ;;  %435 = vst [vmem:[%s2073_s30 + $0x1a4] sm:$0xf] %v434_v41 }
  0x58   : > { %437 = vst [vmem:[%s2073_s30 + $0x1a8] sm:$0xf] %v436_v42  ;;  %v438_v43 = vld [vmem:[%s2069_s29 + $0x504] sm:$0xf]  ;;  %v440_v44 = vld [vmem:[%s2069_s29 + $0x510] sm:$0xf] }
  0x59   : > { %v442_v45 = vld [vmem:[%s2069_s29 + $0x51c] sm:$0xf]  ;;  %439 = vst [vmem:[%s2073_s30 + $0x1ac] sm:$0xf] %v438_v43  ;;  %441 = vst [vmem:[%s2073_s30 + $0x1b0] sm:$0xf] %v440_v44 }
  0x5a   : > { %443 = vst [vmem:[%s2073_s30 + $0x1b4] sm:$0xf] %v442_v45  ;;  %v444_v46 = vld [vmem:[%s2069_s29 + $0x528] sm:$0xf]  ;;  %v446_v47 = vld [vmem:[%s2069_s29 + $0x534] sm:$0xf] }
  0x5b   : > { %v448_v48 = vld [vmem:[%s2069_s29 + $0x540] sm:$0xf]  ;;  %445 = vst [vmem:[%s2073_s30 + $0x1b8] sm:$0xf] %v444_v46  ;;  %447 = vst [vmem:[%s2073_s30 + $0x1bc] sm:$0xf] %v446_v47 }
  0x5c   : > { %449 = vst [vmem:[%s2073_s30 + $0x1c0] sm:$0xf] %v448_v48  ;;  %v450_v49 = vld [vmem:[%s2069_s29 + $0x54c] sm:$0xf]  ;;  %v452_v50 = vld [vmem:[%s2069_s29 + $0x558] sm:$0xf] }
  0x5d   : > { %v454_v51 = vld [vmem:[%s2069_s29 + $0x564] sm:$0xf]  ;;  %451 = vst [vmem:[%s2073_s30 + $0x1c4] sm:$0xf] %v450_v49  ;;  %453 = vst [vmem:[%s2073_s30 + $0x1c8] sm:$0xf] %v452_v50 }
  0x5e   : > { %455 = vst [vmem:[%s2073_s30 + $0x1cc] sm:$0xf] %v454_v51  ;;  %v456_v52 = vld [vmem:[%s2069_s29 + $0x570] sm:$0xf]  ;;  %v458_v53 = vld [vmem:[%s2069_s29 + $0x57c] sm:$0xf] }
  0x5f   : > { %v460_v54 = vld [vmem:[%s2069_s29 + $0x588] sm:$0xf]  ;;  %457 = vst [vmem:[%s2073_s30 + $0x1d0] sm:$0xf] %v456_v52  ;;  %459 = vst [vmem:[%s2073_s30 + $0x1d4] sm:$0xf] %v458_v53 }
  0x60   : > { %461 = vst [vmem:[%s2073_s30 + $0x1d8] sm:$0xf] %v460_v54  ;;  %v462_v55 = vld [vmem:[%s2069_s29 + $0x594] sm:$0xf]  ;;  %v464_v56 = vld [vmem:[%s2069_s29 + $0x5a0] sm:$0xf] }
  0x61   : > { %v466_v57 = vld [vmem:[%s2069_s29 + $0x5ac] sm:$0xf]  ;;  %463 = vst [vmem:[%s2073_s30 + $0x1dc] sm:$0xf] %v462_v55  ;;  %465 = vst [vmem:[%s2073_s30 + $0x1e0] sm:$0xf] %v464_v56 }
  0x62   : > { %467 = vst [vmem:[%s2073_s30 + $0x1e4] sm:$0xf] %v466_v57  ;;  %v468_v58 = vld [vmem:[%s2069_s29 + $0x5b8] sm:$0xf]  ;;  %v470_v59 = vld [vmem:[%s2069_s29 + $0x5c4] sm:$0xf] }
  0x63   : > { %v472_v60 = vld [vmem:[%s2069_s29 + $0x5d0] sm:$0xf]  ;;  %469 = vst [vmem:[%s2073_s30 + $0x1e8] sm:$0xf] %v468_v58  ;;  %471 = vst [vmem:[%s2073_s30 + $0x1ec] sm:$0xf] %v470_v59 }
  0x64   : > { %473 = vst [vmem:[%s2073_s30 + $0x1f0] sm:$0xf] %v472_v60  ;;  %v474_v61 = vld [vmem:[%s2069_s29 + $0x5dc] sm:$0xf]  ;;  %v476_v62 = vld [vmem:[%s2069_s29 + $0x5e8] sm:$0xf] }
  0x65   : > { %v478_v63 = vld [vmem:[%s2069_s29 + $0x5f4] sm:$0xf]  ;;  %475 = vst [vmem:[%s2073_s30 + $0x1f4] sm:$0xf] %v474_v61  ;;  %477 = vst [vmem:[%s2073_s30 + $0x1f8] sm:$0xf] %v476_v62 }
  0x66   : > { %479 = vst [vmem:[%s2073_s30 + $0x1fc] sm:$0xf] %v478_v63 }
  0x67 PF: > { %p1697_p6 = scmp.ge.s32.totalorder %s1999_s19, 1  ;;  %p769_p7 = scmp.lt.s32.totalorder %s1999_s19, 4 }
  0x69   : > { %p770_p8 = pnand %p1697_p6, %p769_p7 }
  0x6a   : > { %s776_s5 = sand.u32 (!%p770_p8), 1, %s1983_s15   ;;  %v851_v0 = vld [vmem:[%s2448_s0 + $0x8] sm:$0xff] (!%p770_p8)  ;;  %v853_v1 = vld [vmem:[%s2448_s0 + $0x18] sm:$0xff] (!%p770_p8)  ;;  %v850_v31 = vld [vmem:[%s2448_s0] sm:$0xff] (!%p770_p8)  ;;  %p830_p9 = scmp.lt.s32.totalorder (!%p770_p8), %s1991_s17, 2 }
  0x6b   : > { %773 = sbr.rel (%p770_p8) target bundleno = 399 (0x18f), region = 73  ;;  %s1698_s10 = sshll.u32 (!%p770_p8), %s776_s5, 9  ;;  %v859_v2 = vpack.c.bf16 (!%p770_p8), %v851_v0, %v851_v0  ;;  %v861_v3 = vpack.c.bf16 (!%p770_p8), %v853_v1, %v853_v1  ;;  %v852_v33 = vld [vmem:[%s2448_s0 + $0x10] sm:$0xff] (!%p770_p8)  ;;  %v855_v35 = vld [vmem:[%s2448_s0 + $0x28] sm:$0xff] (!%p770_p8)  ;;  %v857_v37 = vld [vmem:[%s2448_s0 + $0x38] sm:$0xff] (!%p770_p8)  ;;  %v858_v40 = vpack.c.bf16 (!%p770_p8), %v850_v31, %v850_v31 }
  0x6c   : > { %s2338_s11 = scalar_lea.vmem (!%p770_p8), [#allocation2], %s1698_s10  ;;  %v860_v41 = vpack.c.bf16 (!%p770_p8), %v852_v33, %v852_v33  ;;  %v863_v44 = vpack.c.bf16 (!%p770_p8), %v855_v35, %v855_v35  ;;  %v865_v46 = vpack.c.bf16 (!%p770_p8), %v857_v37, %v857_v37 }
  0x6d   : > { %v1897_v4 = vld [vmem:[%s2338_s11 + $0x40] sm:$0xff] (!%p770_p8)   ;;  %1411 = vmatprep.mubr.bf16.mxu0 (!%p770_p8), %v859_v2  ;;  %1451 = vmatprep.mubr.bf16.mxu1 (!%p770_p8), %v861_v3  ;;  %v1901_v8 = vld [vmem:[%s2338_s11 + $0x48] sm:$0xff] (!%p770_p8)   ;;  %v1905_v12 = vld [vmem:[%s2338_s11 + $0x50] sm:$0xff] (!%p770_p8)  }
  0x6e   : > { %v1898_v5 = vld [vmem:[%s2338_s11 + $0xc0] sm:$0xff] (!%p770_p8)   ;;  %1768 = vmatprep.subr.bf16.mxu0 (!%p770_p8), %v1897_v4  ;;  %v1902_v9 = vld [vmem:[%s2338_s11 + $0xc8] sm:$0xff] (!%p770_p8)   ;;  %v1906_v13 = vld [vmem:[%s2338_s11 + $0xd0] sm:$0xff] (!%p770_p8)  }
  0x6f   : > { %v1899_v6 = vld [vmem:[%s2338_s11] sm:$0xff] (!%p770_p8)   ;;  %1790 = vmatprep.subr.bf16.mxu1 (!%p770_p8), %v1898_v5  ;;  %v1903_v10 = vld [vmem:[%s2338_s11 + $0x8] sm:$0xff] (!%p770_p8)   ;;  %v1907_v14 = vld [vmem:[%s2338_s11 + $0x10] sm:$0xff] (!%p770_p8)  }
  0x70   : > { %v1900_v7 = vld [vmem:[%s2338_s11 + $0x80] sm:$0xff] (!%p770_p8)   ;;  %1769 = vmatpush3.bf16.msra.mxu0 (!%p770_p8), %v1899_v6  ;;  %v1904_v11 = vld [vmem:[%s2338_s11 + $0x88] sm:$0xff] (!%p770_p8)   ;;  %v1908_v15 = vld [vmem:[%s2338_s11 + $0x90] sm:$0xff] (!%p770_p8)  }
  0x71   : > { %1791 = vmatpush3.bf16.msra.mxu1 (!%p770_p8), %v1900_v7  ;;  %1770 = vmatprep.subr.bf16.mxu0 (!%p770_p8), %v1901_v8  ;;  %v1909_v16 = vld [vmem:[%s2338_s11 + $0x58] sm:$0xff] (!%p770_p8)   ;;  %v1913_v20 = vld [vmem:[%s2338_s11 + $0x60] sm:$0xff] (!%p770_p8)   ;;  %v1917_v24 = vld [vmem:[%s2338_s11 + $0x68] sm:$0xff] (!%p770_p8)  }
  0x72   : > { %1792 = vmatprep.subr.bf16.mxu1 %v1902_v9  ;;  %v1910_v17 = vld [vmem:[%s2338_s11 + $0xd8] sm:$0xff]   ;;  %v1914_v21 = vld [vmem:[%s2338_s11 + $0xe0] sm:$0xff]   ;;  %v1918_v25 = vld [vmem:[%s2338_s11 + $0xe8] sm:$0xff]   ;;  %s2460_s17 = smov (!%p830_p9, %s1991_s17), 2 }
  0x73   : > { %v1911_v18 = vld [vmem:[%s2338_s11 + $0x18] sm:$0xff]   ;;  %v1915_v22 = vld [vmem:[%s2338_s11 + $0x20] sm:$0xff]   ;;  %v1919_v26 = vld [vmem:[%s2338_s11 + $0x28] sm:$0xff]   ;;  %s832_s6 = scalar_lea.vmem %s2450_s2, %s2460_s17  ;;  %s835_s9 = scalar_lea.vmem %s2451_s3, %s2460_s17 }
  0x74   : > { %1771 = vmatpush3.bf16.msra.mxu0 %v1903_v10  ;;  %v1912_v19 = vld [vmem:[%s2338_s11 + $0x98] sm:$0xff]   ;;  %v1916_v23 = vld [vmem:[%s2338_s11 + $0xa0] sm:$0xff]   ;;  %v1920_v27 = vld [vmem:[%s2338_s11 + $0xa8] sm:$0xff]   ;;  %s1699_s10 = sshll.u32 %s2460_s17, 3 }
  0x75   : > { %1793 = vmatpush3.bf16.msra.mxu1 %v1904_v11  ;;  %1772 = vmatprep.subr.bf16.mxu0 %v1905_v12  ;;  %v1921_v28 = vld [vmem:[%s2338_s11 + $0x70] sm:$0xff]   ;;  %v1925_v34 = vld [vmem:[%s2338_s11 + $0x78] sm:$0xff]   ;;  %v1929_v42 = vld [vmem:[%s2338_s11 + $0x140] sm:$0xff]   ;;  %s843_s13 = scalar_lea.vmem %s2452_s4, %s1699_s10 }
  0x76   : > { %1794 = vmatprep.subr.bf16.mxu1 %v1906_v13  ;;  %v1922_v29 = vld [vmem:[%s2338_s11 + $0xf0] sm:$0xff]   ;;  %v1926_v36 = vld [vmem:[%s2338_s11 + $0xf8] sm:$0xff]   ;;  %v1930_v43 = vld [vmem:[%s2338_s11 + $0x1c0] sm:$0xff]  }
  0x77   : > { %v1923_v30 = vld [vmem:[%s2338_s11 + $0x30] sm:$0xff]   ;;  %v1927_v38 = vld [vmem:[%s2338_s11 + $0x38] sm:$0xff]   ;;  %v1931_v45 = vld [vmem:[%s2338_s11 + $0x100] sm:$0xff]  }
  0x78   : > { %1773 = vmatpush3.bf16.msra.mxu0 %v1907_v14  ;;  %v1924_v32 = vld [vmem:[%s2338_s11 + $0xb0] sm:$0xff]   ;;  %v1928_v39 = vld [vmem:[%s2338_s11 + $0xb8] sm:$0xff]   ;;  %v1932_v47 = vld [vmem:[%s2338_s11 + $0x180] sm:$0xff]  }
  0x79   : > { %1795 = vmatpush3.bf16.msra.mxu1 %v1908_v15  ;;  %1774 = vmatprep.subr.bf16.mxu0 %v1909_v16  ;;  %v1933_v48 = vld [vmem:[%s2338_s11 + $0x148] sm:$0xff]   ;;  %v1937_v52 = vld [vmem:[%s2338_s11 + $0x150] sm:$0xff]   ;;  %v1941_v56 = vld [vmem:[%s2338_s11 + $0x158] sm:$0xff]  }
  0x7a   : > { %1796 = vmatprep.subr.bf16.mxu1 %v1910_v17  ;;  %v1934_v49 = vld [vmem:[%s2338_s11 + $0x1c8] sm:$0xff]   ;;  %v1938_v53 = vld [vmem:[%s2338_s11 + $0x1d0] sm:$0xff]   ;;  %v1942_v57 = vld [vmem:[%s2338_s11 + $0x1d8] sm:$0xff]  }
  0x7b   : > { %v1935_v50 = vld [vmem:[%s2338_s11 + $0x108] sm:$0xff]   ;;  %v1939_v54 = vld [vmem:[%s2338_s11 + $0x110] sm:$0xff]   ;;  %v1943_v58 = vld [vmem:[%s2338_s11 + $0x118] sm:$0xff]  }
  0x7c   : > { %1775 = vmatpush3.bf16.msra.mxu0 %v1911_v18  ;;  %v1936_v51 = vld [vmem:[%s2338_s11 + $0x188] sm:$0xff]   ;;  %v1940_v55 = vld [vmem:[%s2338_s11 + $0x190] sm:$0xff]   ;;  %v1944_v59 = vld [vmem:[%s2338_s11 + $0x198] sm:$0xff]  }
  0x7d   : > { %1797 = vmatpush3.bf16.msra.mxu1 %v1912_v19  ;;  %1776 = vmatprep.subr.bf16.mxu0 %v1913_v20  ;;  %v1945_v60 = vld [vmem:[%s2338_s11 + $0x160] sm:$0xff]   ;;  %v1949_v0 = vld [vmem:[%s2338_s11 + $0x168] sm:$0xff]   ;;  %v1953_v4 = vld [vmem:[%s2338_s11 + $0x170] sm:$0xff]  }
  0x7e   : > { %1798 = vmatprep.subr.bf16.mxu1 %v1914_v21  ;;  %v1946_v61 = vld [vmem:[%s2338_s11 + $0x1e0] sm:$0xff]   ;;  %v1950_v1 = vld [vmem:[%s2338_s11 + $0x1e8] sm:$0xff]   ;;  %v1954_v5 = vld [vmem:[%s2338_s11 + $0x1f0] sm:$0xff]  }
  0x7f   : > { %v1947_v62 = vld [vmem:[%s2338_s11 + $0x120] sm:$0xff]   ;;  %v1951_v2 = vld [vmem:[%s2338_s11 + $0x128] sm:$0xff]   ;;  %v1955_v6 = vld [vmem:[%s2338_s11 + $0x130] sm:$0xff]  }
  0x80   : > { %1777 = vmatpush3.bf16.msra.mxu0 %v1915_v22  ;;  %v1948_v63 = vld [vmem:[%s2338_s11 + $0x1a0] sm:$0xff]   ;;  %v1952_v3 = vld [vmem:[%s2338_s11 + $0x1a8] sm:$0xff]   ;;  %v1956_v8 = vld [vmem:[%s2338_s11 + $0x1b0] sm:$0xff]  }
  0x81   : > { %1799 = vmatpush3.bf16.msra.mxu1 %v1916_v23  ;;  %1778 = vmatprep.subr.bf16.mxu0 %v1917_v24  ;;  %v854_v7 = vld [vmem:[%s2448_s0 + $0x20] sm:$0xff]  ;;  %v856_v9 = vld [vmem:[%s2448_s0 + $0x30] sm:$0xff]  ;;  %v1957_v10 = vld [vmem:[%s2338_s11 + $0x178] sm:$0xff]  }
  0x82   : > { %1800 = vmatprep.subr.bf16.mxu1 %v1918_v25  ;;  %v1958_v11 = vld [vmem:[%s2338_s11 + $0x1f8] sm:$0xff]   ;;  %v862_v14 = vpack.c.bf16 %v854_v7, %v854_v7  ;;  %v864_v15 = vpack.c.bf16 %v856_v9, %v856_v9 }
  0x83   : > { %v1959_v12 = vld [vmem:[%s2338_s11 + $0x138] sm:$0xff]  }
  0x84   : > { %1779 = vmatpush3.bf16.msra.mxu0 %v1919_v26  ;;  %v1960_v13 = vld [vmem:[%s2338_s11 + $0x1b8] sm:$0xff]  }
  0x85   : > { %1801 = vmatpush3.bf16.msra.mxu1 %v1920_v27  ;;  %1780 = vmatprep.subr.bf16.mxu0 %v1921_v28 }
  0x86   : > { %1802 = vmatprep.subr.bf16.mxu1 %v1922_v29 }
  0x88   : > { %1781 = vmatpush3.bf16.msra.mxu0 %v1923_v30 }
  0x89   : > { %1803 = vmatpush3.bf16.msra.mxu1 %v1924_v32  ;;  %1782 = vmatprep.subr.bf16.mxu0 %v1925_v34 }
  0x8a   : > { %1804 = vmatprep.subr.bf16.mxu1 %v1926_v36 }
  0x8c   : > { %1783 = vmatpush3.bf16.msra.mxu0 %v1927_v38 }
  0x8d   : > { %1805 = vmatpush3.bf16.msra.mxu1 %v1928_v39  ;;  %1812 = vmatprep.subr.bf16.mxu0 %v1929_v42  ;;  %v1764_v39 = vld [vmem:[%s832_s6] ss:$0 sm:$0xff] }
  0x8e   : > { %1834 = vmatprep.subr.bf16.mxu1 %v1930_v43 }
  0x8f   : > { %1412 = vmatmul.mubr.bf16.vlgmr.msra.gmra.mrb[0].mxu0 %v858_v40  ;;  %v1765_v40 = vld [vmem:[%s835_s9] ss:$0 sm:$0xff] }
  0x90   : > { %1452 = vmatmul.mubr.bf16.vlgmr.msra.gmra.mrb[0].mxu1 %v860_v41  ;;  %1813 = vmatpush3.bf16.msra.mxu0 %v1931_v45 }
  0x91   : > { %1835 = vmatpush3.bf16.msra.mxu1 %v1932_v47  ;;  %1491 = vmatprep.mubr.bf16.mxu0 %v863_v44 }
  0x92   : > { %1814 = vmatprep.subr.bf16.mxu0 %v1933_v48  ;;  %1531 = vmatprep.mubr.bf16.mxu1 %v865_v46 }
  0x93   : > { %1836 = vmatprep.subr.bf16.mxu1 %v1934_v49 }
  0x94   : > { %1815 = vmatpush3.bf16.msra.mxu0 %v1935_v50 }
  0x95   : > { %1837 = vmatpush3.bf16.msra.mxu1 %v1936_v51  ;;  %1816 = vmatprep.subr.bf16.mxu0 %v1937_v52 }
  0x96   : > { %1838 = vmatprep.subr.bf16.mxu1 %v1938_v53 }
  0x98   : > { %1817 = vmatpush3.bf16.msra.mxu0 %v1939_v54 }
  0x99   : > { %1839 = vmatpush3.bf16.msra.mxu1 %v1940_v55  ;;  %1818 = vmatprep.subr.bf16.mxu0 %v1941_v56 }
  0x9a   : > { %1840 = vmatprep.subr.bf16.mxu1 %v1942_v57 }
  0x9c   : > { %1819 = vmatpush3.bf16.msra.mxu0 %v1943_v58 }
  0x9d   : > { %1841 = vmatpush3.bf16.msra.mxu1 %v1944_v59  ;;  %1820 = vmatprep.subr.bf16.mxu0 %v1945_v60 }
  0x9e   : > { %1842 = vmatprep.subr.bf16.mxu1 %v1946_v61 }
  0xa0   : > { %1821 = vmatpush3.bf16.msra.mxu0 %v1947_v62 }
  0xa1   : > { %1843 = vmatpush3.bf16.msra.mxu1 %v1948_v63  ;;  %1822 = vmatprep.subr.bf16.mxu0 %v1949_v0 }
  0xa2   : > { %1844 = vmatprep.subr.bf16.mxu1 %v1950_v1 }
  0xa4   : > { %1823 = vmatpush3.bf16.msra.mxu0 %v1951_v2 }
  0xa5   : > { %1845 = vmatpush3.bf16.msra.mxu1 %v1952_v3  ;;  %1824 = vmatprep.subr.bf16.mxu0 %v1953_v4 }
  0xa6   : > { %1846 = vmatprep.subr.bf16.mxu1 %v1954_v5 }
  0xa8   : > { %1825 = vmatpush3.bf16.msra.mxu0 %v1955_v6 }
  0xa9   : > { %1847 = vmatpush3.bf16.msra.mxu1 %v1956_v8  ;;  %1826 = vmatprep.subr.bf16.mxu0 %v1957_v10 }
  0xaa   : > { %1848 = vmatprep.subr.bf16.mxu1 %v1958_v11 }
  0xac   : > { %1827 = vmatpush3.bf16.msra.mxu0 %v1959_v12 }
  0xad   : > { %1849 = vmatpush3.bf16.msra.mxu1 %v1960_v13 }
  0xaf   : > { %1492 = vmatmul.mubr.bf16.vlgmr.msra.gmra.mrb[4].mxu0 %v862_v14 }
  0xb0   : > { %1532 = vmatmul.mubr.bf16.vlgmr.msra.gmra.mrb[4].mxu1 %v864_v15 }
 0x162   : > { %v1784_v16 = vpop.f32.mrb[0].mxu0 }
 0x163   : > { %v1806_v17 = vpop.f32.mrb[0].mxu1  ;;  %v1785_v18 = vpop.f32.mrb[1].mxu0 }
 0x164   : > { %v1786_v19 = vadd.f32 %v1785_v18, %v1784_v16  ;;  %v1807_v20 = vpop.f32.mrb[1].mxu1  ;;  %v1787_v21 = vpop.f32.mrb[2].mxu0 }
 0x165   : > { %v1808_v22 = vadd.f32 %v1807_v20, %v1806_v17  ;;  %v1809_v23 = vpop.f32.mrb[2].mxu1  ;;  %v1788_v24 = vpop.f32.mrb[3].mxu0 }
 0x166   : > { %v1810_v25 = vpop.f32.mrb[3].mxu1 }
 0x167   : > { %v1454_v26 = vadd.f32 %v1808_v22, %v1786_v19 }
 0x182   : > { %v1828_v27 = vpop.f32.mrb[4].mxu0 }
 0x183   : > { %v1850_v28 = vpop.f32.mrb[4].mxu1  ;;  %v1829_v29 = vpop.f32.mrb[5].mxu0 }
 0x184   : > { %v1830_v30 = vadd.f32 %v1829_v29, %v1828_v27  ;;  %v1851_v31 = vpop.f32.mrb[5].mxu1  ;;  %v1831_v32 = vpop.f32.mrb[6].mxu0 }
 0x185   : > { %v1852_v33 = vadd.f32 %v1851_v31, %v1850_v28  ;;  %v1853_v34 = vpop.f32.mrb[6].mxu1  ;;  %v1832_v35 = vpop.f32.mrb[7].mxu0 }
 0x186   : > { %v1494_v36 = vadd.f32 %v1830_v30, %v1454_v26  ;;  %v1854_v37 = vpop.f32.mrb[7].mxu1 }
 0x188   : > { %v1534_v38 = vadd.f32 %v1852_v33, %v1494_v36 }
 0x18a   : > { %v1552_v41 = vmul.f32 %v1764_v39, %v1534_v38 }
 0x18c   : > { %v1560_v42 = vadd.f32 %v1765_v40, %v1552_v41 }
 0x18e   : > { %1561 = vst [vmem:[%s843_s13] sm:$0xff] %v1560_v42 }
 0x18f PF: > { %s14_s19 = sadd.s32 1, %s1999_s19   ;;  %s2453_s15 = smov %s1987_s16 }
 0x190   : > { %p11_p10 = scmp.ge.s32.totalorder %s14_s19, 5   ;;  %s2454_s16 = smov %s2061_s23 }
 0x191   : > { %s2455_s17 = smov %s1995_s18  ;;  %s2456_s18 = smov %s2458_s20 }
 0x192   :  { %13 = sbr.rel (!%p11_p10) target bundleno = 3 (0x3), region = 129 }

// kernel: alphago_policy_forward.3
= control target key start
LH: loop header
LB: loop body
LE: loop exit
PB: predicated region body
PF: predicated region fallthrough
CT: control target
= control target key end

     0   :  { %s7520_s0 = inlined_call_operand.vmem [shape: f32[2,200,1], index: 0, kind: input, shape index: {}]   ;;  %s7521_s1 = inlined_call_operand.hbm [shape: f32[4,1,8], index: 1, kind: input, shape index: {}]   ;;  %s7522_s2 = inlined_call_operand.hbm [shape: f32[1,8], index: 2, kind: input, shape index: {}]   ;;  %s7523_s3 = inlined_call_operand.hbm [shape: f32[1,8], index: 3, kind: input, shape index: {}]   ;;  %s7524_s4 = inlined_call_operand.hbm [shape: f32[4,8,16], index: 4, kind: input, shape index: {}]   ;;  %s7525_s5 = inlined_call_operand.hbm [shape: f32[1,16], index: 5, kind: input, shape index: {}]   ;;  %s7526_s6 = inlined_call_operand.hbm [shape: f32[1,16], index: 6, kind: input, shape index: {}]   ;;  %s7527_s7 = inlined_call_operand.hbm [shape: f32[4,16,32], index: 7, kind: input, shape index: {}]   ;;  %s7528_s8 = inlined_call_operand.hbm [shape: f32[1,32], index: 8, kind: input, shape index: {}]   ;;  %s7529_s9 = inlined_call_operand.hbm [shape: f32[1,32], index: 9, kind: input, shape index: {}]   ;;  %s7530_s10 = inlined_call_operand.hbm [shape: f32[4,32,64], index: 10, kind: input, shape index: {}]   ;;  %s7531_s11 = inlined_call_operand.hbm [shape: f32[1,64], index: 11, kind: input, shape index: {}]   ;;  %s7532_s12 = inlined_call_operand.hbm [shape: f32[1,64], index: 12, kind: input, shape index: {}]   ;;  %s7533_s13 = inlined_call_operand.vmem [shape: f32[2,64,64], index: 13, kind: output, shape index: {}]  }
   0x1   :  { %7540 = sst [smem:[#allocation33_spill]] %s7522_s2 }
   0x2   :  { %7541 = sst [smem:[#allocation34_spill]] %s7524_s4 }
   0x3   :  { %7542 = sst [smem:[#allocation35_spill]] %s7526_s6 }
   0x4   :  { %7543 = sst [smem:[#allocation36_spill]] %s7528_s8 }
   0x5   :  { %18 = vsyncpa [#allocation7], 0 }
   0x6   :  { %19 = vsyncpa [#allocation9], 0 }
   0x7   :  { %20 = vsyncpa [#allocation12], 0 }
   0x8   :  { %21 = vsyncpa [#allocation15], 0 }
   0x9   :  { %22 = vsyncpa [#allocation18], 0 }
   0xa   :  { %23 = vsyncpa [#allocation21], 0 }
   0xb   :  { %24 = vsyncpa [#allocation24], 0  ;;  %s6375_s25 = smov 0  }
   0xc LB: > { %7544 = sst [smem:[#allocation32_spill]] %s6286_s25  ;;  %s6288_s26 = smov [#allocation8]   ;;  %s6286_s25 = sphi %s6375_s25, %s30_s25  }
   0xd   : > { %s365_s27 = sshll.u32 %s6288_s26, 4  ;;  %s6381_s28 = sadd.s32 4294967295, %s6286_s25   ;;  %s6386_s27 = int_to_ptr.vmem [resolvable:$true] %s365_s27 }
   0xe   : > { %p4682_p0 = scmp.ge.s32.totalorder %s6286_s25, 1  ;;  %p339_p1 = scmp.lt.s32.totalorder %s6286_s25, 3 }
   0xf   : > { %p7535_p2 = scmp.eq.s32.totalorder %s6381_s28, 0  ;;  %s6289_s30 = smov [#allocation11]  }
  0x10   : > { %p6388_p3 = pnand %p4682_p0, %p339_p1  ;;  %s386_s14 = sshll.u32 %s6289_s30, 4  ;;  %s6394_s14 = int_to_ptr.vmem [resolvable:$true] %s386_s14 }
  0x11   : > { %s6290_s16 = smov [#allocation14]   ;;  %s6291_s18 = smov [#allocation17]  }
  0x12   : > { %s7545_s29 = scalar_select %p6388_p3, 1, 0 }
  0x13   : > { %p5828_p4 = pneg %p6388_p3  ;;  %s411_s17 = sshll.u32 %s6290_s16, 4  ;;  %s6402_s17 = int_to_ptr.vmem [resolvable:$true] %s411_s17 }
  0x14   : > { %s6404_s19 = sshll.u32 %s6291_s18, 4  ;;  %s7547_s2 = sld [smem:[#allocation33_spill]]  ;;  %s436_s19 = int_to_ptr.vmem [resolvable:$true] %s6404_s19 }
  0x15   : > { %p6398_p5 = pnand %p7535_p2, %p5828_p4 }
  0x17   : > { %p6414_p7 = pneg %p6398_p5 }
  0x1a   : > { %s5916_s22 = scalar_lea.hbm %s7547_s2, 16 }
  0x1b   : > { %p5917_p6 = scmp.ne.s32.totalorder %s7547_s2, %s5916_s22  ;;  %p5923_p10 = scmp.lt.u32.totalorder %s5916_s22, %s7547_s2 }
  0x1d   : > { %p5919_p8 = pnand %p6414_p7, %p5917_p6 }
  0x1f   : > { %p5920_p9 = pneg %p5919_p8 }
  0x21   : > { %p5925_p11 = pnand %p5923_p10, %p5920_p9 }
  0x23   : > { %5928 = shalt.err (!%p5925_p11)
}
  0x24   : > { %s5929_s18 = scalar_lea.vmem %s6386_s27, 16  ;;  %s5936_s20 = scalar_lea.vmem %s6386_s27, 32 }
  0x25   : > { %p5930_p12 = scmp.ne.s32.totalorder %s6386_s27, %s5929_s18  ;;  %p5937_p1 = scmp.lt.s32.totalorder %s6386_s27, %s6386_s27 }
  0x26   : > { %p5938_p4 = scmp.lt.s32.totalorder %s5936_s20, %s5929_s18 }
  0x27   : > { %p5932_p13 = pnand %p5930_p12, %p6414_p7 }
  0x28   : > { %p5939_p6 = por %p5938_p4, %p5937_p1 }
  0x29   : > { %p5933_p0 = pneg %p5932_p13 }
  0x2b   : > { %p5940_p8 = pnand %p5939_p6, %p5933_p0 }
  0x2d   : > { %5943 = shalt.err (!%p5940_p8)
}
  0x2e   : > { %5834 = dma.hbm_to_vmem [thread:$0]  (!%p6398_p5), %s7547_s2, 16, %s6386_s27, [#allocation9]  }
  0x2f   : > { %s7549_s4 = sld [smem:[#allocation34_spill]] }
  0x35   : > { %s5944_s30 = scalar_lea.hbm %s7549_s4, 512 }
  0x36   : > { %p5945_p9 = scmp.ne.s32.totalorder %s7549_s4, %s5944_s30  ;;  %p5951_p12 = scmp.lt.u32.totalorder %s5944_s30, %s7549_s4 }
  0x38   : > { %p5947_p10 = pnand %p5945_p9, %p6414_p7 }
  0x3a   : > { %p5948_p11 = pneg %p5947_p10 }
  0x3c   : > { %p5953_p13 = pnand %p5951_p12, %p5948_p11 }
  0x3e   : > { %5956 = shalt.err (!%p5953_p13)
}
  0x3f   : > { %s5957_s27 = scalar_lea.vmem %s6394_s14, 512  ;;  %p5965_p6 = scmp.lt.s32.totalorder %s6394_s14, %s6394_s14 }
  0x40   : > { %p5958_p0 = scmp.ne.s32.totalorder %s6394_s14, %s5957_s27  ;;  %p5966_p8 = scmp.lt.s32.totalorder %s5957_s27, %s5957_s27 }
  0x42   : > { %p5960_p1 = pnand %p5958_p0, %p6414_p7  ;;  %p5967_p9 = por %p5966_p8, %p5965_p6 }
  0x44   : > { %p5961_p4 = pneg %p5960_p1 }
  0x46   : > { %p5968_p10 = pnand %p5967_p9, %p5961_p4 }
  0x48   : > { %5971 = shalt.err (!%p5968_p10)
}
  0x49   : > { %s7537_s25 = smov 128   ;;  %s7539_s21 = smov 8  }
  0x4a   : > { %5840 = dma.hbm_to_vmem [thread:$0]  (!%p6398_p5), %s7549_s4, 512, %s6394_s14, [#allocation12], %s7537_s25, %s7537_s25, %s7539_s21  }
  0x4b   : > { %s7550_s6 = sld [smem:[#allocation35_spill]] }
  0x51   : > { %s5972_s16 = scalar_lea.hbm %s7550_s6, 16 }
  0x52   : > { %p5973_p11 = scmp.ne.s32.totalorder %s7550_s6, %s5972_s16  ;;  %p5979_p0 = scmp.lt.u32.totalorder %s5972_s16, %s7550_s6 }
  0x54   : > { %p5975_p12 = pnand %p5973_p11, %p6414_p7 }
  0x56   : > { %p5976_p13 = pneg %p5975_p12 }
  0x58   : > { %p5981_p1 = pnand %p5979_p0, %p5976_p13 }
  0x5a   : > { %5984 = shalt.err (!%p5981_p1)
}
  0x5b   : > { %s5985_s14 = scalar_lea.vmem %s6402_s17, 16  ;;  %s5992_s22 = scalar_lea.vmem %s6402_s17, 32 }
  0x5c   : > { %p5986_p4 = scmp.ne.s32.totalorder %s6402_s17, %s5985_s14  ;;  %p5993_p9 = scmp.lt.s32.totalorder %s6402_s17, %s6402_s17 }
  0x5d   : > { %p5994_p10 = scmp.lt.s32.totalorder %s5992_s22, %s5985_s14 }
  0x5e   : > { %p5988_p6 = pnand %p5986_p4, %p6414_p7 }
  0x5f   : > { %p5995_p11 = por %p5994_p10, %p5993_p9 }
  0x60   : > { %p5989_p8 = pneg %p5988_p6 }
  0x62   : > { %p5996_p12 = pnand %p5995_p11, %p5989_p8 }
  0x64   : > { %5999 = shalt.err (!%p5996_p12)
}
  0x65   : > { %5846 = dma.hbm_to_vmem [thread:$0]  (!%p6398_p5), %s7550_s6, 16, %s6402_s17, [#allocation15]  }
  0x66   : > { %s7551_s8 = sld [smem:[#allocation36_spill]] }
  0x6c   : > { %s6000_s16 = scalar_lea.hbm %s7551_s8, 16 }
  0x6d   : > { %p6001_p13 = scmp.ne.s32.totalorder %s7551_s8, %s6000_s16  ;;  %p6007_p4 = scmp.lt.u32.totalorder %s6000_s16, %s7551_s8 }
  0x6f   : > { %p6003_p0 = pnand %p6001_p13, %p6414_p7 }
  0x71   : > { %p6004_p1 = pneg %p6003_p0 }
  0x73   : > { %p6009_p6 = pnand %p6007_p4, %p6004_p1 }
  0x75   : > { %6012 = shalt.err (!%p6009_p6)
}
  0x76   : > { %s6013_s22 = scalar_lea.vmem %s436_s19, 16  ;;  %s6020_s17 = scalar_lea.vmem %s436_s19, 32 }
  0x77   : > { %p6014_p8 = scmp.ne.s32.totalorder %s436_s19, %s6013_s22  ;;  %p6021_p11 = scmp.lt.s32.totalorder %s436_s19, %s436_s19 }
  0x78   : > { %p6022_p12 = scmp.lt.s32.totalorder %s6020_s17, %s6013_s22 }
  0x79   : > { %p6016_p9 = pnand %p6014_p8, %p6414_p7 }
  0x7a   : > { %p6023_p2 = por %p6022_p12, %p6021_p11 }
  0x7b   : > { %p6017_p10 = pneg %p6016_p9 }
  0x7d   : > { %p6024_p3 = pnand %p6023_p2, %p6017_p10 }
  0x7f   : > { %6027 = shalt.err (!%p6024_p3)
}
  0x80   : > { %5852 = dma.hbm_to_vmem [thread:$0]  (!%p6398_p5), %s7551_s8, 16, %s436_s19, [#allocation18]  }
  0x81   : > { %s6294_s24 = smov [#allocation20]   ;;  %s6295_s16 = smov [#allocation6]  }
  0x82   : > { %s456_s30 = sshll.u32 %s6294_s24, 4  ;;  %s351_s18 = sshll.u32 %s6295_s16, 4  ;;  %s457_s30 = int_to_ptr.vmem [resolvable:$true] %s456_s30  ;;  %s352_s18 = int_to_ptr.vmem [resolvable:$true] %s351_s18 }
  0x83   : > { %s6028_s14 = scalar_lea.hbm %s7530_s10, 2048 }
  0x84   : > { %p6029_p2 = scmp.ne.s32.totalorder %s7530_s10, %s6028_s14  ;;  %p6035_p0 = scmp.lt.u32.totalorder %s6028_s14, %s7530_s10 }
  0x86   : > { %p6031_p3 = pnand %p6029_p2, %p6414_p7 }
  0x88   : > { %p6032_p13 = pneg %p6031_p3 }
  0x8a   : > { %p6037_p1 = pnand %p6035_p0, %p6032_p13 }
  0x8c   : > { %6040 = shalt.err (!%p6037_p1)
}
  0x8d   : > { %s6041_s19 = scalar_lea.vmem %s457_s30, 2048  ;;  %p6049_p9 = scmp.lt.s32.totalorder %s457_s30, %s457_s30 }
  0x8e   : > { %p6042_p4 = scmp.ne.s32.totalorder %s457_s30, %s6041_s19  ;;  %p6050_p10 = scmp.lt.s32.totalorder %s6041_s19, %s6041_s19 }
  0x90   : > { %p6044_p6 = pnand %p6042_p4, %p6414_p7  ;;  %p6051_p11 = por %p6050_p10, %p6049_p9 }
  0x92   : > { %p6045_p8 = pneg %p6044_p6 }
  0x94   : > { %p6052_p12 = pnand %p6051_p11, %p6045_p8 }
  0x96   : > { %6055 = shalt.err (!%p6052_p12)
}
  0x97   : > { %s7552_s23 = smov 128   ;;  %s6056_s27 = scalar_lea.hbm %s7521_s1, 64 }
  0x98   : > { %5858 = dma.hbm_to_vmem [thread:$0]  (!%p6398_p5), %s7530_s10, 2048, %s457_s30, [#allocation21], %s7552_s23, %s7552_s23, %s7539_s21  }
  0x99   : > { %p6057_p2 = scmp.ne.s32.totalorder %s7521_s1, %s6056_s27  ;;  %p6063_p0 = scmp.lt.u32.totalorder %s6056_s27, %s7521_s1 }
  0x9b   : > { %p6059_p3 = pnand %p6057_p2, %p6414_p7 }
  0x9d   : > { %p6060_p13 = pneg %p6059_p3 }
  0x9f   : > { %p6065_p1 = pnand %p6063_p0, %p6060_p13 }
  0xa1   : > { %6068 = shalt.err (!%p6065_p1)
}
  0xa2   : > { %s6069_s19 = scalar_lea.vmem %s352_s18, 64  ;;  %p6077_p9 = scmp.lt.s32.totalorder %s352_s18, %s352_s18 }
  0xa3   : > { %p6070_p4 = scmp.ne.s32.totalorder %s352_s18, %s6069_s19  ;;  %p6078_p10 = scmp.lt.s32.totalorder %s6069_s19, %s6069_s19 }
  0xa5   : > { %p6072_p6 = pnand %p6070_p4, %p6414_p7  ;;  %p6079_p11 = por %p6078_p10, %p6077_p9 }
  0xa7   : > { %p6073_p8 = pneg %p6072_p6 }
  0xa9   : > { %p6080_p12 = pnand %p6079_p11, %p6073_p8 }
  0xab   : > { %6083 = shalt.err (!%p6080_p12)
}
  0xac   : > { %s6296_s30 = smov 16   ;;  %s6297_s25 = smov 1  }
  0xad   : > { %5831 = dma.hbm_to_vmem [thread:$0]  (!%p6398_p5), %s7521_s1, 64, %s352_s18, [#allocation7], %s6296_s30, %s6296_s30, %s6297_s25  }
  0xae   : > { %s6298_s20 = smov [#allocation10]   ;;  %s6299_s14 = smov [#allocation13]  }
  0xaf   : > { %s376_s27 = sshll.u32 %s6298_s20, 4  ;;  %s400_s22 = sshll.u32 %s6299_s14, 4  ;;  %s377_s27 = int_to_ptr.vmem [resolvable:$true] %s376_s27  ;;  %s401_s22 = int_to_ptr.vmem [resolvable:$true] %s400_s22 }
  0xb0   : > { %s6084_s19 = scalar_lea.hbm %s7523_s3, 16 }
  0xb1   : > { %p6085_p2 = scmp.ne.s32.totalorder %s7523_s3, %s6084_s19  ;;  %p6091_p0 = scmp.lt.u32.totalorder %s6084_s19, %s7523_s3 }
  0xb3   : > { %p6087_p3 = pnand %p6085_p2, %p6414_p7 }
  0xb5   : > { %p6088_p13 = pneg %p6087_p3 }
  0xb7   : > { %p6093_p1 = pnand %p6091_p0, %p6088_p13 }
  0xb9   : > { %6096 = shalt.err (!%p6093_p1)
}
  0xba   : > { %s6097_s18 = scalar_lea.vmem %s377_s27, 16  ;;  %s6104_s30 = scalar_lea.vmem %s377_s27, 32 }
  0xbb   : > { %p6098_p4 = scmp.ne.s32.totalorder %s377_s27, %s6097_s18  ;;  %p6105_p9 = scmp.lt.s32.totalorder %s377_s27, %s377_s27 }
  0xbc   : > { %p6106_p10 = scmp.lt.s32.totalorder %s6104_s30, %s6097_s18 }
  0xbd   : > { %p6100_p6 = pnand %p6098_p4, %p6414_p7 }
  0xbe   : > { %p6107_p11 = por %p6106_p10, %p6105_p9 }
  0xbf   : > { %p6101_p8 = pneg %p6100_p6 }
  0xc1   : > { %p6108_p12 = pnand %p6107_p11, %p6101_p8 }
  0xc3   : > { %6111 = shalt.err (!%p6108_p12)
}
  0xc4   : > { %5837 = dma.hbm_to_vmem [thread:$0]  (!%p6398_p5), %s7523_s3, 16, %s377_s27, [#allocation9]  }
  0xc5   : > { %s6112_s25 = scalar_lea.hbm %s7525_s5, 16 }
  0xc6   : > { %p6113_p2 = scmp.ne.s32.totalorder %s7525_s5, %s6112_s25  ;;  %p6119_p0 = scmp.lt.u32.totalorder %s6112_s25, %s7525_s5 }
  0xc8   : > { %p6115_p3 = pnand %p6113_p2, %p6414_p7 }
  0xca   : > { %p6116_p13 = pneg %p6115_p3 }
  0xcc   : > { %p6121_p1 = pnand %p6119_p0, %p6116_p13 }
  0xce   : > { %6124 = shalt.err (!%p6121_p1)
}
  0xcf   : > { %s6125_s17 = scalar_lea.vmem %s401_s22, 16  ;;  %s6132_s27 = scalar_lea.vmem %s401_s22, 32 }
  0xd0   : > { %p6126_p4 = scmp.ne.s32.totalorder %s401_s22, %s6125_s17  ;;  %p6133_p9 = scmp.lt.s32.totalorder %s401_s22, %s401_s22 }
  0xd1   : > { %p6134_p10 = scmp.lt.s32.totalorder %s6132_s27, %s6125_s17 }
  0xd2   : > { %p6128_p6 = pnand %p6126_p4, %p6414_p7 }
  0xd3   : > { %p6135_p11 = por %p6134_p10, %p6133_p9 }
  0xd4   : > { %p6129_p8 = pneg %p6128_p6 }
  0xd6   : > { %p6136_p12 = pnand %p6135_p11, %p6129_p8 }
  0xd8   : > { %6139 = shalt.err (!%p6136_p12)
}
  0xd9   : > { %5843 = dma.hbm_to_vmem [thread:$0]  (!%p6398_p5), %s7525_s5, 16, %s401_s22, [#allocation12]  }
  0xda   : > { %s6300_s18 = smov [#allocation16]   ;;  %s6301_s4 = smov [#allocation19]  }
  0xdb   : > { %s421_s30 = sshll.u32 %s6300_s18, 4  ;;  %s446_s21 = sshll.u32 %s6301_s4, 4  ;;  %s422_s30 = int_to_ptr.vmem [resolvable:$true] %s421_s30  ;;  %s447_s21 = int_to_ptr.vmem [resolvable:$true] %s446_s21 }
  0xdc   : > { %s6140_s25 = scalar_lea.hbm %s7527_s7, 1024 }
  0xdd   : > { %p6141_p2 = scmp.ne.s32.totalorder %s7527_s7, %s6140_s25  ;;  %p6147_p0 = scmp.lt.u32.totalorder %s6140_s25, %s7527_s7 }
  0xdf   : > { %p6143_p3 = pnand %p6141_p2, %p6414_p7 }
  0xe1   : > { %p6144_p13 = pneg %p6143_p3 }
  0xe3   : > { %p6149_p1 = pnand %p6147_p0, %p6144_p13 }
  0xe5   : > { %6152 = shalt.err (!%p6149_p1)
}
  0xe6   : > { %s6153_s22 = scalar_lea.vmem %s422_s30, 1024  ;;  %p6161_p9 = scmp.lt.s32.totalorder %s422_s30, %s422_s30 }
  0xe7   : > { %p6154_p4 = scmp.ne.s32.totalorder %s422_s30, %s6153_s22  ;;  %p6162_p10 = scmp.lt.s32.totalorder %s6153_s22, %s6153_s22 }
  0xe9   : > { %p6156_p6 = pnand %p6154_p4, %p6414_p7  ;;  %p6163_p11 = por %p6162_p10, %p6161_p9 }
  0xeb   : > { %p6157_p8 = pneg %p6156_p6 }
  0xed   : > { %p6164_p12 = pnand %p6163_p11, %p6157_p8 }
  0xef   : > { %6167 = shalt.err (!%p6164_p12)
}
  0xf0   : > { %s7553_s17 = smov 8   ;;  %s6168_s4 = scalar_lea.hbm %s7529_s9, 16 }
  0xf1   : > { %5849 = dma.hbm_to_vmem [thread:$0]  (!%p6398_p5), %s7527_s7, 1024, %s422_s30, [#allocation15], %s7552_s23, %s7552_s23, %s7553_s17  }
  0xf2   : > { %p6169_p2 = scmp.ne.s32.totalorder %s7529_s9, %s6168_s4  ;;  %p6175_p0 = scmp.lt.u32.totalorder %s6168_s4, %s7529_s9 }
  0xf4   : > { %p6171_p3 = pnand %p6169_p2, %p6414_p7 }
  0xf6   : > { %p6172_p13 = pneg %p6171_p3 }
  0xf8   : > { %p6177_p1 = pnand %p6175_p0, %p6172_p13 }
  0xfa   : > { %6180 = shalt.err (!%p6177_p1)
}
  0xfb   : > { %s6181_s16 = scalar_lea.vmem %s447_s21, 16  ;;  %s6188_s23 = scalar_lea.vmem %s447_s21, 32 }
  0xfc   : > { %p6182_p4 = scmp.ne.s32.totalorder %s447_s21, %s6181_s16  ;;  %p6189_p9 = scmp.lt.s32.totalorder %s447_s21, %s447_s21 }
  0xfd   : > { %p6190_p10 = scmp.lt.s32.totalorder %s6188_s23, %s6181_s16 }
  0xfe   : > { %p6184_p6 = pnand %p6182_p4, %p6414_p7 }
  0xff   : > { %p6191_p11 = por %p6190_p10, %p6189_p9 }
 0x100   : > { %p6185_p8 = pneg %p6184_p6 }
 0x102   : > { %p6192_p12 = pnand %p6191_p11, %p6185_p8 }
 0x104   : > { %6195 = shalt.err (!%p6192_p12)
}
 0x105   : > { %5855 = dma.hbm_to_vmem [thread:$0]  (!%p6398_p5), %s7529_s9, 16, %s447_s21, [#allocation18]  }
 0x106   : > { %s6302_s14 = smov [#allocation22]   ;;  %s6303_s17 = smov [#allocation23]  }
 0x107   : > { %s470_s22 = sshll.u32 %s6302_s14, 4  ;;  %s481_s27 = sshll.u32 %s6303_s17, 4  ;;  %s471_s22 = int_to_ptr.vmem [resolvable:$true] %s470_s22  ;;  %s482_s27 = int_to_ptr.vmem [resolvable:$true] %s481_s27 }
 0x108   : > { %s6196_s18 = scalar_lea.hbm %s7531_s11, 16 }
 0x109   : > { %p6197_p2 = scmp.ne.s32.totalorder %s7531_s11, %s6196_s18  ;;  %p6203_p0 = scmp.lt.u32.totalorder %s6196_s18, %s7531_s11 }
 0x10b   : > { %p6199_p3 = pnand %p6197_p2, %p6414_p7 }
 0x10d   : > { %p6200_p13 = pneg %p6199_p3 }
 0x10f   : > { %p6205_p1 = pnand %p6203_p0, %p6200_p13 }
 0x111   : > { %6208 = shalt.err (!%p6205_p1)
}
 0x112   : > { %s6209_s21 = scalar_lea.vmem %s471_s22, 16  ;;  %s6216_s24 = scalar_lea.vmem %s471_s22, 32 }
 0x113   : > { %p6210_p4 = scmp.ne.s32.totalorder %s471_s22, %s6209_s21  ;;  %p6217_p9 = scmp.lt.s32.totalorder %s471_s22, %s471_s22 }
 0x114   : > { %p6218_p10 = scmp.lt.s32.totalorder %s6216_s24, %s6209_s21 }
 0x115   : > { %p6212_p6 = pnand %p6210_p4, %p6414_p7 }
 0x116   : > { %p6219_p11 = por %p6218_p10, %p6217_p9 }
 0x117   : > { %p6213_p8 = pneg %p6212_p6 }
 0x119   : > { %p6220_p12 = pnand %p6219_p11, %p6213_p8 }
 0x11b   : > { %6223 = shalt.err (!%p6220_p12)
}
 0x11c   : > { %5861 = dma.hbm_to_vmem [thread:$0]  (!%p6398_p5), %s7531_s11, 16, %s471_s22, [#allocation21]  }
 0x11d   : > { %s6224_s14 = scalar_lea.hbm %s7532_s12, 16 }
 0x11e   : > { %p6225_p2 = scmp.ne.s32.totalorder %s7532_s12, %s6224_s14  ;;  %p6231_p0 = scmp.lt.u32.totalorder %s6224_s14, %s7532_s12 }
 0x120   : > { %p6227_p3 = pnand %p6225_p2, %p6414_p7 }
 0x122   : > { %p6228_p13 = pneg %p6227_p3 }
 0x124   : > { %p6233_p1 = pnand %p6231_p0, %p6228_p13 }
 0x126   : > { %6236 = shalt.err (!%p6233_p1)
}
 0x127   : > { %s6237_s4 = scalar_lea.vmem %s482_s27, 16  ;;  %s6244_s22 = scalar_lea.vmem %s482_s27, 32 }
 0x128   : > { %p6238_p4 = scmp.ne.s32.totalorder %s482_s27, %s6237_s4  ;;  %p6245_p9 = scmp.lt.s32.totalorder %s482_s27, %s482_s27 }
 0x129   : > { %p6246_p10 = scmp.lt.s32.totalorder %s6244_s22, %s6237_s4 }
 0x12a   : > { %p6240_p6 = pnand %p6238_p4, %p6414_p7 }
 0x12b   : > { %p6247_p11 = por %p6246_p10, %p6245_p9 }
 0x12c   : > { %p6241_p8 = pneg %p6240_p6 }
 0x12e   : > { %p6248_p12 = pnand %p6247_p11, %p6241_p8 }
 0x130   : > { %6251 = shalt.err (!%p6248_p12)
}
 0x131   : > { %5864 = dma.hbm_to_vmem [thread:$0]  (!%p6398_p5), %s7532_s12, 16, %s482_s27, [#allocation24]  }
 0x132   : > { %p7554_p2 = scmp.ne.s32.totalorder %s7545_s29, 0 }
 0x133   : > { %p7555_p3 = scmp.eq.s32.totalorder (!%p7554_p2), %s6381_s28, 0 }
 0x134   : > { %502 = sbr.rel (%p7554_p2) target bundleno = 1616 (0x650), region = 72 }
 0x13b   : > { %6257 = dma.done.wait (%p7555_p3), [#allocation7], 64   ;;  %p7556_p7 = pmov %p7555_p3 }
 0x13c   : > { %p7557_p13 = pmov %p7555_p3 }
 0x13d   : > { %6259 = vsyncadd (%p7556_p7), [#allocation7], 4294967232 }
 0x13e   : > { %6261 = dma.done.wait (%p7557_p13), [#allocation9], 32   ;;  %p7558_p0 = pmov %p7555_p3 }
 0x140   : > { %6263 = vsyncadd (%p7558_p0), [#allocation9], 4294967264  ;;  %p7559_p1 = pmov %p7558_p0 }
 0x141   : > { %p7560_p5 = pmov %p7558_p0 }
 0x142   : > { %6265 = dma.done.wait (%p7559_p1), [#allocation12], 528  }
 0x143   : > { %6267 = vsyncadd (%p7560_p5), [#allocation12], 4294966768  ;;  %p7561_p4 = pmov %p7558_p0 }
 0x144   : > { %p7562_p6 = pmov %p7558_p0 }
 0x145   : > { %6269 = dma.done.wait (%p7561_p4), [#allocation15], 1040  }
 0x146   : > { %6271 = vsyncadd (%p7562_p6), [#allocation15], 4294966256  ;;  %p7563_p8 = pmov %p7558_p0 }
 0x147   : > { %p7564_p9 = pmov %p7558_p0 }
 0x148   : > { %6273 = dma.done.wait (%p7563_p8), [#allocation18], 32  }
 0x149   : > { %6275 = vsyncadd (%p7564_p9), [#allocation18], 4294967264  ;;  %p7565_p10 = pmov %p7558_p0 }
 0x14a   : > { %p7566_p11 = pmov %p7558_p0 }
 0x14b   : > { %6277 = dma.done.wait (%p7565_p10), [#allocation21], 2064  }
 0x14c   : > { %6279 = vsyncadd (%p7566_p11), [#allocation21], 4294965232  ;;  %p7567_p12 = pmov %p7558_p0 }
 0x14d   : > { %p7568_p2 = pmov %p7558_p0 }
 0x14e   : > { %6281 = dma.done.wait (%p7567_p12), [#allocation24], 16  }
 0x14f   : > { %6283 = vsyncadd (%p7568_p2), [#allocation24], 4294967280  ;;  %p590_p3 = scmp.lt.s32.totalorder %s6381_s28, 1  ;;  %v6304_v0 = vmov 0   ;;  %v1460_v15 = vld [vmem:[#allocation11 + $0x8] sm:$0xff]  ;;  %vm1393_vm0 = vcmask 64512  }
 0x150   : > { %5915 = vset.pattern.permute.xlu1 %v6304_v0  ;;  %5914 = vset.pattern.permute.xlu0 %v6304_v0  ;;  %v6733_v46 = vld [vmem:[#allocation6 + $0x1] ss:$0 sm:$0xff]  ;;  %v6735_v47 = vld [vmem:[#allocation6] ss:$0 sm:$0xff]  ;;  %v6737_v50 = vld [vmem:[#allocation6 + $0x2] ss:$0 sm:$0xff] }
 0x151   : > { %s7571_s28 = smov (!%p590_p3, %s6381_s28), 1  ;;  %5187 = vmatprep.subr.mxu0 %v1460_v15  ;;  %v6746_v60 = vld [vmem:[#allocation6 + $0x3] ss:$0 sm:$0xff]  ;;  %vm2497_vm1 = vcmask 130048   ;;  %vm3523_vm2 = vcmask 261120   ;;  %vm4475_vm3 = vcmask 523264  }
 0x152   : > { %s5779_s29 = smul.u32 200, %s7571_s28  ;;  %5188 = vmatpush3.msra.mxu0 %v1460_v15  ;;  %s4942_s25 = sshll.u32 %s7571_s28, 6 }
 0x153   : > { %s7493_s16 = scalar_lea.vmem %s7533_s13, %s4942_s25 }
 0x154   : > { %s6693_s27 = scalar_lea.vmem %s7520_s0, %s5779_s29 }
 0x155   : > { %v785_v1 = vld [vmem:[%s6693_s27 + $0x1] sm:$0xff]  ;;  %v786_v3 = vld [vmem:[%s6693_s27 + $0x9] sm:$0xff]  ;;  %v787_v5 = vld [vmem:[%s6693_s27 + $0x11] sm:$0xff] }
 0x156   : > { %v602_v2 = vld [vmem:[%s6693_s27] sm:$0xff]  ;;  %811 = vperm.xlu1 %5915, %v785_v1   ;;  %v603_v4 = vld [vmem:[%s6693_s27 + $0x8] sm:$0xff]  ;;  %v604_v6 = vld [vmem:[%s6693_s27 + $0x10] sm:$0xff] }
 0x157   : > { %627 = vperm.xlu0 %5914, %v602_v2   ;;  %v970_v7 = vld [vmem:[%s6693_s27 + $0x18] sm:$0xff]  ;;  %v971_v8 = vld [vmem:[%s6693_s27 + $0x20] sm:$0xff]  ;;  %v973_v11 = vld [vmem:[%s6693_s27 + $0x30] sm:$0xff] }
 0x158   : > { %v788_v9 = vld [vmem:[%s6693_s27 + $0x19] sm:$0xff]  ;;  %v1155_v10 = vld [vmem:[%s6693_s27 + $0x21] sm:$0xff]  ;;  %v790_v13 = vld [vmem:[%s6693_s27 + $0x29] sm:$0xff] }
 0x159   : > { %v972_v12 = vld [vmem:[%s6693_s27 + $0x28] sm:$0xff]  ;;  %v1157_v14 = vld [vmem:[%s6693_s27 + $0x31] sm:$0xff]  ;;  %v975_v16 = vld [vmem:[%s6693_s27 + $0x40] sm:$0xff] }
 0x15a   : > { %816 = vperm.xlu1 %5915, %v786_v3   ;;  %v974_v17 = vld [vmem:[%s6693_s27 + $0x38] sm:$0xff]  ;;  %v1159_v19 = vld [vmem:[%s6693_s27 + $0x41] sm:$0xff]  ;;  %v977_v20 = vld [vmem:[%s6693_s27 + $0x50] sm:$0xff] }
 0x15b   : > { %632 = vperm.xlu0 %5914, %v603_v4   ;;  %v792_v18 = vld [vmem:[%s6693_s27 + $0x39] sm:$0xff]  ;;  %v976_v21 = vld [vmem:[%s6693_s27 + $0x48] sm:$0xff]  ;;  %v1161_v23 = vld [vmem:[%s6693_s27 + $0x51] sm:$0xff] }
 0x15c   : > { %v794_v22 = vld [vmem:[%s6693_s27 + $0x49] sm:$0xff]  ;;  %v979_v24 = vld [vmem:[%s6693_s27 + $0x60] sm:$0xff]  ;;  %v978_v25 = vld [vmem:[%s6693_s27 + $0x58] sm:$0xff] }
 0x15d   : > { %v796_v26 = vld [vmem:[%s6693_s27 + $0x59] sm:$0xff]  ;;  %v1163_v27 = vld [vmem:[%s6693_s27 + $0x61] sm:$0xff]  ;;  %v981_v28 = vld [vmem:[%s6693_s27 + $0x70] sm:$0xff] }
 0x15e   : > { %821 = vperm.xlu1 %5915, %v787_v5   ;;  %v980_v29 = vld [vmem:[%s6693_s27 + $0x68] sm:$0xff]  ;;  %v1165_v31 = vld [vmem:[%s6693_s27 + $0x71] sm:$0xff]  ;;  %v983_v32 = vld [vmem:[%s6693_s27 + $0x80] sm:$0xff] }
 0x15f   : > { %637 = vperm.xlu0 %5914, %v604_v6   ;;  %v798_v30 = vld [vmem:[%s6693_s27 + $0x69] sm:$0xff]  ;;  %v982_v33 = vld [vmem:[%s6693_s27 + $0x78] sm:$0xff]  ;;  %v1167_v35 = vld [vmem:[%s6693_s27 + $0x81] sm:$0xff] }
 0x160   : > { %v800_v34 = vld [vmem:[%s6693_s27 + $0x79] sm:$0xff]  ;;  %v985_v36 = vld [vmem:[%s6693_s27 + $0x90] sm:$0xff]  ;;  %v984_v37 = vld [vmem:[%s6693_s27 + $0x88] sm:$0xff] }
 0x161   : > { %v802_v40 = vld [vmem:[%s6693_s27 + $0x89] sm:$0xff]  ;;  %v1169_v45 = vld [vmem:[%s6693_s27 + $0x91] sm:$0xff]  ;;  %v987_v51 = vld [vmem:[%s6693_s27 + $0xa0] sm:$0xff] }
 0x162   : > { %1000 = vperm.xlu1 %5915, %v970_v7   ;;  %v986_v52 = vld [vmem:[%s6693_s27 + $0x98] sm:$0xff]  ;;  %v6751_v4 = vld [vmem:[#allocation11] sm:$0xff] }
 0x163   : > { %995 = vperm.xlu0 %5914, %v604_v6   ;;  %v804_v61 = vld [vmem:[%s6693_s27 + $0x99] sm:$0xff]  ;;  %v6753_v6 = vld [vmem:[#allocation8] ss:$0 sm:$0xff]  ;;  %5219 = vmatprep.subr.mxu0 %v6751_v4 }
 0x166   : > { %642 = vperm.xlu1 %5915, %v970_v7  }
 0x167   : > { %1005 = vperm.xlu0 %5914, %v971_v8  }
 0x16a   : > { %1179 = vperm.xlu1 %5915, %v787_v5  }
 0x16b   : > { %826 = vperm.xlu0 %5914, %v788_v9  }
 0x16e   : > { %647 = vperm.xlu1 %5915, %v971_v8  }
 0x16f   : > { %1184 = vperm.xlu0 %5914, %v788_v9  }
 0x172   : > { %1189 = vperm.xlu1 %5915, %v1155_v10  }
 0x173   : > { %831 = vperm.xlu0 %5914, %v1155_v10  }
 0x176   : > { %1015 = vperm.xlu1 %5915, %v973_v11  }
 0x177   : > { %1010 = vperm.xlu0 %5914, %v972_v12  }
 0x17a   : > { %836 = vperm.xlu1 %5915, %v790_v13  }
 0x17b   : > { %652 = vperm.xlu0 %5914, %v972_v12  }
 0x17e   : > { %657 = vperm.xlu1 %5915, %v973_v11   ;;  %v6758_v11 = vld [vmem:[#allocation10] ss:$0 sm:$0xff] }
 0x17f   : > { %1194 = vperm.xlu0 %5914, %v790_v13  }
 0x182   : > { %1199 = vperm.xlu1 %5915, %v1157_v14  }
 0x183   : > { %841 = vperm.xlu0 %5914, %v1157_v14  }
 0x186   : > { %1025 = vperm.xlu1 %5915, %v975_v16  }
 0x187   : > { %1020 = vperm.xlu0 %5914, %v974_v17  }
 0x18a   : > { %846 = vperm.xlu1 %5915, %v792_v18  }
 0x18b   : > { %662 = vperm.xlu0 %5914, %v974_v17   ;;  %v1171_v17 = vld [vmem:[%s6693_s27 + $0xa1] sm:$0xff] }
 0x18e   : > { %667 = vperm.xlu1 %5915, %v975_v16  }
 0x18f   : > { %1204 = vperm.xlu0 %5914, %v792_v18  }
 0x192   : > { %1209 = vperm.xlu1 %5915, %v1159_v19  }
 0x193   : > { %851 = vperm.xlu0 %5914, %v1159_v19  }
 0x196   : > { %1035 = vperm.xlu1 %5915, %v977_v20  }
 0x197   : > { %1030 = vperm.xlu0 %5914, %v976_v21  }
 0x19a   : > { %856 = vperm.xlu1 %5915, %v794_v22  }
 0x19b   : > { %672 = vperm.xlu0 %5914, %v976_v21  }
 0x19e   : > { %677 = vperm.xlu1 %5915, %v977_v20  }
 0x19f   : > { %1214 = vperm.xlu0 %5914, %v794_v22  }
 0x1a2   : > { %1219 = vperm.xlu1 %5915, %v1161_v23  }
 0x1a3   : > { %861 = vperm.xlu0 %5914, %v1161_v23  }
 0x1a6   : > { %1045 = vperm.xlu1 %5915, %v979_v24  }
 0x1a7   : > { %1040 = vperm.xlu0 %5914, %v978_v25  }
 0x1aa   : > { %866 = vperm.xlu1 %5915, %v796_v26  }
 0x1ab   : > { %682 = vperm.xlu0 %5914, %v978_v25  }
 0x1ae   : > { %687 = vperm.xlu1 %5915, %v979_v24  }
 0x1af   : > { %1224 = vperm.xlu0 %5914, %v796_v26   ;;  %v989_v26 = vld [vmem:[%s6693_s27 + $0xb0] sm:$0xff] }
 0x1b2   : > { %1229 = vperm.xlu1 %5915, %v1163_v27  }
 0x1b3   : > { %871 = vperm.xlu0 %5914, %v1163_v27   ;;  %v988_v27 = vld [vmem:[%s6693_s27 + $0xa8] sm:$0xff] }
 0x1b6   : > { %1055 = vperm.xlu1 %5915, %v981_v28  }
 0x1b7   : > { %1050 = vperm.xlu0 %5914, %v980_v29  }
 0x1ba   : > { %876 = vperm.xlu1 %5915, %v798_v30  }
 0x1bb   : > { %692 = vperm.xlu0 %5914, %v980_v29  }
 0x1be   : > { %697 = vperm.xlu1 %5915, %v981_v28  }
 0x1bf   : > { %1234 = vperm.xlu0 %5914, %v798_v30  }
 0x1c2   : > { %1239 = vperm.xlu1 %5915, %v1165_v31  }
 0x1c3   : > { %881 = vperm.xlu0 %5914, %v1165_v31  }
 0x1c6   : > { %1065 = vperm.xlu1 %5915, %v983_v32  }
 0x1c7   : > { %1060 = vperm.xlu0 %5914, %v982_v33  }
 0x1ca   : > { %886 = vperm.xlu1 %5915, %v800_v34  }
 0x1cb   : > { %702 = vperm.xlu0 %5914, %v982_v33   ;;  %v1173_v33 = vld [vmem:[%s6693_s27 + $0xb1] sm:$0xff] }
 0x1ce   : > { %707 = vperm.xlu1 %5915, %v983_v32  }
 0x1cf   : > { %1244 = vperm.xlu0 %5914, %v800_v34   ;;  %v1172_v34 = vld [vmem:[%s6693_s27 + $0xa9] sm:$0xff] }
 0x1d2   : > { %1249 = vperm.xlu1 %5915, %v1167_v35  }
 0x1d3   : > { %891 = vperm.xlu0 %5914, %v1167_v35  }
 0x1d5   : > { %v812_v38 = vpop.permute.xlu1 %811 }
 0x1d6   : > { %v628_v39 = vpop.permute.xlu0 %627  ;;  %1075 = vperm.xlu1 %5915, %v985_v36   ;;  %v925_v53 = vmul.f32 %v6733_v46, %v812_v38 }
 0x1d7   : > { %1070 = vperm.xlu0 %5914, %v984_v37   ;;  %v741_v54 = vmul.f32 %v6735_v47, %v628_v39 }
 0x1d9   : > { %v817_v41 = vpop.permute.xlu1 %816  ;;  %v947_v62 = vadd.f32 %v925_v53, %v741_v54  ;;  %v1174_v53 = vld [vmem:[%s6693_s27 + $0xb9] sm:$0xff] }
 0x1da   : > { %v633_v42 = vpop.permute.xlu0 %632  ;;  %896 = vperm.xlu1 %5915, %v802_v40   ;;  %v926_v58 = vmul.f32 %v6733_v46, %v817_v41  ;;  %v990_v54 = vld [vmem:[%s6693_s27 + $0xb8] sm:$0xff] }
 0x1db   : > { %712 = vperm.xlu0 %5914, %v984_v37   ;;  %v742_v59 = vmul.f32 %v6735_v47, %v633_v42 }
 0x1dd   : > { %v822_v43 = vpop.permute.xlu1 %821  ;;  %v948_v5 = vadd.f32 %v926_v58, %v742_v59 }
 0x1de   : > { %v638_v44 = vpop.permute.xlu0 %637  ;;  %717 = vperm.xlu1 %5915, %v985_v36   ;;  %v927_v7 = vmul.f32 %v6733_v46, %v822_v43 }
 0x1df   : > { %1254 = vperm.xlu0 %5914, %v802_v40   ;;  %v743_v8 = vmul.f32 %v6735_v47, %v638_v44 }
 0x1e1   : > { %v1001_v48 = vpop.permute.xlu1 %1000  ;;  %v949_v18 = vadd.f32 %v927_v7, %v743_v8 }
 0x1e2   : > { %v996_v49 = vpop.permute.xlu0 %995  ;;  %1259 = vperm.xlu1 %5915, %v1169_v45   ;;  %v1110_v63 = vmul.f32 %v6737_v50, %v1001_v48 }
 0x1e3   : > { %901 = vperm.xlu0 %5914, %v1169_v45   ;;  %v1109_v57 = vmul.f32 %v6737_v50, %v996_v49 }
 0x1e4   : > { %v1132_v10 = vadd.f32 %v1110_v63, %v948_v5 }
 0x1e5   : > { %v643_v55 = vpop.permute.xlu1 %642  ;;  %v1131_v2 = vadd.f32 %v1109_v57, %v947_v62 }
 0x1e6   : > { %v1006_v56 = vpop.permute.xlu0 %1005  ;;  %1085 = vperm.xlu1 %5915, %v987_v51   ;;  %v744_v39 = vmul.f32 %v6735_v47, %v643_v55 }
 0x1e7   : > { %1080 = vperm.xlu0 %5914, %v986_v52   ;;  %v1111_v14 = vmul.f32 %v6737_v50, %v1006_v56 }
 0x1e9   : > { %v1180_v0 = vpop.permute.xlu1 %1179  ;;  %v1133_v23 = vadd.f32 %v1111_v14, %v949_v18 }
 0x1ea   : > { %v827_v1 = vpop.permute.xlu0 %826  ;;  %v1293_v3 = vmul.f32 %v6746_v60, %v1180_v0  ;;  %906 = vperm.xlu1 %5915, %v804_v61  }
 0x1eb   : > { %722 = vperm.xlu0 %5914, %v986_v52   ;;  %v928_v35 = vmul.f32 %v6733_v46, %v827_v1 }
 0x1ec   : > { %v1315_v9 = vadd.f32 %v1293_v3, %v1131_v2 }
 0x1ed   : > { %v648_v12 = vpop.permute.xlu1 %647  ;;  %v950_v41 = vadd.f32 %v928_v35, %v744_v39 }
 0x1ee   : > { %v1185_v13 = vpop.permute.xlu0 %1184  ;;  %v1343_v15 = vmul.f32 %v6753_v6, %v1315_v9  ;;  %727 = vperm.xlu1 %5915, %v987_v51   ;;  %v745_v43 = vmul.f32 %v6735_v47, %v648_v12 }
 0x1ef   : > { %v1294_v16 = vmul.f32 %v6746_v60, %v1185_v13  ;;  %1264 = vperm.xlu0 %5914, %v804_v61  }
 0x1f0   : > { %v1371_v19 = vadd.f32 %v6758_v11, %v1343_v15  ;;  %v6800_v15 = vld [vmem:[#allocation11 + $0x10] sm:$0xff] }
 0x1f1   : > { %v1316_v20 = vadd.f32 %v1294_v16, %v1132_v10  ;;  %v1190_v21 = vpop.permute.xlu1 %1189 }
 0x1f2   : > { %v832_v22 = vpop.permute.xlu0 %831  ;;  %1394 = vst.msk [vmem:[#allocation2] sm:$0xff] %vm1393_vm0, %v1371_v19  ;;  %v1295_v25 = vmul.f32 %v6746_v60, %v1190_v21  ;;  %1269 = vperm.xlu1 %5915, %v1171_v17  }
 0x1f3   : > { %v1344_v24 = vmul.f32 %v6753_v6, %v1316_v20  ;;  %911 = vperm.xlu0 %5914, %v1171_v17   ;;  %v929_v42 = vmul.f32 %v6733_v46, %v832_v22 }
 0x1f4   : > { %v1317_v29 = vadd.f32 %v1295_v25, %v1133_v23 }
 0x1f5   : > { %v1372_v28 = vadd.f32 %v6758_v11, %v1344_v24  ;;  %v1016_v30 = vpop.permute.xlu1 %1015  ;;  %v951_v55 = vadd.f32 %v929_v42, %v745_v43 }
 0x1f6   : > { %v1011_v31 = vpop.permute.xlu0 %1010  ;;  %v1345_v32 = vmul.f32 %v6753_v6, %v1317_v29  ;;  %1095 = vperm.xlu1 %5915, %v989_v26   ;;  %v1113_v49 = vmul.f32 %v6737_v50, %v1016_v30 }
 0x1f7   : > { %1395 = vst.msk [vmem:[#allocation2 + $0x8] sm:$0xff] %vm1393_vm0, %v1372_v28  ;;  %1090 = vperm.xlu0 %5914, %v988_v27   ;;  %v1112_v40 = vmul.f32 %v6737_v50, %v1011_v31 }
 0x1f8   : > { %v1373_v36 = vadd.f32 %v6758_v11, %v1345_v32  ;;  %v1135_v61 = vadd.f32 %v1113_v49, %v951_v55 }
 0x1f9   : > { %v837_v37 = vpop.permute.xlu1 %836  ;;  %v1134_v51 = vadd.f32 %v1112_v40, %v950_v41 }
 0x1fa   : > { %v653_v38 = vpop.permute.xlu0 %652  ;;  %1396 = vst.msk [vmem:[#allocation2 + $0x10] sm:$0xff] %vm1393_vm0, %v1373_v36  ;;  %1279 = vperm.xlu1 %5915, %v1173_v33   ;;  %v930_v7 = vmul.f32 %v6733_v46, %v837_v37 }
 0x1fb   : > { %1274 = vperm.xlu0 %5914, %v1172_v34   ;;  %v746_v8 = vmul.f32 %v6735_v47, %v653_v38 }
 0x1fd   : > { %v658_v44 = vpop.permute.xlu1 %657  ;;  %v952_v14 = vadd.f32 %v930_v7, %v746_v8 }
 0x1fe   : > { %v1195_v45 = vpop.permute.xlu0 %1194  ;;  %v1439_v48 = vld [vmem:[#allocation2 + $0x1] sm:$0xff]  ;;  %916 = vperm.xlu1 %5915, %v1172_v34   ;;  %v747_v19 = vmul.f32 %v6735_v47, %v658_v44 }
 0x1ff   : > { %v1296_v52 = vmul.f32 %v6746_v60, %v1195_v45  ;;  %732 = vperm.xlu0 %5914, %v988_v27   ;;  %5189 = vmatprep.mubr.msk.f32.mxu0 %vm1393_vm0, %v1439_v48 }
 0x201   : > { %v1318_v56 = vadd.f32 %v1296_v52, %v1134_v51  ;;  %v1200_v57 = vpop.permute.xlu1 %1199  ;;  %v1440_v59 = vld [vmem:[#allocation2 + $0x9] sm:$0xff] }
 0x202   : > { %v842_v58 = vpop.permute.xlu0 %841  ;;  %v1297_v63 = vmul.f32 %v6746_v60, %v1200_v57  ;;  %1284 = vperm.xlu1 %5915, %v1174_v53   ;;  %5190 = vmatmul.mubr.msk.f32.vlgmr.msra.gmra.mrb[0].mxu0 %vm1393_vm0, %v1440_v59 }
 0x203   : > { %v1346_v62 = vmul.f32 %v6753_v6, %v1318_v56  ;;  %1100 = vperm.xlu0 %5914, %v990_v54   ;;  %5220 = vmatpush3.msra.mxu0 %v6751_v4  ;;  %v931_v4 = vmul.f32 %v6733_v46, %v842_v58 }
 0x204   : > { %v1319_v1 = vadd.f32 %v1297_v63, %v1135_v61  ;;  %5251 = vmatprep.subr.mxu0 %v6800_v15 }
 0x205   : > { %v1374_v0 = vadd.f32 %v6758_v11, %v1346_v62  ;;  %v1026_v2 = vpop.permute.xlu1 %1025  ;;  %v953_v23 = vadd.f32 %v931_v4, %v747_v19 }
 0x206   : > { %v1021_v3 = vpop.permute.xlu0 %1020  ;;  %v1347_v5 = vmul.f32 %v6753_v6, %v1319_v1  ;;  %v1115_v20 = vmul.f32 %v6737_v50, %v1026_v2 }
 0x207   : > { %1397 = vst.msk [vmem:[#allocation2 + $0x18] sm:$0xff] %vm1393_vm0, %v1374_v0  ;;  %v1114_v13 = vmul.f32 %v6737_v50, %v1021_v3 }
 0x208   : > { %v1375_v9 = vadd.f32 %v6758_v11, %v1347_v5  ;;  %v1137_v28 = vadd.f32 %v1115_v20, %v953_v23 }
 0x209   : > { %v847_v10 = vpop.permute.xlu1 %846  ;;  %v1136_v21 = vadd.f32 %v1114_v13, %v952_v14 }
 0x20a   : > { %v663_v12 = vpop.permute.xlu0 %662  ;;  %1398 = vst.msk [vmem:[#allocation2 + $0x20] sm:$0xff] %vm1393_vm0, %v1375_v9  ;;  %v932_v36 = vmul.f32 %v6733_v46, %v847_v10 }
 0x20b   : > { %v748_v37 = vmul.f32 %v6735_v47, %v663_v12 }
 0x20d   : > { %v668_v16 = vpop.permute.xlu1 %667  ;;  %v954_v42 = vadd.f32 %v932_v36, %v748_v37 }
 0x20e   : > { %v1205_v17 = vpop.permute.xlu0 %1204  ;;  %v6802_v18 = vld [vmem:[#allocation2 + $0x11] sm:$0xff]  ;;  %v749_v49 = vmul.f32 %v6735_v47, %v668_v16 }
 0x20f   : > { %v1298_v22 = vmul.f32 %v6746_v60, %v1205_v17  ;;  %5192 = vmatprep.mubr.msk.f32.mxu0 %vm1393_vm0, %v6802_v18 }
 0x211   : > { %v1320_v24 = vadd.f32 %v1298_v22, %v1136_v21  ;;  %v1210_v25 = vpop.permute.xlu1 %1209  ;;  %v6810_v27 = vld [vmem:[#allocation2 + $0x19] sm:$0xff] }
 0x212   : > { %v852_v26 = vpop.permute.xlu0 %851  ;;  %v1299_v30 = vmul.f32 %v6746_v60, %v1210_v25  ;;  %5193 = vmatmul.mubr.msk.f32.gmra.mrb[2].mxu0 %vm1393_vm0, %v6810_v27 }
 0x213   : > { %v1348_v29 = vmul.f32 %v6753_v6, %v1320_v24  ;;  %v933_v43 = vmul.f32 %v6733_v46, %v852_v26 }
 0x214   : > { %v1321_v32 = vadd.f32 %v1299_v30, %v1137_v28 }
 0x215   : > { %v1376_v31 = vadd.f32 %v6758_v11, %v1348_v29  ;;  %v1036_v33 = vpop.permute.xlu1 %1035  ;;  %v955_v54 = vadd.f32 %v933_v43, %v749_v49 }
 0x216   : > { %v1031_v34 = vpop.permute.xlu0 %1030  ;;  %v1349_v35 = vmul.f32 %v6753_v6, %v1321_v32  ;;  %v1117_v51 = vmul.f32 %v6737_v50, %v1036_v33 }
 0x217   : > { %1399 = vst.msk [vmem:[#allocation2 + $0x28] sm:$0xff] %vm1393_vm0, %v1376_v31  ;;  %v1116_v41 = vmul.f32 %v6737_v50, %v1031_v34 }
 0x218   : > { %v1377_v38 = vadd.f32 %v6758_v11, %v1349_v35  ;;  %v1139_v59 = vadd.f32 %v1117_v51, %v955_v54 }
 0x219   : > { %v857_v39 = vpop.permute.xlu1 %856  ;;  %v1138_v52 = vadd.f32 %v1116_v41, %v954_v42 }
 0x21a   : > { %v673_v40 = vpop.permute.xlu0 %672  ;;  %1400 = vst.msk [vmem:[#allocation2 + $0x30] sm:$0xff] %vm1393_vm0, %v1377_v38  ;;  %v934_v5 = vmul.f32 %v6733_v46, %v857_v39 }
 0x21b   : > { %v750_v7 = vmul.f32 %v6735_v47, %v673_v40 }
 0x21d   : > { %v678_v44 = vpop.permute.xlu1 %677  ;;  %v956_v13 = vadd.f32 %v934_v5, %v750_v7 }
 0x21e   : > { %v1215_v45 = vpop.permute.xlu0 %1214  ;;  %v6825_v48 = vld [vmem:[#allocation2 + $0x21] sm:$0xff]  ;;  %v751_v19 = vmul.f32 %v6735_v47, %v678_v44 }
 0x21f   : > { %v1300_v53 = vmul.f32 %v6746_v60, %v1215_v45  ;;  %5195 = vmatprep.mubr.msk.f32.mxu0 %vm1393_vm0, %v6825_v48 }
 0x221   : > { %v1322_v55 = vadd.f32 %v1300_v53, %v1138_v52  ;;  %v1220_v56 = vpop.permute.xlu1 %1219  ;;  %v6832_v58 = vld [vmem:[#allocation2 + $0x29] sm:$0xff] }
 0x222   : > { %v862_v57 = vpop.permute.xlu0 %861  ;;  %v1301_v62 = vmul.f32 %v6746_v60, %v1220_v56  ;;  %5196 = vmatmul.mubr.msk.f32.gmra.mrb[4].mxu0 %vm1393_vm0, %v6832_v58 }
 0x223   : > { %v1350_v61 = vmul.f32 %v6753_v6, %v1322_v55  ;;  %v935_v14 = vmul.f32 %v6733_v46, %v862_v57 }
 0x224   : > { %v1323_v0 = vadd.f32 %v1301_v62, %v1139_v59 }
 0x225   : > { %v1378_v63 = vadd.f32 %v6758_v11, %v1350_v61  ;;  %v1046_v1 = vpop.permute.xlu1 %1045  ;;  %v957_v23 = vadd.f32 %v935_v14, %v751_v19 }
 0x226   : > { %v1041_v2 = vpop.permute.xlu0 %1040  ;;  %v1351_v3 = vmul.f32 %v6753_v6, %v1323_v0  ;;  %v1119_v20 = vmul.f32 %v6737_v50, %v1046_v1 }
 0x227   : > { %1401 = vst.msk [vmem:[#allocation2 + $0x38] sm:$0xff] %vm1393_vm0, %v1378_v63  ;;  %v1118_v12 = vmul.f32 %v6737_v50, %v1041_v2 }
 0x228   : > { %v1379_v8 = vadd.f32 %v6758_v11, %v1351_v3  ;;  %v1141_v29 = vadd.f32 %v1119_v20, %v957_v23 }
 0x229   : > { %v867_v9 = vpop.permute.xlu1 %866  ;;  %v1140_v21 = vadd.f32 %v1118_v12, %v956_v13 }
 0x22a   : > { %v683_v10 = vpop.permute.xlu0 %682  ;;  %1402 = vst.msk [vmem:[#allocation2 + $0x40] sm:$0xff] %vm1393_vm0, %v1379_v8  ;;  %v936_v37 = vmul.f32 %v6733_v46, %v867_v9 }
 0x22b   : > { %v752_v38 = vmul.f32 %v6735_v47, %v683_v10 }
 0x22d   : > { %v688_v4 = vpop.permute.xlu1 %687  ;;  %v958_v43 = vadd.f32 %v936_v37, %v752_v38 }
 0x22e   : > { %v1225_v16 = vpop.permute.xlu0 %1224  ;;  %v6847_v17 = vld [vmem:[#allocation2 + $0x31] sm:$0xff]  ;;  %v753_v52 = vmul.f32 %v6735_v47, %v688_v4 }
 0x22f   : > { %v1302_v22 = vmul.f32 %v6746_v60, %v1225_v16  ;;  %5198 = vmatprep.mubr.msk.f32.mxu0 %vm1393_vm0, %v6847_v17 }
 0x231   : > { %v1324_v24 = vadd.f32 %v1302_v22, %v1140_v21  ;;  %v1230_v25 = vpop.permute.xlu1 %1229  ;;  %v6854_v28 = vld [vmem:[#allocation2 + $0x39] sm:$0xff] }
 0x232   : > { %v872_v26 = vpop.permute.xlu0 %871  ;;  %v1303_v31 = vmul.f32 %v6746_v60, %v1230_v25  ;;  %5199 = vmatmul.mubr.msk.f32.gmra.mrb[6].mxu0 %vm1393_vm0, %v6854_v28 }
 0x233   : > { %v1352_v30 = vmul.f32 %v6753_v6, %v1324_v24  ;;  %v937_v44 = vmul.f32 %v6733_v46, %v872_v26 }
 0x234   : > { %v1325_v33 = vadd.f32 %v1303_v31, %v1141_v29 }
 0x235   : > { %v1380_v32 = vadd.f32 %v6758_v11, %v1352_v30  ;;  %v1056_v34 = vpop.permute.xlu1 %1055  ;;  %v959_v56 = vadd.f32 %v937_v44, %v753_v52 }
 0x236   : > { %v1051_v35 = vpop.permute.xlu0 %1050  ;;  %v1353_v36 = vmul.f32 %v6753_v6, %v1325_v33  ;;  %v1121_v53 = vmul.f32 %v6737_v50, %v1056_v34 }
 0x237   : > { %1403 = vst.msk [vmem:[#allocation2 + $0x48] sm:$0xff] %vm1393_vm0, %v1380_v32  ;;  %v1120_v42 = vmul.f32 %v6737_v50, %v1051_v35 }
 0x238   : > { %v1381_v39 = vadd.f32 %v6758_v11, %v1353_v36  ;;  %v1143_v63 = vadd.f32 %v1121_v53, %v959_v56 }
 0x239   : > { %v877_v40 = vpop.permute.xlu1 %876  ;;  %v1142_v54 = vadd.f32 %v1120_v42, %v958_v43 }
 0x23a   : > { %v693_v41 = vpop.permute.xlu0 %692  ;;  %1404 = vst.msk [vmem:[#allocation2 + $0x50] sm:$0xff] %vm1393_vm0, %v1381_v39  ;;  %v938_v9 = vmul.f32 %v6733_v46, %v877_v40 }
 0x23b   : > { %v754_v10 = vmul.f32 %v6735_v47, %v693_v41 }
 0x23d   : > { %v698_v45 = vpop.permute.xlu1 %697  ;;  %v960_v16 = vadd.f32 %v938_v9, %v754_v10 }
 0x23e   : > { %v1235_v49 = vpop.permute.xlu0 %1234  ;;  %v6869_v51 = vld [vmem:[#allocation2 + $0x41] sm:$0xff]  ;;  %v755_v23 = vmul.f32 %v6735_v47, %v698_v45 }
 0x23f   : > { %v1304_v55 = vmul.f32 %v6746_v60, %v1235_v49  ;;  %5201 = vmatprep.mubr.msk.f32.mxu0 %vm1393_vm0, %v6869_v51 }
 0x241   : > { %v1326_v57 = vadd.f32 %v1304_v55, %v1142_v54  ;;  %v1240_v59 = vpop.permute.xlu1 %1239  ;;  %v6876_v62 = vld [vmem:[#allocation2 + $0x49] sm:$0xff] }
 0x242   : > { %v882_v61 = vpop.permute.xlu0 %881  ;;  %v1305_v1 = vmul.f32 %v6746_v60, %v1240_v59  ;;  %5202 = vmatmul.mubr.msk.f32.gmra.mrb[8].mxu0 %vm1393_vm0, %v6876_v62 }
 0x243   : > { %v1354_v0 = vmul.f32 %v6753_v6, %v1326_v57  ;;  %v939_v19 = vmul.f32 %v6733_v46, %v882_v61 }
 0x244   : > { %v1327_v3 = vadd.f32 %v1305_v1, %v1143_v63 }
 0x245   : > { %v1382_v2 = vadd.f32 %v6758_v11, %v1354_v0  ;;  %v1066_v5 = vpop.permute.xlu1 %1065  ;;  %v961_v29 = vadd.f32 %v939_v19, %v755_v23 }
 0x246   : > { %v1061_v7 = vpop.permute.xlu0 %1060  ;;  %v1355_v8 = vmul.f32 %v6753_v6, %v1327_v3  ;;  %v1123_v24 = vmul.f32 %v6737_v50, %v1066_v5 }
 0x247   : > { %1405 = vst.msk [vmem:[#allocation2 + $0x58] sm:$0xff] %vm1393_vm0, %v1382_v2  ;;  %v1122_v4 = vmul.f32 %v6737_v50, %v1061_v7 }
 0x248   : > { %v1383_v12 = vadd.f32 %v6758_v11, %v1355_v8  ;;  %v1145_v34 = vadd.f32 %v1123_v24, %v961_v29 }
 0x249   : > { %v887_v13 = vpop.permute.xlu1 %886  ;;  %v1144_v25 = vadd.f32 %v1122_v4, %v960_v16 }
 0x24a   : > { %v703_v14 = vpop.permute.xlu0 %702  ;;  %1406 = vst.msk [vmem:[#allocation2 + $0x60] sm:$0xff] %vm1393_vm0, %v1383_v12  ;;  %v940_v42 = vmul.f32 %v6733_v46, %v887_v13 }
 0x24b   : > { %v756_v43 = vmul.f32 %v6735_v47, %v703_v14 }
 0x24d   : > { %v708_v20 = vpop.permute.xlu1 %707  ;;  %v962_v53 = vadd.f32 %v940_v42, %v756_v43 }
 0x24e   : > { %v1245_v21 = vpop.permute.xlu0 %1244  ;;  %v6891_v22 = vld [vmem:[#allocation2 + $0x51] sm:$0xff]  ;;  %v757_v59 = vmul.f32 %v6735_v47, %v708_v20 }
 0x24f   : > { %v1306_v26 = vmul.f32 %v6746_v60, %v1245_v21  ;;  %5204 = vmatprep.mubr.msk.f32.mxu0 %vm1393_vm0, %v6891_v22 }
 0x251   : > { %v1328_v30 = vadd.f32 %v1306_v26, %v1144_v25  ;;  %v1250_v31 = vpop.permute.xlu1 %1249  ;;  %v6898_v33 = vld [vmem:[#allocation2 + $0x59] sm:$0xff] }
 0x252   : > { %v892_v32 = vpop.permute.xlu0 %891  ;;  %v1307_v36 = vmul.f32 %v6746_v60, %v1250_v31  ;;  %5205 = vmatmul.mubr.msk.f32.gmra.mrb[10].mxu0 %vm1393_vm0, %v6898_v33 }
 0x253   : > { %v1356_v35 = vmul.f32 %v6753_v6, %v1328_v30  ;;  %v941_v54 = vmul.f32 %v6733_v46, %v892_v32 }
 0x254   : > { %v1329_v38 = vadd.f32 %v1307_v36, %v1145_v34 }
 0x255   : > { %v1384_v37 = vadd.f32 %v6758_v11, %v1356_v35  ;;  %v1076_v39 = vpop.permute.xlu1 %1075  ;;  %v963_v1 = vadd.f32 %v941_v54, %v757_v59 }
 0x256   : > { %v1071_v40 = vpop.permute.xlu0 %1070  ;;  %v1357_v41 = vmul.f32 %v6753_v6, %v1329_v38  ;;  %v1125_v61 = vmul.f32 %v6737_v50, %v1076_v39 }
 0x257   : > { %1407 = vst.msk [vmem:[#allocation2 + $0x68] sm:$0xff] %vm1393_vm0, %v1384_v37  ;;  %v1124_v52 = vmul.f32 %v6737_v50, %v1071_v40 }
 0x258   : > { %v1385_v44 = vadd.f32 %v6758_v11, %v1357_v41  ;;  %v1147_v8 = vadd.f32 %v1125_v61, %v963_v1 }
 0x259   : > { %v897_v45 = vpop.permute.xlu1 %896  ;;  %v1146_v63 = vadd.f32 %v1124_v52, %v962_v53 }
 0x25a   : > { %v713_v49 = vpop.permute.xlu0 %712  ;;  %1408 = vst.msk [vmem:[#allocation2 + $0x70] sm:$0xff] %vm1393_vm0, %v1385_v44  ;;  %v942_v19 = vmul.f32 %v6733_v46, %v897_v45 }
 0x25b   : > { %v758_v20 = vmul.f32 %v6735_v47, %v713_v49 }
 0x25d   : > { %v718_v55 = vpop.permute.xlu1 %717  ;;  %v964_v26 = vadd.f32 %v942_v19, %v758_v20 }
 0x25e   : > { %v1255_v56 = vpop.permute.xlu0 %1254  ;;  %v6913_v57 = vld [vmem:[#allocation2 + $0x61] sm:$0xff]  ;;  %v759_v34 = vmul.f32 %v6735_v47, %v718_v55 }
 0x25f   : > { %v1308_v0 = vmul.f32 %v6746_v60, %v1255_v56  ;;  %5207 = vmatprep.mubr.msk.f32.mxu0 %vm1393_vm0, %v6913_v57 }
 0x261   : > { %v1330_v2 = vadd.f32 %v1308_v0, %v1146_v63  ;;  %v1260_v3 = vpop.permute.xlu1 %1259  ;;  %v6920_v7 = vld [vmem:[#allocation2 + $0x69] sm:$0xff] }
 0x262   : > { %v902_v5 = vpop.permute.xlu0 %901  ;;  %v1309_v10 = vmul.f32 %v6746_v60, %v1260_v3  ;;  %5208 = vmatmul.mubr.msk.f32.gmra.mrb[12].mxu0 %vm1393_vm0, %v6920_v7 }
 0x263   : > { %v1358_v9 = vmul.f32 %v6753_v6, %v1330_v2  ;;  %v943_v29 = vmul.f32 %v6733_v46, %v902_v5 }
 0x264   : > { %v1331_v13 = vadd.f32 %v1309_v10, %v1147_v8 }
 0x265   : > { %v1386_v12 = vadd.f32 %v6758_v11, %v1358_v9  ;;  %v1086_v14 = vpop.permute.xlu1 %1085  ;;  %v965_v38 = vadd.f32 %v943_v29, %v759_v34 }
 0x266   : > { %v1081_v4 = vpop.permute.xlu0 %1080  ;;  %v1359_v16 = vmul.f32 %v6753_v6, %v1331_v13  ;;  %v1127_v35 = vmul.f32 %v6737_v50, %v1086_v14 }
 0x267   : > { %1409 = vst.msk [vmem:[#allocation2 + $0x78] sm:$0xff] %vm1393_vm0, %v1386_v12  ;;  %v1126_v25 = vmul.f32 %v6737_v50, %v1081_v4 }
 0x268   : > { %v1387_v21 = vadd.f32 %v6758_v11, %v1359_v16  ;;  %v1149_v43 = vadd.f32 %v1127_v35, %v965_v38 }
 0x269   : > { %v907_v23 = vpop.permute.xlu1 %906  ;;  %v1148_v36 = vadd.f32 %v1126_v25, %v964_v26 }
 0x26a   : > { %v723_v24 = vpop.permute.xlu0 %722  ;;  %1410 = vst.msk [vmem:[#allocation2 + $0x80] sm:$0xff] %vm1393_vm0, %v1387_v21  ;;  %v944_v49 = vmul.f32 %v6733_v46, %v907_v23 }
 0x26b   : > { %v760_v52 = vmul.f32 %v6735_v47, %v723_v24 }
 0x26d   : > { %v728_v30 = vpop.permute.xlu1 %727  ;;  %v966_v2 = vadd.f32 %v944_v49, %v760_v52  ;;  %v1423_v49 = vld [vmem:[#allocation2 + $0x28] sm:$0xff]  ;;  %v1424_v52 = vld [vmem:[#allocation2 + $0x30] sm:$0xff] }
 0x26e   : > { %v1265_v31 = vpop.permute.xlu0 %1264  ;;  %v6935_v32 = vld [vmem:[#allocation2 + $0x71] sm:$0xff]  ;;  %v761_v61 = vmul.f32 %v6735_v47, %v728_v30 }
 0x26f   : > { %v1310_v37 = vmul.f32 %v6746_v60, %v1265_v31  ;;  %5210 = vmatprep.mubr.msk.f32.mxu0 %vm1393_vm0, %v6935_v32 }
 0x271   : > { %v1332_v39 = vadd.f32 %v1310_v37, %v1148_v36  ;;  %v1270_v40 = vpop.permute.xlu1 %1269  ;;  %v6942_v42 = vld [vmem:[#allocation2 + $0x79] sm:$0xff] }
 0x272   : > { %v912_v41 = vpop.permute.xlu0 %911  ;;  %v1311_v45 = vmul.f32 %v6746_v60, %v1270_v40  ;;  %5211 = vmatmul.mubr.msk.f32.gmra.mrb[14].mxu0 %vm1393_vm0, %v6942_v42 }
 0x273   : > { %v1360_v44 = vmul.f32 %v6753_v6, %v1332_v39  ;;  %v945_v55 = vmul.f32 %v6733_v46, %v912_v41 }
 0x274   : > { %v1333_v54 = vadd.f32 %v1311_v45, %v1149_v43  ;;  %v1422_v45 = vld [vmem:[#allocation2 + $0x20] sm:$0xff] }
 0x275   : > { %v1388_v53 = vadd.f32 %v6758_v11, %v1360_v44  ;;  %v1096_v56 = vpop.permute.xlu1 %1095  ;;  %v967_v5 = vadd.f32 %v945_v55, %v761_v61  ;;  %v2199_v44 = vld [vmem:[#allocation11 + $0x18] sm:$0xff]  ;;  %v1428_v55 = vld [vmem:[#allocation2 + $0x50] sm:$0xff]  ;;  %v1431_v61 = vld [vmem:[#allocation2 + $0x68] sm:$0xff] }
 0x276   : > { %v1091_v59 = vpop.permute.xlu0 %1090  ;;  %v1361_v63 = vmul.f32 %v6753_v6, %v1333_v54  ;;  %v1129_v0 = vmul.f32 %v6737_v50, %v1096_v56  ;;  %v1426_v54 = vld [vmem:[#allocation2 + $0x40] sm:$0xff]  ;;  %v1429_v56 = vld [vmem:[#allocation2 + $0x58] sm:$0xff] }
 0x277   : > { %1411 = vst.msk [vmem:[#allocation2 + $0x88] sm:$0xff] %vm1393_vm0, %v1388_v53  ;;  %v1128_v1 = vmul.f32 %v6737_v50, %v1091_v59  ;;  %v1425_v53 = vld [vmem:[#allocation2 + $0x38] sm:$0xff]  ;;  %v1430_v59 = vld [vmem:[#allocation2 + $0x60] sm:$0xff] }
 0x278   : > { %v1389_v3 = vadd.f32 %v6758_v11, %v1361_v63  ;;  %v1151_v10 = vadd.f32 %v1129_v0, %v967_v5  ;;  %v1432_v63 = vld [vmem:[#allocation2 + $0x70] sm:$0xff]  ;;  %v1433_v0 = vld [vmem:[#allocation2 + $0x78] sm:$0xff] }
 0x279   : > { %v1280_v8 = vpop.permute.xlu1 %1279  ;;  %v1150_v12 = vadd.f32 %v1128_v1, %v966_v2  ;;  %v1434_v1 = vld [vmem:[#allocation2 + $0x80] sm:$0xff] }
 0x27a   : > { %v1275_v9 = vpop.permute.xlu0 %1274  ;;  %1412 = vst.msk [vmem:[#allocation2 + $0x90] sm:$0xff] %vm1393_vm0, %v1389_v3  ;;  %v1313_v13 = vmul.f32 %v6746_v60, %v1280_v8 }
 0x27b   : > { %v1312_v14 = vmul.f32 %v6746_v60, %v1275_v9 }
 0x27c   : > { %v1335_v4 = vadd.f32 %v1313_v13, %v1151_v10 }
 0x27d   : > { %v1334_v16 = vadd.f32 %v1312_v14, %v1150_v12  ;;  %v917_v19 = vpop.permute.xlu1 %916 }
 0x27e   : > { %v733_v20 = vpop.permute.xlu0 %732  ;;  %v6961_v21 = vld [vmem:[#allocation2 + $0x81] sm:$0xff]  ;;  %v1363_v23 = vmul.f32 %v6753_v6, %v1335_v4  ;;  %v946_v25 = vmul.f32 %v6733_v46, %v917_v19 }
 0x27f   : > { %v1362_v24 = vmul.f32 %v6753_v6, %v1334_v16  ;;  %v762_v26 = vmul.f32 %v6735_v47, %v733_v20  ;;  %5213 = vmatprep.mubr.msk.f32.mxu0 %vm1393_vm0, %v6961_v21  ;;  %v1435_v2 = vld [vmem:[#allocation2 + $0x88] sm:$0xff] }
 0x280   : > { %v1391_v29 = vadd.f32 %v6758_v11, %v1363_v23 }
 0x281   : > { %v1390_v30 = vadd.f32 %v6758_v11, %v1362_v24  ;;  %v1285_v31 = vpop.permute.xlu1 %1284  ;;  %v6971_v35 = vld [vmem:[#allocation2 + $0x89] sm:$0xff]  ;;  %v968_v36 = vadd.f32 %v946_v25, %v762_v26 }
 0x282   : > { %v1101_v34 = vpop.permute.xlu0 %1100  ;;  %1414 = vst.msk [vmem:[#allocation2 + $0xa0] sm:$0xff] %vm1393_vm0, %v1391_v29  ;;  %5214 = vmatmul.mubr.msk.f32.gmra.mrb[16].mxu0 %vm1393_vm0, %v6971_v35  ;;  %v1314_v47 = vmul.f32 %v6746_v60, %v1285_v31  ;;  %v1419_v60 = vld [vmem:[#allocation2 + $0x8] sm:$0xff]  ;;  %v1436_v3 = vld [vmem:[#allocation2 + $0x90] sm:$0xff] }
 0x283   : > { %1413 = vst.msk [vmem:[#allocation2 + $0x98] sm:$0xff] %vm1393_vm0, %v1390_v30  ;;  %v1130_v46 = vmul.f32 %v6737_v50, %v1101_v34  ;;  %v1418_v50 = vld [vmem:[#allocation2] sm:$0xff] }
 0x285   : > { %v1152_v37 = vadd.f32 %v1130_v46, %v968_v36 }
 0x287   : > { %v1336_v38 = vadd.f32 %v1314_v47, %v1152_v37 }
 0x289   : > { %v1364_v39 = vmul.f32 %v6753_v6, %v1336_v38  ;;  %v1420_v6 = vld [vmem:[#allocation2 + $0x10] sm:$0xff]  ;;  %v1929_v8 = vld [vmem:[#allocation2 + $0xa0] sm:$0xff] }
 0x28a   : > { %v6980_v40 = vld [vmem:[#allocation2 + $0x91] sm:$0xff]  ;;  %v6982_v41 = vld [vmem:[#allocation2 + $0x99] sm:$0xff] }
 0x28b   : > { %v1392_v43 = vadd.f32 %v6758_v11, %v1364_v39  ;;  %5216 = vmatprep.mubr.msk.f32.mxu0 %vm1393_vm0, %v6980_v40  ;;  %v1421_v11 = vld [vmem:[#allocation2 + $0x18] sm:$0xff] }
 0x28c   : > { %5217 = vmatmul.mubr.msk.f32.gmra.mrb[18].mxu0 %vm1393_vm0, %v6982_v41  ;;  %v1437_v5 = vld [vmem:[#allocation2 + $0x98] sm:$0xff] }
 0x28d   : > { %1415 = vst.msk [vmem:[#allocation2 + $0xa8] sm:$0xff] %vm1393_vm0, %v1392_v43  ;;  %5221 = vmatprep.mubr.msk.f32.mxu0 %vm1393_vm0, %v1418_v50 }
 0x290   : > { %5222 = vmatmul.mubr.msk.f32.vlgmr.msra.gmra.mrb[0].mxu0 %vm1393_vm0, %v1419_v60 }
 0x291   : > { %5252 = vmatpush3.msra.mxu0 %v6800_v15  ;;  %5224 = vmatprep.mubr.msk.f32.mxu0 %vm1393_vm0, %v1420_v6  ;;  %v1427_v15 = vld [vmem:[#allocation2 + $0x48] sm:$0xff] }
 0x292   : > { %5283 = vmatprep.subr.mxu0 %v2199_v44 }
 0x294   : > { %5225 = vmatmul.mubr.msk.f32.gmra.mrb[2].mxu0 %vm1393_vm0, %v1421_v11  ;;  %v1930_v9 = vld [vmem:[#allocation2 + $0xa8] sm:$0xff] }
 0x295   : > { %5227 = vmatprep.mubr.msk.f32.mxu0 %vm1393_vm0, %v1422_v45 }
 0x298   : > { %5228 = vmatmul.mubr.msk.f32.gmra.mrb[4].mxu0 %vm1393_vm0, %v1423_v49 }
 0x299   : > { %5230 = vmatprep.mubr.msk.f32.mxu0 %vm1393_vm0, %v1424_v52 }
 0x29c   : > { %5231 = vmatmul.mubr.msk.f32.gmra.mrb[6].mxu0 %vm1393_vm0, %v1425_v53 }
 0x29d   : > { %5233 = vmatprep.mubr.msk.f32.mxu0 %vm1393_vm0, %v1426_v54 }
 0x2a0   : > { %5234 = vmatmul.mubr.msk.f32.gmra.mrb[8].mxu0 %vm1393_vm0, %v1427_v15 }
 0x2a1   : > { %5236 = vmatprep.mubr.msk.f32.mxu0 %vm1393_vm0, %v1428_v55 }
 0x2a4   : > { %5237 = vmatmul.mubr.msk.f32.gmra.mrb[10].mxu0 %vm1393_vm0, %v1429_v56 }
 0x2a5   : > { %5239 = vmatprep.mubr.msk.f32.mxu0 %vm1393_vm0, %v1430_v59 }
 0x2a8   : > { %5240 = vmatmul.mubr.msk.f32.gmra.mrb[12].mxu0 %vm1393_vm0, %v1431_v61 }
 0x2a9   : > { %5242 = vmatprep.mubr.msk.f32.mxu0 %vm1393_vm0, %v1432_v63 }
 0x2ac   : > { %5243 = vmatmul.mubr.msk.f32.gmra.mrb[14].mxu0 %vm1393_vm0, %v1433_v0 }
 0x2ad   : > { %5245 = vmatprep.mubr.msk.f32.mxu0 %vm1393_vm0, %v1434_v1 }
 0x2b0   : > { %5246 = vmatmul.mubr.msk.f32.gmra.mrb[16].mxu0 %vm1393_vm0, %v1435_v2 }
 0x2b1   : > { %5248 = vmatprep.mubr.msk.f32.mxu0 %vm1393_vm0, %v1436_v3 }
 0x2b4   : > { %5249 = vmatmul.mubr.msk.f32.gmra.mrb[18].mxu0 %vm1393_vm0, %v1437_v5 }
 0x2b5   : > { %5253 = vmatprep.mubr.msk.f32.mxu0 %vm1393_vm0, %v1420_v6 }
 0x2b8   : > { %5254 = vmatmul.mubr.msk.f32.vlgmr.msra.gmra.mrb[0].mxu0 %vm1393_vm0, %v1421_v11 }
 0x2b9   : > { %5284 = vmatpush3.msra.mxu0 %v2199_v44  ;;  %5256 = vmatprep.mubr.msk.f32.mxu0 %vm1393_vm0, %v1422_v45 }
 0x2bc   : > { %5257 = vmatmul.mubr.msk.f32.gmra.mrb[2].mxu0 %vm1393_vm0, %v1423_v49 }
 0x2bd   : > { %5259 = vmatprep.mubr.msk.f32.mxu0 %vm1393_vm0, %v1424_v52 }
 0x2c0   : > { %5260 = vmatmul.mubr.msk.f32.gmra.mrb[4].mxu0 %vm1393_vm0, %v1425_v53 }
 0x2c1   : > { %5262 = vmatprep.mubr.msk.f32.mxu0 %vm1393_vm0, %v1426_v54 }
 0x2c4   : > { %5263 = vmatmul.mubr.msk.f32.gmra.mrb[6].mxu0 %vm1393_vm0, %v1427_v15 }
 0x2c5   : > { %5265 = vmatprep.mubr.msk.f32.mxu0 %vm1393_vm0, %v1428_v55 }
 0x2c8   : > { %5266 = vmatmul.mubr.msk.f32.gmra.mrb[8].mxu0 %vm1393_vm0, %v1429_v56 }
 0x2c9   : > { %5268 = vmatprep.mubr.msk.f32.mxu0 %vm1393_vm0, %v1430_v59 }
 0x2cc   : > { %5269 = vmatmul.mubr.msk.f32.gmra.mrb[10].mxu0 %vm1393_vm0, %v1431_v61 }
 0x2cd   : > { %5271 = vmatprep.mubr.msk.f32.mxu0 %vm1393_vm0, %v1432_v63 }
 0x2d0   : > { %5272 = vmatmul.mubr.msk.f32.gmra.mrb[12].mxu0 %vm1393_vm0, %v1433_v0 }
 0x2d1   : > { %5274 = vmatprep.mubr.msk.f32.mxu0 %vm1393_vm0, %v1434_v1 }
 0x2d4   : > { %5275 = vmatmul.mubr.msk.f32.gmra.mrb[14].mxu0 %vm1393_vm0, %v1435_v2 }
 0x2d5   : > { %5277 = vmatprep.mubr.msk.f32.mxu0 %vm1393_vm0, %v1436_v3 }
 0x2d8   : > { %5278 = vmatmul.mubr.msk.f32.gmra.mrb[16].mxu0 %vm1393_vm0, %v1437_v5 }
 0x2d9   : > { %5280 = vmatprep.mubr.msk.f32.mxu0 %vm1393_vm0, %v1929_v8 }
 0x2dc   : > { %5281 = vmatmul.mubr.msk.f32.gmra.mrb[18].mxu0 %vm1393_vm0, %v1930_v9 }
 0x2dd   : > { %5285 = vmatprep.mubr.msk.f32.mxu0 %vm1393_vm0, %v6802_v18  ;;  %v2196_v18 = vld [vmem:[#allocation2 + $0xa1] sm:$0xff] }
 0x2e0   : > { %5286 = vmatmul.mubr.msk.f32.vlgmr.msra.gmra.mrb[0].mxu0 %vm1393_vm0, %v6810_v27  ;;  %v2197_v27 = vld [vmem:[#allocation2 + $0xa9] sm:$0xff] }
 0x2e1   : > { %5288 = vmatprep.mubr.msk.f32.mxu0 %vm1393_vm0, %v6825_v48  ;;  %v2559_v48 = vld [vmem:[#allocation16 + $0x10] sm:$0xff] }
 0x2e4   : > { %5289 = vmatmul.mubr.msk.f32.gmra.mrb[2].mxu0 %vm1393_vm0, %v6832_v58  ;;  %v2560_v58 = vld [vmem:[#allocation16 + $0x18] sm:$0xff] }
 0x2e5   : > { %5291 = vmatprep.mubr.msk.f32.mxu0 %vm1393_vm0, %v6847_v17  ;;  %v5567_v17 = vpack.c.bf16 %v2560_v58, %v2559_v48 }
 0x2e7   : > { %5568 = vmatprep.subr.bf16.mxu0 %v5567_v17 }
 0x2e8   : > { %5292 = vmatmul.mubr.msk.f32.gmra.mrb[4].mxu0 %vm1393_vm0, %v6854_v28  ;;  %v2538_v28 = vld [vmem:[#allocation16] sm:$0xff] }
 0x2e9   : > { %5294 = vmatprep.mubr.msk.f32.mxu0 %vm1393_vm0, %v6869_v51  ;;  %5570 = vmatpush3.bf16.msra.mxu0 %v5567_v17  ;;  %v2539_v51 = vld [vmem:[#allocation16 + $0x8] sm:$0xff]  ;;  %v3246_v17 = vld [vmem:[#allocation16 + $0x30] sm:$0xff] }
 0x2ec   : > { %5295 = vmatmul.mubr.msk.f32.gmra.mrb[6].mxu0 %vm1393_vm0, %v6876_v62  ;;  %v5571_v62 = vpack.c.bf16 %v2539_v51, %v2538_v28  ;;  %v3247_v28 = vld [vmem:[#allocation16 + $0x38] sm:$0xff] }
 0x2ed   : > { %5297 = vmatprep.mubr.msk.f32.mxu0 %vm1393_vm0, %v6891_v22  ;;  %v2998_v22 = vld [vmem:[#allocation16 + $0x20] sm:$0xff] }
 0x2ee   : > { %5615 = vmatprep.subr.bf16.mxu1 %v5571_v62  ;;  %5572 = vmatprep.subr.bf16.mxu0 %v5571_v62 }
 0x2ef   : > { %5616 = vmatpush3.bf16.msra.mxu1 %v5571_v62 }
 0x2f0   : > { %5298 = vmatmul.mubr.msk.f32.gmra.mrb[8].mxu0 %vm1393_vm0, %v6898_v33  ;;  %v2999_v33 = vld [vmem:[#allocation16 + $0x28] sm:$0xff] }
 0x2f1   : > { %5300 = vmatprep.mubr.msk.f32.mxu0 %vm1393_vm0, %v6913_v57  ;;  %v7069_v57 = vpack.c.bf16 %v2999_v33, %v2998_v22 }
 0x2f3   : > { %5576 = vmatprep.subr.bf16.mxu1 %v7069_v57 }
 0x2f4   : > { %5301 = vmatmul.mubr.msk.f32.gmra.mrb[10].mxu0 %vm1393_vm0, %v6920_v7  ;;  %v7072_v7 = vld [vmem:[#allocation13] ss:$0 sm:$0xff] }
 0x2f5   : > { %5303 = vmatprep.mubr.msk.f32.mxu0 %vm1393_vm0, %v6935_v32  ;;  %v7074_v32 = vld [vmem:[#allocation14] ss:$0 sm:$0xff] }
 0x2f8   : > { %5304 = vmatmul.mubr.msk.f32.gmra.mrb[12].mxu0 %vm1393_vm0, %v6942_v42 }
 0x2f9   : > { %5306 = vmatprep.mubr.msk.f32.mxu0 %vm1393_vm0, %v6961_v21 }
 0x2fc   : > { %5307 = vmatmul.mubr.msk.f32.gmra.mrb[14].mxu0 %vm1393_vm0, %v6971_v35 }
 0x2fd   : > { %5309 = vmatprep.mubr.msk.f32.mxu0 %vm1393_vm0, %v6980_v40 }
 0x300   : > { %5310 = vmatmul.mubr.msk.f32.gmra.mrb[16].mxu0 %vm1393_vm0, %v6982_v41 }
 0x301   : > { %5312 = vmatprep.mubr.msk.f32.mxu0 %vm1393_vm0, %v2196_v18 }
 0x304   : > { %5313 = vmatmul.mubr.msk.f32.gmra.mrb[18].mxu0 %vm1393_vm0, %v2197_v27 }
 0x3b3   : > { %v5287_v42 = vpop.f32.mrb[0].mxu0 }
 0x3b4   : > { %v2452_v10 = vmul.f32 %v5287_v42, %v7072_v7  ;;  %v2326_v12 = vpop.f32.mrb[1].mxu0 }
 0x3b5   : > { %v2451_v13 = vmul.f32 %v7072_v7, %v2326_v12 }
 0x3b6   : > { %v2478_v14 = vadd.f32 %v7074_v32, %v2452_v10 }
 0x3b7   : > { %v2477_v4 = vadd.f32 %v7074_v32, %v2451_v13  ;;  %v5290_v16 = vpop.f32.mrb[2].mxu0 }
 0x3b8   : > { %2499 = vst.msk [vmem:[#allocation3 + $0x8] sm:$0xff] %vm2497_vm1, %v2478_v14  ;;  %v2454_v19 = vmul.f32 %v5290_v16, %v7072_v7  ;;  %v2336_v20 = vpop.f32.mrb[3].mxu0  ;;  %v5579_v14 = vpack.c.bf16 %v3247_v28, %v3246_v17 }
 0x3b9   : > { %2498 = vst.msk [vmem:[#allocation3] sm:$0xff] %vm2497_vm1, %v2477_v4  ;;  %v2453_v21 = vmul.f32 %v7072_v7, %v2336_v20 }
 0x3ba   : > { %v2480_v23 = vadd.f32 %v7074_v32, %v2454_v19 }
 0x3bb   : > { %v2479_v24 = vadd.f32 %v7074_v32, %v2453_v21  ;;  %v5293_v25 = vpop.f32.mrb[4].mxu0 }
 0x3bc   : > { %2501 = vst.msk [vmem:[#allocation3 + $0x18] sm:$0xff] %vm2497_vm1, %v2480_v23  ;;  %v2456_v26 = vmul.f32 %v5293_v25, %v7072_v7  ;;  %v2346_v29 = vpop.f32.mrb[5].mxu0 }
 0x3bd   : > { %2500 = vst.msk [vmem:[#allocation3 + $0x10] sm:$0xff] %vm2497_vm1, %v2479_v24  ;;  %v2455_v30 = vmul.f32 %v7072_v7, %v2346_v29 }
 0x3be   : > { %v2482_v31 = vadd.f32 %v7074_v32, %v2456_v26 }
 0x3bf   : > { %v2481_v34 = vadd.f32 %v7074_v32, %v2455_v30  ;;  %v5296_v35 = vpop.f32.mrb[6].mxu0 }
 0x3c0   : > { %2503 = vst.msk [vmem:[#allocation3 + $0x28] sm:$0xff] %vm2497_vm1, %v2482_v31  ;;  %v2458_v36 = vmul.f32 %v5296_v35, %v7072_v7  ;;  %v2356_v46 = vpop.f32.mrb[7].mxu0  ;;  %v2540_v47 = vld [vmem:[#allocation3 + $0x1] sm:$0xff] }
 0x3c1   : > { %2502 = vst.msk [vmem:[#allocation3 + $0x20] sm:$0xff] %vm2497_vm1, %v2481_v34  ;;  %v2457_v37 = vmul.f32 %v7072_v7, %v2356_v46  ;;  %5319 = vmatprep.mubr.msk.f32.mxu0 %vm2497_vm1, %v2540_v47 }
 0x3c2   : > { %v2484_v38 = vadd.f32 %v7074_v32, %v2458_v36 }
 0x3c3   : > { %v2483_v39 = vadd.f32 %v7074_v32, %v2457_v37  ;;  %v5299_v40 = vpop.f32.mrb[8].mxu0 }
 0x3c4   : > { %2505 = vst.msk [vmem:[#allocation3 + $0x38] sm:$0xff] %vm2497_vm1, %v2484_v38  ;;  %v2460_v41 = vmul.f32 %v5299_v40, %v7072_v7  ;;  %v2366_v43 = vpop.f32.mrb[9].mxu0  ;;  %v2541_v50 = vld [vmem:[#allocation3 + $0x9] sm:$0xff]  ;;  %v7101_v60 = vld [vmem:[#allocation3 + $0x11] sm:$0xff] }
 0x3c5   : > { %2504 = vst.msk [vmem:[#allocation3 + $0x30] sm:$0xff] %vm2497_vm1, %v2483_v39  ;;  %v2459_v44 = vmul.f32 %v7072_v7, %v2366_v43  ;;  %5320 = vmatmul.mubr.msk.f32.vlgmr.msra.gmra.mrb[20].mxu0 %vm2497_vm1, %v2541_v50  ;;  %v2979_v39 = vld [vmem:[#allocation3 + $0x10] sm:$0xff]  ;;  %v2980_v43 = vld [vmem:[#allocation3 + $0x18] sm:$0xff] }
 0x3c6   : > { %v2486_v6 = vadd.f32 %v7074_v32, %v2460_v41  ;;  %5322 = vmatprep.mubr.msk.f32.mxu0 %vm2497_vm1, %v7101_v60  ;;  %5574 = vmatpush3.bf16.msra.mxu0 %v5571_v62  ;;  %v2520_v41 = vld [vmem:[#allocation3] sm:$0xff] }
 0x3c7   : > { %v2485_v11 = vadd.f32 %v7074_v32, %v2459_v44  ;;  %v5302_v45 = vpop.f32.mrb[10].mxu0  ;;  %v2521_v44 = vld [vmem:[#allocation3 + $0x8] sm:$0xff] }
 0x3c8   : > { %2507 = vst.msk [vmem:[#allocation3 + $0x48] sm:$0xff] %vm2497_vm1, %v2486_v6  ;;  %v2462_v49 = vmul.f32 %v5302_v45, %v7072_v7  ;;  %v2376_v52 = vpop.f32.mrb[11].mxu0  ;;  %v7112_v53 = vld [vmem:[#allocation3 + $0x19] sm:$0xff]  ;;  %v7114_v54 = vld [vmem:[#allocation3 + $0x21] sm:$0xff] }
 0x3c9   : > { %2506 = vst.msk [vmem:[#allocation3 + $0x40] sm:$0xff] %vm2497_vm1, %v2485_v11  ;;  %v2461_v15 = vmul.f32 %v7072_v7, %v2376_v52  ;;  %5323 = vmatmul.mubr.msk.f32.gmra.mrb[22].mxu0 %vm2497_vm1, %v7112_v53  ;;  %v2981_v50 = vld [vmem:[#allocation3 + $0x20] sm:$0xff]  ;;  %v2982_v6 = vld [vmem:[#allocation3 + $0x28] sm:$0xff] }
 0x3ca   : > { %v2488_v55 = vadd.f32 %v7074_v32, %v2462_v49  ;;  %5325 = vmatprep.mubr.msk.f32.mxu0 %vm2497_vm1, %v7114_v54 }
 0x3cb   : > { %v2487_v56 = vadd.f32 %v7074_v32, %v2461_v15  ;;  %v5305_v59 = vpop.f32.mrb[12].mxu0  ;;  %v2984_v45 = vld [vmem:[#allocation3 + $0x38] sm:$0xff] }
 0x3cc   : > { %2509 = vst.msk [vmem:[#allocation3 + $0x58] sm:$0xff] %vm2497_vm1, %v2488_v55  ;;  %v2464_v61 = vmul.f32 %v5305_v59, %v7072_v7  ;;  %v2386_v63 = vpop.f32.mrb[13].mxu0  ;;  %v7126_v0 = vld [vmem:[#allocation3 + $0x29] sm:$0xff]  ;;  %v7128_v1 = vld [vmem:[#allocation3 + $0x31] sm:$0xff] }
 0x3cd   : > { %2508 = vst.msk [vmem:[#allocation3 + $0x50] sm:$0xff] %vm2497_vm1, %v2487_v56  ;;  %v2463_v2 = vmul.f32 %v7072_v7, %v2386_v63  ;;  %5326 = vmatmul.mubr.msk.f32.gmra.mrb[24].mxu0 %vm2497_vm1, %v7126_v0  ;;  %v2983_v11 = vld [vmem:[#allocation3 + $0x30] sm:$0xff]  ;;  %v3582_v56 = vld [vmem:[#allocation20 + $0x28] sm:$0xff] }
 0x3ce   : > { %v2490_v3 = vadd.f32 %v7074_v32, %v2464_v61  ;;  %5328 = vmatprep.mubr.msk.f32.mxu0 %vm2497_vm1, %v7128_v1  ;;  %v3583_v61 = vld [vmem:[#allocation20 + $0x30] sm:$0xff]  ;;  %v3584_v63 = vld [vmem:[#allocation20 + $0x38] sm:$0xff] }
 0x3cf   : > { %v2489_v5 = vadd.f32 %v7074_v32, %v2463_v2  ;;  %v5308_v8 = vpop.f32.mrb[14].mxu0  ;;  %v2986_v52 = vld [vmem:[#allocation3 + $0x48] sm:$0xff]  ;;  %v3561_v2 = vld [vmem:[#allocation20 + $0x8] sm:$0xff] }
 0x3d0   : > { %2511 = vst.msk [vmem:[#allocation3 + $0x68] sm:$0xff] %vm2497_vm1, %v2490_v3  ;;  %v2466_v9 = vmul.f32 %v5308_v8, %v7072_v7  ;;  %v2396_v18 = vpop.f32.mrb[15].mxu0  ;;  %v7140_v27 = vld [vmem:[#allocation3 + $0x39] sm:$0xff]  ;;  %v7142_v48 = vld [vmem:[#allocation3 + $0x41] sm:$0xff] }
 0x3d1   : > { %2510 = vst.msk [vmem:[#allocation3 + $0x60] sm:$0xff] %vm2497_vm1, %v2489_v5  ;;  %v2465_v58 = vmul.f32 %v7072_v7, %v2396_v18  ;;  %5329 = vmatmul.mubr.msk.f32.gmra.mrb[26].mxu0 %vm2497_vm1, %v7140_v27  ;;  %v2985_v49 = vld [vmem:[#allocation3 + $0x40] sm:$0xff] }
 0x3d2   : > { %v2492_v51 = vadd.f32 %v7074_v32, %v2466_v9  ;;  %5331 = vmatprep.mubr.msk.f32.mxu0 %vm2497_vm1, %v7142_v48 }
 0x3d3   : > { %v2491_v62 = vadd.f32 %v7074_v32, %v2465_v58  ;;  %v5311_v22 = vpop.f32.mrb[16].mxu0  ;;  %v7166_v16 = vld [vmem:[#allocation3 + $0x58] sm:$0xff] }
 0x3d4   : > { %2513 = vst.msk [vmem:[#allocation3 + $0x78] sm:$0xff] %vm2497_vm1, %v2492_v51  ;;  %v2468_v33 = vmul.f32 %v5311_v22, %v7072_v7  ;;  %v2406_v42 = vpop.f32.mrb[17].mxu0  ;;  %v7154_v10 = vld [vmem:[#allocation3 + $0x49] sm:$0xff]  ;;  %v7158_v13 = vld [vmem:[#allocation3 + $0x51] sm:$0xff] }
 0x3d5   : > { %v7156_v12 = vld [vmem:[#allocation3 + $0x50] sm:$0xff]  ;;  %2512 = vst.msk [vmem:[#allocation3 + $0x70] sm:$0xff] %vm2497_vm1, %v2491_v62  ;;  %v2467_v4 = vmul.f32 %v7072_v7, %v2406_v42  ;;  %5332 = vmatmul.mubr.msk.f32.gmra.mrb[28].mxu0 %vm2497_vm1, %v7154_v10 }
 0x3d6   : > { %5365 = vmatprep.mubr.msk.f32.mxu1 %vm2497_vm1, %v7156_v12  ;;  %v2494_v19 = vadd.f32 %v7074_v32, %v2468_v33  ;;  %5334 = vmatprep.mubr.msk.f32.mxu0 %vm2497_vm1, %v7158_v13 }
 0x3d7   : > { %5366 = vmatmul.mubr.msk.f32.vlgmr.msra.gmra.mrb[0].mxu1 %vm2497_vm1, %v7166_v16  ;;  %v2493_v20 = vadd.f32 %v7074_v32, %v2467_v4  ;;  %v5314_v21 = vpop.f32.mrb[18].mxu0  ;;  %v7296_v4 = vld [vmem:[#allocation17] ss:$0 sm:$0xff] }
 0x3d8   : > { %5578 = vmatpush3.bf16.msra.mxu1 %v7069_v57  ;;  %2515 = vst.msk [vmem:[#allocation3 + $0x88] sm:$0xff] %vm2497_vm1, %v2494_v19  ;;  %v2470_v23 = vmul.f32 %v5314_v21, %v7072_v7  ;;  %v2416_v24 = vpop.f32.mrb[19].mxu0  ;;  %v7177_v25 = vld [vmem:[#allocation3 + $0x59] sm:$0xff]  ;;  %v7179_v29 = vld [vmem:[#allocation3 + $0x61] sm:$0xff]  ;;  %v7298_v21 = vld [vmem:[#allocation19] ss:$0 sm:$0xff] }
 0x3d9   : > { %v2532_v26 = vld [vmem:[#allocation3 + $0x60] sm:$0xff]  ;;  %5580 = vmatprep.subr.bf16.mxu1 %v5579_v14  ;;  %2514 = vst.msk [vmem:[#allocation3 + $0x80] sm:$0xff] %vm2497_vm1, %v2493_v20  ;;  %v2469_v30 = vmul.f32 %v7072_v7, %v2416_v24  ;;  %5335 = vmatmul.mubr.msk.f32.gmra.mrb[30].mxu0 %vm2497_vm1, %v7177_v25  ;;  %v2533_v57 = vld [vmem:[#allocation3 + $0x68] sm:$0xff] }
 0x3da   : > { %5368 = vmatprep.mubr.msk.f32.mxu1 %vm2497_vm1, %v2532_v26  ;;  %v2496_v31 = vadd.f32 %v7074_v32, %v2470_v23  ;;  %5337 = vmatprep.mubr.msk.f32.mxu0 %vm2497_vm1, %v7179_v29 }
 0x3db   : > { %5369 = vmatmul.mubr.msk.f32.gmra.mrb[2].mxu1 %vm2497_vm1, %v2533_v57  ;;  %v2495_v34 = vadd.f32 %v7074_v32, %v2469_v30  ;;  %v2535_v46 = vld [vmem:[#allocation3 + $0x78] sm:$0xff] }
 0x3dc   : > { %2517 = vst.msk [vmem:[#allocation3 + $0x98] sm:$0xff] %vm2497_vm1, %v2496_v31  ;;  %v7192_v35 = vld [vmem:[#allocation3 + $0x69] sm:$0xff]  ;;  %v7194_v36 = vld [vmem:[#allocation3 + $0x71] sm:$0xff] }
 0x3dd   : > { %v2534_v7 = vld [vmem:[#allocation3 + $0x70] sm:$0xff]  ;;  %2516 = vst.msk [vmem:[#allocation3 + $0x90] sm:$0xff] %vm2497_vm1, %v2495_v34  ;;  %5338 = vmatmul.mubr.msk.f32.gmra.mrb[32].mxu0 %vm2497_vm1, %v7192_v35 }
 0x3de   : > { %5371 = vmatprep.mubr.msk.f32.mxu1 %vm2497_vm1, %v2534_v7  ;;  %5340 = vmatprep.mubr.msk.f32.mxu0 %vm2497_vm1, %v7194_v36 }
 0x3df   : > { %5372 = vmatmul.mubr.msk.f32.gmra.mrb[4].mxu1 %vm2497_vm1, %v2535_v46  ;;  %v2537_v38 = vld [vmem:[#allocation3 + $0x88] sm:$0xff] }
 0x3e0   : > { %v7203_v32 = vld [vmem:[#allocation3 + $0x79] sm:$0xff]  ;;  %v7205_v37 = vld [vmem:[#allocation3 + $0x81] sm:$0xff] }
 0x3e1   : > { %v2536_v47 = vld [vmem:[#allocation3 + $0x80] sm:$0xff]  ;;  %5341 = vmatmul.mubr.msk.f32.gmra.mrb[34].mxu0 %vm2497_vm1, %v7203_v32 }
 0x3e2   : > { %5374 = vmatprep.mubr.msk.f32.mxu1 %vm2497_vm1, %v2536_v47  ;;  %5343 = vmatprep.mubr.msk.f32.mxu0 %vm2497_vm1, %v7205_v37 }
 0x3e3   : > { %5375 = vmatmul.mubr.msk.f32.gmra.mrb[6].mxu1 %vm2497_vm1, %v2537_v38  ;;  %v2996_v55 = vld [vmem:[#allocation3 + $0x98] sm:$0xff] }
 0x3e4   : > { %5381 = vmatprep.mubr.msk.f32.mxu1 %vm2497_vm1, %v2979_v39  ;;  %v2557_v40 = vld [vmem:[#allocation3 + $0x89] sm:$0xff] }
 0x3e5   : > { %5344 = vmatmul.mubr.msk.f32.gmra.mrb[36].mxu0 %vm2497_vm1, %v2557_v40  ;;  %v2995_v15 = vld [vmem:[#allocation3 + $0x90] sm:$0xff] }
 0x3e6   : > { %5350 = vmatprep.mubr.msk.f32.mxu0 %vm2497_vm1, %v2520_v41 }
 0x3e7   : > { %5382 = vmatmul.mubr.msk.f32.vlgmr.msra.gmra.mrb[8].mxu1 %vm2497_vm1, %v2980_v43 }
 0x3e8   : > { %5582 = vmatpush3.bf16.msra.mxu1 %v5579_v14  ;;  %5384 = vmatprep.mubr.msk.f32.mxu1 %vm2497_vm1, %v2981_v50 }
 0x3e9   : > { %5351 = vmatmul.mubr.msk.f32.vlgmr.msra.gmra.mrb[20].mxu0 %vm2497_vm1, %v2521_v44 }
 0x3ea   : > { %5353 = vmatprep.mubr.msk.f32.mxu0 %vm2497_vm1, %v2979_v39 }
 0x3eb   : > { %5385 = vmatmul.mubr.msk.f32.gmra.mrb[10].mxu1 %vm2497_vm1, %v2982_v6 }
 0x3ec   : > { %5387 = vmatprep.mubr.msk.f32.mxu1 %vm2497_vm1, %v2983_v11 }
 0x3ed   : > { %5354 = vmatmul.mubr.msk.f32.gmra.mrb[22].mxu0 %vm2497_vm1, %v2980_v43 }
 0x3ee   : > { %5356 = vmatprep.mubr.msk.f32.mxu0 %vm2497_vm1, %v2981_v50 }
 0x3ef   : > { %5388 = vmatmul.mubr.msk.f32.gmra.mrb[12].mxu1 %vm2497_vm1, %v2984_v45 }
 0x3f0   : > { %5390 = vmatprep.mubr.msk.f32.mxu1 %vm2497_vm1, %v2985_v49 }
 0x3f1   : > { %5357 = vmatmul.mubr.msk.f32.gmra.mrb[24].mxu0 %vm2497_vm1, %v2982_v6 }
 0x3f2   : > { %5359 = vmatprep.mubr.msk.f32.mxu0 %vm2497_vm1, %v2983_v11 }
 0x3f3   : > { %5391 = vmatmul.mubr.msk.f32.gmra.mrb[14].mxu1 %vm2497_vm1, %v2986_v52 }
 0x3f4   : > { %5393 = vmatprep.mubr.msk.f32.mxu1 %vm2497_vm1, %v7156_v12 }
 0x3f5   : > { %5360 = vmatmul.mubr.msk.f32.gmra.mrb[26].mxu0 %vm2497_vm1, %v2984_v45 }
 0x3f6   : > { %5362 = vmatprep.mubr.msk.f32.mxu0 %vm2497_vm1, %v2985_v49 }
 0x3f7   : > { %5394 = vmatmul.mubr.msk.f32.gmra.mrb[16].mxu1 %vm2497_vm1, %v7166_v16 }
 0x3f8   : > { %5396 = vmatprep.mubr.msk.f32.mxu1 %vm2497_vm1, %v2532_v26 }
 0x3f9   : > { %5363 = vmatmul.mubr.msk.f32.gmra.mrb[28].mxu0 %vm2497_vm1, %v2986_v52  ;;  %v3562_v52 = vld [vmem:[#allocation20 + $0x10] sm:$0xff] }
 0x3fb   : > { %5397 = vmatmul.mubr.msk.f32.gmra.mrb[0].mxu1 %vm2497_vm1, %v2533_v57 }
 0x3fc   : > { %5399 = vmatprep.mubr.msk.f32.mxu1 %vm2497_vm1, %v2534_v7 }
 0x3ff   : > { %5400 = vmatmul.mubr.msk.f32.gmra.mrb[2].mxu1 %vm2497_vm1, %v2535_v46 }
 0x400   : > { %5402 = vmatprep.mubr.msk.f32.mxu1 %vm2497_vm1, %v2536_v47 }
 0x403   : > { %5403 = vmatmul.mubr.msk.f32.gmra.mrb[4].mxu1 %vm2497_vm1, %v2537_v38 }
 0x404   : > { %5405 = vmatprep.mubr.msk.f32.mxu1 %vm2497_vm1, %v2995_v15  ;;  %v3563_v15 = vld [vmem:[#allocation20 + $0x18] sm:$0xff] }
 0x407   : > { %5406 = vmatmul.mubr.msk.f32.gmra.mrb[6].mxu1 %vm2497_vm1, %v2996_v55 }
 0x408   : > { %5412 = vmatprep.mubr.msk.f32.mxu1 %vm2497_vm1, %v7101_v60  ;;  %v3243_v60 = vld [vmem:[#allocation3 + $0x91] sm:$0xff] }
 0x40b   : > { %5413 = vmatmul.mubr.msk.f32.vlgmr.msra.gmra.mrb[8].mxu1 %vm2497_vm1, %v7112_v53  ;;  %v3244_v53 = vld [vmem:[#allocation3 + $0x99] sm:$0xff] }
 0x40c   : > { %5415 = vmatprep.mubr.msk.f32.mxu1 %vm2497_vm1, %v7114_v54  ;;  %v3581_v54 = vld [vmem:[#allocation20 + $0x20] sm:$0xff] }
 0x40d   : > { %v5583_v59 = vpack.c.bf16 %v3582_v56, %v3581_v54 }
 0x40f   : > { %5416 = vmatmul.mubr.msk.f32.gmra.mrb[10].mxu1 %vm2497_vm1, %v7126_v0  ;;  %5584 = vmatprep.subr.bf16.mxu1 %v5583_v59  ;;  %v5587_v0 = vpack.c.bf16 %v3584_v63, %v3583_v61  ;;  %v5595_v63 = vpack.c.bf16 %v3563_v15, %v3562_v52  ;;  %v3990_v52 = vld [vmem:[#allocation20 + $0x50] sm:$0xff]  ;;  %v3991_v15 = vld [vmem:[#allocation20 + $0x58] sm:$0xff] }
 0x410   : > { %5418 = vmatprep.mubr.msk.f32.mxu1 %vm2497_vm1, %v7128_v1  ;;  %5586 = vmatpush3.bf16.msra.mxu1 %v5583_v59  ;;  %v3560_v1 = vld [vmem:[#allocation20] sm:$0xff] }
 0x411   : > { %5588 = vmatprep.subr.bf16.mxu1 %v5587_v0  ;;  %v7277_v3 = vpack.c.bf16 %v3561_v2, %v3560_v1 }
 0x413   : > { %5419 = vmatmul.mubr.msk.f32.gmra.mrb[12].mxu1 %vm2497_vm1, %v7140_v27 }
 0x414   : > { %5421 = vmatprep.mubr.msk.f32.mxu1 %vm2497_vm1, %v7142_v48  ;;  %5590 = vmatpush3.bf16.msra.mxu1 %v5587_v0  ;;  %v3988_v0 = vld [vmem:[#allocation20 + $0x40] sm:$0xff] }
 0x415   : > { %5592 = vmatprep.subr.bf16.mxu1 %v7277_v3 }
 0x417   : > { %5422 = vmatmul.mubr.msk.f32.gmra.mrb[14].mxu1 %vm2497_vm1, %v7154_v10 }
 0x418   : > { %5424 = vmatprep.mubr.msk.f32.mxu1 %vm2497_vm1, %v7158_v13 }
 0x41b   : > { %5425 = vmatmul.mubr.msk.f32.gmra.mrb[16].mxu1 %vm2497_vm1, %v7177_v25 }
 0x41c   : > { %5427 = vmatprep.mubr.msk.f32.mxu1 %vm2497_vm1, %v7179_v29 }
 0x41f   : > { %5428 = vmatmul.mubr.msk.f32.gmra.mrb[0].mxu1 %vm2497_vm1, %v7192_v35 }
 0x420   : > { %5430 = vmatprep.mubr.msk.f32.mxu1 %vm2497_vm1, %v7194_v36 }
 0x423   : > { %5431 = vmatmul.mubr.msk.f32.gmra.mrb[2].mxu1 %vm2497_vm1, %v7203_v32 }
 0x424   : > { %5433 = vmatprep.mubr.msk.f32.mxu1 %vm2497_vm1, %v7205_v37 }
 0x427   : > { %5434 = vmatmul.mubr.msk.f32.gmra.mrb[4].mxu1 %vm2497_vm1, %v2557_v40 }
 0x428   : > { %5436 = vmatprep.mubr.msk.f32.mxu1 %vm2497_vm1, %v3243_v60 }
 0x42b   : > { %5437 = vmatmul.mubr.msk.f32.gmra.mrb[6].mxu1 %vm2497_vm1, %v3244_v53 }
 0x4ac   : > { %v7280_v5 = vpop.f32.mrb[30].mxu0 }
 0x4ad   : > { %v7282_v8 = vpop.f32.mrb[31].mxu0 }
 0x4b0   : > { %v7284_v9 = vpop.f32.mrb[32].mxu0 }
 0x4b1   : > { %v7286_v18 = vpop.f32.mrb[33].mxu0 }
 0x4b4   : > { %v7288_v27 = vpop.f32.mrb[34].mxu0 }
 0x4b5   : > { %v7290_v48 = vpop.f32.mrb[35].mxu0 }
 0x4b8   : > { %v7292_v58 = vpop.f32.mrb[36].mxu0 }
 0x4b9   : > { %v7294_v17 = vpop.f32.mrb[37].mxu0 }
 0x4bc   : > { %v5352_v28 = vpop.f32.mrb[20].mxu0 }
 0x4bd   : > { %v2890_v51 = vpop.f32.mrb[21].mxu0 }
 0x4c0   : > { %v5355_v62 = vpop.f32.mrb[22].mxu0 }
 0x4c1   : > { %v2900_v22 = vpop.f32.mrb[23].mxu0 }
 0x4c4   : > { %v5358_v33 = vpop.f32.mrb[24].mxu0 }
 0x4c5   : > { %v2910_v42 = vpop.f32.mrb[25].mxu0 }
 0x4c8   : > { %v5361_v10 = vpop.f32.mrb[26].mxu0 }
 0x4c9   : > { %v2920_v12 = vpop.f32.mrb[27].mxu0 }
 0x4cc   : > { %v5364_v13 = vpop.f32.mrb[28].mxu0 }
 0x4cd   : > { %v2930_v14 = vpop.f32.mrb[29].mxu0 }
 0x4de   : > { %v5414_v16 = vpop.f32.mrb[8].mxu1 }
 0x4df   : > { %v5617_v19 = vadd.f32 %v5414_v16, %v5352_v28  ;;  %v3368_v20 = vpop.f32.mrb[9].mxu1 }
 0x4e0   : > { %v5618_v23 = vadd.f32 %v3368_v20, %v2890_v51  ;;  %v3989_v51 = vld [vmem:[#allocation20 + $0x48] sm:$0xff] }
 0x4e1   : > { %v3482_v24 = vmul.f32 %v5617_v19, %v7296_v4 }
 0x4e2   : > { %v3481_v25 = vmul.f32 %v5618_v23, %v7296_v4  ;;  %v5417_v26 = vpop.f32.mrb[10].mxu1 }
 0x4e3   : > { %v3506_v29 = vadd.f32 %v7298_v21, %v3482_v24  ;;  %v5619_v30 = vadd.f32 %v5417_v26, %v5355_v62  ;;  %v3378_v57 = vpop.f32.mrb[11].mxu1 }
 0x4e4   : > { %v3505_v31 = vadd.f32 %v7298_v21, %v3481_v25  ;;  %v5620_v34 = vadd.f32 %v3378_v57, %v2900_v22 }
 0x4e5   : > { %3525 = vst.msk [vmem:[#allocation4 + $0x8] sm:$0xff] %vm3523_vm2, %v3506_v29  ;;  %v3484_v35 = vmul.f32 %v5619_v30, %v7296_v4 }
 0x4e6   : > { %3524 = vst.msk [vmem:[#allocation4] sm:$0xff] %vm3523_vm2, %v3505_v31  ;;  %v3483_v7 = vmul.f32 %v5620_v34, %v7296_v4  ;;  %v5420_v36 = vpop.f32.mrb[12].mxu1 }
 0x4e7   : > { %v3508_v46 = vadd.f32 %v7298_v21, %v3484_v35  ;;  %v5621_v32 = vadd.f32 %v5420_v36, %v5358_v33  ;;  %v3388_v47 = vpop.f32.mrb[13].mxu1 }
 0x4e8   : > { %v3507_v37 = vadd.f32 %v7298_v21, %v3483_v7  ;;  %v5622_v38 = vadd.f32 %v3388_v47, %v2910_v42 }
 0x4e9   : > { %3527 = vst.msk [vmem:[#allocation4 + $0x18] sm:$0xff] %vm3523_vm2, %v3508_v46  ;;  %v3486_v39 = vmul.f32 %v5621_v32, %v7296_v4 }
 0x4ea   : > { %3526 = vst.msk [vmem:[#allocation4 + $0x10] sm:$0xff] %vm3523_vm2, %v3507_v37  ;;  %v3485_v40 = vmul.f32 %v5622_v38, %v7296_v4  ;;  %v5423_v41 = vpop.f32.mrb[14].mxu1 }
 0x4eb   : > { %v3510_v43 = vadd.f32 %v7298_v21, %v3486_v39  ;;  %v5623_v50 = vadd.f32 %v5423_v41, %v5361_v10  ;;  %v3398_v44 = vpop.f32.mrb[15].mxu1 }
 0x4ec   : > { %v3509_v6 = vadd.f32 %v7298_v21, %v3485_v40  ;;  %v5624_v11 = vadd.f32 %v3398_v44, %v2920_v12 }
 0x4ed   : > { %3529 = vst.msk [vmem:[#allocation4 + $0x28] sm:$0xff] %vm3523_vm2, %v3510_v43  ;;  %v3488_v45 = vmul.f32 %v5623_v50, %v7296_v4  ;;  %v3564_v49 = vld [vmem:[#allocation4 + $0x1] sm:$0xff] }
 0x4ee   : > { %3528 = vst.msk [vmem:[#allocation4 + $0x20] sm:$0xff] %vm3523_vm2, %v3509_v6  ;;  %v3487_v55 = vmul.f32 %v5624_v11, %v7296_v4  ;;  %v5426_v60 = vpop.f32.mrb[16].mxu1  ;;  %5447 = vmatprep.mubr.msk.f32.mxu1 %vm3523_vm2, %v3564_v49 }
 0x4ef   : > { %v3512_v53 = vadd.f32 %v7298_v21, %v3488_v45  ;;  %v5625_v54 = vadd.f32 %v5426_v60, %v5364_v13  ;;  %v3408_v56 = vpop.f32.mrb[17].mxu1  ;;  %v5603_v60 = vpack.c.bf16 %v3991_v15, %v3990_v52 }
 0x4f0   : > { %v3511_v59 = vadd.f32 %v7298_v21, %v3487_v55  ;;  %v5626_v61 = vadd.f32 %v3408_v56, %v2930_v14  ;;  %v7337_v14 = vpack.c.bf16 %v3989_v51, %v3988_v0  ;;  %v3544_v55 = vld [vmem:[#allocation4] sm:$0xff]  ;;  %v4219_v56 = vld [vmem:[#allocation20 + $0x68] sm:$0xff] }
 0x4f1   : > { %3531 = vst.msk [vmem:[#allocation4 + $0x38] sm:$0xff] %vm3523_vm2, %v3512_v53  ;;  %v3490_v1 = vmul.f32 %v5625_v54, %v7296_v4  ;;  %v3565_v2 = vld [vmem:[#allocation4 + $0x9] sm:$0xff]  ;;  %v7325_v28 = vld [vmem:[#allocation4 + $0x11] sm:$0xff] }
 0x4f2   : > { %3530 = vst.msk [vmem:[#allocation4 + $0x30] sm:$0xff] %vm3523_vm2, %v3511_v59  ;;  %v3489_v62 = vmul.f32 %v5626_v61, %v7296_v4  ;;  %v5429_v22 = vpop.f32.mrb[0].mxu1  ;;  %5448 = vmatmul.mubr.msk.f32.vlgmr.msra.gmra.mrb[18].mxu1 %vm3523_vm2, %v3565_v2  ;;  %v3545_v53 = vld [vmem:[#allocation4 + $0x8] sm:$0xff]  ;;  %v4218_v54 = vld [vmem:[#allocation20 + $0x60] sm:$0xff] }
 0x4f3   : > { %v3514_v33 = vadd.f32 %v7298_v21, %v3490_v1  ;;  %v5627_v42 = vadd.f32 %v5429_v22, %v7280_v5  ;;  %5594 = vmatpush3.bf16.msra.mxu1 %v7277_v3  ;;  %v3418_v10 = vpop.f32.mrb[1].mxu1  ;;  %5450 = vmatprep.mubr.msk.f32.mxu1 %vm3523_vm2, %v7325_v28  ;;  %v3546_v59 = vld [vmem:[#allocation4 + $0x10] sm:$0xff]  ;;  %v5607_v61 = vpack.c.bf16 %v4219_v56, %v4218_v54 }
 0x4f4   : > { %v3513_v12 = vadd.f32 %v7298_v21, %v3489_v62  ;;  %v5628_v13 = vadd.f32 %v3418_v10, %v7282_v8  ;;  %5596 = vmatprep.subr.bf16.mxu1 %v5595_v63  ;;  %v3549_v1 = vld [vmem:[#allocation4 + $0x28] sm:$0xff] }
 0x4f5   : > { %3533 = vst.msk [vmem:[#allocation4 + $0x48] sm:$0xff] %vm3523_vm2, %v3514_v33  ;;  %v3492_v16 = vmul.f32 %v5627_v42, %v7296_v4  ;;  %v7341_v19 = vld [vmem:[#allocation4 + $0x19] sm:$0xff]  ;;  %v7343_v5 = vld [vmem:[#allocation4 + $0x21] sm:$0xff] }
 0x4f6   : > { %3532 = vst.msk [vmem:[#allocation4 + $0x40] sm:$0xff] %vm3523_vm2, %v3513_v12  ;;  %v3491_v3 = vmul.f32 %v5628_v13, %v7296_v4  ;;  %v5432_v20 = vpop.f32.mrb[2].mxu1  ;;  %5451 = vmatmul.mubr.msk.f32.gmra.mrb[20].mxu1 %vm3523_vm2, %v7341_v19  ;;  %v3548_v0 = vld [vmem:[#allocation4 + $0x20] sm:$0xff] }
 0x4f7   : > { %v3516_v8 = vadd.f32 %v7298_v21, %v3492_v16  ;;  %v5629_v23 = vadd.f32 %v5432_v20, %v7284_v9  ;;  %v3428_v24 = vpop.f32.mrb[3].mxu1  ;;  %5453 = vmatprep.mubr.msk.f32.mxu1 %vm3523_vm2, %v7343_v5  ;;  %5598 = vmatpush3.bf16.msra.mxu1 %v5595_v63  ;;  %v3547_v63 = vld [vmem:[#allocation4 + $0x18] sm:$0xff]  ;;  %v4220_v16 = vld [vmem:[#allocation20 + $0x70] sm:$0xff] }
 0x4f8   : > { %v3515_v25 = vadd.f32 %v7298_v21, %v3491_v3  ;;  %v5630_v26 = vadd.f32 %v3428_v24, %v7286_v18  ;;  %5600 = vmatprep.subr.bf16.mxu1 %v7337_v14  ;;  %v3551_v51 = vld [vmem:[#allocation4 + $0x38] sm:$0xff]  ;;  %v4221_v3 = vld [vmem:[#allocation20 + $0x78] sm:$0xff]  ;;  %v4939_v24 = vld [vmem:[#allocation23] ss:$0 sm:$0xff] }
 0x4f9   : > { %3535 = vst.msk [vmem:[#allocation4 + $0x58] sm:$0xff] %vm3523_vm2, %v3516_v8  ;;  %v3494_v29 = vmul.f32 %v5629_v23, %v7296_v4  ;;  %v7358_v30 = vld [vmem:[#allocation4 + $0x29] sm:$0xff]  ;;  %v7360_v57 = vld [vmem:[#allocation4 + $0x31] sm:$0xff]  ;;  %v5611_v20 = vpack.c.bf16 %v4221_v3, %v4220_v16 }
 0x4fa   : > { %3534 = vst.msk [vmem:[#allocation4 + $0x50] sm:$0xff] %vm3523_vm2, %v3515_v25  ;;  %v3493_v9 = vmul.f32 %v5630_v26, %v7296_v4  ;;  %v5435_v31 = vpop.f32.mrb[4].mxu1  ;;  %5454 = vmatmul.mubr.msk.f32.gmra.mrb[22].mxu1 %vm3523_vm2, %v7358_v30  ;;  %v3550_v2 = vld [vmem:[#allocation4 + $0x30] sm:$0xff] }
 0x4fb   : > { %v3518_v18 = vadd.f32 %v7298_v21, %v3494_v29  ;;  %v5631_v34 = vadd.f32 %v5435_v31, %v7288_v27  ;;  %v3438_v35 = vpop.f32.mrb[5].mxu1  ;;  %5456 = vmatprep.mubr.msk.f32.mxu1 %vm3523_vm2, %v7360_v57 }
 0x4fc   : > { %v3517_v7 = vadd.f32 %v7298_v21, %v3493_v9  ;;  %v5632_v36 = vadd.f32 %v3438_v35, %v7290_v48  ;;  %v3553_v22 = vld [vmem:[#allocation4 + $0x48] sm:$0xff] }
 0x4fd   : > { %3537 = vst.msk [vmem:[#allocation4 + $0x68] sm:$0xff] %vm3523_vm2, %v3518_v18  ;;  %v3496_v46 = vmul.f32 %v5631_v34, %v7296_v4  ;;  %v7374_v32 = vld [vmem:[#allocation4 + $0x39] sm:$0xff]  ;;  %v7376_v47 = vld [vmem:[#allocation4 + $0x41] sm:$0xff] }
 0x4fe   : > { %3536 = vst.msk [vmem:[#allocation4 + $0x60] sm:$0xff] %vm3523_vm2, %v3517_v7  ;;  %v3495_v27 = vmul.f32 %v5632_v36, %v7296_v4  ;;  %v5438_v37 = vpop.f32.mrb[6].mxu1  ;;  %5457 = vmatmul.mubr.msk.f32.gmra.mrb[24].mxu1 %vm3523_vm2, %v7374_v32  ;;  %v3552_v62 = vld [vmem:[#allocation4 + $0x40] sm:$0xff] }
 0x4ff   : > { %v3520_v38 = vadd.f32 %v7298_v21, %v3496_v46  ;;  %v5633_v48 = vadd.f32 %v5438_v37, %v7292_v58  ;;  %v3448_v39 = vpop.f32.mrb[7].mxu1  ;;  %5459 = vmatprep.mubr.msk.f32.mxu1 %vm3523_vm2, %v7376_v47 }
 0x500   : > { %v3519_v40 = vadd.f32 %v7298_v21, %v3495_v27  ;;  %v5634_v41 = vadd.f32 %v3448_v39, %v7294_v17  ;;  %v3555_v42 = vld [vmem:[#allocation4 + $0x58] sm:$0xff] }
 0x501   : > { %3539 = vst.msk [vmem:[#allocation4 + $0x78] sm:$0xff] %vm3523_vm2, %v3520_v38  ;;  %v3498_v43 = vmul.f32 %v5633_v48, %v7296_v4  ;;  %v7390_v50 = vld [vmem:[#allocation4 + $0x49] sm:$0xff]  ;;  %v7392_v44 = vld [vmem:[#allocation4 + $0x51] sm:$0xff] }
 0x502   : > { %3538 = vst.msk [vmem:[#allocation4 + $0x70] sm:$0xff] %vm3523_vm2, %v3519_v40  ;;  %v3497_v58 = vmul.f32 %v5634_v41, %v7296_v4  ;;  %5460 = vmatmul.mubr.msk.f32.gmra.mrb[26].mxu1 %vm3523_vm2, %v7390_v50  ;;  %v3554_v33 = vld [vmem:[#allocation4 + $0x50] sm:$0xff] }
 0x503   : > { %v3522_v6 = vadd.f32 %v7298_v21, %v3498_v43  ;;  %5462 = vmatprep.mubr.msk.f32.mxu1 %vm3523_vm2, %v7392_v44 }
 0x504   : > { %v3521_v17 = vadd.f32 %v7298_v21, %v3497_v58  ;;  %v3557_v12 = vld [vmem:[#allocation4 + $0x68] sm:$0xff] }
 0x505   : > { %3541 = vst.msk [vmem:[#allocation4 + $0x88] sm:$0xff] %vm3523_vm2, %v3522_v6  ;;  %v7403_v11 = vld [vmem:[#allocation4 + $0x59] sm:$0xff]  ;;  %v7405_v45 = vld [vmem:[#allocation4 + $0x61] sm:$0xff] }
 0x506   : > { %3540 = vst.msk [vmem:[#allocation4 + $0x80] sm:$0xff] %vm3523_vm2, %v3521_v17  ;;  %5463 = vmatmul.mubr.msk.f32.gmra.mrb[28].mxu1 %vm3523_vm2, %v7403_v11  ;;  %v3556_v10 = vld [vmem:[#allocation4 + $0x60] sm:$0xff] }
 0x507   : > { %5465 = vmatprep.mubr.msk.f32.mxu1 %vm3523_vm2, %v7405_v45 }
 0x509   : > { %v7412_v4 = vld [vmem:[#allocation4 + $0x69] sm:$0xff]  ;;  %v7414_v49 = vld [vmem:[#allocation4 + $0x71] sm:$0xff] }
 0x50a   : > { %5466 = vmatmul.mubr.msk.f32.gmra.mrb[30].mxu1 %vm3523_vm2, %v7412_v4  ;;  %v3558_v13 = vld [vmem:[#allocation4 + $0x70] sm:$0xff] }
 0x50b   : > { %5468 = vmatprep.mubr.msk.f32.mxu1 %vm3523_vm2, %v7414_v49 }
 0x50c   : > { %v3986_v23 = vld [vmem:[#allocation4 + $0x88] sm:$0xff] }
 0x50d   : > { %v7420_v21 = vld [vmem:[#allocation4 + $0x79] sm:$0xff] }
 0x50e   : > { %5469 = vmatmul.mubr.msk.f32.gmra.mrb[32].mxu1 %vm3523_vm2, %v7420_v21  ;;  %v3985_v8 = vld [vmem:[#allocation4 + $0x80] sm:$0xff] }
 0x50f   : > { %5479 = vmatprep.mubr.msk.f32.mxu1 %vm3523_vm2, %v3544_v55 }
 0x512   : > { %5480 = vmatmul.mubr.msk.f32.vlgmr.msra.gmra.mrb[18].mxu1 %vm3523_vm2, %v3545_v53 }
 0x513   : > { %5602 = vmatpush3.bf16.msra.mxu1 %v7337_v14  ;;  %5482 = vmatprep.mubr.msk.f32.mxu1 %vm3523_vm2, %v3546_v59  ;;  %v3559_v14 = vld [vmem:[#allocation4 + $0x78] sm:$0xff] }
 0x514   : > { %5604 = vmatprep.subr.bf16.mxu1 %v5603_v60 }
 0x516   : > { %5483 = vmatmul.mubr.msk.f32.gmra.mrb[20].mxu1 %vm3523_vm2, %v3547_v63 }
 0x517   : > { %5485 = vmatprep.mubr.msk.f32.mxu1 %vm3523_vm2, %v3548_v0  ;;  %5606 = vmatpush3.bf16.msra.mxu1 %v5603_v60 }
 0x518   : > { %5608 = vmatprep.subr.bf16.mxu1 %v5607_v61 }
 0x51a   : > { %5486 = vmatmul.mubr.msk.f32.gmra.mrb[22].mxu1 %vm3523_vm2, %v3549_v1 }
 0x51b   : > { %5488 = vmatprep.mubr.msk.f32.mxu1 %vm3523_vm2, %v3550_v2 }
 0x51e   : > { %5489 = vmatmul.mubr.msk.f32.gmra.mrb[24].mxu1 %vm3523_vm2, %v3551_v51 }
 0x51f   : > { %5491 = vmatprep.mubr.msk.f32.mxu1 %vm3523_vm2, %v3552_v62 }
 0x522   : > { %5492 = vmatmul.mubr.msk.f32.gmra.mrb[26].mxu1 %vm3523_vm2, %v3553_v22 }
 0x523   : > { %5494 = vmatprep.mubr.msk.f32.mxu1 %vm3523_vm2, %v3554_v33 }
 0x526   : > { %5495 = vmatmul.mubr.msk.f32.gmra.mrb[28].mxu1 %vm3523_vm2, %v3555_v42 }
 0x527   : > { %5497 = vmatprep.mubr.msk.f32.mxu1 %vm3523_vm2, %v3556_v10 }
 0x52a   : > { %5498 = vmatmul.mubr.msk.f32.gmra.mrb[30].mxu1 %vm3523_vm2, %v3557_v12 }
 0x52b   : > { %5500 = vmatprep.mubr.msk.f32.mxu1 %vm3523_vm2, %v3558_v13 }
 0x52e   : > { %5501 = vmatmul.mubr.msk.f32.gmra.mrb[32].mxu1 %vm3523_vm2, %v3559_v14 }
 0x52f   : > { %5511 = vmatprep.mubr.msk.f32.mxu1 %vm3523_vm2, %v3546_v59 }
 0x532   : > { %5512 = vmatmul.mubr.msk.f32.vlgmr.msra.gmra.mrb[18].mxu1 %vm3523_vm2, %v3547_v63 }
 0x533   : > { %5610 = vmatpush3.bf16.msra.mxu1 %v5607_v61  ;;  %5514 = vmatprep.mubr.msk.f32.mxu1 %vm3523_vm2, %v3548_v0 }
 0x534   : > { %5612 = vmatprep.subr.bf16.mxu1 %v5611_v20 }
 0x536   : > { %5515 = vmatmul.mubr.msk.f32.gmra.mrb[20].mxu1 %vm3523_vm2, %v3549_v1 }
 0x537   : > { %5517 = vmatprep.mubr.msk.f32.mxu1 %vm3523_vm2, %v3550_v2  ;;  %5614 = vmatpush3.bf16.msra.mxu1 %v5611_v20 }
 0x53a   : > { %5518 = vmatmul.mubr.msk.f32.gmra.mrb[22].mxu1 %vm3523_vm2, %v3551_v51 }
 0x53b   : > { %5520 = vmatprep.mubr.msk.f32.mxu1 %vm3523_vm2, %v3552_v62 }
 0x53e   : > { %5521 = vmatmul.mubr.msk.f32.gmra.mrb[24].mxu1 %vm3523_vm2, %v3553_v22 }
 0x53f   : > { %5523 = vmatprep.mubr.msk.f32.mxu1 %vm3523_vm2, %v3554_v33 }
 0x542   : > { %5524 = vmatmul.mubr.msk.f32.gmra.mrb[26].mxu1 %vm3523_vm2, %v3555_v42 }
 0x543   : > { %5526 = vmatprep.mubr.msk.f32.mxu1 %vm3523_vm2, %v3556_v10 }
 0x546   : > { %5527 = vmatmul.mubr.msk.f32.gmra.mrb[28].mxu1 %vm3523_vm2, %v3557_v12 }
 0x547   : > { %5529 = vmatprep.mubr.msk.f32.mxu1 %vm3523_vm2, %v3558_v13 }
 0x54a   : > { %5530 = vmatmul.mubr.msk.f32.gmra.mrb[30].mxu1 %vm3523_vm2, %v3559_v14 }
 0x54b   : > { %5532 = vmatprep.mubr.msk.f32.mxu1 %vm3523_vm2, %v3985_v8 }
 0x54e   : > { %5533 = vmatmul.mubr.msk.f32.gmra.mrb[32].mxu1 %vm3523_vm2, %v3986_v23 }
 0x54f   : > { %5543 = vmatprep.mubr.msk.f32.mxu1 %vm3523_vm2, %v7325_v28  ;;  %v4215_v28 = vld [vmem:[#allocation4 + $0x81] sm:$0xff] }
 0x552   : > { %5544 = vmatmul.mubr.msk.f32.vlgmr.msra.gmra.mrb[18].mxu1 %vm3523_vm2, %v7341_v19  ;;  %v4216_v19 = vld [vmem:[#allocation4 + $0x89] sm:$0xff] }
 0x553   : > { %5546 = vmatprep.mubr.msk.f32.mxu1 %vm3523_vm2, %v7343_v5  ;;  %v4938_v5 = vld [vmem:[#allocation22] ss:$0 sm:$0xff] }
 0x556   : > { %5547 = vmatmul.mubr.msk.f32.gmra.mrb[20].mxu1 %vm3523_vm2, %v7358_v30 }
 0x557   : > { %5549 = vmatprep.mubr.msk.f32.mxu1 %vm3523_vm2, %v7360_v57 }
 0x55a   : > { %5550 = vmatmul.mubr.msk.f32.gmra.mrb[22].mxu1 %vm3523_vm2, %v7374_v32 }
 0x55b   : > { %5552 = vmatprep.mubr.msk.f32.mxu1 %vm3523_vm2, %v7376_v47 }
 0x55e   : > { %5553 = vmatmul.mubr.msk.f32.gmra.mrb[24].mxu1 %vm3523_vm2, %v7390_v50 }
 0x55f   : > { %5555 = vmatprep.mubr.msk.f32.mxu1 %vm3523_vm2, %v7392_v44 }
 0x562   : > { %5556 = vmatmul.mubr.msk.f32.gmra.mrb[26].mxu1 %vm3523_vm2, %v7403_v11 }
 0x563   : > { %5558 = vmatprep.mubr.msk.f32.mxu1 %vm3523_vm2, %v7405_v45 }
 0x566   : > { %5559 = vmatmul.mubr.msk.f32.gmra.mrb[28].mxu1 %vm3523_vm2, %v7412_v4 }
 0x567   : > { %5561 = vmatprep.mubr.msk.f32.mxu1 %vm3523_vm2, %v7414_v49 }
 0x56a   : > { %5562 = vmatmul.mubr.msk.f32.gmra.mrb[30].mxu1 %vm3523_vm2, %v7420_v21 }
 0x56b   : > { %5564 = vmatprep.mubr.msk.f32.mxu1 %vm3523_vm2, %v4215_v28 }
 0x56e   : > { %5565 = vmatmul.mubr.msk.f32.gmra.mrb[32].mxu1 %vm3523_vm2, %v4216_v19 }
 0x625   : > { %v5545_v25 = vpop.f32.mrb[18].mxu1 }
 0x626   : > { %v4336_v26 = vpop.f32.mrb[19].mxu1 }
 0x627   : > { %v4437_v29 = vmul.f32 %v4938_v5, %v4336_v26 }
 0x629   : > { %v4459_v30 = vadd.f32 %v4939_v24, %v4437_v29  ;;  %v5548_v57 = vpop.f32.mrb[20].mxu1 }
 0x62a   : > { %v4346_v9 = vpop.f32.mrb[21].mxu1 }
 0x62b   : > { %4476 = vst.msk [vmem:[#allocation5] sm:$0xff] %vm4475_vm3, %v4459_v30  ;;  %v4439_v31 = vmul.f32 %v4938_v5, %v4346_v9 }
 0x62d   : > { %v4461_v18 = vadd.f32 %v4939_v24, %v4439_v31  ;;  %v5551_v34 = vpop.f32.mrb[22].mxu1 }
 0x62e   : > { %v4356_v35 = vpop.f32.mrb[23].mxu1 }
 0x62f   : > { %4478 = vst.msk [vmem:[#allocation5 + $0x10] sm:$0xff] %vm4475_vm3, %v4461_v18  ;;  %v4441_v7 = vmul.f32 %v4938_v5, %v4356_v35 }
 0x631   : > { %v4463_v36 = vadd.f32 %v4939_v24, %v4441_v7  ;;  %v5554_v46 = vpop.f32.mrb[24].mxu1 }
 0x632   : > { %v4492_v32 = vld [vmem:[#allocation5] sm:$0xff]  ;;  %v4366_v47 = vpop.f32.mrb[25].mxu1 }
 0x633   : > { %4493 = vst.msk [vmem:[%s7493_s16] sm:$0xff] %vm4475_vm3, %v4492_v32  ;;  %4480 = vst.msk [vmem:[#allocation5 + $0x20] sm:$0xff] %vm4475_vm3, %v4463_v36  ;;  %v4443_v27 = vmul.f32 %v4938_v5, %v4366_v47 }
 0x635   : > { %v4465_v37 = vadd.f32 %v4939_v24, %v4443_v27  ;;  %v5557_v38 = vpop.f32.mrb[26].mxu1 }
 0x636   : > { %v4494_v48 = vld [vmem:[#allocation5 + $0x10] sm:$0xff]  ;;  %v4376_v39 = vpop.f32.mrb[27].mxu1 }
 0x637   : > { %4495 = vst.msk [vmem:[%s7493_s16 + $0x8] sm:$0xff] %vm4475_vm3, %v4494_v48  ;;  %4482 = vst.msk [vmem:[#allocation5 + $0x30] sm:$0xff] %vm4475_vm3, %v4465_v37  ;;  %v4445_v40 = vmul.f32 %v4938_v5, %v4376_v39 }
 0x639   : > { %v4467_v41 = vadd.f32 %v4939_v24, %v4445_v40  ;;  %v5560_v43 = vpop.f32.mrb[28].mxu1 }
 0x63a   : > { %v4496_v50 = vld [vmem:[#allocation5 + $0x20] sm:$0xff]  ;;  %v4386_v44 = vpop.f32.mrb[29].mxu1 }
 0x63b   : > { %4497 = vst.msk [vmem:[%s7493_s16 + $0x10] sm:$0xff] %vm4475_vm3, %v4496_v50  ;;  %4484 = vst.msk [vmem:[#allocation5 + $0x40] sm:$0xff] %vm4475_vm3, %v4467_v41  ;;  %v4447_v58 = vmul.f32 %v4938_v5, %v4386_v44 }
 0x63d   : > { %v4469_v6 = vadd.f32 %v4939_v24, %v4447_v58  ;;  %v5563_v17 = vpop.f32.mrb[30].mxu1 }
 0x63e   : > { %v4498_v11 = vld [vmem:[#allocation5 + $0x30] sm:$0xff]  ;;  %v4396_v45 = vpop.f32.mrb[31].mxu1 }
 0x63f   : > { %4499 = vst.msk [vmem:[%s7493_s16 + $0x18] sm:$0xff] %vm4475_vm3, %v4498_v11  ;;  %4486 = vst.msk [vmem:[#allocation5 + $0x50] sm:$0xff] %vm4475_vm3, %v4469_v6  ;;  %v4449_v4 = vmul.f32 %v4938_v5, %v4396_v45 }
 0x641   : > { %v4471_v49 = vadd.f32 %v4939_v24, %v4449_v4  ;;  %v5566_v21 = vpop.f32.mrb[32].mxu1 }
 0x642   : > { %v4500_v52 = vld [vmem:[#allocation5 + $0x40] sm:$0xff]  ;;  %v4406_v15 = vpop.f32.mrb[33].mxu1 }
 0x643   : > { %4501 = vst.msk [vmem:[%s7493_s16 + $0x20] sm:$0xff] %vm4475_vm3, %v4500_v52  ;;  %4488 = vst.msk [vmem:[#allocation5 + $0x60] sm:$0xff] %vm4475_vm3, %v4471_v49  ;;  %v4451_v55 = vmul.f32 %v4938_v5, %v4406_v15 }
 0x645   : > { %v4473_v60 = vadd.f32 %v4939_v24, %v4451_v55 }
 0x646   : > { %v4502_v53 = vld [vmem:[#allocation5 + $0x50] sm:$0xff] }
 0x647   : > { %4503 = vst.msk [vmem:[%s7493_s16 + $0x28] sm:$0xff] %vm4475_vm3, %v4502_v53  ;;  %4490 = vst.msk [vmem:[#allocation5 + $0x70] sm:$0xff] %vm4475_vm3, %v4473_v60 }
 0x64a   : > { %v4504_v54 = vld [vmem:[#allocation5 + $0x60] sm:$0xff] }
 0x64b   : > { %4505 = vst.msk [vmem:[%s7493_s16 + $0x30] sm:$0xff] %vm4475_vm3, %v4504_v54 }
 0x64e   : > { %v4506_v56 = vld [vmem:[#allocation5 + $0x70] sm:$0xff] }
 0x64f   : > { %4507 = vst.msk [vmem:[%s7493_s16 + $0x38] sm:$0xff] %vm4475_vm3, %v4506_v56 }
 0x650 PF: > { %s7569_s28 = sld [smem:[#allocation32_spill]] }
 0x656   : > { %s30_s25 = sadd.s32 1, %s7569_s28  }
 0x657   : > { %p27_p7 = scmp.ge.s32.totalorder %s30_s25, 4  }
 0x659   :  { %29 = sbr.rel (!%p27_p7) target bundleno = 12 (0xc), region = 163 }
 0x660   :  { %4529 = vsyncpa [#allocation7], 1 }
 0x661   :  { %4531 = vsyncpa [#allocation7 + $0x1], 1 }
 0x662   :  { %4532 = vsyncpa [#allocation9], 1 }
 0x663   :  { %4533 = vsyncpa [#allocation12], 1 }
 0x664   :  { %4534 = vsyncpa [#allocation15], 1 }
 0x665   :  { %4535 = vsyncpa [#allocation18], 1 }
 0x666   :  { %4536 = vsyncpa [#allocation21], 1 }
 0x667   :  { %4537 = vsyncpa [#allocation24], 1 }

// kernel: alphago_policy_forward.4
= control target key start
LH: loop header
LB: loop body
LE: loop exit
PB: predicated region body
PF: predicated region fallthrough
CT: control target
= control target key end

     0   :  { %s12515_s0 = inlined_call_operand.vmem [shape: f32[8,4096], index: 0, kind: input, shape index: {}]   ;;  %s12516_s1 = inlined_call_operand.hbm [shape: bf16[4096,1024], index: 1, kind: input, shape index: {}]   ;;  %s12517_s2 = inlined_call_operand.hbm [shape: f32[1,1024], index: 2, kind: input, shape index: {}]   ;;  %s12518_s3 = inlined_call_operand.hbm [shape: f32[1,1024], index: 3, kind: input, shape index: {}]   ;;  %s12519_s4 = inlined_call_operand.vmem [shape: f32[8,1024], index: 4, kind: output, shape index: {}]  }
   0x1   :  { %12525 = sst [smem:[#allocation10_spill]] %s12516_s1 }
   0x2   :  { %12526 = sst [smem:[#allocation11_spill]] %s12517_s2 }
   0x3   :  { %9 = vsyncpa [#allocation3], 0 }
   0x4   :  { %11 = vsyncpa [#allocation3 + $0x1], 0 }
   0x5   :  { %12 = vsyncpa [#allocation5], 0 }
   0x6   :  { %14 = vsyncpa [#allocation5 + $0x1], 0  ;;  %s10967_s15 = smov 0   ;;  %s10969_s16 = smov 0  }
   0x7   :  { %s10971_s17 = smov 0   ;;  %s10973_s18 = smov 0  }
   0x8   :  { %s10975_s19 = smov 0   ;;  %s10977_s20 = smov 0  }
   0x9 LB: > { %s12521_s21 = sadd.s32 4294967295, %s10933_s20   ;;  %s35_s22 = sadd.s32 1, %s10929_s19  ;;  %s10933_s20 = sphi %s10977_s20, %s20_s20   ;;  %s10929_s19 = sphi %s10975_s19, %s12544_s19   ;;  %s10925_s18 = sphi %s10973_s18, %s12543_s18   ;;  %s10921_s17 = sphi %s10971_s17, %s12542_s17   ;;  %s10917_s16 = sphi %s10969_s16, %s12541_s16   ;;  %s10913_s15 = sphi %s10967_s15, %s12540_s15  }
   0xa   : > { %p37_p0 = scmp.ge.s32.totalorder %s35_s22, 2  ;;  %s76_s23 = sadd.s32 1, %s10921_s17 }
   0xb   : > { %p83_p1 = scmp.ne.s32.totalorder %s10921_s17, %s10917_s16  ;;  %p84_p2 = scmp.eq.s32.totalorder %s10933_s20, 0 }
   0xc   : > { %s12546_s22 = smov (%p37_p0, %s35_s22), 0  ;;  %p89_p4 = scmp.ne.s32.totalorder %s10917_s16, %s10913_s15 }
   0xd   : > { %12527 = sst [smem:[#allocation9_spill]] %s12546_s22  ;;  %p85_p3 = por %p84_p2, %p83_p1 }
   0xe   : > { %s72_s24 = ssub.s32 %s10929_s19, %s12546_s22  ;;  %p90_p5 = scmp.eq.s32.totalorder %s12521_s21, 0 }
   0xf   : > { %p74_p6 = scmp.eq.s32.totalorder %s72_s24, 0  ;;  %p9200_p8 = scmp.lt.s32.totalorder %s10933_s20, 2 }
  0x10   : > { %p11008_p7 = por %p90_p5, %p89_p4  ;;  %s11017_s27 = sand.u32 1, %s10921_s17  }
  0x11   : > { %s11014_s26 = scalar_select %p74_p6, %s10921_s17, %s76_s23  }
  0x12   : > { %s12528_s25 = scalar_select %p11008_p7, 1, 0 }
  0x13   : > { %p11019_p9 = pnand %p9200_p8, %p85_p3  ;;  %s8140_s29 = sshll.u32 %s11017_s27, 13 }
  0x14   : > { %s210_s30 = scalar_lea.vmem [#allocation2], %s8140_s29  ;;  %s230_s6 = sand.u32 1, %s10933_s20  }
  0x15   : > { %s12529_s28 = scalar_select %p11019_p9, 1, 0 }
  0x16   : > { %s220_s5 = sshll.u32 %s210_s30, 4  ;;  %s12522_s7 = sshll.u32 %s11017_s27, 2  ;;  %s11025_s5 = int_to_ptr.vmem [resolvable:$true] %s220_s5 }
  0x17   : > { %s9182_s8 = sshll.u32 %s10929_s19, 6  ;;  %s12530_s2 = sld [smem:[#allocation11_spill]] }
  0x18   : > { %s234_s12 = scalar_lea.vmem [#allocation4], %s12522_s7  ;;  %s11041_s23 = scalar_lea.hbm %s12518_s3, %s9182_s8 }
  0x19   : > { %s242_s13 = sshll.u32 %s234_s12, 4  ;;  %s11043_s24 = scalar_lea.sflag [#allocation5], %s230_s6  ;;  %s11036_s13 = int_to_ptr.vmem [resolvable:$true] %s242_s13 }
  0x1a   : > { %p11049_p11 = pneg %p11019_p9 }
  0x1d   : > { %s11032_s11 = scalar_lea.hbm %s12530_s2, %s9182_s8  ;;  %s10794_s12 = scalar_lea.hbm %s12530_s2, 128 }
  0x1e   : > { %s10789_s29 = scalar_lea.hbm %s11032_s11, 64  ;;  %p10795_p0 = scmp.lt.u32.totalorder %s11032_s11, %s12530_s2 }
  0x1f   : > { %p10790_p10 = scmp.ne.s32.totalorder %s11032_s11, %s10789_s29  ;;  %p10796_p1 = scmp.lt.u32.totalorder %s10794_s12, %s10789_s29 }
  0x20   : > { %p10798_p3 = scmp.lt.u32.totalorder %s10789_s29, %s11032_s11 }
  0x21   : > { %p10792_p12 = pnand %p11049_p11, %p10790_p10  ;;  %p10797_p2 = por %p10796_p1, %p10795_p0 }
  0x23   : > { %p10793_p13 = pneg %p10792_p12  ;;  %p10799_p4 = por %p10798_p3, %p10797_p2 }
  0x25   : > { %p10800_p5 = pnand %p10799_p4, %p10793_p13 }
  0x27   : > { %10803 = shalt.err (!%p10800_p5)
}
  0x28   : > { %s10804_s6 = scalar_lea.vmem %s11036_s13, 64  ;;  %s10935_s15 = smov [#allocation4]  }
  0x29   : > { %p10805_p6 = scmp.ne.s32.totalorder %s11036_s13, %s10804_s6  ;;  %s10809_s9 = sshll.u32 %s10935_s15, 4  ;;  %s10810_s9 = int_to_ptr.vmem [resolvable:$false] %s10809_s9 }
  0x2a   : > { %s10811_s10 = scalar_lea.vmem %s10810_s9, 128  ;;  %p10812_p12 = scmp.lt.s32.totalorder %s11036_s13, %s10810_s9 }
  0x2b   : > { %p10807_p8 = pnand %p10805_p6, %p11049_p11  ;;  %p10813_p7 = scmp.lt.s32.totalorder %s10811_s10, %s10804_s6 }
  0x2d   : > { %p10808_p10 = pneg %p10807_p8  ;;  %p10814_p0 = por %p10813_p7, %p10812_p12 }
  0x2f   : > { %p10815_p1 = pnand %p10814_p0, %p10808_p10 }
  0x31   : > { %10818 = shalt.err (!%p10815_p1)
}
  0x32   : > { %9196 = dma.hbm_to_vmem [thread:$0]  (!%p11019_p9), %s11032_s11, 64, %s11036_s13, %s11043_s24  }
  0x33   : > { %p8149_p13 = scmp.ge.s32.totalorder %s10933_s20, 1  ;;  %p266_p2 = scmp.lt.s32.totalorder %s10933_s20, 3 }
  0x34   : > { %s9181_s29 = sshll.u32 %s10929_s19, 8  ;;  %s12533_s1 = sld [smem:[#allocation10_spill]] }
  0x35   : > { %p11076_p3 = pnand %p8149_p13, %p266_p2  ;;  %s207_s15 = scalar_lea.sflag [#allocation3], %s11017_s27 }
  0x37   : > { %s12532_s12 = scalar_select %p11076_p3, 1, 0 }
  0x3a   : > { %s11083_s6 = scalar_lea.hbm %s12533_s1, %s9181_s29  ;;  %s10824_s10 = scalar_lea.hbm %s12533_s1, 262144 }
  0x3b   : > { %s10819_s9 = scalar_lea.hbm %s11083_s6, 131072  ;;  %p10825_p6 = scmp.lt.u32.totalorder %s11083_s6, %s12533_s1 }
  0x3c   : > { %p10820_p7 = scmp.ne.s32.totalorder %s11083_s6, %s10819_s9  ;;  %p10826_p8 = scmp.lt.u32.totalorder %s10824_s10, %s10819_s9 }
  0x3d   : > { %p10828_p12 = scmp.lt.u32.totalorder %s10819_s9, %s11083_s6 }
  0x3e   : > { %p10822_p4 = pnand %p10820_p7, %p11049_p11  ;;  %p10827_p10 = por %p10826_p8, %p10825_p6 }
  0x40   : > { %p10823_p5 = pneg %p10822_p4  ;;  %p10829_p0 = por %p10828_p12, %p10827_p10 }
  0x42   : > { %p10830_p1 = pnand %p10829_p0, %p10823_p5 }
  0x44   : > { %10833 = shalt.err (!%p10830_p1)
}
  0x45   : > { %s10834_s29 = scalar_lea.vmem %s11025_s5, 131072  ;;  %s10936_s14 = smov [#allocation2]  }
  0x46   : > { %p10835_p13 = scmp.ne.s32.totalorder %s11025_s5, %s10834_s29  ;;  %s10839_s8 = sshll.u32 %s10936_s14, 4  ;;  %s10840_s8 = int_to_ptr.vmem [resolvable:$false] %s10839_s8 }
  0x47   : > { %s10841_s21 = scalar_lea.vmem %s10840_s8, 262144  ;;  %p10842_p4 = scmp.lt.s32.totalorder %s11025_s5, %s10840_s8 }
  0x48   : > { %p10837_p2 = pnand %p10835_p13, %p11049_p11  ;;  %p10843_p3 = scmp.lt.s32.totalorder %s10841_s21, %s10834_s29 }
  0x4a   : > { %p10838_p7 = pneg %p10837_p2  ;;  %p10844_p6 = por %p10843_p3, %p10842_p4 }
  0x4c   : > { %p10845_p8 = pnand %p10844_p6, %p10838_p7 }
  0x4e   : > { %10848 = shalt.err (!%p10845_p8)
}
  0x4f   : > { %s10937_s7 = smov 512   ;;  %s10938_s9 = smov 256  }
  0x50   : > { %s10939_s11 = smov 16   ;;  %s12534_s13 = sshll.u32 %s11017_s27, 2 }
  0x51   : > { %9193 = dma.hbm_to_vmem [thread:$0]  (!%p11019_p9), %s11083_s6, 131072, %s11025_s5, %s207_s15, %s10937_s7, %s10938_s9, %s10939_s11  }
  0x52   : > { %s253_s10 = scalar_lea.vmem [#allocation6], %s12534_s13  ;;  %s10849_s14 = scalar_lea.hbm %s11041_s23, 64 }
  0x53   : > { %s261_s29 = sshll.u32 %s253_s10, 4  ;;  %p10850_p3 = scmp.ne.s32.totalorder %s11041_s23, %s10849_s14  ;;  %s262_s29 = int_to_ptr.vmem [resolvable:$true] %s261_s29 }
  0x54   : > { %s10854_s1 = scalar_lea.hbm %s12518_s3, 128  ;;  %p10855_p12 = scmp.lt.u32.totalorder %s11041_s23, %s12518_s3 }
  0x55   : > { %p10852_p5 = pnand %p10850_p3, %p11049_p11  ;;  %p10856_p0 = scmp.lt.u32.totalorder %s10854_s1, %s10849_s14 }
  0x56   : > { %p10858_p13 = scmp.lt.u32.totalorder %s10849_s14, %s11041_s23 }
  0x57   : > { %p10853_p10 = pneg %p10852_p5  ;;  %p10857_p1 = por %p10856_p0, %p10855_p12 }
  0x59   : > { %p10859_p2 = por %p10858_p13, %p10857_p1 }
  0x5b   : > { %p10860_p7 = pnand %p10859_p2, %p10853_p10 }
  0x5d   : > { %10863 = shalt.err (!%p10860_p7)
}
  0x5e   : > { %s10864_s27 = scalar_lea.vmem %s262_s29, 64  ;;  %s10940_s5 = smov [#allocation6]  }
  0x5f   : > { %p10865_p4 = scmp.ne.s32.totalorder %s262_s29, %s10864_s27  ;;  %s10869_s6 = sshll.u32 %s10940_s5, 4  ;;  %s10870_s6 = int_to_ptr.vmem [resolvable:$false] %s10869_s6 }
  0x60   : > { %s10871_s15 = scalar_lea.vmem %s10870_s6, 128  ;;  %p10872_p3 = scmp.lt.s32.totalorder %s262_s29, %s10870_s6 }
  0x61   : > { %p10867_p6 = pnand %p10865_p4, %p11049_p11  ;;  %p10873_p5 = scmp.lt.s32.totalorder %s10871_s15, %s10864_s27 }
  0x63   : > { %p10868_p8 = pneg %p10867_p6  ;;  %p10874_p9 = por %p10873_p5, %p10872_p3 }
  0x65   : > { %p10875_p0 = pnand %p10874_p9, %p10868_p8 }
  0x67   : > { %10878 = shalt.err (!%p10875_p0)
}
  0x68   : > { %p12535_p12 = scmp.ne.s32.totalorder %s12529_s28, 0  ;;  %p12536_p10 = scmp.ne.s32.totalorder %s12532_s12, 0 }
  0x69   : > { %s11132_s1 = sand.u32 (!%p12536_p10), 1, %s10917_s16   ;;  %p12537_p9 = scmp.ne.s32.totalorder (!%p12536_p10), %s12528_s25, 0 }
  0x6a   : > { %9199 = dma.hbm_to_vmem [thread:$0]  (!%p12535_p12), %s11041_s23, 64, %s262_s29, %s11043_s24  }
  0x6b   : > { %270 = sbr.rel (%p12536_p10) target bundleno = 1377 (0x561), region = 36  ;;  %s8150_s2 = sshll.u32 (!%p12536_p10), %s11132_s1, 13 }
  0x6c   : > { %s273_s22 = scalar_lea.sflag (!%p12536_p10), [#allocation3], %s11132_s1  ;;  %s11136_s30 = scalar_lea.vmem (!%p12536_p10), [#allocation2], %s8150_s2 }
  0x72   : > { %10904 = dma.done.wait (%p12537_p9), %s273_s22, 131072  }
  0x73   : > { %10906 = vsyncadd (%p12537_p9), %s273_s22, 4294836224  ;;  %s12538_s28 = sadd.s32 4294967295, %s10933_s20   ;;  %s8151_s24 = sshll.u32 %s11132_s1, 2 }
  0x74   : > { %s281_s23 = sand.u32 1, %s12538_s28   ;;  %s11147_s7 = scalar_lea.vmem [#allocation4], %s8151_s24 }
  0x75   : > { %s282_s12 = scalar_lea.sflag [#allocation5], %s281_s23 }
  0x76   : > { %10908 = dma.done.wait (%p12537_p9), %s282_s12, 128  }
  0x77   : > { %10910 = vsyncadd (%p12537_p9), %s282_s12, 4294967168  ;;  %v9253_v0 = vld [vmem:[%s11136_s30 + $0x4] ss:$16 sps:$4 sm:$0xff]   ;;  %v9257_v2 = vld [vmem:[%s11136_s30] ss:$16 sps:$4 sm:$0xff]   ;;  %s8153_s5 = sshll.u32 %s10925_s18, 2 }
  0x78   : > { %v9255_v1 = vld [vmem:[%s11136_s30 + $0x204] ss:$16 sps:$4 sm:$0xff]   ;;  %6586 = vmatprep.subr.bf16.mxu0 %v9253_v0  ;;  %v9258_v3 = vld [vmem:[%s11136_s30 + $0x200] ss:$16 sps:$4 sm:$0xff]   ;;  %v375_v46 = vld [vmem:[%s12515_s0 + $0x8] sm:$0xff]  ;;  %p359_p11 = scmp.lt.s32.totalorder %s8153_s5, 7 }
  0x79   : > { %6627 = vmatprep.subr.bf16.mxu1 %v9255_v1  ;;  %v9259_v4 = vld [vmem:[%s11136_s30 + $0x24] ss:$16 sps:$4 sm:$0xff]   ;;  %6587 = vmatpush1.bf16.msra.mxu0 %v9257_v2  ;;  %v9263_v6 = vld [vmem:[%s11136_s30 + $0x20] ss:$16 sps:$4 sm:$0xff]   ;;  %v11204_v49 = vpack.c.bf16 %v375_v46, %v375_v46  ;;  %v377_v50 = vld [vmem:[%s12515_s0 + $0x18] sm:$0xff]  ;;  %s294_s18 = scalar_lea.vmem [#allocation6], %s8151_s24 }
  0x7a   : > { %6628 = vmatpush1.bf16.msra.mxu1 %v9258_v3  ;;  %v9261_v5 = vld [vmem:[%s11136_s30 + $0x224] ss:$16 sps:$4 sm:$0xff]   ;;  %6588 = vmatprep.subr.bf16.mxu0 %v9259_v4  ;;  %v9264_v7 = vld [vmem:[%s11136_s30 + $0x220] ss:$16 sps:$4 sm:$0xff]   ;;  %v11210_v52 = vpack.c.bf16 %v377_v50, %v377_v50  ;;  %s12548_s5 = smov (!%p359_p11, %s8153_s5), 7 }
  0x7b   : > { %6629 = vmatprep.subr.bf16.mxu1 %v9261_v5  ;;  %v9265_v8 = vld [vmem:[%s11136_s30 + $0x44] ss:$16 sps:$4 sm:$0xff]   ;;  %v9269_v10 = vld [vmem:[%s11136_s30 + $0x40] ss:$16 sps:$4 sm:$0xff]   ;;  %6618 = vmatprep.mubr.bf16.mxu0 %v11204_v49  ;;  %s8154_s6 = sshll.u32 %s12548_s5, 3 }
  0x7c   : > { %v9267_v9 = vld [vmem:[%s11136_s30 + $0x244] ss:$16 sps:$4 sm:$0xff]   ;;  %v9270_v11 = vld [vmem:[%s11136_s30 + $0x240] ss:$16 sps:$4 sm:$0xff]   ;;  %6659 = vmatprep.mubr.bf16.mxu1 %v11210_v52  ;;  %s11977_s22 = scalar_lea.vmem %s12519_s4, %s8154_s6 }
  0x7d   : > { %6589 = vmatpush1.bf16.msra.mxu0 %v9263_v6  ;;  %v9271_v12 = vld [vmem:[%s11136_s30 + $0x64] ss:$16 sps:$4 sm:$0xff]   ;;  %v9275_v14 = vld [vmem:[%s11136_s30 + $0x60] ss:$16 sps:$4 sm:$0xff]  }
  0x7e   : > { %6630 = vmatpush1.bf16.msra.mxu1 %v9264_v7  ;;  %6590 = vmatprep.subr.bf16.mxu0 %v9265_v8  ;;  %v9273_v13 = vld [vmem:[%s11136_s30 + $0x264] ss:$16 sps:$4 sm:$0xff]   ;;  %v9276_v15 = vld [vmem:[%s11136_s30 + $0x260] ss:$16 sps:$4 sm:$0xff]  }
  0x7f   : > { %6631 = vmatprep.subr.bf16.mxu1 %v9267_v9  ;;  %v9277_v16 = vld [vmem:[%s11136_s30 + $0x84] ss:$16 sps:$4 sm:$0xff]   ;;  %v9281_v18 = vld [vmem:[%s11136_s30 + $0x80] ss:$16 sps:$4 sm:$0xff]  }
  0x80   : > { %v9279_v17 = vld [vmem:[%s11136_s30 + $0x284] ss:$16 sps:$4 sm:$0xff]   ;;  %v9282_v19 = vld [vmem:[%s11136_s30 + $0x280] ss:$16 sps:$4 sm:$0xff]  }
  0x81   : > { %6591 = vmatpush1.bf16.msra.mxu0 %v9269_v10  ;;  %v9283_v20 = vld [vmem:[%s11136_s30 + $0xa4] ss:$16 sps:$4 sm:$0xff]   ;;  %v9287_v22 = vld [vmem:[%s11136_s30 + $0xa0] ss:$16 sps:$4 sm:$0xff]  }
  0x82   : > { %6632 = vmatpush1.bf16.msra.mxu1 %v9270_v11  ;;  %6592 = vmatprep.subr.bf16.mxu0 %v9271_v12  ;;  %v9285_v21 = vld [vmem:[%s11136_s30 + $0x2a4] ss:$16 sps:$4 sm:$0xff]   ;;  %v9288_v23 = vld [vmem:[%s11136_s30 + $0x2a0] ss:$16 sps:$4 sm:$0xff]  }
  0x83   : > { %6633 = vmatprep.subr.bf16.mxu1 %v9273_v13  ;;  %v9289_v24 = vld [vmem:[%s11136_s30 + $0xc4] ss:$16 sps:$4 sm:$0xff]   ;;  %v9293_v26 = vld [vmem:[%s11136_s30 + $0xc0] ss:$16 sps:$4 sm:$0xff]  }
  0x84   : > { %v9291_v25 = vld [vmem:[%s11136_s30 + $0x2c4] ss:$16 sps:$4 sm:$0xff]   ;;  %v9294_v27 = vld [vmem:[%s11136_s30 + $0x2c0] ss:$16 sps:$4 sm:$0xff]  }
  0x85   : > { %6593 = vmatpush1.bf16.msra.mxu0 %v9275_v14  ;;  %v9295_v28 = vld [vmem:[%s11136_s30 + $0xe4] ss:$16 sps:$4 sm:$0xff]   ;;  %v9299_v30 = vld [vmem:[%s11136_s30 + $0xe0] ss:$16 sps:$4 sm:$0xff]  }
  0x86   : > { %6634 = vmatpush1.bf16.msra.mxu1 %v9276_v15  ;;  %6594 = vmatprep.subr.bf16.mxu0 %v9277_v16  ;;  %v9297_v29 = vld [vmem:[%s11136_s30 + $0x2e4] ss:$16 sps:$4 sm:$0xff]   ;;  %v9300_v31 = vld [vmem:[%s11136_s30 + $0x2e0] ss:$16 sps:$4 sm:$0xff]  }
  0x87   : > { %6635 = vmatprep.subr.bf16.mxu1 %v9279_v17  ;;  %v9301_v32 = vld [vmem:[%s11136_s30 + $0x104] ss:$16 sps:$4 sm:$0xff]   ;;  %v9305_v34 = vld [vmem:[%s11136_s30 + $0x100] ss:$16 sps:$4 sm:$0xff]  }
  0x88   : > { %v9303_v33 = vld [vmem:[%s11136_s30 + $0x304] ss:$16 sps:$4 sm:$0xff]   ;;  %v9306_v35 = vld [vmem:[%s11136_s30 + $0x300] ss:$16 sps:$4 sm:$0xff]  }
  0x89   : > { %6595 = vmatpush1.bf16.msra.mxu0 %v9281_v18  ;;  %v9307_v36 = vld [vmem:[%s11136_s30 + $0x124] ss:$16 sps:$4 sm:$0xff]   ;;  %v9311_v38 = vld [vmem:[%s11136_s30 + $0x120] ss:$16 sps:$4 sm:$0xff]  }
  0x8a   : > { %6636 = vmatpush1.bf16.msra.mxu1 %v9282_v19  ;;  %6596 = vmatprep.subr.bf16.mxu0 %v9283_v20  ;;  %v9309_v37 = vld [vmem:[%s11136_s30 + $0x324] ss:$16 sps:$4 sm:$0xff]   ;;  %v9312_v39 = vld [vmem:[%s11136_s30 + $0x320] ss:$16 sps:$4 sm:$0xff]  }
  0x8b   : > { %6637 = vmatprep.subr.bf16.mxu1 %v9285_v21  ;;  %v9313_v40 = vld [vmem:[%s11136_s30 + $0x144] ss:$16 sps:$4 sm:$0xff]   ;;  %v9317_v42 = vld [vmem:[%s11136_s30 + $0x140] ss:$16 sps:$4 sm:$0xff]  }
  0x8c   : > { %v9315_v41 = vld [vmem:[%s11136_s30 + $0x344] ss:$16 sps:$4 sm:$0xff]   ;;  %v9318_v43 = vld [vmem:[%s11136_s30 + $0x340] ss:$16 sps:$4 sm:$0xff]  }
  0x8d   : > { %6597 = vmatpush1.bf16.msra.mxu0 %v9287_v22  ;;  %v9319_v44 = vld [vmem:[%s11136_s30 + $0x164] ss:$16 sps:$4 sm:$0xff]   ;;  %v9323_v47 = vld [vmem:[%s11136_s30 + $0x160] ss:$16 sps:$4 sm:$0xff]  }
  0x8e   : > { %6638 = vmatpush1.bf16.msra.mxu1 %v9288_v23  ;;  %6598 = vmatprep.subr.bf16.mxu0 %v9289_v24  ;;  %v9321_v45 = vld [vmem:[%s11136_s30 + $0x364] ss:$16 sps:$4 sm:$0xff]   ;;  %v9324_v48 = vld [vmem:[%s11136_s30 + $0x360] ss:$16 sps:$4 sm:$0xff]  }
  0x8f   : > { %6639 = vmatprep.subr.bf16.mxu1 %v9291_v25  ;;  %v9325_v51 = vld [vmem:[%s11136_s30 + $0x184] ss:$16 sps:$4 sm:$0xff]   ;;  %v9329_v54 = vld [vmem:[%s11136_s30 + $0x180] ss:$16 sps:$4 sm:$0xff]  }
  0x90   : > { %v9327_v53 = vld [vmem:[%s11136_s30 + $0x384] ss:$16 sps:$4 sm:$0xff]   ;;  %v9330_v55 = vld [vmem:[%s11136_s30 + $0x380] ss:$16 sps:$4 sm:$0xff]  }
  0x91   : > { %6599 = vmatpush1.bf16.msra.mxu0 %v9293_v26  ;;  %v9331_v56 = vld [vmem:[%s11136_s30 + $0x1a4] ss:$16 sps:$4 sm:$0xff]   ;;  %v9335_v58 = vld [vmem:[%s11136_s30 + $0x1a0] ss:$16 sps:$4 sm:$0xff]  }
  0x92   : > { %6640 = vmatpush1.bf16.msra.mxu1 %v9294_v27  ;;  %6600 = vmatprep.subr.bf16.mxu0 %v9295_v28  ;;  %v9333_v57 = vld [vmem:[%s11136_s30 + $0x3a4] ss:$16 sps:$4 sm:$0xff]   ;;  %v9336_v59 = vld [vmem:[%s11136_s30 + $0x3a0] ss:$16 sps:$4 sm:$0xff]  }
  0x93   : > { %6641 = vmatprep.subr.bf16.mxu1 %v9297_v29  ;;  %v9337_v60 = vld [vmem:[%s11136_s30 + $0x1c4] ss:$16 sps:$4 sm:$0xff]   ;;  %v9341_v62 = vld [vmem:[%s11136_s30 + $0x1c0] ss:$16 sps:$4 sm:$0xff]  }
  0x94   : > { %v9339_v61 = vld [vmem:[%s11136_s30 + $0x3c4] ss:$16 sps:$4 sm:$0xff]   ;;  %v9342_v63 = vld [vmem:[%s11136_s30 + $0x3c0] ss:$16 sps:$4 sm:$0xff]  }
  0x95   : > { %6601 = vmatpush1.bf16.msra.mxu0 %v9299_v30  ;;  %v9343_v0 = vld [vmem:[%s11136_s30 + $0x1e4] ss:$16 sps:$4 sm:$0xff]   ;;  %v9347_v2 = vld [vmem:[%s11136_s30 + $0x1e0] ss:$16 sps:$4 sm:$0xff]  }
  0x96   : > { %6642 = vmatpush1.bf16.msra.mxu1 %v9300_v31  ;;  %6602 = vmatprep.subr.bf16.mxu0 %v9301_v32  ;;  %v9345_v1 = vld [vmem:[%s11136_s30 + $0x3e4] ss:$16 sps:$4 sm:$0xff]   ;;  %v9348_v3 = vld [vmem:[%s11136_s30 + $0x3e0] ss:$16 sps:$4 sm:$0xff]  }
  0x97   : > { %6643 = vmatprep.subr.bf16.mxu1 %v9303_v33  ;;  %v374_v4 = vld [vmem:[%s12515_s0] sm:$0xff]  ;;  %v376_v5 = vld [vmem:[%s12515_s0 + $0x10] sm:$0xff] }
  0x98   : > { %v9351_v6 = vld [vmem:[%s11136_s30 + $0x404] ss:$16 sps:$4 sm:$0xff]   ;;  %v11237_v8 = vpack.c.bf16 %v374_v4, %v374_v4  ;;  %v11239_v9 = vpack.c.bf16 %v376_v5, %v376_v5  ;;  %v9349_v10 = vld [vmem:[%s11136_s30 + $0x400] ss:$16 sps:$4 sm:$0xff]  }
  0x99   : > { %6603 = vmatpush1.bf16.msra.mxu0 %v9305_v34  ;;  %v9354_v7 = vld [vmem:[%s11136_s30 + $0x604] ss:$16 sps:$4 sm:$0xff]   ;;  %v9352_v11 = vld [vmem:[%s11136_s30 + $0x600] ss:$16 sps:$4 sm:$0xff]   ;;  %v379_v34 = vld [vmem:[%s12515_s0 + $0x28] sm:$0xff] }
  0x9a   : > { %6644 = vmatpush1.bf16.msra.mxu1 %v9306_v35  ;;  %6604 = vmatprep.subr.bf16.mxu0 %v9307_v36  ;;  %v9357_v12 = vld [vmem:[%s11136_s30 + $0x424] ss:$16 sps:$4 sm:$0xff]   ;;  %v9355_v14 = vld [vmem:[%s11136_s30 + $0x420] ss:$16 sps:$4 sm:$0xff]  }
  0x9b   : > { %6645 = vmatprep.subr.bf16.mxu1 %v9309_v37  ;;  %v9360_v13 = vld [vmem:[%s11136_s30 + $0x624] ss:$16 sps:$4 sm:$0xff]   ;;  %v9358_v15 = vld [vmem:[%s11136_s30 + $0x620] ss:$16 sps:$4 sm:$0xff]   ;;  %v11272_v37 = vpack.c.bf16 %v379_v34, %v379_v34 }
  0x9c   : > { %v9363_v16 = vld [vmem:[%s11136_s30 + $0x444] ss:$16 sps:$4 sm:$0xff]   ;;  %v9361_v18 = vld [vmem:[%s11136_s30 + $0x440] ss:$16 sps:$4 sm:$0xff]  }
  0x9d   : > { %6605 = vmatpush1.bf16.msra.mxu0 %v9311_v38  ;;  %v9366_v17 = vld [vmem:[%s11136_s30 + $0x644] ss:$16 sps:$4 sm:$0xff]   ;;  %v9364_v19 = vld [vmem:[%s11136_s30 + $0x640] ss:$16 sps:$4 sm:$0xff]   ;;  %v381_v38 = vld [vmem:[%s12515_s0 + $0x38] sm:$0xff] }
  0x9e   : > { %6646 = vmatpush1.bf16.msra.mxu1 %v9312_v39  ;;  %6606 = vmatprep.subr.bf16.mxu0 %v9313_v40  ;;  %v9369_v20 = vld [vmem:[%s11136_s30 + $0x464] ss:$16 sps:$4 sm:$0xff]   ;;  %v9367_v22 = vld [vmem:[%s11136_s30 + $0x460] ss:$16 sps:$4 sm:$0xff]   ;;  %v11278_v40 = vpack.c.bf16 %v381_v38, %v381_v38 }
  0x9f   : > { %6647 = vmatprep.subr.bf16.mxu1 %v9315_v41  ;;  %v9372_v21 = vld [vmem:[%s11136_s30 + $0x664] ss:$16 sps:$4 sm:$0xff]   ;;  %v9370_v23 = vld [vmem:[%s11136_s30 + $0x660] ss:$16 sps:$4 sm:$0xff]  }
  0xa0   : > { %v9375_v24 = vld [vmem:[%s11136_s30 + $0x484] ss:$16 sps:$4 sm:$0xff]   ;;  %v9373_v26 = vld [vmem:[%s11136_s30 + $0x480] ss:$16 sps:$4 sm:$0xff]  }
  0xa1   : > { %6607 = vmatpush1.bf16.msra.mxu0 %v9317_v42  ;;  %v9378_v25 = vld [vmem:[%s11136_s30 + $0x684] ss:$16 sps:$4 sm:$0xff]   ;;  %v9376_v27 = vld [vmem:[%s11136_s30 + $0x680] ss:$16 sps:$4 sm:$0xff]  }
  0xa2   : > { %6648 = vmatpush1.bf16.msra.mxu1 %v9318_v43  ;;  %6608 = vmatprep.subr.bf16.mxu0 %v9319_v44  ;;  %v9381_v28 = vld [vmem:[%s11136_s30 + $0x4a4] ss:$16 sps:$4 sm:$0xff]   ;;  %v9379_v30 = vld [vmem:[%s11136_s30 + $0x4a0] ss:$16 sps:$4 sm:$0xff]  }
  0xa3   : > { %6649 = vmatprep.subr.bf16.mxu1 %v9321_v45  ;;  %v9384_v29 = vld [vmem:[%s11136_s30 + $0x6a4] ss:$16 sps:$4 sm:$0xff]   ;;  %v9382_v31 = vld [vmem:[%s11136_s30 + $0x6a0] ss:$16 sps:$4 sm:$0xff]  }
  0xa4   : > { %v9387_v32 = vld [vmem:[%s11136_s30 + $0x4c4] ss:$16 sps:$4 sm:$0xff]   ;;  %v9385_v35 = vld [vmem:[%s11136_s30 + $0x4c0] ss:$16 sps:$4 sm:$0xff]  }
  0xa5   : > { %6609 = vmatpush1.bf16.msra.mxu0 %v9323_v47  ;;  %v9390_v33 = vld [vmem:[%s11136_s30 + $0x6c4] ss:$16 sps:$4 sm:$0xff]   ;;  %v9388_v36 = vld [vmem:[%s11136_s30 + $0x6c0] ss:$16 sps:$4 sm:$0xff]  }
  0xa6   : > { %6650 = vmatpush1.bf16.msra.mxu1 %v9324_v48  ;;  %6610 = vmatprep.subr.bf16.mxu0 %v9325_v51  ;;  %v9393_v39 = vld [vmem:[%s11136_s30 + $0x4e4] ss:$16 sps:$4 sm:$0xff]   ;;  %v9391_v42 = vld [vmem:[%s11136_s30 + $0x4e0] ss:$16 sps:$4 sm:$0xff]  }
  0xa7   : > { %6651 = vmatprep.subr.bf16.mxu1 %v9327_v53  ;;  %v9396_v41 = vld [vmem:[%s11136_s30 + $0x6e4] ss:$16 sps:$4 sm:$0xff]   ;;  %v9394_v43 = vld [vmem:[%s11136_s30 + $0x6e0] ss:$16 sps:$4 sm:$0xff]  }
  0xa8   : > { %v9399_v44 = vld [vmem:[%s11136_s30 + $0x504] ss:$16 sps:$4 sm:$0xff]   ;;  %v9397_v46 = vld [vmem:[%s11136_s30 + $0x500] ss:$16 sps:$4 sm:$0xff]  }
  0xa9   : > { %6611 = vmatpush1.bf16.msra.mxu0 %v9329_v54  ;;  %v9402_v45 = vld [vmem:[%s11136_s30 + $0x704] ss:$16 sps:$4 sm:$0xff]   ;;  %v9400_v47 = vld [vmem:[%s11136_s30 + $0x700] ss:$16 sps:$4 sm:$0xff]  }
  0xaa   : > { %6652 = vmatpush1.bf16.msra.mxu1 %v9330_v55  ;;  %6612 = vmatprep.subr.bf16.mxu0 %v9331_v56  ;;  %v9405_v48 = vld [vmem:[%s11136_s30 + $0x524] ss:$16 sps:$4 sm:$0xff]   ;;  %v9403_v51 = vld [vmem:[%s11136_s30 + $0x520] ss:$16 sps:$4 sm:$0xff]  }
  0xab   : > { %6653 = vmatprep.subr.bf16.mxu1 %v9333_v57  ;;  %v9408_v50 = vld [vmem:[%s11136_s30 + $0x724] ss:$16 sps:$4 sm:$0xff]   ;;  %v9406_v53 = vld [vmem:[%s11136_s30 + $0x720] ss:$16 sps:$4 sm:$0xff]  }
  0xac   : > { %v9411_v54 = vld [vmem:[%s11136_s30 + $0x544] ss:$16 sps:$4 sm:$0xff]   ;;  %v9409_v56 = vld [vmem:[%s11136_s30 + $0x540] ss:$16 sps:$4 sm:$0xff]  }
  0xad   : > { %6613 = vmatpush1.bf16.msra.mxu0 %v9335_v58  ;;  %v9414_v55 = vld [vmem:[%s11136_s30 + $0x744] ss:$16 sps:$4 sm:$0xff]   ;;  %v9412_v57 = vld [vmem:[%s11136_s30 + $0x740] ss:$16 sps:$4 sm:$0xff]  }
  0xae   : > { %6654 = vmatpush1.bf16.msra.mxu1 %v9336_v59  ;;  %6614 = vmatprep.subr.bf16.mxu0 %v9337_v60  ;;  %v9417_v58 = vld [vmem:[%s11136_s30 + $0x564] ss:$16 sps:$4 sm:$0xff]   ;;  %v9415_v60 = vld [vmem:[%s11136_s30 + $0x560] ss:$16 sps:$4 sm:$0xff]  }
  0xaf   : > { %6655 = vmatprep.subr.bf16.mxu1 %v9339_v61  ;;  %v9420_v59 = vld [vmem:[%s11136_s30 + $0x764] ss:$16 sps:$4 sm:$0xff]   ;;  %v9418_v61 = vld [vmem:[%s11136_s30 + $0x760] ss:$16 sps:$4 sm:$0xff]  }
  0xb0   : > { %v9427_v4 = vld [vmem:[%s11136_s30 + $0x5a0] ss:$16 sps:$4 sm:$0xff]   ;;  %v9468_v38 = vld [vmem:[%s11136_s30 + $0xa64] ss:$16 sps:$4 sm:$0xff]  }
  0xb1   : > { %6615 = vmatpush1.bf16.msra.mxu0 %v9341_v62  ;;  %v9423_v62 = vld [vmem:[%s11136_s30 + $0x584] ss:$16 sps:$4 sm:$0xff]   ;;  %v9430_v5 = vld [vmem:[%s11136_s30 + $0x7a0] ss:$16 sps:$4 sm:$0xff]  }
  0xb2   : > { %6656 = vmatpush1.bf16.msra.mxu1 %v9342_v63  ;;  %6616 = vmatprep.subr.bf16.mxu0 %v9343_v0  ;;  %v9426_v63 = vld [vmem:[%s11136_s30 + $0x784] ss:$16 sps:$4 sm:$0xff]   ;;  %v9421_v0 = vld [vmem:[%s11136_s30 + $0x580] ss:$16 sps:$4 sm:$0xff]  }
  0xb3   : > { %6657 = vmatprep.subr.bf16.mxu1 %v9345_v1  ;;  %v9424_v1 = vld [vmem:[%s11136_s30 + $0x780] ss:$16 sps:$4 sm:$0xff]  }
  0xb4   : > { %v9457_v34 = vld [vmem:[%s11136_s30 + $0x840] ss:$16 sps:$4 sm:$0xff]  }
  0xb5   : > { %6617 = vmatpush1.bf16.msra.mxu0 %v9347_v2  ;;  %v9429_v2 = vld [vmem:[%s11136_s30 + $0x5a4] ss:$16 sps:$4 sm:$0xff]  }
  0xb6   : > { %6658 = vmatpush1.bf16.msra.mxu1 %v9348_v3  ;;  %6668 = vmatprep.subr.bf16.mxu0 %v9351_v6  ;;  %v9432_v3 = vld [vmem:[%s11136_s30 + $0x7a4] ss:$16 sps:$4 sm:$0xff]  }
  0xb7   : > { %6709 = vmatprep.subr.bf16.mxu1 %v9354_v7  ;;  %v9435_v6 = vld [vmem:[%s11136_s30 + $0x5c4] ss:$16 sps:$4 sm:$0xff]  }
  0xb8   : > { %6619 = vmatmul.mubr.bf16.vlgmr.msra.gmra.mrb[0].mxu0 %v11237_v8  ;;  %v9438_v7 = vld [vmem:[%s11136_s30 + $0x7c4] ss:$16 sps:$4 sm:$0xff]  }
  0xb9   : > { %6660 = vmatmul.mubr.bf16.vlgmr.msra.gmra.mrb[0].mxu1 %v11239_v9  ;;  %6669 = vmatpush1.bf16.msra.mxu0 %v9349_v10  ;;  %v9433_v10 = vld [vmem:[%s11136_s30 + $0x5c0] ss:$16 sps:$4 sm:$0xff]  }
  0xba   : > { %6710 = vmatpush1.bf16.msra.mxu1 %v9352_v11  ;;  %6670 = vmatprep.subr.bf16.mxu0 %v9357_v12  ;;  %v9436_v11 = vld [vmem:[%s11136_s30 + $0x7c0] ss:$16 sps:$4 sm:$0xff]   ;;  %v9441_v12 = vld [vmem:[%s11136_s30 + $0x5e4] ss:$16 sps:$4 sm:$0xff]  }
  0xbb   : > { %6711 = vmatprep.subr.bf16.mxu1 %v9360_v13  ;;  %6700 = vmatprep.mubr.bf16.mxu0 %v11272_v37  ;;  %v9444_v13 = vld [vmem:[%s11136_s30 + $0x7e4] ss:$16 sps:$4 sm:$0xff]  }
  0xbc   : > { %6741 = vmatprep.mubr.bf16.mxu1 %v11278_v40 }
  0xbd   : > { %6671 = vmatpush1.bf16.msra.mxu0 %v9355_v14  ;;  %v9439_v14 = vld [vmem:[%s11136_s30 + $0x5e0] ss:$16 sps:$4 sm:$0xff]  }
  0xbe   : > { %6712 = vmatpush1.bf16.msra.mxu1 %v9358_v15  ;;  %6672 = vmatprep.subr.bf16.mxu0 %v9363_v16  ;;  %v9442_v15 = vld [vmem:[%s11136_s30 + $0x7e0] ss:$16 sps:$4 sm:$0xff]  }
  0xbf   : > { %6713 = vmatprep.subr.bf16.mxu1 %v9366_v17  ;;  %v378_v16 = vld [vmem:[%s12515_s0 + $0x20] sm:$0xff]  ;;  %v380_v17 = vld [vmem:[%s12515_s0 + $0x30] sm:$0xff] }
  0xc1   : > { %6673 = vmatpush1.bf16.msra.mxu0 %v9361_v18  ;;  %v9447_v18 = vld [vmem:[%s11136_s30 + $0x804] ss:$16 sps:$4 sm:$0xff]  }
  0xc2   : > { %6714 = vmatpush1.bf16.msra.mxu1 %v9364_v19  ;;  %6674 = vmatprep.subr.bf16.mxu0 %v9369_v20  ;;  %v9450_v19 = vld [vmem:[%s11136_s30 + $0xa04] ss:$16 sps:$4 sm:$0xff]   ;;  %v11325_v20 = vpack.c.bf16 %v378_v16, %v378_v16  ;;  %v9517_v16 = vld [vmem:[%s11136_s30 + $0x980] ss:$16 sps:$4 sm:$0xff]  }
  0xc3   : > { %6715 = vmatprep.subr.bf16.mxu1 %v9372_v21  ;;  %v11327_v21 = vpack.c.bf16 %v380_v17, %v380_v17  ;;  %v9520_v17 = vld [vmem:[%s11136_s30 + $0xb80] ss:$16 sps:$4 sm:$0xff]  }
  0xc5   : > { %6675 = vmatpush1.bf16.msra.mxu0 %v9367_v22  ;;  %v9445_v22 = vld [vmem:[%s11136_s30 + $0x800] ss:$16 sps:$4 sm:$0xff]  }
  0xc6   : > { %6716 = vmatpush1.bf16.msra.mxu1 %v9370_v23  ;;  %6676 = vmatprep.subr.bf16.mxu0 %v9375_v24  ;;  %v9448_v23 = vld [vmem:[%s11136_s30 + $0xa00] ss:$16 sps:$4 sm:$0xff]   ;;  %v9453_v24 = vld [vmem:[%s11136_s30 + $0x824] ss:$16 sps:$4 sm:$0xff]  }
  0xc7   : > { %6717 = vmatprep.subr.bf16.mxu1 %v9378_v25  ;;  %v9456_v25 = vld [vmem:[%s11136_s30 + $0xa24] ss:$16 sps:$4 sm:$0xff]  }
  0xc9   : > { %6677 = vmatpush1.bf16.msra.mxu0 %v9373_v26  ;;  %v383_v26 = vld [vmem:[%s12515_s0 + $0x48] sm:$0xff] }
  0xca   : > { %6718 = vmatpush1.bf16.msra.mxu1 %v9376_v27  ;;  %6678 = vmatprep.subr.bf16.mxu0 %v9381_v28  ;;  %v9451_v27 = vld [vmem:[%s11136_s30 + $0x820] ss:$16 sps:$4 sm:$0xff]  }
  0xcb   : > { %6719 = vmatprep.subr.bf16.mxu1 %v9384_v29  ;;  %v9454_v28 = vld [vmem:[%s11136_s30 + $0xa20] ss:$16 sps:$4 sm:$0xff]   ;;  %v11340_v29 = vpack.c.bf16 %v383_v26, %v383_v26 }
  0xcc   : > { %v9529_v26 = vld [vmem:[%s11136_s30 + $0x9c0] ss:$16 sps:$4 sm:$0xff]  }
  0xcd   : > { %6679 = vmatpush1.bf16.msra.mxu0 %v9379_v30  ;;  %v385_v30 = vld [vmem:[%s12515_s0 + $0x58] sm:$0xff] }
  0xce   : > { %6720 = vmatpush1.bf16.msra.mxu1 %v9382_v31  ;;  %6680 = vmatprep.subr.bf16.mxu0 %v9387_v32  ;;  %v9459_v31 = vld [vmem:[%s11136_s30 + $0x844] ss:$16 sps:$4 sm:$0xff]   ;;  %v11346_v32 = vpack.c.bf16 %v385_v30, %v385_v30 }
  0xcf   : > { %6721 = vmatprep.subr.bf16.mxu1 %v9390_v33  ;;  %v9462_v33 = vld [vmem:[%s11136_s30 + $0xa44] ss:$16 sps:$4 sm:$0xff]  }
  0xd0   : > { %v9540_v30 = vld [vmem:[%s11136_s30 + $0xbe4] ss:$16 sps:$4 sm:$0xff]  }
  0xd1   : > { %6681 = vmatpush1.bf16.msra.mxu0 %v9385_v35  ;;  %v9460_v35 = vld [vmem:[%s11136_s30 + $0xa40] ss:$16 sps:$4 sm:$0xff]  }
  0xd2   : > { %6722 = vmatpush1.bf16.msra.mxu1 %v9388_v36  ;;  %6682 = vmatprep.subr.bf16.mxu0 %v9393_v39  ;;  %v9465_v36 = vld [vmem:[%s11136_s30 + $0x864] ss:$16 sps:$4 sm:$0xff]   ;;  %v9463_v39 = vld [vmem:[%s11136_s30 + $0x860] ss:$16 sps:$4 sm:$0xff]  }
  0xd3   : > { %6723 = vmatprep.subr.bf16.mxu1 %v9396_v41  ;;  %v9466_v41 = vld [vmem:[%s11136_s30 + $0xa60] ss:$16 sps:$4 sm:$0xff]  }
  0xd5   : > { %6683 = vmatpush1.bf16.msra.mxu0 %v9391_v42  ;;  %v9471_v42 = vld [vmem:[%s11136_s30 + $0x884] ss:$16 sps:$4 sm:$0xff]  }
  0xd6   : > { %6724 = vmatpush1.bf16.msra.mxu1 %v9394_v43  ;;  %6684 = vmatprep.subr.bf16.mxu0 %v9399_v44  ;;  %v9474_v43 = vld [vmem:[%s11136_s30 + $0xa84] ss:$16 sps:$4 sm:$0xff]   ;;  %v9469_v44 = vld [vmem:[%s11136_s30 + $0x880] ss:$16 sps:$4 sm:$0xff]  }
  0xd7   : > { %6725 = vmatprep.subr.bf16.mxu1 %v9402_v45  ;;  %v9472_v45 = vld [vmem:[%s11136_s30 + $0xa80] ss:$16 sps:$4 sm:$0xff]  }
  0xd9   : > { %6685 = vmatpush1.bf16.msra.mxu0 %v9397_v46  ;;  %v9477_v46 = vld [vmem:[%s11136_s30 + $0x8a4] ss:$16 sps:$4 sm:$0xff]  }
  0xda   : > { %6726 = vmatpush1.bf16.msra.mxu1 %v9400_v47  ;;  %6686 = vmatprep.subr.bf16.mxu0 %v9405_v48  ;;  %v9480_v47 = vld [vmem:[%s11136_s30 + $0xaa4] ss:$16 sps:$4 sm:$0xff]   ;;  %v9475_v48 = vld [vmem:[%s11136_s30 + $0x8a0] ss:$16 sps:$4 sm:$0xff]  }
  0xdb   : > { %6727 = vmatprep.subr.bf16.mxu1 %v9408_v50  ;;  %v9478_v50 = vld [vmem:[%s11136_s30 + $0xaa0] ss:$16 sps:$4 sm:$0xff]  }
  0xdd   : > { %6687 = vmatpush1.bf16.msra.mxu0 %v9403_v51  ;;  %v9483_v51 = vld [vmem:[%s11136_s30 + $0x8c4] ss:$16 sps:$4 sm:$0xff]  }
  0xde   : > { %6728 = vmatpush1.bf16.msra.mxu1 %v9406_v53  ;;  %6688 = vmatprep.subr.bf16.mxu0 %v9411_v54  ;;  %v9486_v53 = vld [vmem:[%s11136_s30 + $0xac4] ss:$16 sps:$4 sm:$0xff]   ;;  %v9481_v54 = vld [vmem:[%s11136_s30 + $0x8c0] ss:$16 sps:$4 sm:$0xff]  }
  0xdf   : > { %6729 = vmatprep.subr.bf16.mxu1 %v9414_v55  ;;  %v9484_v55 = vld [vmem:[%s11136_s30 + $0xac0] ss:$16 sps:$4 sm:$0xff]  }
  0xe1   : > { %6689 = vmatpush1.bf16.msra.mxu0 %v9409_v56  ;;  %v9489_v56 = vld [vmem:[%s11136_s30 + $0x8e4] ss:$16 sps:$4 sm:$0xff]  }
  0xe2   : > { %6730 = vmatpush1.bf16.msra.mxu1 %v9412_v57  ;;  %6690 = vmatprep.subr.bf16.mxu0 %v9417_v58  ;;  %v9492_v57 = vld [vmem:[%s11136_s30 + $0xae4] ss:$16 sps:$4 sm:$0xff]   ;;  %v9487_v58 = vld [vmem:[%s11136_s30 + $0x8e0] ss:$16 sps:$4 sm:$0xff]  }
  0xe3   : > { %6731 = vmatprep.subr.bf16.mxu1 %v9420_v59  ;;  %v9490_v59 = vld [vmem:[%s11136_s30 + $0xae0] ss:$16 sps:$4 sm:$0xff]  }
  0xe5   : > { %6691 = vmatpush1.bf16.msra.mxu0 %v9415_v60  ;;  %v9495_v60 = vld [vmem:[%s11136_s30 + $0x904] ss:$16 sps:$4 sm:$0xff]  }
  0xe6   : > { %6732 = vmatpush1.bf16.msra.mxu1 %v9418_v61  ;;  %6692 = vmatprep.subr.bf16.mxu0 %v9423_v62  ;;  %v9498_v61 = vld [vmem:[%s11136_s30 + $0xb04] ss:$16 sps:$4 sm:$0xff]   ;;  %v9493_v62 = vld [vmem:[%s11136_s30 + $0x900] ss:$16 sps:$4 sm:$0xff]  }
  0xe7   : > { %6733 = vmatprep.subr.bf16.mxu1 %v9426_v63  ;;  %v9496_v63 = vld [vmem:[%s11136_s30 + $0xb00] ss:$16 sps:$4 sm:$0xff]  }
  0xe9   : > { %6693 = vmatpush1.bf16.msra.mxu0 %v9421_v0  ;;  %v9501_v0 = vld [vmem:[%s11136_s30 + $0x924] ss:$16 sps:$4 sm:$0xff]  }
  0xea   : > { %6734 = vmatpush1.bf16.msra.mxu1 %v9424_v1  ;;  %6694 = vmatprep.subr.bf16.mxu0 %v9429_v2  ;;  %v9504_v1 = vld [vmem:[%s11136_s30 + $0xb24] ss:$16 sps:$4 sm:$0xff]   ;;  %v9499_v2 = vld [vmem:[%s11136_s30 + $0x920] ss:$16 sps:$4 sm:$0xff]  }
  0xeb   : > { %6735 = vmatprep.subr.bf16.mxu1 %v9432_v3  ;;  %v9502_v3 = vld [vmem:[%s11136_s30 + $0xb20] ss:$16 sps:$4 sm:$0xff]  }
  0xed   : > { %6695 = vmatpush1.bf16.msra.mxu0 %v9427_v4  ;;  %v9507_v4 = vld [vmem:[%s11136_s30 + $0x944] ss:$16 sps:$4 sm:$0xff]  }
  0xee   : > { %6736 = vmatpush1.bf16.msra.mxu1 %v9430_v5  ;;  %6696 = vmatprep.subr.bf16.mxu0 %v9435_v6  ;;  %v9510_v5 = vld [vmem:[%s11136_s30 + $0xb44] ss:$16 sps:$4 sm:$0xff]   ;;  %v9505_v6 = vld [vmem:[%s11136_s30 + $0x940] ss:$16 sps:$4 sm:$0xff]  }
  0xef   : > { %6737 = vmatprep.subr.bf16.mxu1 %v9438_v7  ;;  %v9508_v7 = vld [vmem:[%s11136_s30 + $0xb40] ss:$16 sps:$4 sm:$0xff]  }
  0xf1   : > { %6697 = vmatpush1.bf16.msra.mxu0 %v9433_v10  ;;  %v9513_v10 = vld [vmem:[%s11136_s30 + $0x964] ss:$16 sps:$4 sm:$0xff]  }
  0xf2   : > { %6738 = vmatpush1.bf16.msra.mxu1 %v9436_v11  ;;  %6698 = vmatprep.subr.bf16.mxu0 %v9441_v12  ;;  %v9516_v11 = vld [vmem:[%s11136_s30 + $0xb64] ss:$16 sps:$4 sm:$0xff]   ;;  %v9511_v12 = vld [vmem:[%s11136_s30 + $0x960] ss:$16 sps:$4 sm:$0xff]  }
  0xf3   : > { %6739 = vmatprep.subr.bf16.mxu1 %v9444_v13  ;;  %v9514_v13 = vld [vmem:[%s11136_s30 + $0xb60] ss:$16 sps:$4 sm:$0xff]  }
  0xf5   : > { %6699 = vmatpush1.bf16.msra.mxu0 %v9439_v14  ;;  %v9519_v14 = vld [vmem:[%s11136_s30 + $0x984] ss:$16 sps:$4 sm:$0xff]  }
  0xf6   : > { %6740 = vmatpush1.bf16.msra.mxu1 %v9442_v15  ;;  %6750 = vmatprep.subr.bf16.mxu0 %v9447_v18  ;;  %v9522_v15 = vld [vmem:[%s11136_s30 + $0xb84] ss:$16 sps:$4 sm:$0xff]  }
  0xf7   : > { %6791 = vmatprep.subr.bf16.mxu1 %v9450_v19  ;;  %v9525_v18 = vld [vmem:[%s11136_s30 + $0x9a4] ss:$16 sps:$4 sm:$0xff]  }
  0xf8   : > { %6701 = vmatmul.mubr.bf16.vlgmr.msra.gmra.mrb[4].mxu0 %v11325_v20  ;;  %v9528_v19 = vld [vmem:[%s11136_s30 + $0xba4] ss:$16 sps:$4 sm:$0xff]  }
  0xf9   : > { %6742 = vmatmul.mubr.bf16.vlgmr.msra.gmra.mrb[4].mxu1 %v11327_v21  ;;  %6751 = vmatpush1.bf16.msra.mxu0 %v9445_v22  ;;  %v9523_v22 = vld [vmem:[%s11136_s30 + $0x9a0] ss:$16 sps:$4 sm:$0xff]  }
  0xfa   : > { %6792 = vmatpush1.bf16.msra.mxu1 %v9448_v23  ;;  %6752 = vmatprep.subr.bf16.mxu0 %v9453_v24  ;;  %v9526_v23 = vld [vmem:[%s11136_s30 + $0xba0] ss:$16 sps:$4 sm:$0xff]   ;;  %v9531_v24 = vld [vmem:[%s11136_s30 + $0x9c4] ss:$16 sps:$4 sm:$0xff]  }
  0xfb   : > { %6793 = vmatprep.subr.bf16.mxu1 %v9456_v25  ;;  %6782 = vmatprep.mubr.bf16.mxu0 %v11340_v29  ;;  %v9534_v25 = vld [vmem:[%s11136_s30 + $0xbc4] ss:$16 sps:$4 sm:$0xff]  }
  0xfc   : > { %6823 = vmatprep.mubr.bf16.mxu1 %v11346_v32 }
  0xfd   : > { %6753 = vmatpush1.bf16.msra.mxu0 %v9451_v27  ;;  %v9532_v27 = vld [vmem:[%s11136_s30 + $0xbc0] ss:$16 sps:$4 sm:$0xff]  }
  0xfe   : > { %6794 = vmatpush1.bf16.msra.mxu1 %v9454_v28  ;;  %6754 = vmatprep.subr.bf16.mxu0 %v9459_v31  ;;  %v9537_v28 = vld [vmem:[%s11136_s30 + $0x9e4] ss:$16 sps:$4 sm:$0xff]   ;;  %v9535_v31 = vld [vmem:[%s11136_s30 + $0x9e0] ss:$16 sps:$4 sm:$0xff]  }
  0xff   : > { %6795 = vmatprep.subr.bf16.mxu1 %v9462_v33  ;;  %v9538_v33 = vld [vmem:[%s11136_s30 + $0xbe0] ss:$16 sps:$4 sm:$0xff]  }
 0x101   : > { %6755 = vmatpush1.bf16.msra.mxu0 %v9457_v34  ;;  %v382_v34 = vld [vmem:[%s12515_s0 + $0x40] sm:$0xff] }
 0x102   : > { %6796 = vmatpush1.bf16.msra.mxu1 %v9460_v35  ;;  %6756 = vmatprep.subr.bf16.mxu0 %v9465_v36  ;;  %v384_v35 = vld [vmem:[%s12515_s0 + $0x50] sm:$0xff] }
 0x103   : > { %6797 = vmatprep.subr.bf16.mxu1 %v9468_v38  ;;  %v9543_v36 = vld [vmem:[%s11136_s30 + $0xc04] ss:$16 sps:$4 sm:$0xff]  }
 0x104   : > { %v9546_v38 = vld [vmem:[%s11136_s30 + $0xe04] ss:$16 sps:$4 sm:$0xff]  }
 0x105   : > { %6757 = vmatpush1.bf16.msra.mxu0 %v9463_v39  ;;  %v9541_v39 = vld [vmem:[%s11136_s30 + $0xc00] ss:$16 sps:$4 sm:$0xff]  }
 0x106   : > { %6798 = vmatpush1.bf16.msra.mxu1 %v9466_v41  ;;  %6758 = vmatprep.subr.bf16.mxu0 %v9471_v42  ;;  %v9544_v41 = vld [vmem:[%s11136_s30 + $0xe00] ss:$16 sps:$4 sm:$0xff]   ;;  %v11415_v42 = vpack.c.bf16 %v382_v34, %v382_v34 }
 0x107   : > { %6799 = vmatprep.subr.bf16.mxu1 %v9474_v43  ;;  %v11417_v43 = vpack.c.bf16 %v384_v35, %v384_v35  ;;  %v9607_v34 = vld [vmem:[%s11136_s30 + $0xd60] ss:$16 sps:$4 sm:$0xff]  }
 0x108   : > { %v9610_v35 = vld [vmem:[%s11136_s30 + $0xf60] ss:$16 sps:$4 sm:$0xff]  }
 0x109   : > { %6759 = vmatpush1.bf16.msra.mxu0 %v9469_v44  ;;  %v387_v44 = vld [vmem:[%s12515_s0 + $0x68] sm:$0xff] }
 0x10a   : > { %6800 = vmatpush1.bf16.msra.mxu1 %v9472_v45  ;;  %6760 = vmatprep.subr.bf16.mxu0 %v9477_v46  ;;  %v389_v45 = vld [vmem:[%s12515_s0 + $0x78] sm:$0xff]  ;;  %v9549_v46 = vld [vmem:[%s11136_s30 + $0xc24] ss:$16 sps:$4 sm:$0xff]  }
 0x10b   : > { %6801 = vmatprep.subr.bf16.mxu1 %v9480_v47  ;;  %v9552_v47 = vld [vmem:[%s11136_s30 + $0xe24] ss:$16 sps:$4 sm:$0xff]  }
 0x10d   : > { %6761 = vmatpush1.bf16.msra.mxu0 %v9475_v48  ;;  %v11427_v48 = vpack.c.bf16 %v387_v44, %v387_v44  ;;  %v9621_v44 = vld [vmem:[%s11136_s30 + $0xda4] ss:$16 sps:$4 sm:$0xff]  }
 0x10e   : > { %6802 = vmatpush1.bf16.msra.mxu1 %v9478_v50  ;;  %6762 = vmatprep.subr.bf16.mxu0 %v9483_v51  ;;  %v11429_v50 = vpack.c.bf16 %v389_v45, %v389_v45  ;;  %v9547_v51 = vld [vmem:[%s11136_s30 + $0xc20] ss:$16 sps:$4 sm:$0xff]   ;;  %v9624_v45 = vld [vmem:[%s11136_s30 + $0xfa4] ss:$16 sps:$4 sm:$0xff]  }
 0x10f   : > { %6803 = vmatprep.subr.bf16.mxu1 %v9486_v53  ;;  %v9550_v53 = vld [vmem:[%s11136_s30 + $0xe20] ss:$16 sps:$4 sm:$0xff]  }
 0x111   : > { %6763 = vmatpush1.bf16.msra.mxu0 %v9481_v54  ;;  %v9555_v54 = vld [vmem:[%s11136_s30 + $0xc44] ss:$16 sps:$4 sm:$0xff]  }
 0x112   : > { %6804 = vmatpush1.bf16.msra.mxu1 %v9484_v55  ;;  %6764 = vmatprep.subr.bf16.mxu0 %v9489_v56  ;;  %v9558_v55 = vld [vmem:[%s11136_s30 + $0xe44] ss:$16 sps:$4 sm:$0xff]   ;;  %v9553_v56 = vld [vmem:[%s11136_s30 + $0xc40] ss:$16 sps:$4 sm:$0xff]  }
 0x113   : > { %6805 = vmatprep.subr.bf16.mxu1 %v9492_v57  ;;  %v9556_v57 = vld [vmem:[%s11136_s30 + $0xe40] ss:$16 sps:$4 sm:$0xff]  }
 0x115   : > { %6765 = vmatpush1.bf16.msra.mxu0 %v9487_v58  ;;  %v9561_v58 = vld [vmem:[%s11136_s30 + $0xc64] ss:$16 sps:$4 sm:$0xff]  }
 0x116   : > { %6806 = vmatpush1.bf16.msra.mxu1 %v9490_v59  ;;  %6766 = vmatprep.subr.bf16.mxu0 %v9495_v60  ;;  %v9564_v59 = vld [vmem:[%s11136_s30 + $0xe64] ss:$16 sps:$4 sm:$0xff]   ;;  %v9559_v60 = vld [vmem:[%s11136_s30 + $0xc60] ss:$16 sps:$4 sm:$0xff]  }
 0x117   : > { %6807 = vmatprep.subr.bf16.mxu1 %v9498_v61  ;;  %v9562_v61 = vld [vmem:[%s11136_s30 + $0xe60] ss:$16 sps:$4 sm:$0xff]  }
 0x119   : > { %6767 = vmatpush1.bf16.msra.mxu0 %v9493_v62  ;;  %v9567_v62 = vld [vmem:[%s11136_s30 + $0xc84] ss:$16 sps:$4 sm:$0xff]  }
 0x11a   : > { %6808 = vmatpush1.bf16.msra.mxu1 %v9496_v63  ;;  %6768 = vmatprep.subr.bf16.mxu0 %v9501_v0  ;;  %v9570_v63 = vld [vmem:[%s11136_s30 + $0xe84] ss:$16 sps:$4 sm:$0xff]   ;;  %v9565_v0 = vld [vmem:[%s11136_s30 + $0xc80] ss:$16 sps:$4 sm:$0xff]  }
 0x11b   : > { %6809 = vmatprep.subr.bf16.mxu1 %v9504_v1  ;;  %v9568_v1 = vld [vmem:[%s11136_s30 + $0xe80] ss:$16 sps:$4 sm:$0xff]  }
 0x11d   : > { %6769 = vmatpush1.bf16.msra.mxu0 %v9499_v2  ;;  %v9573_v2 = vld [vmem:[%s11136_s30 + $0xca4] ss:$16 sps:$4 sm:$0xff]  }
 0x11e   : > { %6810 = vmatpush1.bf16.msra.mxu1 %v9502_v3  ;;  %6770 = vmatprep.subr.bf16.mxu0 %v9507_v4  ;;  %v9576_v3 = vld [vmem:[%s11136_s30 + $0xea4] ss:$16 sps:$4 sm:$0xff]   ;;  %v9571_v4 = vld [vmem:[%s11136_s30 + $0xca0] ss:$16 sps:$4 sm:$0xff]  }
 0x11f   : > { %6811 = vmatprep.subr.bf16.mxu1 %v9510_v5  ;;  %v9574_v5 = vld [vmem:[%s11136_s30 + $0xea0] ss:$16 sps:$4 sm:$0xff]  }
 0x121   : > { %6771 = vmatpush1.bf16.msra.mxu0 %v9505_v6  ;;  %v9579_v6 = vld [vmem:[%s11136_s30 + $0xcc4] ss:$16 sps:$4 sm:$0xff]  }
 0x122   : > { %6812 = vmatpush1.bf16.msra.mxu1 %v9508_v7  ;;  %6772 = vmatprep.subr.bf16.mxu0 %v9513_v10  ;;  %v9582_v7 = vld [vmem:[%s11136_s30 + $0xec4] ss:$16 sps:$4 sm:$0xff]   ;;  %v9577_v10 = vld [vmem:[%s11136_s30 + $0xcc0] ss:$16 sps:$4 sm:$0xff]  }
 0x123   : > { %6813 = vmatprep.subr.bf16.mxu1 %v9516_v11  ;;  %v9580_v11 = vld [vmem:[%s11136_s30 + $0xec0] ss:$16 sps:$4 sm:$0xff]  }
 0x125   : > { %6773 = vmatpush1.bf16.msra.mxu0 %v9511_v12  ;;  %v9585_v12 = vld [vmem:[%s11136_s30 + $0xce4] ss:$16 sps:$4 sm:$0xff]  }
 0x126   : > { %6814 = vmatpush1.bf16.msra.mxu1 %v9514_v13  ;;  %6774 = vmatprep.subr.bf16.mxu0 %v9519_v14  ;;  %v9588_v13 = vld [vmem:[%s11136_s30 + $0xee4] ss:$16 sps:$4 sm:$0xff]   ;;  %v9583_v14 = vld [vmem:[%s11136_s30 + $0xce0] ss:$16 sps:$4 sm:$0xff]  }
 0x127   : > { %6815 = vmatprep.subr.bf16.mxu1 %v9522_v15  ;;  %v9586_v15 = vld [vmem:[%s11136_s30 + $0xee0] ss:$16 sps:$4 sm:$0xff]  }
 0x129   : > { %6775 = vmatpush1.bf16.msra.mxu0 %v9517_v16  ;;  %v9591_v16 = vld [vmem:[%s11136_s30 + $0xd04] ss:$16 sps:$4 sm:$0xff]  }
 0x12a   : > { %6816 = vmatpush1.bf16.msra.mxu1 %v9520_v17  ;;  %6776 = vmatprep.subr.bf16.mxu0 %v9525_v18  ;;  %v9594_v17 = vld [vmem:[%s11136_s30 + $0xf04] ss:$16 sps:$4 sm:$0xff]   ;;  %v9589_v18 = vld [vmem:[%s11136_s30 + $0xd00] ss:$16 sps:$4 sm:$0xff]  }
 0x12b   : > { %6817 = vmatprep.subr.bf16.mxu1 %v9528_v19  ;;  %v9592_v19 = vld [vmem:[%s11136_s30 + $0xf00] ss:$16 sps:$4 sm:$0xff]  }
 0x12d   : > { %6777 = vmatpush1.bf16.msra.mxu0 %v9523_v22  ;;  %v9597_v22 = vld [vmem:[%s11136_s30 + $0xd24] ss:$16 sps:$4 sm:$0xff]  }
 0x12e   : > { %6818 = vmatpush1.bf16.msra.mxu1 %v9526_v23  ;;  %6778 = vmatprep.subr.bf16.mxu0 %v9531_v24  ;;  %v9600_v23 = vld [vmem:[%s11136_s30 + $0xf24] ss:$16 sps:$4 sm:$0xff]   ;;  %v9595_v24 = vld [vmem:[%s11136_s30 + $0xd20] ss:$16 sps:$4 sm:$0xff]  }
 0x12f   : > { %6819 = vmatprep.subr.bf16.mxu1 %v9534_v25  ;;  %v9598_v25 = vld [vmem:[%s11136_s30 + $0xf20] ss:$16 sps:$4 sm:$0xff]  }
 0x131   : > { %6779 = vmatpush1.bf16.msra.mxu0 %v9529_v26  ;;  %v9603_v26 = vld [vmem:[%s11136_s30 + $0xd44] ss:$16 sps:$4 sm:$0xff]  }
 0x132   : > { %6820 = vmatpush1.bf16.msra.mxu1 %v9532_v27  ;;  %6780 = vmatprep.subr.bf16.mxu0 %v9537_v28  ;;  %v9606_v27 = vld [vmem:[%s11136_s30 + $0xf44] ss:$16 sps:$4 sm:$0xff]   ;;  %v9601_v28 = vld [vmem:[%s11136_s30 + $0xd40] ss:$16 sps:$4 sm:$0xff]  }
 0x133   : > { %6821 = vmatprep.subr.bf16.mxu1 %v9540_v30  ;;  %v9604_v30 = vld [vmem:[%s11136_s30 + $0xf40] ss:$16 sps:$4 sm:$0xff]  }
 0x135   : > { %6781 = vmatpush1.bf16.msra.mxu0 %v9535_v31  ;;  %v9609_v31 = vld [vmem:[%s11136_s30 + $0xd64] ss:$16 sps:$4 sm:$0xff]  }
 0x136   : > { %6822 = vmatpush1.bf16.msra.mxu1 %v9538_v33  ;;  %6832 = vmatprep.subr.bf16.mxu0 %v9543_v36  ;;  %v9612_v33 = vld [vmem:[%s11136_s30 + $0xf64] ss:$16 sps:$4 sm:$0xff]  }
 0x137   : > { %6873 = vmatprep.subr.bf16.mxu1 %v9546_v38  ;;  %v9615_v36 = vld [vmem:[%s11136_s30 + $0xd84] ss:$16 sps:$4 sm:$0xff]  }
 0x138   : > { %6783 = vmatmul.mubr.bf16.vlgmr.msra.gmra.mrb[8].mxu0 %v11415_v42  ;;  %v9618_v38 = vld [vmem:[%s11136_s30 + $0xf84] ss:$16 sps:$4 sm:$0xff]  }
 0x139   : > { %6824 = vmatmul.mubr.bf16.vlgmr.msra.gmra.mrb[8].mxu1 %v11417_v43  ;;  %6833 = vmatpush1.bf16.msra.mxu0 %v9541_v39  ;;  %v9613_v39 = vld [vmem:[%s11136_s30 + $0xd80] ss:$16 sps:$4 sm:$0xff]  }
 0x13a   : > { %6874 = vmatpush1.bf16.msra.mxu1 %v9544_v41  ;;  %6834 = vmatprep.subr.bf16.mxu0 %v9549_v46  ;;  %v9616_v41 = vld [vmem:[%s11136_s30 + $0xf80] ss:$16 sps:$4 sm:$0xff]  }
 0x13b   : > { %6875 = vmatprep.subr.bf16.mxu1 %v9552_v47  ;;  %6864 = vmatprep.mubr.bf16.mxu0 %v11427_v48  ;;  %v9619_v46 = vld [vmem:[%s11136_s30 + $0xda0] ss:$16 sps:$4 sm:$0xff]  }
 0x13c   : > { %6905 = vmatprep.mubr.bf16.mxu1 %v11429_v50  ;;  %v9622_v47 = vld [vmem:[%s11136_s30 + $0xfa0] ss:$16 sps:$4 sm:$0xff]  }
 0x13d   : > { %6835 = vmatpush1.bf16.msra.mxu0 %v9547_v51  ;;  %v9627_v51 = vld [vmem:[%s11136_s30 + $0xdc4] ss:$16 sps:$4 sm:$0xff]  }
 0x13e   : > { %6876 = vmatpush1.bf16.msra.mxu1 %v9550_v53  ;;  %6836 = vmatprep.subr.bf16.mxu0 %v9555_v54  ;;  %v9630_v53 = vld [vmem:[%s11136_s30 + $0xfc4] ss:$16 sps:$4 sm:$0xff]   ;;  %v9625_v54 = vld [vmem:[%s11136_s30 + $0xdc0] ss:$16 sps:$4 sm:$0xff]  }
 0x13f   : > { %6877 = vmatprep.subr.bf16.mxu1 %v9558_v55  ;;  %v9628_v55 = vld [vmem:[%s11136_s30 + $0xfc0] ss:$16 sps:$4 sm:$0xff]  }
 0x141   : > { %6837 = vmatpush1.bf16.msra.mxu0 %v9553_v56  ;;  %v9633_v56 = vld [vmem:[%s11136_s30 + $0xde4] ss:$16 sps:$4 sm:$0xff]  }
 0x142   : > { %6878 = vmatpush1.bf16.msra.mxu1 %v9556_v57  ;;  %6838 = vmatprep.subr.bf16.mxu0 %v9561_v58  ;;  %v9636_v57 = vld [vmem:[%s11136_s30 + $0xfe4] ss:$16 sps:$4 sm:$0xff]   ;;  %v9631_v58 = vld [vmem:[%s11136_s30 + $0xde0] ss:$16 sps:$4 sm:$0xff]  }
 0x143   : > { %6879 = vmatprep.subr.bf16.mxu1 %v9564_v59  ;;  %v9634_v59 = vld [vmem:[%s11136_s30 + $0xfe0] ss:$16 sps:$4 sm:$0xff]  }
 0x145   : > { %6839 = vmatpush1.bf16.msra.mxu0 %v9559_v60  ;;  %v386_v60 = vld [vmem:[%s12515_s0 + $0x60] sm:$0xff] }
 0x146   : > { %6880 = vmatpush1.bf16.msra.mxu1 %v9562_v61  ;;  %6840 = vmatprep.subr.bf16.mxu0 %v9567_v62  ;;  %v388_v61 = vld [vmem:[%s12515_s0 + $0x70] sm:$0xff] }
 0x147   : > { %6881 = vmatprep.subr.bf16.mxu1 %v9570_v63  ;;  %v9639_v62 = vld [vmem:[%s11136_s30 + $0x1004] ss:$16 sps:$4 sm:$0xff]  }
 0x148   : > { %v9642_v63 = vld [vmem:[%s11136_s30 + $0x1204] ss:$16 sps:$4 sm:$0xff]  }
 0x149   : > { %6841 = vmatpush1.bf16.msra.mxu0 %v9565_v0  ;;  %v9637_v0 = vld [vmem:[%s11136_s30 + $0x1000] ss:$16 sps:$4 sm:$0xff]  }
 0x14a   : > { %6882 = vmatpush1.bf16.msra.mxu1 %v9568_v1  ;;  %6842 = vmatprep.subr.bf16.mxu0 %v9573_v2  ;;  %v9640_v1 = vld [vmem:[%s11136_s30 + $0x1200] ss:$16 sps:$4 sm:$0xff]   ;;  %v11503_v2 = vpack.c.bf16 %v386_v60, %v386_v60  ;;  %v9687_v60 = vld [vmem:[%s11136_s30 + $0x1104] ss:$16 sps:$4 sm:$0xff]  }
 0x14b   : > { %6883 = vmatprep.subr.bf16.mxu1 %v9576_v3  ;;  %v11505_v3 = vpack.c.bf16 %v388_v61, %v388_v61  ;;  %v9690_v61 = vld [vmem:[%s11136_s30 + $0x1304] ss:$16 sps:$4 sm:$0xff]  }
 0x14d   : > { %6843 = vmatpush1.bf16.msra.mxu0 %v9571_v4  ;;  %v391_v4 = vld [vmem:[%s12515_s0 + $0x88] sm:$0xff] }
 0x14e   : > { %6884 = vmatpush1.bf16.msra.mxu1 %v9574_v5  ;;  %6844 = vmatprep.subr.bf16.mxu0 %v9579_v6  ;;  %v393_v5 = vld [vmem:[%s12515_s0 + $0x98] sm:$0xff]  ;;  %v9645_v6 = vld [vmem:[%s11136_s30 + $0x1024] ss:$16 sps:$4 sm:$0xff]  }
 0x14f   : > { %6885 = vmatprep.subr.bf16.mxu1 %v9582_v7  ;;  %v9648_v7 = vld [vmem:[%s11136_s30 + $0x1224] ss:$16 sps:$4 sm:$0xff]  }
 0x151   : > { %6845 = vmatpush1.bf16.msra.mxu0 %v9577_v10  ;;  %v11515_v10 = vpack.c.bf16 %v391_v4, %v391_v4  ;;  %v9691_v4 = vld [vmem:[%s11136_s30 + $0x1120] ss:$16 sps:$4 sm:$0xff]  }
 0x152   : > { %6886 = vmatpush1.bf16.msra.mxu1 %v9580_v11  ;;  %6846 = vmatprep.subr.bf16.mxu0 %v9585_v12  ;;  %v11517_v11 = vpack.c.bf16 %v393_v5, %v393_v5  ;;  %v9643_v12 = vld [vmem:[%s11136_s30 + $0x1020] ss:$16 sps:$4 sm:$0xff]  }
 0x153   : > { %6887 = vmatprep.subr.bf16.mxu1 %v9588_v13  ;;  %v9646_v13 = vld [vmem:[%s11136_s30 + $0x1220] ss:$16 sps:$4 sm:$0xff]  }
 0x154   : > { %v9694_v5 = vld [vmem:[%s11136_s30 + $0x1320] ss:$16 sps:$4 sm:$0xff]  }
 0x155   : > { %6847 = vmatpush1.bf16.msra.mxu0 %v9583_v14  ;;  %v9651_v14 = vld [vmem:[%s11136_s30 + $0x1044] ss:$16 sps:$4 sm:$0xff]  }
 0x156   : > { %6888 = vmatpush1.bf16.msra.mxu1 %v9586_v15  ;;  %6848 = vmatprep.subr.bf16.mxu0 %v9591_v16  ;;  %v9654_v15 = vld [vmem:[%s11136_s30 + $0x1244] ss:$16 sps:$4 sm:$0xff]   ;;  %v9649_v16 = vld [vmem:[%s11136_s30 + $0x1040] ss:$16 sps:$4 sm:$0xff]  }
 0x157   : > { %6889 = vmatprep.subr.bf16.mxu1 %v9594_v17  ;;  %v9652_v17 = vld [vmem:[%s11136_s30 + $0x1240] ss:$16 sps:$4 sm:$0xff]  }
 0x159   : > { %6849 = vmatpush1.bf16.msra.mxu0 %v9589_v18  ;;  %v9657_v18 = vld [vmem:[%s11136_s30 + $0x1064] ss:$16 sps:$4 sm:$0xff]  }
 0x15a   : > { %6890 = vmatpush1.bf16.msra.mxu1 %v9592_v19  ;;  %6850 = vmatprep.subr.bf16.mxu0 %v9597_v22  ;;  %v9660_v19 = vld [vmem:[%s11136_s30 + $0x1264] ss:$16 sps:$4 sm:$0xff]   ;;  %v9655_v22 = vld [vmem:[%s11136_s30 + $0x1060] ss:$16 sps:$4 sm:$0xff]  }
 0x15b   : > { %6891 = vmatprep.subr.bf16.mxu1 %v9600_v23  ;;  %v9658_v23 = vld [vmem:[%s11136_s30 + $0x1260] ss:$16 sps:$4 sm:$0xff]  }
 0x15d   : > { %6851 = vmatpush1.bf16.msra.mxu0 %v9595_v24  ;;  %v9663_v24 = vld [vmem:[%s11136_s30 + $0x1084] ss:$16 sps:$4 sm:$0xff]  }
 0x15e   : > { %6892 = vmatpush1.bf16.msra.mxu1 %v9598_v25  ;;  %6852 = vmatprep.subr.bf16.mxu0 %v9603_v26  ;;  %v9666_v25 = vld [vmem:[%s11136_s30 + $0x1284] ss:$16 sps:$4 sm:$0xff]   ;;  %v9661_v26 = vld [vmem:[%s11136_s30 + $0x1080] ss:$16 sps:$4 sm:$0xff]  }
 0x15f   : > { %6893 = vmatprep.subr.bf16.mxu1 %v9606_v27  ;;  %v9664_v27 = vld [vmem:[%s11136_s30 + $0x1280] ss:$16 sps:$4 sm:$0xff]  }
 0x161   : > { %6853 = vmatpush1.bf16.msra.mxu0 %v9601_v28  ;;  %v9669_v28 = vld [vmem:[%s11136_s30 + $0x10a4] ss:$16 sps:$4 sm:$0xff]  }
 0x162   : > { %6894 = vmatpush1.bf16.msra.mxu1 %v9604_v30  ;;  %6854 = vmatprep.subr.bf16.mxu0 %v9609_v31  ;;  %v9672_v30 = vld [vmem:[%s11136_s30 + $0x12a4] ss:$16 sps:$4 sm:$0xff]   ;;  %v9667_v31 = vld [vmem:[%s11136_s30 + $0x10a0] ss:$16 sps:$4 sm:$0xff]  }
 0x163   : > { %6895 = vmatprep.subr.bf16.mxu1 %v9612_v33  ;;  %v9670_v33 = vld [vmem:[%s11136_s30 + $0x12a0] ss:$16 sps:$4 sm:$0xff]  }
 0x165   : > { %6855 = vmatpush1.bf16.msra.mxu0 %v9607_v34  ;;  %v9675_v34 = vld [vmem:[%s11136_s30 + $0x10c4] ss:$16 sps:$4 sm:$0xff]  }
 0x166   : > { %6896 = vmatpush1.bf16.msra.mxu1 %v9610_v35  ;;  %6856 = vmatprep.subr.bf16.mxu0 %v9615_v36  ;;  %v9678_v35 = vld [vmem:[%s11136_s30 + $0x12c4] ss:$16 sps:$4 sm:$0xff]  }
 0x167   : > { %6897 = vmatprep.subr.bf16.mxu1 %v9618_v38 }
 0x169   : > { %6857 = vmatpush1.bf16.msra.mxu0 %v9613_v39  ;;  %v9673_v39 = vld [vmem:[%s11136_s30 + $0x10c0] ss:$16 sps:$4 sm:$0xff]  }
 0x16a   : > { %6898 = vmatpush1.bf16.msra.mxu1 %v9616_v41  ;;  %6858 = vmatprep.subr.bf16.mxu0 %v9621_v44 }
 0x16b   : > { %6899 = vmatprep.subr.bf16.mxu1 %v9624_v45 }
 0x16d   : > { %6859 = vmatpush1.bf16.msra.mxu0 %v9619_v46  ;;  %v9676_v46 = vld [vmem:[%s11136_s30 + $0x12c0] ss:$16 sps:$4 sm:$0xff]  }
 0x16e   : > { %6900 = vmatpush1.bf16.msra.mxu1 %v9622_v47  ;;  %6860 = vmatprep.subr.bf16.mxu0 %v9627_v51 }
 0x16f   : > { %6901 = vmatprep.subr.bf16.mxu1 %v9630_v53 }
 0x171   : > { %6861 = vmatpush1.bf16.msra.mxu0 %v9625_v54  ;;  %v9681_v54 = vld [vmem:[%s11136_s30 + $0x10e4] ss:$16 sps:$4 sm:$0xff]  }
 0x172   : > { %6902 = vmatpush1.bf16.msra.mxu1 %v9628_v55  ;;  %6862 = vmatprep.subr.bf16.mxu0 %v9633_v56 }
 0x173   : > { %6903 = vmatprep.subr.bf16.mxu1 %v9636_v57  ;;  %v9684_v57 = vld [vmem:[%s11136_s30 + $0x12e4] ss:$16 sps:$4 sm:$0xff]  }
 0x175   : > { %6863 = vmatpush1.bf16.msra.mxu0 %v9631_v58  ;;  %v9679_v58 = vld [vmem:[%s11136_s30 + $0x10e0] ss:$16 sps:$4 sm:$0xff]  }
 0x176   : > { %6904 = vmatpush1.bf16.msra.mxu1 %v9634_v59  ;;  %6914 = vmatprep.subr.bf16.mxu0 %v9639_v62  ;;  %v9682_v59 = vld [vmem:[%s11136_s30 + $0x12e0] ss:$16 sps:$4 sm:$0xff]  }
 0x177   : > { %6955 = vmatprep.subr.bf16.mxu1 %v9642_v63  ;;  %v9685_v62 = vld [vmem:[%s11136_s30 + $0x1100] ss:$16 sps:$4 sm:$0xff]  }
 0x178   : > { %6865 = vmatmul.mubr.bf16.vlgmr.msra.gmra.mrb[12].mxu0 %v11503_v2  ;;  %v9688_v63 = vld [vmem:[%s11136_s30 + $0x1300] ss:$16 sps:$4 sm:$0xff]  }
 0x179   : > { %6906 = vmatmul.mubr.bf16.vlgmr.msra.gmra.mrb[12].mxu1 %v11505_v3  ;;  %6915 = vmatpush1.bf16.msra.mxu0 %v9637_v0  ;;  %v9693_v0 = vld [vmem:[%s11136_s30 + $0x1124] ss:$16 sps:$4 sm:$0xff]  }
 0x17a   : > { %6956 = vmatpush1.bf16.msra.mxu1 %v9640_v1  ;;  %6916 = vmatprep.subr.bf16.mxu0 %v9645_v6  ;;  %v9696_v1 = vld [vmem:[%s11136_s30 + $0x1324] ss:$16 sps:$4 sm:$0xff]  }
 0x17b   : > { %6957 = vmatprep.subr.bf16.mxu1 %v9648_v7  ;;  %6946 = vmatprep.mubr.bf16.mxu0 %v11515_v10  ;;  %v9699_v6 = vld [vmem:[%s11136_s30 + $0x1144] ss:$16 sps:$4 sm:$0xff]  }
 0x17c   : > { %6987 = vmatprep.mubr.bf16.mxu1 %v11517_v11  ;;  %v9702_v7 = vld [vmem:[%s11136_s30 + $0x1344] ss:$16 sps:$4 sm:$0xff]  }
 0x17d   : > { %6917 = vmatpush1.bf16.msra.mxu0 %v9643_v12  ;;  %v9697_v12 = vld [vmem:[%s11136_s30 + $0x1140] ss:$16 sps:$4 sm:$0xff]  }
 0x17e   : > { %6958 = vmatpush1.bf16.msra.mxu1 %v9646_v13  ;;  %6918 = vmatprep.subr.bf16.mxu0 %v9651_v14  ;;  %v9700_v13 = vld [vmem:[%s11136_s30 + $0x1340] ss:$16 sps:$4 sm:$0xff]   ;;  %v9705_v14 = vld [vmem:[%s11136_s30 + $0x1164] ss:$16 sps:$4 sm:$0xff]  }
 0x17f   : > { %6959 = vmatprep.subr.bf16.mxu1 %v9654_v15  ;;  %v9708_v15 = vld [vmem:[%s11136_s30 + $0x1364] ss:$16 sps:$4 sm:$0xff]  }
 0x181   : > { %6919 = vmatpush1.bf16.msra.mxu0 %v9649_v16  ;;  %v9703_v16 = vld [vmem:[%s11136_s30 + $0x1160] ss:$16 sps:$4 sm:$0xff]  }
 0x182   : > { %6960 = vmatpush1.bf16.msra.mxu1 %v9652_v17  ;;  %6920 = vmatprep.subr.bf16.mxu0 %v9657_v18  ;;  %v9706_v17 = vld [vmem:[%s11136_s30 + $0x1360] ss:$16 sps:$4 sm:$0xff]   ;;  %v9711_v18 = vld [vmem:[%s11136_s30 + $0x1184] ss:$16 sps:$4 sm:$0xff]  }
 0x183   : > { %6961 = vmatprep.subr.bf16.mxu1 %v9660_v19  ;;  %v9714_v19 = vld [vmem:[%s11136_s30 + $0x1384] ss:$16 sps:$4 sm:$0xff]  }
 0x185   : > { %6921 = vmatpush1.bf16.msra.mxu0 %v9655_v22  ;;  %v9709_v22 = vld [vmem:[%s11136_s30 + $0x1180] ss:$16 sps:$4 sm:$0xff]  }
 0x186   : > { %6962 = vmatpush1.bf16.msra.mxu1 %v9658_v23  ;;  %6922 = vmatprep.subr.bf16.mxu0 %v9663_v24  ;;  %v9712_v23 = vld [vmem:[%s11136_s30 + $0x1380] ss:$16 sps:$4 sm:$0xff]   ;;  %v9717_v24 = vld [vmem:[%s11136_s30 + $0x11a4] ss:$16 sps:$4 sm:$0xff]  }
 0x187   : > { %6963 = vmatprep.subr.bf16.mxu1 %v9666_v25  ;;  %v9720_v25 = vld [vmem:[%s11136_s30 + $0x13a4] ss:$16 sps:$4 sm:$0xff]  }
 0x189   : > { %6923 = vmatpush1.bf16.msra.mxu0 %v9661_v26  ;;  %v9715_v26 = vld [vmem:[%s11136_s30 + $0x11a0] ss:$16 sps:$4 sm:$0xff]  }
 0x18a   : > { %6964 = vmatpush1.bf16.msra.mxu1 %v9664_v27  ;;  %6924 = vmatprep.subr.bf16.mxu0 %v9669_v28  ;;  %v9718_v27 = vld [vmem:[%s11136_s30 + $0x13a0] ss:$16 sps:$4 sm:$0xff]   ;;  %v9723_v28 = vld [vmem:[%s11136_s30 + $0x11c4] ss:$16 sps:$4 sm:$0xff]  }
 0x18b   : > { %6965 = vmatprep.subr.bf16.mxu1 %v9672_v30  ;;  %v6620_v36 = vpop.f32.mrb[0].mxu0  ;;  %v9726_v30 = vld [vmem:[%s11136_s30 + $0x13c4] ss:$16 sps:$4 sm:$0xff]  }
 0x18c   : > { %v6661_v38 = vpop.f32.mrb[0].mxu1  ;;  %v6622_v44 = vpop.f32.mrb[1].mxu0 }
 0x18d   : > { %v11544_v41 = vadd.f32 %v6661_v38, %v6620_v36  ;;  %v6663_v45 = vpop.f32.mrb[1].mxu1  ;;  %v6624_v51 = vpop.f32.mrb[2].mxu0  ;;  %6925 = vmatpush1.bf16.msra.mxu0 %v9667_v31  ;;  %v9721_v31 = vld [vmem:[%s11136_s30 + $0x11c0] ss:$16 sps:$4 sm:$0xff]  }
 0x18e   : > { %v11547_v47 = vadd.f32 %v6663_v45, %v6622_v44  ;;  %v6665_v53 = vpop.f32.mrb[2].mxu1  ;;  %6966 = vmatpush1.bf16.msra.mxu1 %v9670_v33  ;;  %v6625_v55 = vpop.f32.mrb[3].mxu0  ;;  %6926 = vmatprep.subr.bf16.mxu0 %v9675_v34  ;;  %v9724_v33 = vld [vmem:[%s11136_s30 + $0x13c0] ss:$16 sps:$4 sm:$0xff]   ;;  %v9729_v34 = vld [vmem:[%s11136_s30 + $0x11e4] ss:$16 sps:$4 sm:$0xff]  }
 0x18f   : > { %v6666_v56 = vpop.f32.mrb[3].mxu1  ;;  %6967 = vmatprep.subr.bf16.mxu1 %v9678_v35  ;;  %v9732_v35 = vld [vmem:[%s11136_s30 + $0x13e4] ss:$16 sps:$4 sm:$0xff]   ;;  %v9727_v36 = vld [vmem:[%s11136_s30 + $0x11e0] ss:$16 sps:$4 sm:$0xff]   ;;  %v397_v55 = vld [vmem:[%s12515_s0 + $0xb8] sm:$0xff] }
 0x190   : > { %v9730_v38 = vld [vmem:[%s11136_s30 + $0x13e0] ss:$16 sps:$4 sm:$0xff]   ;;  %v9735_v45 = vld [vmem:[%s11136_s30 + $0x1404] ss:$16 sps:$4 sm:$0xff]  }
 0x191   : > { %6927 = vmatpush1.bf16.msra.mxu0 %v9673_v39  ;;  %v390_v39 = vld [vmem:[%s12515_s0 + $0x80] sm:$0xff]  ;;  %v392_v44 = vld [vmem:[%s12515_s0 + $0x90] sm:$0xff] }
 0x192   : > { %6968 = vmatpush1.bf16.msra.mxu1 %v9676_v46  ;;  %6928 = vmatprep.subr.bf16.mxu0 %v9681_v54  ;;  %v9738_v46 = vld [vmem:[%s11136_s30 + $0x1604] ss:$16 sps:$4 sm:$0xff]   ;;  %v11593_v51 = vpack.c.bf16 %v390_v39, %v390_v39  ;;  %v11595_v53 = vpack.c.bf16 %v392_v44, %v392_v44  ;;  %v395_v54 = vld [vmem:[%s12515_s0 + $0xa8] sm:$0xff]  ;;  %v9733_v56 = vld [vmem:[%s11136_s30 + $0x1400] ss:$16 sps:$4 sm:$0xff]  }
 0x193   : > { %6969 = vmatprep.subr.bf16.mxu1 %v9684_v57  ;;  %v9736_v57 = vld [vmem:[%s11136_s30 + $0x1600] ss:$16 sps:$4 sm:$0xff]  }
 0x195   : > { %6929 = vmatpush1.bf16.msra.mxu0 %v9679_v58  ;;  %v9741_v58 = vld [vmem:[%s11136_s30 + $0x1424] ss:$16 sps:$4 sm:$0xff]  }
 0x196   : > { %6970 = vmatpush1.bf16.msra.mxu1 %v9682_v59  ;;  %6930 = vmatprep.subr.bf16.mxu0 %v9687_v60  ;;  %v9744_v59 = vld [vmem:[%s11136_s30 + $0x1624] ss:$16 sps:$4 sm:$0xff]   ;;  %v11607_v60 = vpack.c.bf16 %v395_v54, %v395_v54 }
 0x197   : > { %6971 = vmatprep.subr.bf16.mxu1 %v9690_v61  ;;  %v11609_v61 = vpack.c.bf16 %v397_v55, %v397_v55  ;;  %v9778_v55 = vld [vmem:[%s11136_s30 + $0x16e0] ss:$16 sps:$4 sm:$0xff]  }
 0x199   : > { %6931 = vmatpush1.bf16.msra.mxu0 %v9685_v62  ;;  %v9739_v62 = vld [vmem:[%s11136_s30 + $0x1420] ss:$16 sps:$4 sm:$0xff]  }
 0x19a   : > { %6972 = vmatpush1.bf16.msra.mxu1 %v9688_v63  ;;  %6932 = vmatprep.subr.bf16.mxu0 %v9693_v0  ;;  %v9742_v63 = vld [vmem:[%s11136_s30 + $0x1620] ss:$16 sps:$4 sm:$0xff]   ;;  %v9747_v0 = vld [vmem:[%s11136_s30 + $0x1444] ss:$16 sps:$4 sm:$0xff]  }
 0x19b   : > { %6973 = vmatprep.subr.bf16.mxu1 %v9696_v1  ;;  %v9750_v1 = vld [vmem:[%s11136_s30 + $0x1644] ss:$16 sps:$4 sm:$0xff]  }
 0x19d   : > { %6933 = vmatpush1.bf16.msra.mxu0 %v9691_v4  ;;  %v9745_v4 = vld [vmem:[%s11136_s30 + $0x1440] ss:$16 sps:$4 sm:$0xff]  }
 0x19e   : > { %6974 = vmatpush1.bf16.msra.mxu1 %v9694_v5  ;;  %6934 = vmatprep.subr.bf16.mxu0 %v9699_v6  ;;  %v9748_v5 = vld [vmem:[%s11136_s30 + $0x1640] ss:$16 sps:$4 sm:$0xff]   ;;  %v9753_v6 = vld [vmem:[%s11136_s30 + $0x1464] ss:$16 sps:$4 sm:$0xff]  }
 0x19f   : > { %6975 = vmatprep.subr.bf16.mxu1 %v9702_v7  ;;  %v9756_v7 = vld [vmem:[%s11136_s30 + $0x1664] ss:$16 sps:$4 sm:$0xff]  }
 0x1a1   : > { %6935 = vmatpush1.bf16.msra.mxu0 %v9697_v12  ;;  %v9751_v12 = vld [vmem:[%s11136_s30 + $0x1460] ss:$16 sps:$4 sm:$0xff]  }
 0x1a2   : > { %6976 = vmatpush1.bf16.msra.mxu1 %v9700_v13  ;;  %6936 = vmatprep.subr.bf16.mxu0 %v9705_v14  ;;  %v9754_v13 = vld [vmem:[%s11136_s30 + $0x1660] ss:$16 sps:$4 sm:$0xff]   ;;  %v9759_v14 = vld [vmem:[%s11136_s30 + $0x1484] ss:$16 sps:$4 sm:$0xff]  }
 0x1a3   : > { %6977 = vmatprep.subr.bf16.mxu1 %v9708_v15  ;;  %v9762_v15 = vld [vmem:[%s11136_s30 + $0x1684] ss:$16 sps:$4 sm:$0xff]  }
 0x1a5   : > { %6937 = vmatpush1.bf16.msra.mxu0 %v9703_v16  ;;  %v9757_v16 = vld [vmem:[%s11136_s30 + $0x1480] ss:$16 sps:$4 sm:$0xff]  }
 0x1a6   : > { %6978 = vmatpush1.bf16.msra.mxu1 %v9706_v17  ;;  %6938 = vmatprep.subr.bf16.mxu0 %v9711_v18  ;;  %v9760_v17 = vld [vmem:[%s11136_s30 + $0x1680] ss:$16 sps:$4 sm:$0xff]   ;;  %v9765_v18 = vld [vmem:[%s11136_s30 + $0x14a4] ss:$16 sps:$4 sm:$0xff]  }
 0x1a7   : > { %6979 = vmatprep.subr.bf16.mxu1 %v9714_v19  ;;  %v9768_v19 = vld [vmem:[%s11136_s30 + $0x16a4] ss:$16 sps:$4 sm:$0xff]  }
 0x1a9   : > { %6939 = vmatpush1.bf16.msra.mxu0 %v9709_v22  ;;  %v9763_v22 = vld [vmem:[%s11136_s30 + $0x14a0] ss:$16 sps:$4 sm:$0xff]  }
 0x1aa   : > { %6980 = vmatpush1.bf16.msra.mxu1 %v9712_v23  ;;  %6940 = vmatprep.subr.bf16.mxu0 %v9717_v24  ;;  %v9766_v23 = vld [vmem:[%s11136_s30 + $0x16a0] ss:$16 sps:$4 sm:$0xff]   ;;  %v9771_v24 = vld [vmem:[%s11136_s30 + $0x14c4] ss:$16 sps:$4 sm:$0xff]  }
 0x1ab   : > { %6981 = vmatprep.subr.bf16.mxu1 %v9720_v25  ;;  %v9774_v25 = vld [vmem:[%s11136_s30 + $0x16c4] ss:$16 sps:$4 sm:$0xff]  }
 0x1ad   : > { %6941 = vmatpush1.bf16.msra.mxu0 %v9715_v26 }
 0x1ae   : > { %6982 = vmatpush1.bf16.msra.mxu1 %v9718_v27  ;;  %6942 = vmatprep.subr.bf16.mxu0 %v9723_v28  ;;  %v9769_v28 = vld [vmem:[%s11136_s30 + $0x14c0] ss:$16 sps:$4 sm:$0xff]  }
 0x1af   : > { %6983 = vmatprep.subr.bf16.mxu1 %v9726_v30  ;;  %v9772_v30 = vld [vmem:[%s11136_s30 + $0x16c0] ss:$16 sps:$4 sm:$0xff]  }
 0x1b1   : > { %6943 = vmatpush1.bf16.msra.mxu0 %v9721_v31 }
 0x1b2   : > { %6984 = vmatpush1.bf16.msra.mxu1 %v9724_v33  ;;  %6944 = vmatprep.subr.bf16.mxu0 %v9729_v34 }
 0x1b3   : > { %6985 = vmatprep.subr.bf16.mxu1 %v9732_v35 }
 0x1b5   : > { %6945 = vmatpush1.bf16.msra.mxu0 %v9727_v36 }
 0x1b6   : > { %6986 = vmatpush1.bf16.msra.mxu1 %v9730_v38  ;;  %6996 = vmatprep.subr.bf16.mxu0 %v9735_v45 }
 0x1b7   : > { %7037 = vmatprep.subr.bf16.mxu1 %v9738_v46  ;;  %v9780_v46 = vld [vmem:[%s11136_s30 + $0x16e4] ss:$16 sps:$4 sm:$0xff]  }
 0x1b8   : > { %6947 = vmatmul.mubr.bf16.vlgmr.msra.gmra.mrb[16].mxu0 %v11593_v51 }
 0x1b9   : > { %6988 = vmatmul.mubr.bf16.vlgmr.msra.gmra.mrb[16].mxu1 %v11595_v53  ;;  %6997 = vmatpush1.bf16.msra.mxu0 %v9733_v56  ;;  %v9783_v56 = vld [vmem:[%s11136_s30 + $0x1504] ss:$16 sps:$4 sm:$0xff]  }
 0x1ba   : > { %7038 = vmatpush1.bf16.msra.mxu1 %v9736_v57  ;;  %6998 = vmatprep.subr.bf16.mxu0 %v9741_v58  ;;  %v9786_v57 = vld [vmem:[%s11136_s30 + $0x1704] ss:$16 sps:$4 sm:$0xff]   ;;  %v9781_v58 = vld [vmem:[%s11136_s30 + $0x1500] ss:$16 sps:$4 sm:$0xff]  }
 0x1bb   : > { %7039 = vmatprep.subr.bf16.mxu1 %v9744_v59  ;;  %7028 = vmatprep.mubr.bf16.mxu0 %v11607_v60  ;;  %v9784_v59 = vld [vmem:[%s11136_s30 + $0x1700] ss:$16 sps:$4 sm:$0xff]  }
 0x1bc   : > { %7069 = vmatprep.mubr.bf16.mxu1 %v11609_v61 }
 0x1bd   : > { %6999 = vmatpush1.bf16.msra.mxu0 %v9739_v62  ;;  %v9789_v62 = vld [vmem:[%s11136_s30 + $0x1524] ss:$16 sps:$4 sm:$0xff]  }
 0x1be   : > { %7040 = vmatpush1.bf16.msra.mxu1 %v9742_v63  ;;  %7000 = vmatprep.subr.bf16.mxu0 %v9747_v0  ;;  %v9792_v63 = vld [vmem:[%s11136_s30 + $0x1724] ss:$16 sps:$4 sm:$0xff]   ;;  %v9787_v0 = vld [vmem:[%s11136_s30 + $0x1520] ss:$16 sps:$4 sm:$0xff]  }
 0x1bf   : > { %7041 = vmatprep.subr.bf16.mxu1 %v9750_v1  ;;  %v9790_v1 = vld [vmem:[%s11136_s30 + $0x1720] ss:$16 sps:$4 sm:$0xff]  }
 0x1c1   : > { %7001 = vmatpush1.bf16.msra.mxu0 %v9745_v4  ;;  %v9795_v4 = vld [vmem:[%s11136_s30 + $0x1544] ss:$16 sps:$4 sm:$0xff]  }
 0x1c2   : > { %7042 = vmatpush1.bf16.msra.mxu1 %v9748_v5  ;;  %7002 = vmatprep.subr.bf16.mxu0 %v9753_v6  ;;  %v9798_v5 = vld [vmem:[%s11136_s30 + $0x1744] ss:$16 sps:$4 sm:$0xff]   ;;  %v9793_v6 = vld [vmem:[%s11136_s30 + $0x1540] ss:$16 sps:$4 sm:$0xff]  }
 0x1c3   : > { %7043 = vmatprep.subr.bf16.mxu1 %v9756_v7  ;;  %v9796_v7 = vld [vmem:[%s11136_s30 + $0x1740] ss:$16 sps:$4 sm:$0xff]  }
 0x1c5   : > { %7003 = vmatpush1.bf16.msra.mxu0 %v9751_v12  ;;  %v9801_v12 = vld [vmem:[%s11136_s30 + $0x1564] ss:$16 sps:$4 sm:$0xff]  }
 0x1c6   : > { %7044 = vmatpush1.bf16.msra.mxu1 %v9754_v13  ;;  %7004 = vmatprep.subr.bf16.mxu0 %v9759_v14  ;;  %v9804_v13 = vld [vmem:[%s11136_s30 + $0x1764] ss:$16 sps:$4 sm:$0xff]   ;;  %v9799_v14 = vld [vmem:[%s11136_s30 + $0x1560] ss:$16 sps:$4 sm:$0xff]  }
 0x1c7   : > { %7045 = vmatprep.subr.bf16.mxu1 %v9762_v15  ;;  %v9802_v15 = vld [vmem:[%s11136_s30 + $0x1760] ss:$16 sps:$4 sm:$0xff]  }
 0x1c9   : > { %7005 = vmatpush1.bf16.msra.mxu0 %v9757_v16  ;;  %v9807_v16 = vld [vmem:[%s11136_s30 + $0x1584] ss:$16 sps:$4 sm:$0xff]  }
 0x1ca   : > { %7046 = vmatpush1.bf16.msra.mxu1 %v9760_v17  ;;  %7006 = vmatprep.subr.bf16.mxu0 %v9765_v18  ;;  %v9810_v17 = vld [vmem:[%s11136_s30 + $0x1784] ss:$16 sps:$4 sm:$0xff]   ;;  %v9805_v18 = vld [vmem:[%s11136_s30 + $0x1580] ss:$16 sps:$4 sm:$0xff]  }
 0x1cb   : > { %7047 = vmatprep.subr.bf16.mxu1 %v9768_v19  ;;  %v6702_v26 = vpop.f32.mrb[4].mxu0  ;;  %v9808_v19 = vld [vmem:[%s11136_s30 + $0x1780] ss:$16 sps:$4 sm:$0xff]  }
 0x1cc   : > { %v6743_v27 = vpop.f32.mrb[4].mxu1  ;;  %v6703_v31 = vadd.f32 %v6702_v26, %v11544_v41  ;;  %v6704_v33 = vpop.f32.mrb[5].mxu0  ;;  %v9777_v41 = vld [vmem:[%s11136_s30 + $0x14e4] ss:$16 sps:$4 sm:$0xff]  }
 0x1cd   : > { %v6745_v34 = vpop.f32.mrb[5].mxu1  ;;  %v6705_v35 = vadd.f32 %v6704_v33, %v11547_v47  ;;  %v6706_v36 = vpop.f32.mrb[6].mxu0  ;;  %7007 = vmatpush1.bf16.msra.mxu0 %v9763_v22  ;;  %v9775_v47 = vld [vmem:[%s11136_s30 + $0x14e0] ss:$16 sps:$4 sm:$0xff]   ;;  %v9813_v22 = vld [vmem:[%s11136_s30 + $0x15a4] ss:$16 sps:$4 sm:$0xff]  }
 0x1ce   : > { %v6747_v38 = vpop.f32.mrb[6].mxu1  ;;  %7048 = vmatpush1.bf16.msra.mxu1 %v9766_v23  ;;  %v11639_v39 = vadd.f32 %v6743_v27, %v6703_v31  ;;  %v6707_v44 = vpop.f32.mrb[7].mxu0  ;;  %7008 = vmatprep.subr.bf16.mxu0 %v9771_v24  ;;  %v9816_v23 = vld [vmem:[%s11136_s30 + $0x17a4] ss:$16 sps:$4 sm:$0xff]   ;;  %v9811_v24 = vld [vmem:[%s11136_s30 + $0x15a0] ss:$16 sps:$4 sm:$0xff]  }
 0x1cf   : > { %v6748_v45 = vpop.f32.mrb[7].mxu1  ;;  %7049 = vmatprep.subr.bf16.mxu1 %v9774_v25  ;;  %v11643_v54 = vadd.f32 %v6745_v34, %v6705_v35  ;;  %v9814_v25 = vld [vmem:[%s11136_s30 + $0x17a0] ss:$16 sps:$4 sm:$0xff]   ;;  %v9819_v26 = vld [vmem:[%s11136_s30 + $0x15c4] ss:$16 sps:$4 sm:$0xff]  }
 0x1d0   : > { %v9822_v27 = vld [vmem:[%s11136_s30 + $0x17c4] ss:$16 sps:$4 sm:$0xff]   ;;  %v9823_v34 = vld [vmem:[%s11136_s30 + $0x15e0] ss:$16 sps:$4 sm:$0xff]  }
 0x1d1   : > { %7009 = vmatpush1.bf16.msra.mxu0 %v9769_v28  ;;  %v9817_v28 = vld [vmem:[%s11136_s30 + $0x15c0] ss:$16 sps:$4 sm:$0xff]   ;;  %v9825_v31 = vld [vmem:[%s11136_s30 + $0x15e4] ss:$16 sps:$4 sm:$0xff]  }
 0x1d2   : > { %7050 = vmatpush1.bf16.msra.mxu1 %v9772_v30  ;;  %7010 = vmatprep.subr.bf16.mxu0 %v9777_v41  ;;  %v9820_v30 = vld [vmem:[%s11136_s30 + $0x17c0] ss:$16 sps:$4 sm:$0xff]   ;;  %v9828_v33 = vld [vmem:[%s11136_s30 + $0x17e4] ss:$16 sps:$4 sm:$0xff]  }
 0x1d3   : > { %7051 = vmatprep.subr.bf16.mxu1 %v9780_v46  ;;  %v9826_v35 = vld [vmem:[%s11136_s30 + $0x17e0] ss:$16 sps:$4 sm:$0xff]   ;;  %v9831_v44 = vld [vmem:[%s11136_s30 + $0x1804] ss:$16 sps:$4 sm:$0xff]  }
 0x1d4   : > { %v394_v36 = vld [vmem:[%s12515_s0 + $0xa0] sm:$0xff]  ;;  %v396_v38 = vld [vmem:[%s12515_s0 + $0xb0] sm:$0xff] }
 0x1d5   : > { %7011 = vmatpush1.bf16.msra.mxu0 %v9775_v47  ;;  %v9834_v45 = vld [vmem:[%s11136_s30 + $0x1a04] ss:$16 sps:$4 sm:$0xff]   ;;  %v11687_v41 = vpack.c.bf16 %v394_v36, %v394_v36  ;;  %v11689_v46 = vpack.c.bf16 %v396_v38, %v396_v38  ;;  %v399_v47 = vld [vmem:[%s12515_s0 + $0xc8] sm:$0xff] }
 0x1d6   : > { %7052 = vmatpush1.bf16.msra.mxu1 %v9778_v55  ;;  %7012 = vmatprep.subr.bf16.mxu0 %v9783_v56  ;;  %v401_v55 = vld [vmem:[%s12515_s0 + $0xd8] sm:$0xff]  ;;  %v9829_v56 = vld [vmem:[%s11136_s30 + $0x1800] ss:$16 sps:$4 sm:$0xff]  }
 0x1d7   : > { %7053 = vmatprep.subr.bf16.mxu1 %v9786_v57  ;;  %v9832_v57 = vld [vmem:[%s11136_s30 + $0x1a00] ss:$16 sps:$4 sm:$0xff]  }
 0x1d9   : > { %7013 = vmatpush1.bf16.msra.mxu0 %v9781_v58  ;;  %v9837_v58 = vld [vmem:[%s11136_s30 + $0x1824] ss:$16 sps:$4 sm:$0xff]  }
 0x1da   : > { %7054 = vmatpush1.bf16.msra.mxu1 %v9784_v59  ;;  %7014 = vmatprep.subr.bf16.mxu0 %v9789_v62  ;;  %v9840_v59 = vld [vmem:[%s11136_s30 + $0x1a24] ss:$16 sps:$4 sm:$0xff]   ;;  %v11701_v62 = vpack.c.bf16 %v399_v47, %v399_v47 }
 0x1db   : > { %7055 = vmatprep.subr.bf16.mxu1 %v9792_v63  ;;  %v11703_v63 = vpack.c.bf16 %v401_v55, %v401_v55 }
 0x1dd   : > { %7015 = vmatpush1.bf16.msra.mxu0 %v9787_v0  ;;  %v9835_v0 = vld [vmem:[%s11136_s30 + $0x1820] ss:$16 sps:$4 sm:$0xff]  }
 0x1de   : > { %7056 = vmatpush1.bf16.msra.mxu1 %v9790_v1  ;;  %7016 = vmatprep.subr.bf16.mxu0 %v9795_v4  ;;  %v9838_v1 = vld [vmem:[%s11136_s30 + $0x1a20] ss:$16 sps:$4 sm:$0xff]   ;;  %v9843_v4 = vld [vmem:[%s11136_s30 + $0x1844] ss:$16 sps:$4 sm:$0xff]  }
 0x1df   : > { %7057 = vmatprep.subr.bf16.mxu1 %v9798_v5  ;;  %v9846_v5 = vld [vmem:[%s11136_s30 + $0x1a44] ss:$16 sps:$4 sm:$0xff]  }
 0x1e1   : > { %7017 = vmatpush1.bf16.msra.mxu0 %v9793_v6  ;;  %v9841_v6 = vld [vmem:[%s11136_s30 + $0x1840] ss:$16 sps:$4 sm:$0xff]  }
 0x1e2   : > { %7058 = vmatpush1.bf16.msra.mxu1 %v9796_v7  ;;  %7018 = vmatprep.subr.bf16.mxu0 %v9801_v12  ;;  %v9844_v7 = vld [vmem:[%s11136_s30 + $0x1a40] ss:$16 sps:$4 sm:$0xff]   ;;  %v9849_v12 = vld [vmem:[%s11136_s30 + $0x1864] ss:$16 sps:$4 sm:$0xff]  }
 0x1e3   : > { %7059 = vmatprep.subr.bf16.mxu1 %v9804_v13  ;;  %v9852_v13 = vld [vmem:[%s11136_s30 + $0x1a64] ss:$16 sps:$4 sm:$0xff]  }
 0x1e5   : > { %7019 = vmatpush1.bf16.msra.mxu0 %v9799_v14  ;;  %v9847_v14 = vld [vmem:[%s11136_s30 + $0x1860] ss:$16 sps:$4 sm:$0xff]  }
 0x1e6   : > { %7060 = vmatpush1.bf16.msra.mxu1 %v9802_v15  ;;  %7020 = vmatprep.subr.bf16.mxu0 %v9807_v16  ;;  %v9850_v15 = vld [vmem:[%s11136_s30 + $0x1a60] ss:$16 sps:$4 sm:$0xff]   ;;  %v9855_v16 = vld [vmem:[%s11136_s30 + $0x1884] ss:$16 sps:$4 sm:$0xff]  }
 0x1e7   : > { %7061 = vmatprep.subr.bf16.mxu1 %v9810_v17  ;;  %v9858_v17 = vld [vmem:[%s11136_s30 + $0x1a84] ss:$16 sps:$4 sm:$0xff]  }
 0x1e9   : > { %7021 = vmatpush1.bf16.msra.mxu0 %v9805_v18  ;;  %v9853_v18 = vld [vmem:[%s11136_s30 + $0x1880] ss:$16 sps:$4 sm:$0xff]  }
 0x1ea   : > { %7062 = vmatpush1.bf16.msra.mxu1 %v9808_v19  ;;  %7022 = vmatprep.subr.bf16.mxu0 %v9813_v22  ;;  %v9856_v19 = vld [vmem:[%s11136_s30 + $0x1a80] ss:$16 sps:$4 sm:$0xff]   ;;  %v9861_v22 = vld [vmem:[%s11136_s30 + $0x18a4] ss:$16 sps:$4 sm:$0xff]  }
 0x1eb   : > { %7063 = vmatprep.subr.bf16.mxu1 %v9816_v23  ;;  %v9864_v23 = vld [vmem:[%s11136_s30 + $0x1aa4] ss:$16 sps:$4 sm:$0xff]  }
 0x1ed   : > { %7023 = vmatpush1.bf16.msra.mxu0 %v9811_v24  ;;  %v9859_v24 = vld [vmem:[%s11136_s30 + $0x18a0] ss:$16 sps:$4 sm:$0xff]  }
 0x1ee   : > { %7064 = vmatpush1.bf16.msra.mxu1 %v9814_v25  ;;  %7024 = vmatprep.subr.bf16.mxu0 %v9819_v26  ;;  %v9862_v25 = vld [vmem:[%s11136_s30 + $0x1aa0] ss:$16 sps:$4 sm:$0xff]   ;;  %v9867_v26 = vld [vmem:[%s11136_s30 + $0x18c4] ss:$16 sps:$4 sm:$0xff]  }
 0x1ef   : > { %7065 = vmatprep.subr.bf16.mxu1 %v9822_v27  ;;  %v9870_v27 = vld [vmem:[%s11136_s30 + $0x1ac4] ss:$16 sps:$4 sm:$0xff]  }
 0x1f1   : > { %7025 = vmatpush1.bf16.msra.mxu0 %v9817_v28 }
 0x1f2   : > { %7066 = vmatpush1.bf16.msra.mxu1 %v9820_v30  ;;  %7026 = vmatprep.subr.bf16.mxu0 %v9825_v31  ;;  %v9865_v31 = vld [vmem:[%s11136_s30 + $0x18c0] ss:$16 sps:$4 sm:$0xff]  }
 0x1f3   : > { %7067 = vmatprep.subr.bf16.mxu1 %v9828_v33  ;;  %v9868_v33 = vld [vmem:[%s11136_s30 + $0x1ac0] ss:$16 sps:$4 sm:$0xff]  }
 0x1f5   : > { %7027 = vmatpush1.bf16.msra.mxu0 %v9823_v34 }
 0x1f6   : > { %7068 = vmatpush1.bf16.msra.mxu1 %v9826_v35  ;;  %7078 = vmatprep.subr.bf16.mxu0 %v9831_v44 }
 0x1f7   : > { %7119 = vmatprep.subr.bf16.mxu1 %v9834_v45 }
 0x1f8   : > { %7029 = vmatmul.mubr.bf16.vlgmr.msra.gmra.mrb[20].mxu0 %v11687_v41 }
 0x1f9   : > { %7070 = vmatmul.mubr.bf16.vlgmr.msra.gmra.mrb[20].mxu1 %v11689_v46  ;;  %7079 = vmatpush1.bf16.msra.mxu0 %v9829_v56 }
 0x1fa   : > { %7120 = vmatpush1.bf16.msra.mxu1 %v9832_v57  ;;  %7080 = vmatprep.subr.bf16.mxu0 %v9837_v58  ;;  %v9876_v57 = vld [vmem:[%s11136_s30 + $0x1ae4] ss:$16 sps:$4 sm:$0xff]  }
 0x1fb   : > { %7121 = vmatprep.subr.bf16.mxu1 %v9840_v59  ;;  %7110 = vmatprep.mubr.bf16.mxu0 %v11701_v62  ;;  %v9874_v59 = vld [vmem:[%s11136_s30 + $0x1ae0] ss:$16 sps:$4 sm:$0xff]  }
 0x1fc   : > { %7151 = vmatprep.mubr.bf16.mxu1 %v11703_v63 }
 0x1fd   : > { %7081 = vmatpush1.bf16.msra.mxu0 %v9835_v0  ;;  %v9879_v0 = vld [vmem:[%s11136_s30 + $0x1904] ss:$16 sps:$4 sm:$0xff]  }
 0x1fe   : > { %7122 = vmatpush1.bf16.msra.mxu1 %v9838_v1  ;;  %7082 = vmatprep.subr.bf16.mxu0 %v9843_v4  ;;  %v9882_v1 = vld [vmem:[%s11136_s30 + $0x1b04] ss:$16 sps:$4 sm:$0xff]   ;;  %v9877_v4 = vld [vmem:[%s11136_s30 + $0x1900] ss:$16 sps:$4 sm:$0xff]  }
 0x1ff   : > { %7123 = vmatprep.subr.bf16.mxu1 %v9846_v5  ;;  %v9880_v5 = vld [vmem:[%s11136_s30 + $0x1b00] ss:$16 sps:$4 sm:$0xff]  }
 0x201   : > { %7083 = vmatpush1.bf16.msra.mxu0 %v9841_v6  ;;  %v9885_v6 = vld [vmem:[%s11136_s30 + $0x1924] ss:$16 sps:$4 sm:$0xff]  }
 0x202   : > { %7124 = vmatpush1.bf16.msra.mxu1 %v9844_v7  ;;  %7084 = vmatprep.subr.bf16.mxu0 %v9849_v12  ;;  %v9888_v7 = vld [vmem:[%s11136_s30 + $0x1b24] ss:$16 sps:$4 sm:$0xff]   ;;  %v9883_v12 = vld [vmem:[%s11136_s30 + $0x1920] ss:$16 sps:$4 sm:$0xff]  }
 0x203   : > { %7125 = vmatprep.subr.bf16.mxu1 %v9852_v13  ;;  %v9886_v13 = vld [vmem:[%s11136_s30 + $0x1b20] ss:$16 sps:$4 sm:$0xff]  }
 0x205   : > { %7085 = vmatpush1.bf16.msra.mxu0 %v9847_v14  ;;  %v9891_v14 = vld [vmem:[%s11136_s30 + $0x1944] ss:$16 sps:$4 sm:$0xff]  }
 0x206   : > { %7126 = vmatpush1.bf16.msra.mxu1 %v9850_v15  ;;  %7086 = vmatprep.subr.bf16.mxu0 %v9855_v16  ;;  %v9894_v15 = vld [vmem:[%s11136_s30 + $0x1b44] ss:$16 sps:$4 sm:$0xff]   ;;  %v9889_v16 = vld [vmem:[%s11136_s30 + $0x1940] ss:$16 sps:$4 sm:$0xff]  }
 0x207   : > { %7127 = vmatprep.subr.bf16.mxu1 %v9858_v17  ;;  %v9892_v17 = vld [vmem:[%s11136_s30 + $0x1b40] ss:$16 sps:$4 sm:$0xff]  }
 0x209   : > { %7087 = vmatpush1.bf16.msra.mxu0 %v9853_v18  ;;  %v9897_v18 = vld [vmem:[%s11136_s30 + $0x1964] ss:$16 sps:$4 sm:$0xff]  }
 0x20a   : > { %7128 = vmatpush1.bf16.msra.mxu1 %v9856_v19  ;;  %7088 = vmatprep.subr.bf16.mxu0 %v9861_v22  ;;  %v9900_v19 = vld [vmem:[%s11136_s30 + $0x1b64] ss:$16 sps:$4 sm:$0xff]   ;;  %v9895_v22 = vld [vmem:[%s11136_s30 + $0x1960] ss:$16 sps:$4 sm:$0xff]  }
 0x20b   : > { %7129 = vmatprep.subr.bf16.mxu1 %v9864_v23  ;;  %v6784_v28 = vpop.f32.mrb[8].mxu0  ;;  %v9898_v23 = vld [vmem:[%s11136_s30 + $0x1b60] ss:$16 sps:$4 sm:$0xff]  }
 0x20c   : > { %v6825_v30 = vpop.f32.mrb[8].mxu1  ;;  %v6785_v34 = vadd.f32 %v6784_v28, %v11639_v39  ;;  %v6786_v35 = vpop.f32.mrb[9].mxu0  ;;  %v9873_v39 = vld [vmem:[%s11136_s30 + $0x18e4] ss:$16 sps:$4 sm:$0xff]  }
 0x20d   : > { %v6827_v36 = vpop.f32.mrb[9].mxu1  ;;  %v6787_v38 = vadd.f32 %v6786_v35, %v11643_v54  ;;  %v6788_v44 = vpop.f32.mrb[10].mxu0  ;;  %7089 = vmatpush1.bf16.msra.mxu0 %v9859_v24  ;;  %v9871_v54 = vld [vmem:[%s11136_s30 + $0x18e0] ss:$16 sps:$4 sm:$0xff]   ;;  %v9903_v24 = vld [vmem:[%s11136_s30 + $0x1984] ss:$16 sps:$4 sm:$0xff]  }
 0x20e   : > { %v6829_v45 = vpop.f32.mrb[10].mxu1  ;;  %7130 = vmatpush1.bf16.msra.mxu1 %v9862_v25  ;;  %v11733_v47 = vadd.f32 %v6825_v30, %v6785_v34  ;;  %v6789_v55 = vpop.f32.mrb[11].mxu0  ;;  %7090 = vmatprep.subr.bf16.mxu0 %v9867_v26  ;;  %v9906_v25 = vld [vmem:[%s11136_s30 + $0x1b84] ss:$16 sps:$4 sm:$0xff]   ;;  %v9901_v26 = vld [vmem:[%s11136_s30 + $0x1980] ss:$16 sps:$4 sm:$0xff]  }
 0x20f   : > { %v6830_v56 = vpop.f32.mrb[11].mxu1  ;;  %7131 = vmatprep.subr.bf16.mxu1 %v9870_v27  ;;  %v11737_v58 = vadd.f32 %v6827_v36, %v6787_v38  ;;  %v9904_v27 = vld [vmem:[%s11136_s30 + $0x1b80] ss:$16 sps:$4 sm:$0xff]   ;;  %v9909_v28 = vld [vmem:[%s11136_s30 + $0x19a4] ss:$16 sps:$4 sm:$0xff]  }
 0x210   : > { %v9912_v30 = vld [vmem:[%s11136_s30 + $0x1ba4] ss:$16 sps:$4 sm:$0xff]   ;;  %v9913_v36 = vld [vmem:[%s11136_s30 + $0x19c0] ss:$16 sps:$4 sm:$0xff]  }
 0x211   : > { %7091 = vmatpush1.bf16.msra.mxu0 %v9865_v31  ;;  %v9907_v31 = vld [vmem:[%s11136_s30 + $0x19a0] ss:$16 sps:$4 sm:$0xff]   ;;  %v9915_v34 = vld [vmem:[%s11136_s30 + $0x19c4] ss:$16 sps:$4 sm:$0xff]  }
 0x212   : > { %7132 = vmatpush1.bf16.msra.mxu1 %v9868_v33  ;;  %7092 = vmatprep.subr.bf16.mxu0 %v9873_v39  ;;  %v9910_v33 = vld [vmem:[%s11136_s30 + $0x1ba0] ss:$16 sps:$4 sm:$0xff]   ;;  %v9918_v35 = vld [vmem:[%s11136_s30 + $0x1bc4] ss:$16 sps:$4 sm:$0xff]  }
 0x213   : > { %7133 = vmatprep.subr.bf16.mxu1 %v9876_v57  ;;  %v9916_v38 = vld [vmem:[%s11136_s30 + $0x1bc0] ss:$16 sps:$4 sm:$0xff]   ;;  %v9921_v44 = vld [vmem:[%s11136_s30 + $0x19e4] ss:$16 sps:$4 sm:$0xff]  }
 0x214   : > { %v9924_v45 = vld [vmem:[%s11136_s30 + $0x1be4] ss:$16 sps:$4 sm:$0xff]   ;;  %v9919_v55 = vld [vmem:[%s11136_s30 + $0x19e0] ss:$16 sps:$4 sm:$0xff]  }
 0x215   : > { %7093 = vmatpush1.bf16.msra.mxu0 %v9871_v54  ;;  %v9922_v56 = vld [vmem:[%s11136_s30 + $0x1be0] ss:$16 sps:$4 sm:$0xff]   ;;  %v9927_v54 = vld [vmem:[%s11136_s30 + $0x1c04] ss:$16 sps:$4 sm:$0xff]  }
 0x216   : > { %7134 = vmatpush1.bf16.msra.mxu1 %v9874_v59  ;;  %7094 = vmatprep.subr.bf16.mxu0 %v9879_v0  ;;  %v398_v39 = vld [vmem:[%s12515_s0 + $0xc0] sm:$0xff]  ;;  %v400_v57 = vld [vmem:[%s12515_s0 + $0xd0] sm:$0xff]  ;;  %v403_v0 = vld [vmem:[%s12515_s0 + $0xe8] sm:$0xff] }
 0x217   : > { %7135 = vmatprep.subr.bf16.mxu1 %v9882_v1  ;;  %v9930_v59 = vld [vmem:[%s11136_s30 + $0x1e04] ss:$16 sps:$4 sm:$0xff]   ;;  %v405_v1 = vld [vmem:[%s12515_s0 + $0xf8] sm:$0xff] }
 0x219   : > { %7095 = vmatpush1.bf16.msra.mxu0 %v9877_v4  ;;  %v9925_v4 = vld [vmem:[%s11136_s30 + $0x1c00] ss:$16 sps:$4 sm:$0xff]  }
 0x21a   : > { %7136 = vmatpush1.bf16.msra.mxu1 %v9880_v5  ;;  %7096 = vmatprep.subr.bf16.mxu0 %v9885_v6  ;;  %v9928_v5 = vld [vmem:[%s11136_s30 + $0x1e00] ss:$16 sps:$4 sm:$0xff]   ;;  %v11789_v6 = vpack.c.bf16 %v398_v39, %v398_v39 }
 0x21b   : > { %7137 = vmatprep.subr.bf16.mxu1 %v9888_v7  ;;  %v11791_v7 = vpack.c.bf16 %v400_v57, %v400_v57  ;;  %v9961_v39 = vld [vmem:[%s11136_s30 + $0x1cc0] ss:$16 sps:$4 sm:$0xff]  }
 0x21c   : > { %v9964_v57 = vld [vmem:[%s11136_s30 + $0x1ec0] ss:$16 sps:$4 sm:$0xff]  }
 0x21d   : > { %7097 = vmatpush1.bf16.msra.mxu0 %v9883_v12  ;;  %v9933_v12 = vld [vmem:[%s11136_s30 + $0x1c24] ss:$16 sps:$4 sm:$0xff]  }
 0x21e   : > { %7138 = vmatpush1.bf16.msra.mxu1 %v9886_v13  ;;  %7098 = vmatprep.subr.bf16.mxu0 %v9891_v14  ;;  %v9936_v13 = vld [vmem:[%s11136_s30 + $0x1e24] ss:$16 sps:$4 sm:$0xff]   ;;  %v11795_v14 = vpack.c.bf16 %v403_v0, %v403_v0 }
 0x21f   : > { %7139 = vmatprep.subr.bf16.mxu1 %v9894_v15  ;;  %v11797_v15 = vpack.c.bf16 %v405_v1, %v405_v1 }
 0x221   : > { %7099 = vmatpush1.bf16.msra.mxu0 %v9889_v16  ;;  %v9931_v16 = vld [vmem:[%s11136_s30 + $0x1c20] ss:$16 sps:$4 sm:$0xff]  }
 0x222   : > { %7140 = vmatpush1.bf16.msra.mxu1 %v9892_v17  ;;  %7100 = vmatprep.subr.bf16.mxu0 %v9897_v18  ;;  %v9934_v17 = vld [vmem:[%s11136_s30 + $0x1e20] ss:$16 sps:$4 sm:$0xff]   ;;  %v9939_v18 = vld [vmem:[%s11136_s30 + $0x1c44] ss:$16 sps:$4 sm:$0xff]  }
 0x223   : > { %7141 = vmatprep.subr.bf16.mxu1 %v9900_v19  ;;  %v9942_v19 = vld [vmem:[%s11136_s30 + $0x1e44] ss:$16 sps:$4 sm:$0xff]  }
 0x225   : > { %7101 = vmatpush1.bf16.msra.mxu0 %v9895_v22  ;;  %v9937_v22 = vld [vmem:[%s11136_s30 + $0x1c40] ss:$16 sps:$4 sm:$0xff]  }
 0x226   : > { %7142 = vmatpush1.bf16.msra.mxu1 %v9898_v23  ;;  %7102 = vmatprep.subr.bf16.mxu0 %v9903_v24  ;;  %v9940_v23 = vld [vmem:[%s11136_s30 + $0x1e40] ss:$16 sps:$4 sm:$0xff]   ;;  %v9945_v24 = vld [vmem:[%s11136_s30 + $0x1c64] ss:$16 sps:$4 sm:$0xff]  }
 0x227   : > { %7143 = vmatprep.subr.bf16.mxu1 %v9906_v25  ;;  %v9948_v25 = vld [vmem:[%s11136_s30 + $0x1e64] ss:$16 sps:$4 sm:$0xff]  }
 0x229   : > { %7103 = vmatpush1.bf16.msra.mxu0 %v9901_v26  ;;  %v9943_v26 = vld [vmem:[%s11136_s30 + $0x1c60] ss:$16 sps:$4 sm:$0xff]  }
 0x22a   : > { %7144 = vmatpush1.bf16.msra.mxu1 %v9904_v27  ;;  %7104 = vmatprep.subr.bf16.mxu0 %v9909_v28  ;;  %v9946_v27 = vld [vmem:[%s11136_s30 + $0x1e60] ss:$16 sps:$4 sm:$0xff]   ;;  %v9951_v28 = vld [vmem:[%s11136_s30 + $0x1c84] ss:$16 sps:$4 sm:$0xff]  }
 0x22b   : > { %7145 = vmatprep.subr.bf16.mxu1 %v9912_v30  ;;  %v9954_v30 = vld [vmem:[%s11136_s30 + $0x1e84] ss:$16 sps:$4 sm:$0xff]  }
 0x22d   : > { %7105 = vmatpush1.bf16.msra.mxu0 %v9907_v31  ;;  %v9949_v31 = vld [vmem:[%s11136_s30 + $0x1c80] ss:$16 sps:$4 sm:$0xff]  }
 0x22e   : > { %7146 = vmatpush1.bf16.msra.mxu1 %v9910_v33  ;;  %7106 = vmatprep.subr.bf16.mxu0 %v9915_v34  ;;  %v9952_v33 = vld [vmem:[%s11136_s30 + $0x1e80] ss:$16 sps:$4 sm:$0xff]   ;;  %v9957_v34 = vld [vmem:[%s11136_s30 + $0x1ca4] ss:$16 sps:$4 sm:$0xff]  }
 0x22f   : > { %7147 = vmatprep.subr.bf16.mxu1 %v9918_v35  ;;  %v9960_v35 = vld [vmem:[%s11136_s30 + $0x1ea4] ss:$16 sps:$4 sm:$0xff]  }
 0x231   : > { %7107 = vmatpush1.bf16.msra.mxu0 %v9913_v36  ;;  %v9955_v36 = vld [vmem:[%s11136_s30 + $0x1ca0] ss:$16 sps:$4 sm:$0xff]  }
 0x232   : > { %7148 = vmatpush1.bf16.msra.mxu1 %v9916_v38  ;;  %7108 = vmatprep.subr.bf16.mxu0 %v9921_v44  ;;  %v9958_v38 = vld [vmem:[%s11136_s30 + $0x1ea0] ss:$16 sps:$4 sm:$0xff]   ;;  %v9963_v44 = vld [vmem:[%s11136_s30 + $0x1cc4] ss:$16 sps:$4 sm:$0xff]  }
 0x233   : > { %7149 = vmatprep.subr.bf16.mxu1 %v9924_v45  ;;  %v9966_v45 = vld [vmem:[%s11136_s30 + $0x1ec4] ss:$16 sps:$4 sm:$0xff]  }
 0x235   : > { %7109 = vmatpush1.bf16.msra.mxu0 %v9919_v55 }
 0x236   : > { %7150 = vmatpush1.bf16.msra.mxu1 %v9922_v56  ;;  %7160 = vmatprep.subr.bf16.mxu0 %v9927_v54 }
 0x237   : > { %7201 = vmatprep.subr.bf16.mxu1 %v9930_v59 }
 0x238   : > { %7111 = vmatmul.mubr.bf16.vlgmr.msra.gmra.mrb[24].mxu0 %v11789_v6 }
 0x239   : > { %7152 = vmatmul.mubr.bf16.vlgmr.msra.gmra.mrb[24].mxu1 %v11791_v7  ;;  %7161 = vmatpush1.bf16.msra.mxu0 %v9925_v4 }
 0x23a   : > { %7202 = vmatpush1.bf16.msra.mxu1 %v9928_v5  ;;  %7162 = vmatprep.subr.bf16.mxu0 %v9933_v12 }
 0x23b   : > { %7203 = vmatprep.subr.bf16.mxu1 %v9936_v13  ;;  %7192 = vmatprep.mubr.bf16.mxu0 %v11795_v14 }
 0x23c   : > { %7233 = vmatprep.mubr.bf16.mxu1 %v11797_v15 }
 0x23d   : > { %7163 = vmatpush1.bf16.msra.mxu0 %v9931_v16 }
 0x23e   : > { %7204 = vmatpush1.bf16.msra.mxu1 %v9934_v17  ;;  %7164 = vmatprep.subr.bf16.mxu0 %v9939_v18  ;;  %v9972_v17 = vld [vmem:[%s11136_s30 + $0x1ee4] ss:$16 sps:$4 sm:$0xff]  }
 0x23f   : > { %7205 = vmatprep.subr.bf16.mxu1 %v9942_v19  ;;  %v9970_v19 = vld [vmem:[%s11136_s30 + $0x1ee0] ss:$16 sps:$4 sm:$0xff]  }
 0x241   : > { %7165 = vmatpush1.bf16.msra.mxu0 %v9937_v22  ;;  %v9975_v22 = vld [vmem:[%s11136_s30 + $0x1d04] ss:$16 sps:$4 sm:$0xff]  }
 0x242   : > { %7206 = vmatpush1.bf16.msra.mxu1 %v9940_v23  ;;  %7166 = vmatprep.subr.bf16.mxu0 %v9945_v24  ;;  %v9978_v23 = vld [vmem:[%s11136_s30 + $0x1f04] ss:$16 sps:$4 sm:$0xff]   ;;  %v9973_v24 = vld [vmem:[%s11136_s30 + $0x1d00] ss:$16 sps:$4 sm:$0xff]  }
 0x243   : > { %7207 = vmatprep.subr.bf16.mxu1 %v9948_v25  ;;  %v9976_v25 = vld [vmem:[%s11136_s30 + $0x1f00] ss:$16 sps:$4 sm:$0xff]  }
 0x245   : > { %7167 = vmatpush1.bf16.msra.mxu0 %v9943_v26  ;;  %v9981_v26 = vld [vmem:[%s11136_s30 + $0x1d24] ss:$16 sps:$4 sm:$0xff]  }
 0x246   : > { %7208 = vmatpush1.bf16.msra.mxu1 %v9946_v27  ;;  %7168 = vmatprep.subr.bf16.mxu0 %v9951_v28  ;;  %v9984_v27 = vld [vmem:[%s11136_s30 + $0x1f24] ss:$16 sps:$4 sm:$0xff]   ;;  %v9979_v28 = vld [vmem:[%s11136_s30 + $0x1d20] ss:$16 sps:$4 sm:$0xff]  }
 0x247   : > { %7209 = vmatprep.subr.bf16.mxu1 %v9954_v30  ;;  %v9982_v30 = vld [vmem:[%s11136_s30 + $0x1f20] ss:$16 sps:$4 sm:$0xff]  }
 0x249   : > { %7169 = vmatpush1.bf16.msra.mxu0 %v9949_v31  ;;  %v9987_v31 = vld [vmem:[%s11136_s30 + $0x1d44] ss:$16 sps:$4 sm:$0xff]  }
 0x24a   : > { %7210 = vmatpush1.bf16.msra.mxu1 %v9952_v33  ;;  %7170 = vmatprep.subr.bf16.mxu0 %v9957_v34  ;;  %v9990_v33 = vld [vmem:[%s11136_s30 + $0x1f44] ss:$16 sps:$4 sm:$0xff]   ;;  %v9985_v34 = vld [vmem:[%s11136_s30 + $0x1d40] ss:$16 sps:$4 sm:$0xff]  }
 0x24b   : > { %7211 = vmatprep.subr.bf16.mxu1 %v9960_v35  ;;  %v6866_v55 = vpop.f32.mrb[12].mxu0  ;;  %v9988_v35 = vld [vmem:[%s11136_s30 + $0x1f40] ss:$16 sps:$4 sm:$0xff]  }
 0x24c   : > { %v6907_v56 = vpop.f32.mrb[12].mxu1  ;;  %v6867_v54 = vadd.f32 %v6866_v55, %v11733_v47  ;;  %v6868_v59 = vpop.f32.mrb[13].mxu0  ;;  %v9969_v47 = vld [vmem:[%s11136_s30 + $0x1ce4] ss:$16 sps:$4 sm:$0xff]  }
 0x24d   : > { %v6909_v0 = vpop.f32.mrb[13].mxu1  ;;  %v6869_v1 = vadd.f32 %v6868_v59, %v11737_v58  ;;  %v6870_v4 = vpop.f32.mrb[14].mxu0  ;;  %7171 = vmatpush1.bf16.msra.mxu0 %v9955_v36  ;;  %v9967_v58 = vld [vmem:[%s11136_s30 + $0x1ce0] ss:$16 sps:$4 sm:$0xff]   ;;  %v9993_v36 = vld [vmem:[%s11136_s30 + $0x1d64] ss:$16 sps:$4 sm:$0xff]  }
 0x24e   : > { %v6911_v5 = vpop.f32.mrb[14].mxu1  ;;  %7212 = vmatpush1.bf16.msra.mxu1 %v9958_v38  ;;  %v11827_v12 = vadd.f32 %v6907_v56, %v6867_v54  ;;  %v6871_v13 = vpop.f32.mrb[15].mxu0  ;;  %7172 = vmatprep.subr.bf16.mxu0 %v9963_v44  ;;  %v9996_v38 = vld [vmem:[%s11136_s30 + $0x1f64] ss:$16 sps:$4 sm:$0xff]   ;;  %v9991_v44 = vld [vmem:[%s11136_s30 + $0x1d60] ss:$16 sps:$4 sm:$0xff]  }
 0x24f   : > { %v6912_v16 = vpop.f32.mrb[15].mxu1  ;;  %7213 = vmatprep.subr.bf16.mxu1 %v9966_v45  ;;  %v11831_v18 = vadd.f32 %v6909_v0, %v6869_v1  ;;  %v9994_v45 = vld [vmem:[%s11136_s30 + $0x1f60] ss:$16 sps:$4 sm:$0xff]   ;;  %v9999_v55 = vld [vmem:[%s11136_s30 + $0x1d84] ss:$16 sps:$4 sm:$0xff]  }
 0x250   : > { %v10002_v56 = vld [vmem:[%s11136_s30 + $0x1f84] ss:$16 sps:$4 sm:$0xff]   ;;  %v10003_v0 = vld [vmem:[%s11136_s30 + $0x1da0] ss:$16 sps:$4 sm:$0xff]  }
 0x251   : > { %7173 = vmatpush1.bf16.msra.mxu0 %v9961_v39  ;;  %v9997_v39 = vld [vmem:[%s11136_s30 + $0x1d80] ss:$16 sps:$4 sm:$0xff]   ;;  %v10005_v54 = vld [vmem:[%s11136_s30 + $0x1da4] ss:$16 sps:$4 sm:$0xff]  }
 0x252   : > { %7214 = vmatpush1.bf16.msra.mxu1 %v9964_v57  ;;  %7174 = vmatprep.subr.bf16.mxu0 %v9969_v47  ;;  %v10000_v57 = vld [vmem:[%s11136_s30 + $0x1f80] ss:$16 sps:$4 sm:$0xff]   ;;  %v10008_v59 = vld [vmem:[%s11136_s30 + $0x1fa4] ss:$16 sps:$4 sm:$0xff]  }
 0x253   : > { %7215 = vmatprep.subr.bf16.mxu1 %v9972_v17  ;;  %v10006_v1 = vld [vmem:[%s11136_s30 + $0x1fa0] ss:$16 sps:$4 sm:$0xff]   ;;  %v10011_v4 = vld [vmem:[%s11136_s30 + $0x1dc4] ss:$16 sps:$4 sm:$0xff]  }
 0x254   : > { %v10014_v5 = vld [vmem:[%s11136_s30 + $0x1fc4] ss:$16 sps:$4 sm:$0xff]   ;;  %v10009_v13 = vld [vmem:[%s11136_s30 + $0x1dc0] ss:$16 sps:$4 sm:$0xff]  }
 0x255   : > { %7175 = vmatpush1.bf16.msra.mxu0 %v9967_v58  ;;  %v10012_v16 = vld [vmem:[%s11136_s30 + $0x1fc0] ss:$16 sps:$4 sm:$0xff]   ;;  %v10017_v47 = vld [vmem:[%s11136_s30 + $0x1de4] ss:$16 sps:$4 sm:$0xff]  }
 0x256   : > { %7216 = vmatpush1.bf16.msra.mxu1 %v9970_v19  ;;  %7176 = vmatprep.subr.bf16.mxu0 %v9975_v22  ;;  %v10020_v17 = vld [vmem:[%s11136_s30 + $0x1fe4] ss:$16 sps:$4 sm:$0xff]   ;;  %v10015_v58 = vld [vmem:[%s11136_s30 + $0x1de0] ss:$16 sps:$4 sm:$0xff]  }
 0x257   : > { %7217 = vmatprep.subr.bf16.mxu1 %v9978_v23  ;;  %v10018_v19 = vld [vmem:[%s11136_s30 + $0x1fe0] ss:$16 sps:$4 sm:$0xff]  }
 0x258   : > { %v402_v22 = vld [vmem:[%s12515_s0 + $0xe0] sm:$0xff]  ;;  %v404_v23 = vld [vmem:[%s12515_s0 + $0xf0] sm:$0xff] }
 0x259   : > { %7177 = vmatpush1.bf16.msra.mxu0 %v9973_v24  ;;  %v10023_v24 = vld [vmem:[%s11136_s30 + $0xc] ss:$16 sps:$4 sm:$0xff]  }
 0x25a   : > { %7218 = vmatpush1.bf16.msra.mxu1 %v9976_v25  ;;  %7178 = vmatprep.subr.bf16.mxu0 %v9981_v26  ;;  %v10026_v25 = vld [vmem:[%s11136_s30 + $0x20c] ss:$16 sps:$4 sm:$0xff]   ;;  %v10021_v26 = vld [vmem:[%s11136_s30 + $0x8] ss:$16 sps:$4 sm:$0xff]  }
 0x25b   : > { %7219 = vmatprep.subr.bf16.mxu1 %v9984_v27  ;;  %v10024_v27 = vld [vmem:[%s11136_s30 + $0x208] ss:$16 sps:$4 sm:$0xff]  }
 0x25d   : > { %7179 = vmatpush1.bf16.msra.mxu0 %v9979_v28  ;;  %v11877_v28 = vpack.c.bf16 %v402_v22, %v402_v22 }
 0x25e   : > { %7220 = vmatpush1.bf16.msra.mxu1 %v9982_v30  ;;  %7180 = vmatprep.subr.bf16.mxu0 %v9987_v31  ;;  %v11879_v30 = vpack.c.bf16 %v404_v23, %v404_v23  ;;  %v10029_v31 = vld [vmem:[%s11136_s30 + $0x2c] ss:$16 sps:$4 sm:$0xff]  }
 0x25f   : > { %7221 = vmatprep.subr.bf16.mxu1 %v9990_v33  ;;  %v10032_v33 = vld [vmem:[%s11136_s30 + $0x22c] ss:$16 sps:$4 sm:$0xff]  }
 0x261   : > { %7181 = vmatpush1.bf16.msra.mxu0 %v9985_v34  ;;  %v10027_v34 = vld [vmem:[%s11136_s30 + $0x28] ss:$16 sps:$4 sm:$0xff]  }
 0x262   : > { %7222 = vmatpush1.bf16.msra.mxu1 %v9988_v35  ;;  %7182 = vmatprep.subr.bf16.mxu0 %v9993_v36  ;;  %v10030_v35 = vld [vmem:[%s11136_s30 + $0x228] ss:$16 sps:$4 sm:$0xff]   ;;  %v10035_v36 = vld [vmem:[%s11136_s30 + $0x4c] ss:$16 sps:$4 sm:$0xff]  }
 0x263   : > { %7223 = vmatprep.subr.bf16.mxu1 %v9996_v38  ;;  %v10038_v38 = vld [vmem:[%s11136_s30 + $0x24c] ss:$16 sps:$4 sm:$0xff]  }
 0x265   : > { %7183 = vmatpush1.bf16.msra.mxu0 %v9991_v44  ;;  %v10033_v44 = vld [vmem:[%s11136_s30 + $0x48] ss:$16 sps:$4 sm:$0xff]  }
 0x266   : > { %7224 = vmatpush1.bf16.msra.mxu1 %v9994_v45  ;;  %7184 = vmatprep.subr.bf16.mxu0 %v9999_v55  ;;  %v10036_v45 = vld [vmem:[%s11136_s30 + $0x248] ss:$16 sps:$4 sm:$0xff]   ;;  %v10041_v55 = vld [vmem:[%s11136_s30 + $0x6c] ss:$16 sps:$4 sm:$0xff]  }
 0x267   : > { %7225 = vmatprep.subr.bf16.mxu1 %v10002_v56  ;;  %v10044_v56 = vld [vmem:[%s11136_s30 + $0x26c] ss:$16 sps:$4 sm:$0xff]  }
 0x269   : > { %7185 = vmatpush1.bf16.msra.mxu0 %v9997_v39  ;;  %v10042_v39 = vld [vmem:[%s11136_s30 + $0x268] ss:$16 sps:$4 sm:$0xff]  }
 0x26a   : > { %7226 = vmatpush1.bf16.msra.mxu1 %v10000_v57  ;;  %7186 = vmatprep.subr.bf16.mxu0 %v10005_v54  ;;  %v10050_v57 = vld [vmem:[%s11136_s30 + $0x28c] ss:$16 sps:$4 sm:$0xff]   ;;  %v10045_v54 = vld [vmem:[%s11136_s30 + $0x88] ss:$16 sps:$4 sm:$0xff]  }
 0x26b   : > { %7227 = vmatprep.subr.bf16.mxu1 %v10008_v59  ;;  %v10048_v59 = vld [vmem:[%s11136_s30 + $0x288] ss:$16 sps:$4 sm:$0xff]  }
 0x26d   : > { %7187 = vmatpush1.bf16.msra.mxu0 %v10003_v0  ;;  %v10053_v0 = vld [vmem:[%s11136_s30 + $0xac] ss:$16 sps:$4 sm:$0xff]  }
 0x26e   : > { %7228 = vmatpush1.bf16.msra.mxu1 %v10006_v1  ;;  %7188 = vmatprep.subr.bf16.mxu0 %v10011_v4  ;;  %v10056_v1 = vld [vmem:[%s11136_s30 + $0x2ac] ss:$16 sps:$4 sm:$0xff]   ;;  %v10051_v4 = vld [vmem:[%s11136_s30 + $0xa8] ss:$16 sps:$4 sm:$0xff]  }
 0x26f   : > { %7229 = vmatprep.subr.bf16.mxu1 %v10014_v5  ;;  %v10054_v5 = vld [vmem:[%s11136_s30 + $0x2a8] ss:$16 sps:$4 sm:$0xff]  }
 0x271   : > { %7189 = vmatpush1.bf16.msra.mxu0 %v10009_v13  ;;  %v10059_v13 = vld [vmem:[%s11136_s30 + $0xcc] ss:$16 sps:$4 sm:$0xff]  }
 0x272   : > { %7230 = vmatpush1.bf16.msra.mxu1 %v10012_v16  ;;  %7190 = vmatprep.subr.bf16.mxu0 %v10017_v47  ;;  %v10062_v16 = vld [vmem:[%s11136_s30 + $0x2cc] ss:$16 sps:$4 sm:$0xff]  }
 0x273   : > { %7231 = vmatprep.subr.bf16.mxu1 %v10020_v17 }
 0x275   : > { %7191 = vmatpush1.bf16.msra.mxu0 %v10015_v58  ;;  %v10057_v58 = vld [vmem:[%s11136_s30 + $0xc8] ss:$16 sps:$4 sm:$0xff]  }
 0x276   : > { %7232 = vmatpush1.bf16.msra.mxu1 %v10018_v19  ;;  %7242 = vmatprep.subr.bf16.mxu0 %v10023_v24  ;;  %v10060_v19 = vld [vmem:[%s11136_s30 + $0x2c8] ss:$16 sps:$4 sm:$0xff]  }
 0x277   : > { %7283 = vmatprep.subr.bf16.mxu1 %v10026_v25 }
 0x278   : > { %7193 = vmatmul.mubr.bf16.vlgmr.msra.gmra.mrb[28].mxu0 %v11877_v28 }
 0x279   : > { %7234 = vmatmul.mubr.bf16.vlgmr.msra.gmra.mrb[28].mxu1 %v11879_v30  ;;  %7243 = vmatpush1.bf16.msra.mxu0 %v10021_v26 }
 0x27a   : > { %7284 = vmatpush1.bf16.msra.mxu1 %v10024_v27  ;;  %7244 = vmatprep.subr.bf16.mxu0 %v10029_v31 }
 0x27b   : > { %7285 = vmatprep.subr.bf16.mxu1 %v10032_v33  ;;  %7274 = vmatprep.mubr.bf16.mxu0 %v11204_v49  ;;  %v10039_v49 = vld [vmem:[%s11136_s30 + $0x68] ss:$16 sps:$4 sm:$0xff]  }
 0x27c   : > { %7315 = vmatprep.mubr.bf16.mxu1 %v11210_v52  ;;  %v10047_v52 = vld [vmem:[%s11136_s30 + $0x8c] ss:$16 sps:$4 sm:$0xff]  }
 0x27d   : > { %7245 = vmatpush1.bf16.msra.mxu0 %v10027_v34 }
 0x27e   : > { %7286 = vmatpush1.bf16.msra.mxu1 %v10030_v35  ;;  %7246 = vmatprep.subr.bf16.mxu0 %v10035_v36  ;;  %v10068_v35 = vld [vmem:[%s11136_s30 + $0x2ec] ss:$16 sps:$4 sm:$0xff]  }
 0x27f   : > { %7287 = vmatprep.subr.bf16.mxu1 %v10038_v38  ;;  %v10066_v38 = vld [vmem:[%s11136_s30 + $0x2e8] ss:$16 sps:$4 sm:$0xff]  }
 0x281   : > { %7247 = vmatpush1.bf16.msra.mxu0 %v10033_v44  ;;  %v10071_v44 = vld [vmem:[%s11136_s30 + $0x10c] ss:$16 sps:$4 sm:$0xff]  }
 0x282   : > { %7288 = vmatpush1.bf16.msra.mxu1 %v10036_v45  ;;  %7248 = vmatprep.subr.bf16.mxu0 %v10041_v55  ;;  %v10074_v45 = vld [vmem:[%s11136_s30 + $0x30c] ss:$16 sps:$4 sm:$0xff]   ;;  %v10069_v55 = vld [vmem:[%s11136_s30 + $0x108] ss:$16 sps:$4 sm:$0xff]  }
 0x283   : > { %7289 = vmatprep.subr.bf16.mxu1 %v10044_v56  ;;  %v10072_v56 = vld [vmem:[%s11136_s30 + $0x308] ss:$16 sps:$4 sm:$0xff]  }
 0x285   : > { %7249 = vmatpush1.bf16.msra.mxu0 %v10039_v49  ;;  %v10077_v49 = vld [vmem:[%s11136_s30 + $0x12c] ss:$16 sps:$4 sm:$0xff]  }
 0x286   : > { %7290 = vmatpush1.bf16.msra.mxu1 %v10042_v39  ;;  %7250 = vmatprep.subr.bf16.mxu0 %v10047_v52  ;;  %v10080_v39 = vld [vmem:[%s11136_s30 + $0x32c] ss:$16 sps:$4 sm:$0xff]   ;;  %v10075_v52 = vld [vmem:[%s11136_s30 + $0x128] ss:$16 sps:$4 sm:$0xff]  }
 0x287   : > { %7291 = vmatprep.subr.bf16.mxu1 %v10050_v57  ;;  %v10078_v57 = vld [vmem:[%s11136_s30 + $0x328] ss:$16 sps:$4 sm:$0xff]  }
 0x289   : > { %7251 = vmatpush1.bf16.msra.mxu0 %v10045_v54  ;;  %v10083_v54 = vld [vmem:[%s11136_s30 + $0x14c] ss:$16 sps:$4 sm:$0xff]  }
 0x28a   : > { %7292 = vmatpush1.bf16.msra.mxu1 %v10048_v59  ;;  %7252 = vmatprep.subr.bf16.mxu0 %v10053_v0  ;;  %v10086_v59 = vld [vmem:[%s11136_s30 + $0x34c] ss:$16 sps:$4 sm:$0xff]   ;;  %v10081_v0 = vld [vmem:[%s11136_s30 + $0x148] ss:$16 sps:$4 sm:$0xff]  }
 0x28b   : > { %7293 = vmatprep.subr.bf16.mxu1 %v10056_v1  ;;  %v6948_v47 = vpop.f32.mrb[16].mxu0  ;;  %v10084_v1 = vld [vmem:[%s11136_s30 + $0x348] ss:$16 sps:$4 sm:$0xff]  }
 0x28c   : > { %v6989_v17 = vpop.f32.mrb[16].mxu1  ;;  %v6949_v22 = vadd.f32 %v6948_v47, %v11827_v12  ;;  %v6950_v23 = vpop.f32.mrb[17].mxu0  ;;  %v10065_v12 = vld [vmem:[%s11136_s30 + $0xec] ss:$16 sps:$4 sm:$0xff]  }
 0x28d   : > { %v6991_v24 = vpop.f32.mrb[17].mxu1  ;;  %v6951_v25 = vadd.f32 %v6950_v23, %v11831_v18  ;;  %v6952_v26 = vpop.f32.mrb[18].mxu0  ;;  %7253 = vmatpush1.bf16.msra.mxu0 %v10051_v4  ;;  %v10063_v18 = vld [vmem:[%s11136_s30 + $0xe8] ss:$16 sps:$4 sm:$0xff]   ;;  %v10089_v4 = vld [vmem:[%s11136_s30 + $0x16c] ss:$16 sps:$4 sm:$0xff]  }
 0x28e   : > { %v6993_v27 = vpop.f32.mrb[18].mxu1  ;;  %7294 = vmatpush1.bf16.msra.mxu1 %v10054_v5  ;;  %v11911_v31 = vadd.f32 %v6989_v17, %v6949_v22  ;;  %v6953_v33 = vpop.f32.mrb[19].mxu0  ;;  %7254 = vmatprep.subr.bf16.mxu0 %v10059_v13  ;;  %v10092_v5 = vld [vmem:[%s11136_s30 + $0x36c] ss:$16 sps:$4 sm:$0xff]   ;;  %v10087_v13 = vld [vmem:[%s11136_s30 + $0x168] ss:$16 sps:$4 sm:$0xff]  }
 0x28f   : > { %v6994_v34 = vpop.f32.mrb[19].mxu1  ;;  %7295 = vmatprep.subr.bf16.mxu1 %v10062_v16  ;;  %v11915_v36 = vadd.f32 %v6991_v24, %v6951_v25  ;;  %v10090_v16 = vld [vmem:[%s11136_s30 + $0x368] ss:$16 sps:$4 sm:$0xff]   ;;  %v10095_v47 = vld [vmem:[%s11136_s30 + $0x18c] ss:$16 sps:$4 sm:$0xff]  }
 0x290   : > { %v10098_v17 = vld [vmem:[%s11136_s30 + $0x38c] ss:$16 sps:$4 sm:$0xff]   ;;  %v10099_v24 = vld [vmem:[%s11136_s30 + $0x1a8] ss:$16 sps:$4 sm:$0xff]  }
 0x291   : > { %7255 = vmatpush1.bf16.msra.mxu0 %v10057_v58  ;;  %v10093_v58 = vld [vmem:[%s11136_s30 + $0x188] ss:$16 sps:$4 sm:$0xff]   ;;  %v10101_v22 = vld [vmem:[%s11136_s30 + $0x1ac] ss:$16 sps:$4 sm:$0xff]  }
 0x292   : > { %7296 = vmatpush1.bf16.msra.mxu1 %v10060_v19  ;;  %7256 = vmatprep.subr.bf16.mxu0 %v10065_v12  ;;  %v10096_v19 = vld [vmem:[%s11136_s30 + $0x388] ss:$16 sps:$4 sm:$0xff]   ;;  %v10104_v23 = vld [vmem:[%s11136_s30 + $0x3ac] ss:$16 sps:$4 sm:$0xff]  }
 0x293   : > { %7297 = vmatprep.subr.bf16.mxu1 %v10068_v35  ;;  %v10102_v25 = vld [vmem:[%s11136_s30 + $0x3a8] ss:$16 sps:$4 sm:$0xff]   ;;  %v10107_v26 = vld [vmem:[%s11136_s30 + $0x1cc] ss:$16 sps:$4 sm:$0xff]  }
 0x294   : > { %v10110_v27 = vld [vmem:[%s11136_s30 + $0x3cc] ss:$16 sps:$4 sm:$0xff]   ;;  %v10105_v33 = vld [vmem:[%s11136_s30 + $0x1c8] ss:$16 sps:$4 sm:$0xff]  }
 0x295   : > { %7257 = vmatpush1.bf16.msra.mxu0 %v10063_v18  ;;  %v10108_v34 = vld [vmem:[%s11136_s30 + $0x3c8] ss:$16 sps:$4 sm:$0xff]   ;;  %v10113_v12 = vld [vmem:[%s11136_s30 + $0x1ec] ss:$16 sps:$4 sm:$0xff]  }
 0x296   : > { %7298 = vmatpush1.bf16.msra.mxu1 %v10066_v38  ;;  %7258 = vmatprep.subr.bf16.mxu0 %v10071_v44  ;;  %v10116_v35 = vld [vmem:[%s11136_s30 + $0x3ec] ss:$16 sps:$4 sm:$0xff]   ;;  %v10111_v18 = vld [vmem:[%s11136_s30 + $0x1e8] ss:$16 sps:$4 sm:$0xff]  }
 0x297   : > { %7299 = vmatprep.subr.bf16.mxu1 %v10074_v45  ;;  %v10114_v38 = vld [vmem:[%s11136_s30 + $0x3e8] ss:$16 sps:$4 sm:$0xff]   ;;  %v10119_v44 = vld [vmem:[%s11136_s30 + $0x40c] ss:$16 sps:$4 sm:$0xff]  }
 0x298   : > { %v10122_v45 = vld [vmem:[%s11136_s30 + $0x60c] ss:$16 sps:$4 sm:$0xff]  }
 0x299   : > { %7259 = vmatpush1.bf16.msra.mxu0 %v10069_v55  ;;  %v10117_v55 = vld [vmem:[%s11136_s30 + $0x408] ss:$16 sps:$4 sm:$0xff]  }
 0x29a   : > { %7300 = vmatpush1.bf16.msra.mxu1 %v10072_v56  ;;  %7260 = vmatprep.subr.bf16.mxu0 %v10077_v49  ;;  %v10120_v56 = vld [vmem:[%s11136_s30 + $0x608] ss:$16 sps:$4 sm:$0xff]   ;;  %v10125_v49 = vld [vmem:[%s11136_s30 + $0x42c] ss:$16 sps:$4 sm:$0xff]  }
 0x29b   : > { %7301 = vmatprep.subr.bf16.mxu1 %v10080_v39  ;;  %v10128_v39 = vld [vmem:[%s11136_s30 + $0x62c] ss:$16 sps:$4 sm:$0xff]  }
 0x29d   : > { %7261 = vmatpush1.bf16.msra.mxu0 %v10075_v52  ;;  %v10123_v52 = vld [vmem:[%s11136_s30 + $0x428] ss:$16 sps:$4 sm:$0xff]  }
 0x29e   : > { %7302 = vmatpush1.bf16.msra.mxu1 %v10078_v57  ;;  %7262 = vmatprep.subr.bf16.mxu0 %v10083_v54  ;;  %v10126_v57 = vld [vmem:[%s11136_s30 + $0x628] ss:$16 sps:$4 sm:$0xff]   ;;  %v10131_v54 = vld [vmem:[%s11136_s30 + $0x44c] ss:$16 sps:$4 sm:$0xff]  }
 0x29f   : > { %7303 = vmatprep.subr.bf16.mxu1 %v10086_v59  ;;  %v10134_v59 = vld [vmem:[%s11136_s30 + $0x64c] ss:$16 sps:$4 sm:$0xff]  }
 0x2a1   : > { %7263 = vmatpush1.bf16.msra.mxu0 %v10081_v0  ;;  %v10137_v0 = vld [vmem:[%s11136_s30 + $0x46c] ss:$16 sps:$4 sm:$0xff]  }
 0x2a2   : > { %7304 = vmatpush1.bf16.msra.mxu1 %v10084_v1  ;;  %7264 = vmatprep.subr.bf16.mxu0 %v10089_v4  ;;  %v10140_v1 = vld [vmem:[%s11136_s30 + $0x66c] ss:$16 sps:$4 sm:$0xff]   ;;  %v10135_v4 = vld [vmem:[%s11136_s30 + $0x468] ss:$16 sps:$4 sm:$0xff]  }
 0x2a3   : > { %7305 = vmatprep.subr.bf16.mxu1 %v10092_v5  ;;  %v10146_v5 = vld [vmem:[%s11136_s30 + $0x68c] ss:$16 sps:$4 sm:$0xff]  }
 0x2a5   : > { %7265 = vmatpush1.bf16.msra.mxu0 %v10087_v13  ;;  %v10141_v13 = vld [vmem:[%s11136_s30 + $0x488] ss:$16 sps:$4 sm:$0xff]  }
 0x2a6   : > { %7306 = vmatpush1.bf16.msra.mxu1 %v10090_v16  ;;  %7266 = vmatprep.subr.bf16.mxu0 %v10095_v47  ;;  %v10144_v16 = vld [vmem:[%s11136_s30 + $0x688] ss:$16 sps:$4 sm:$0xff]   ;;  %v10941_v47 = vmov 0.0  }
 0x2a7   : > { %7307 = vmatprep.subr.bf16.mxu1 %v10098_v17  ;;  %370 = vst [vmem:[%s11977_s22] sm:$0xff] %v10941_v47  ;;  %v10149_v17 = vld [vmem:[%s11136_s30 + $0x4ac] ss:$16 sps:$4 sm:$0xff]   ;;  %371 = vst [vmem:[%s11977_s22 + $0x8] sm:$0xff] %v10941_v47 }
 0x2a8   : > { %372 = vst [vmem:[%s11977_s22 + $0x10] sm:$0xff] %v10941_v47  ;;  %373 = vst [vmem:[%s11977_s22 + $0x18] sm:$0xff] %v10941_v47  ;;  %v10188_v47 = vld [vmem:[%s11136_s30 + $0x76c] ss:$16 sps:$4 sm:$0xff]  }
 0x2a9   : > { %7267 = vmatpush1.bf16.msra.mxu0 %v10093_v58  ;;  %v10152_v58 = vld [vmem:[%s11136_s30 + $0x6ac] ss:$16 sps:$4 sm:$0xff]  }
 0x2aa   : > { %7308 = vmatpush1.bf16.msra.mxu1 %v10096_v19  ;;  %7268 = vmatprep.subr.bf16.mxu0 %v10101_v22  ;;  %v10147_v19 = vld [vmem:[%s11136_s30 + $0x4a8] ss:$16 sps:$4 sm:$0xff]  }
 0x2ab   : > { %7309 = vmatprep.subr.bf16.mxu1 %v10104_v23  ;;  %v10150_v22 = vld [vmem:[%s11136_s30 + $0x6a8] ss:$16 sps:$4 sm:$0xff]   ;;  %v10155_v23 = vld [vmem:[%s11136_s30 + $0x4cc] ss:$16 sps:$4 sm:$0xff]  }
 0x2ad   : > { %7269 = vmatpush1.bf16.msra.mxu0 %v10099_v24  ;;  %v10158_v24 = vld [vmem:[%s11136_s30 + $0x6cc] ss:$16 sps:$4 sm:$0xff]  }
 0x2ae   : > { %7310 = vmatpush1.bf16.msra.mxu1 %v10102_v25  ;;  %7270 = vmatprep.subr.bf16.mxu0 %v10107_v26 }
 0x2af   : > { %7311 = vmatprep.subr.bf16.mxu1 %v10110_v27 }
 0x2b1   : > { %7271 = vmatpush1.bf16.msra.mxu0 %v10105_v33 }
 0x2b2   : > { %7312 = vmatpush1.bf16.msra.mxu1 %v10108_v34  ;;  %7272 = vmatprep.subr.bf16.mxu0 %v10113_v12 }
 0x2b3   : > { %7313 = vmatprep.subr.bf16.mxu1 %v10116_v35 }
 0x2b5   : > { %7273 = vmatpush1.bf16.msra.mxu0 %v10111_v18 }
 0x2b6   : > { %7314 = vmatpush1.bf16.msra.mxu1 %v10114_v38  ;;  %7324 = vmatprep.subr.bf16.mxu0 %v10119_v44  ;;  %v10153_v38 = vld [vmem:[%s11136_s30 + $0x4c8] ss:$16 sps:$4 sm:$0xff]  }
 0x2b7   : > { %7365 = vmatprep.subr.bf16.mxu1 %v10122_v45  ;;  %v10156_v44 = vld [vmem:[%s11136_s30 + $0x6c8] ss:$16 sps:$4 sm:$0xff]  }
 0x2b8   : > { %7275 = vmatmul.mubr.bf16.vlgmr.msra.gmra.mrb[32].mxu0 %v11237_v8  ;;  %v10129_v8 = vld [vmem:[%s11136_s30 + $0x448] ss:$16 sps:$4 sm:$0xff]  }
 0x2b9   : > { %7316 = vmatmul.mubr.bf16.vlgmr.msra.gmra.mrb[32].mxu1 %v11239_v9  ;;  %7325 = vmatpush1.bf16.msra.mxu0 %v10117_v55  ;;  %v10132_v9 = vld [vmem:[%s11136_s30 + $0x648] ss:$16 sps:$4 sm:$0xff]  }
 0x2ba   : > { %7366 = vmatpush1.bf16.msra.mxu1 %v10120_v56  ;;  %7326 = vmatprep.subr.bf16.mxu0 %v10125_v49 }
 0x2bb   : > { %7367 = vmatprep.subr.bf16.mxu1 %v10128_v39  ;;  %7356 = vmatprep.mubr.bf16.mxu0 %v11272_v37  ;;  %v10138_v37 = vld [vmem:[%s11136_s30 + $0x668] ss:$16 sps:$4 sm:$0xff]  }
 0x2bc   : > { %7397 = vmatprep.mubr.bf16.mxu1 %v11278_v40  ;;  %v10143_v40 = vld [vmem:[%s11136_s30 + $0x48c] ss:$16 sps:$4 sm:$0xff]   ;;  %v10159_v39 = vld [vmem:[%s11136_s30 + $0x4e8] ss:$16 sps:$4 sm:$0xff]  }
 0x2bd   : > { %7327 = vmatpush1.bf16.msra.mxu0 %v10123_v52  ;;  %v10162_v52 = vld [vmem:[%s11136_s30 + $0x6e8] ss:$16 sps:$4 sm:$0xff]  }
 0x2be   : > { %7368 = vmatpush1.bf16.msra.mxu1 %v10126_v57  ;;  %7328 = vmatprep.subr.bf16.mxu0 %v10131_v54  ;;  %v10167_v57 = vld [vmem:[%s11136_s30 + $0x50c] ss:$16 sps:$4 sm:$0xff]  }
 0x2bf   : > { %7369 = vmatprep.subr.bf16.mxu1 %v10134_v59  ;;  %v10170_v54 = vld [vmem:[%s11136_s30 + $0x70c] ss:$16 sps:$4 sm:$0xff]   ;;  %v10165_v59 = vld [vmem:[%s11136_s30 + $0x508] ss:$16 sps:$4 sm:$0xff]  }
 0x2c1   : > { %7329 = vmatpush1.bf16.msra.mxu0 %v10129_v8  ;;  %v10168_v8 = vld [vmem:[%s11136_s30 + $0x708] ss:$16 sps:$4 sm:$0xff]  }
 0x2c2   : > { %7370 = vmatpush1.bf16.msra.mxu1 %v10132_v9  ;;  %7330 = vmatprep.subr.bf16.mxu0 %v10137_v0  ;;  %v10173_v9 = vld [vmem:[%s11136_s30 + $0x52c] ss:$16 sps:$4 sm:$0xff]  }
 0x2c3   : > { %7371 = vmatprep.subr.bf16.mxu1 %v10140_v1  ;;  %v10176_v0 = vld [vmem:[%s11136_s30 + $0x72c] ss:$16 sps:$4 sm:$0xff]   ;;  %v10171_v1 = vld [vmem:[%s11136_s30 + $0x528] ss:$16 sps:$4 sm:$0xff]  }
 0x2c5   : > { %7331 = vmatpush1.bf16.msra.mxu0 %v10135_v4  ;;  %v10174_v4 = vld [vmem:[%s11136_s30 + $0x728] ss:$16 sps:$4 sm:$0xff]  }
 0x2c6   : > { %7372 = vmatpush1.bf16.msra.mxu1 %v10138_v37  ;;  %7332 = vmatprep.subr.bf16.mxu0 %v10143_v40  ;;  %v10179_v37 = vld [vmem:[%s11136_s30 + $0x54c] ss:$16 sps:$4 sm:$0xff]  }
 0x2c7   : > { %7373 = vmatprep.subr.bf16.mxu1 %v10146_v5  ;;  %v10182_v40 = vld [vmem:[%s11136_s30 + $0x74c] ss:$16 sps:$4 sm:$0xff]   ;;  %v10177_v5 = vld [vmem:[%s11136_s30 + $0x548] ss:$16 sps:$4 sm:$0xff]  }
 0x2c9   : > { %7333 = vmatpush1.bf16.msra.mxu0 %v10141_v13  ;;  %v10180_v13 = vld [vmem:[%s11136_s30 + $0x748] ss:$16 sps:$4 sm:$0xff]  }
 0x2ca   : > { %7374 = vmatpush1.bf16.msra.mxu1 %v10144_v16  ;;  %7334 = vmatprep.subr.bf16.mxu0 %v10149_v17  ;;  %v10185_v16 = vld [vmem:[%s11136_s30 + $0x56c] ss:$16 sps:$4 sm:$0xff]   ;;  %v10183_v17 = vld [vmem:[%s11136_s30 + $0x568] ss:$16 sps:$4 sm:$0xff]  }
 0x2cb   : > { %7375 = vmatprep.subr.bf16.mxu1 %v10152_v58  ;;  %v7030_v25 = vpop.f32.mrb[20].mxu0  ;;  %v10186_v58 = vld [vmem:[%s11136_s30 + $0x768] ss:$16 sps:$4 sm:$0xff]  }
 0x2cc   : > { %v7071_v26 = vpop.f32.mrb[20].mxu1  ;;  %v7031_v27 = vadd.f32 %v7030_v25, %v11911_v31  ;;  %v7032_v33 = vpop.f32.mrb[21].mxu0  ;;  %v10161_v31 = vld [vmem:[%s11136_s30 + $0x4ec] ss:$16 sps:$4 sm:$0xff]  }
 0x2cd   : > { %v7073_v34 = vpop.f32.mrb[21].mxu1  ;;  %v7033_v12 = vadd.f32 %v7032_v33, %v11915_v36  ;;  %v7034_v35 = vpop.f32.mrb[22].mxu0  ;;  %7335 = vmatpush1.bf16.msra.mxu0 %v10147_v19  ;;  %v10164_v36 = vld [vmem:[%s11136_s30 + $0x6ec] ss:$16 sps:$4 sm:$0xff]   ;;  %v10198_v33 = vld [vmem:[%s11136_s30 + $0x7a8] ss:$16 sps:$4 sm:$0xff]  }
 0x2ce   : > { %v7075_v18 = vpop.f32.mrb[22].mxu1  ;;  %7376 = vmatpush1.bf16.msra.mxu1 %v10150_v22  ;;  %v11995_v45 = vadd.f32 %v7071_v26, %v7031_v27  ;;  %v7035_v55 = vpop.f32.mrb[23].mxu0  ;;  %7336 = vmatprep.subr.bf16.mxu0 %v10155_v23  ;;  %v10191_v19 = vld [vmem:[%s11136_s30 + $0x58c] ss:$16 sps:$4 sm:$0xff]   ;;  %v10189_v23 = vld [vmem:[%s11136_s30 + $0x588] ss:$16 sps:$4 sm:$0xff]  }
 0x2cf   : > { %v7076_v56 = vpop.f32.mrb[23].mxu1  ;;  %7377 = vmatprep.subr.bf16.mxu1 %v10158_v24  ;;  %v11999_v49 = vadd.f32 %v7073_v34, %v7033_v12  ;;  %v10194_v22 = vld [vmem:[%s11136_s30 + $0x78c] ss:$16 sps:$4 sm:$0xff]   ;;  %v10192_v24 = vld [vmem:[%s11136_s30 + $0x788] ss:$16 sps:$4 sm:$0xff]  }
 0x2d0   : > { %v10197_v25 = vld [vmem:[%s11136_s30 + $0x5ac] ss:$16 sps:$4 sm:$0xff]   ;;  %v10195_v27 = vld [vmem:[%s11136_s30 + $0x5a8] ss:$16 sps:$4 sm:$0xff]  }
 0x2d1   : > { %7337 = vmatpush1.bf16.msra.mxu0 %v10153_v38  ;;  %v10200_v26 = vld [vmem:[%s11136_s30 + $0x7ac] ss:$16 sps:$4 sm:$0xff]   ;;  %v10201_v35 = vld [vmem:[%s11136_s30 + $0x5c8] ss:$16 sps:$4 sm:$0xff]  }
 0x2d2   : > { %7378 = vmatpush1.bf16.msra.mxu1 %v10156_v44  ;;  %7338 = vmatprep.subr.bf16.mxu0 %v10161_v31  ;;  %v10203_v34 = vld [vmem:[%s11136_s30 + $0x5cc] ss:$16 sps:$4 sm:$0xff]   ;;  %v10204_v18 = vld [vmem:[%s11136_s30 + $0x7c8] ss:$16 sps:$4 sm:$0xff]  }
 0x2d3   : > { %7379 = vmatprep.subr.bf16.mxu1 %v10164_v36  ;;  %v10206_v12 = vld [vmem:[%s11136_s30 + $0x7cc] ss:$16 sps:$4 sm:$0xff]   ;;  %v10207_v55 = vld [vmem:[%s11136_s30 + $0x5e8] ss:$16 sps:$4 sm:$0xff]  }
 0x2d4   : > { %v10209_v38 = vld [vmem:[%s11136_s30 + $0x5ec] ss:$16 sps:$4 sm:$0xff]   ;;  %v10210_v56 = vld [vmem:[%s11136_s30 + $0x7e8] ss:$16 sps:$4 sm:$0xff]  }
 0x2d5   : > { %7339 = vmatpush1.bf16.msra.mxu0 %v10159_v39  ;;  %v10212_v44 = vld [vmem:[%s11136_s30 + $0x7ec] ss:$16 sps:$4 sm:$0xff]   ;;  %v10213_v39 = vld [vmem:[%s11136_s30 + $0x808] ss:$16 sps:$4 sm:$0xff]  }
 0x2d6   : > { %7380 = vmatpush1.bf16.msra.mxu1 %v10162_v52  ;;  %7340 = vmatprep.subr.bf16.mxu0 %v10167_v57  ;;  %v10215_v31 = vld [vmem:[%s11136_s30 + $0x80c] ss:$16 sps:$4 sm:$0xff]   ;;  %v10216_v52 = vld [vmem:[%s11136_s30 + $0xa08] ss:$16 sps:$4 sm:$0xff]  }
 0x2d7   : > { %7381 = vmatprep.subr.bf16.mxu1 %v10170_v54  ;;  %v10218_v36 = vld [vmem:[%s11136_s30 + $0xa0c] ss:$16 sps:$4 sm:$0xff]  }
 0x2d8   : > { %v10221_v57 = vld [vmem:[%s11136_s30 + $0x82c] ss:$16 sps:$4 sm:$0xff]  }
 0x2d9   : > { %7341 = vmatpush1.bf16.msra.mxu0 %v10165_v59  ;;  %v10224_v54 = vld [vmem:[%s11136_s30 + $0xa2c] ss:$16 sps:$4 sm:$0xff]   ;;  %v10219_v59 = vld [vmem:[%s11136_s30 + $0x828] ss:$16 sps:$4 sm:$0xff]  }
 0x2da   : > { %7382 = vmatpush1.bf16.msra.mxu1 %v10168_v8  ;;  %7342 = vmatprep.subr.bf16.mxu0 %v10173_v9  ;;  %v10222_v8 = vld [vmem:[%s11136_s30 + $0xa28] ss:$16 sps:$4 sm:$0xff]   ;;  %v10227_v9 = vld [vmem:[%s11136_s30 + $0x84c] ss:$16 sps:$4 sm:$0xff]  }
 0x2db   : > { %7383 = vmatprep.subr.bf16.mxu1 %v10176_v0  ;;  %v10230_v0 = vld [vmem:[%s11136_s30 + $0xa4c] ss:$16 sps:$4 sm:$0xff]  }
 0x2dd   : > { %7343 = vmatpush1.bf16.msra.mxu0 %v10171_v1  ;;  %v10233_v1 = vld [vmem:[%s11136_s30 + $0x86c] ss:$16 sps:$4 sm:$0xff]  }
 0x2de   : > { %7384 = vmatpush1.bf16.msra.mxu1 %v10174_v4  ;;  %7344 = vmatprep.subr.bf16.mxu0 %v10179_v37  ;;  %v10236_v4 = vld [vmem:[%s11136_s30 + $0xa6c] ss:$16 sps:$4 sm:$0xff]   ;;  %v10231_v37 = vld [vmem:[%s11136_s30 + $0x868] ss:$16 sps:$4 sm:$0xff]  }
 0x2df   : > { %7385 = vmatprep.subr.bf16.mxu1 %v10182_v40  ;;  %v10242_v40 = vld [vmem:[%s11136_s30 + $0xa8c] ss:$16 sps:$4 sm:$0xff]  }
 0x2e1   : > { %7345 = vmatpush1.bf16.msra.mxu0 %v10177_v5  ;;  %v10237_v5 = vld [vmem:[%s11136_s30 + $0x888] ss:$16 sps:$4 sm:$0xff]  }
 0x2e2   : > { %7386 = vmatpush1.bf16.msra.mxu1 %v10180_v13  ;;  %7346 = vmatprep.subr.bf16.mxu0 %v10185_v16  ;;  %v10240_v13 = vld [vmem:[%s11136_s30 + $0xa88] ss:$16 sps:$4 sm:$0xff]   ;;  %v10245_v16 = vld [vmem:[%s11136_s30 + $0x8ac] ss:$16 sps:$4 sm:$0xff]  }
 0x2e3   : > { %7387 = vmatprep.subr.bf16.mxu1 %v10188_v47  ;;  %v10248_v47 = vld [vmem:[%s11136_s30 + $0xaac] ss:$16 sps:$4 sm:$0xff]  }
 0x2e5   : > { %7347 = vmatpush1.bf16.msra.mxu0 %v10183_v17  ;;  %v10243_v17 = vld [vmem:[%s11136_s30 + $0x8a8] ss:$16 sps:$4 sm:$0xff]  }
 0x2e6   : > { %7388 = vmatpush1.bf16.msra.mxu1 %v10186_v58  ;;  %7348 = vmatprep.subr.bf16.mxu0 %v10191_v19  ;;  %v10246_v58 = vld [vmem:[%s11136_s30 + $0xaa8] ss:$16 sps:$4 sm:$0xff]   ;;  %v10251_v19 = vld [vmem:[%s11136_s30 + $0x8cc] ss:$16 sps:$4 sm:$0xff]  }
 0x2e7   : > { %7389 = vmatprep.subr.bf16.mxu1 %v10194_v22  ;;  %v10254_v22 = vld [vmem:[%s11136_s30 + $0xacc] ss:$16 sps:$4 sm:$0xff]  }
 0x2e9   : > { %7349 = vmatpush1.bf16.msra.mxu0 %v10189_v23 }
 0x2ea   : > { %7390 = vmatpush1.bf16.msra.mxu1 %v10192_v24  ;;  %7350 = vmatprep.subr.bf16.mxu0 %v10197_v25 }
 0x2eb   : > { %7391 = vmatprep.subr.bf16.mxu1 %v10200_v26 }
 0x2ed   : > { %7351 = vmatpush1.bf16.msra.mxu0 %v10195_v27 }
 0x2ee   : > { %7392 = vmatpush1.bf16.msra.mxu1 %v10198_v33  ;;  %7352 = vmatprep.subr.bf16.mxu0 %v10203_v34 }
 0x2ef   : > { %7393 = vmatprep.subr.bf16.mxu1 %v10206_v12 }
 0x2f1   : > { %7353 = vmatpush1.bf16.msra.mxu0 %v10201_v35  ;;  %v10249_v35 = vld [vmem:[%s11136_s30 + $0x8c8] ss:$16 sps:$4 sm:$0xff]  }
 0x2f2   : > { %7394 = vmatpush1.bf16.msra.mxu1 %v10204_v18  ;;  %7354 = vmatprep.subr.bf16.mxu0 %v10209_v38  ;;  %v10252_v18 = vld [vmem:[%s11136_s30 + $0xac8] ss:$16 sps:$4 sm:$0xff]  }
 0x2f3   : > { %7395 = vmatprep.subr.bf16.mxu1 %v10212_v44 }
 0x2f5   : > { %7355 = vmatpush1.bf16.msra.mxu0 %v10207_v55 }
 0x2f6   : > { %7396 = vmatpush1.bf16.msra.mxu1 %v10210_v56  ;;  %7406 = vmatprep.subr.bf16.mxu0 %v10215_v31  ;;  %v10255_v31 = vld [vmem:[%s11136_s30 + $0x8e8] ss:$16 sps:$4 sm:$0xff]  }
 0x2f7   : > { %7447 = vmatprep.subr.bf16.mxu1 %v10218_v36  ;;  %v10258_v36 = vld [vmem:[%s11136_s30 + $0xae8] ss:$16 sps:$4 sm:$0xff]  }
 0x2f8   : > { %7357 = vmatmul.mubr.bf16.vlgmr.msra.gmra.mrb[36].mxu0 %v11325_v20  ;;  %v10225_v20 = vld [vmem:[%s11136_s30 + $0x848] ss:$16 sps:$4 sm:$0xff]  }
 0x2f9   : > { %7398 = vmatmul.mubr.bf16.vlgmr.msra.gmra.mrb[36].mxu1 %v11327_v21  ;;  %7407 = vmatpush1.bf16.msra.mxu0 %v10213_v39  ;;  %v10228_v21 = vld [vmem:[%s11136_s30 + $0xa48] ss:$16 sps:$4 sm:$0xff]   ;;  %v10263_v39 = vld [vmem:[%s11136_s30 + $0x90c] ss:$16 sps:$4 sm:$0xff]  }
 0x2fa   : > { %7448 = vmatpush1.bf16.msra.mxu1 %v10216_v52  ;;  %7408 = vmatprep.subr.bf16.mxu0 %v10221_v57  ;;  %v10266_v52 = vld [vmem:[%s11136_s30 + $0xb0c] ss:$16 sps:$4 sm:$0xff]   ;;  %v10261_v57 = vld [vmem:[%s11136_s30 + $0x908] ss:$16 sps:$4 sm:$0xff]  }
 0x2fb   : > { %7449 = vmatprep.subr.bf16.mxu1 %v10224_v54  ;;  %7438 = vmatprep.mubr.bf16.mxu0 %v11340_v29  ;;  %v10234_v29 = vld [vmem:[%s11136_s30 + $0xa68] ss:$16 sps:$4 sm:$0xff]  }
 0x2fc   : > { %7479 = vmatprep.mubr.bf16.mxu1 %v11346_v32  ;;  %v10239_v32 = vld [vmem:[%s11136_s30 + $0x88c] ss:$16 sps:$4 sm:$0xff]   ;;  %v10264_v54 = vld [vmem:[%s11136_s30 + $0xb08] ss:$16 sps:$4 sm:$0xff]  }
 0x2fd   : > { %7409 = vmatpush1.bf16.msra.mxu0 %v10219_v59  ;;  %v10269_v59 = vld [vmem:[%s11136_s30 + $0x92c] ss:$16 sps:$4 sm:$0xff]  }
 0x2fe   : > { %7450 = vmatpush1.bf16.msra.mxu1 %v10222_v8  ;;  %7410 = vmatprep.subr.bf16.mxu0 %v10227_v9  ;;  %v10272_v8 = vld [vmem:[%s11136_s30 + $0xb2c] ss:$16 sps:$4 sm:$0xff]   ;;  %v10267_v9 = vld [vmem:[%s11136_s30 + $0x928] ss:$16 sps:$4 sm:$0xff]  }
 0x2ff   : > { %7451 = vmatprep.subr.bf16.mxu1 %v10230_v0  ;;  %v10270_v0 = vld [vmem:[%s11136_s30 + $0xb28] ss:$16 sps:$4 sm:$0xff]  }
 0x301   : > { %7411 = vmatpush1.bf16.msra.mxu0 %v10225_v20  ;;  %v10275_v20 = vld [vmem:[%s11136_s30 + $0x94c] ss:$16 sps:$4 sm:$0xff]  }
 0x302   : > { %7452 = vmatpush1.bf16.msra.mxu1 %v10228_v21  ;;  %7412 = vmatprep.subr.bf16.mxu0 %v10233_v1  ;;  %v10278_v21 = vld [vmem:[%s11136_s30 + $0xb4c] ss:$16 sps:$4 sm:$0xff]   ;;  %v10273_v1 = vld [vmem:[%s11136_s30 + $0x948] ss:$16 sps:$4 sm:$0xff]  }
 0x303   : > { %7453 = vmatprep.subr.bf16.mxu1 %v10236_v4  ;;  %v10276_v4 = vld [vmem:[%s11136_s30 + $0xb48] ss:$16 sps:$4 sm:$0xff]  }
 0x305   : > { %7413 = vmatpush1.bf16.msra.mxu0 %v10231_v37  ;;  %v10281_v37 = vld [vmem:[%s11136_s30 + $0x96c] ss:$16 sps:$4 sm:$0xff]  }
 0x306   : > { %7454 = vmatpush1.bf16.msra.mxu1 %v10234_v29  ;;  %7414 = vmatprep.subr.bf16.mxu0 %v10239_v32  ;;  %v10284_v29 = vld [vmem:[%s11136_s30 + $0xb6c] ss:$16 sps:$4 sm:$0xff]   ;;  %v10279_v32 = vld [vmem:[%s11136_s30 + $0x968] ss:$16 sps:$4 sm:$0xff]  }
 0x307   : > { %7455 = vmatprep.subr.bf16.mxu1 %v10242_v40  ;;  %v10282_v40 = vld [vmem:[%s11136_s30 + $0xb68] ss:$16 sps:$4 sm:$0xff]  }
 0x309   : > { %7415 = vmatpush1.bf16.msra.mxu0 %v10237_v5  ;;  %v10287_v5 = vld [vmem:[%s11136_s30 + $0x98c] ss:$16 sps:$4 sm:$0xff]  }
 0x30a   : > { %7456 = vmatpush1.bf16.msra.mxu1 %v10240_v13  ;;  %7416 = vmatprep.subr.bf16.mxu0 %v10245_v16  ;;  %v10290_v13 = vld [vmem:[%s11136_s30 + $0xb8c] ss:$16 sps:$4 sm:$0xff]   ;;  %v10285_v16 = vld [vmem:[%s11136_s30 + $0x988] ss:$16 sps:$4 sm:$0xff]  }
 0x30b   : > { %7457 = vmatprep.subr.bf16.mxu1 %v10248_v47  ;;  %v7112_v23 = vpop.f32.mrb[24].mxu0  ;;  %v10288_v47 = vld [vmem:[%s11136_s30 + $0xb88] ss:$16 sps:$4 sm:$0xff]  }
 0x30c   : > { %v7153_v24 = vpop.f32.mrb[24].mxu1  ;;  %v7113_v25 = vadd.f32 %v7112_v23, %v11995_v45  ;;  %v7114_v26 = vpop.f32.mrb[25].mxu0  ;;  %v10257_v45 = vld [vmem:[%s11136_s30 + $0x8ec] ss:$16 sps:$4 sm:$0xff]  }
 0x30d   : > { %v7155_v27 = vpop.f32.mrb[25].mxu1  ;;  %v7115_v33 = vadd.f32 %v7114_v26, %v11999_v49  ;;  %v7116_v34 = vpop.f32.mrb[26].mxu0  ;;  %7417 = vmatpush1.bf16.msra.mxu0 %v10243_v17  ;;  %v10260_v49 = vld [vmem:[%s11136_s30 + $0xaec] ss:$16 sps:$4 sm:$0xff]   ;;  %v10300_v26 = vld [vmem:[%s11136_s30 + $0xbc8] ss:$16 sps:$4 sm:$0xff]  }
 0x30e   : > { %v7157_v12 = vpop.f32.mrb[26].mxu1  ;;  %7458 = vmatpush1.bf16.msra.mxu1 %v10246_v58  ;;  %v12069_v38 = vadd.f32 %v7153_v24, %v7113_v25  ;;  %v7117_v44 = vpop.f32.mrb[27].mxu0  ;;  %7418 = vmatprep.subr.bf16.mxu0 %v10251_v19  ;;  %v10293_v17 = vld [vmem:[%s11136_s30 + $0x9ac] ss:$16 sps:$4 sm:$0xff]   ;;  %v10291_v19 = vld [vmem:[%s11136_s30 + $0x9a8] ss:$16 sps:$4 sm:$0xff]  }
 0x30f   : > { %v7158_v55 = vpop.f32.mrb[27].mxu1  ;;  %7459 = vmatprep.subr.bf16.mxu1 %v10254_v22  ;;  %v12073_v56 = vadd.f32 %v7155_v27, %v7115_v33  ;;  %v10296_v58 = vld [vmem:[%s11136_s30 + $0xbac] ss:$16 sps:$4 sm:$0xff]   ;;  %v10294_v22 = vld [vmem:[%s11136_s30 + $0xba8] ss:$16 sps:$4 sm:$0xff]  }
 0x310   : > { %v10299_v23 = vld [vmem:[%s11136_s30 + $0x9cc] ss:$16 sps:$4 sm:$0xff]   ;;  %v10297_v25 = vld [vmem:[%s11136_s30 + $0x9c8] ss:$16 sps:$4 sm:$0xff]  }
 0x311   : > { %7419 = vmatpush1.bf16.msra.mxu0 %v10249_v35  ;;  %v10302_v24 = vld [vmem:[%s11136_s30 + $0xbcc] ss:$16 sps:$4 sm:$0xff]   ;;  %v10303_v34 = vld [vmem:[%s11136_s30 + $0x9e8] ss:$16 sps:$4 sm:$0xff]  }
 0x312   : > { %7460 = vmatpush1.bf16.msra.mxu1 %v10252_v18  ;;  %7420 = vmatprep.subr.bf16.mxu0 %v10257_v45  ;;  %v10305_v27 = vld [vmem:[%s11136_s30 + $0x9ec] ss:$16 sps:$4 sm:$0xff]   ;;  %v10306_v12 = vld [vmem:[%s11136_s30 + $0xbe8] ss:$16 sps:$4 sm:$0xff]  }
 0x313   : > { %7461 = vmatprep.subr.bf16.mxu1 %v10260_v49  ;;  %v10308_v33 = vld [vmem:[%s11136_s30 + $0xbec] ss:$16 sps:$4 sm:$0xff]   ;;  %v10309_v44 = vld [vmem:[%s11136_s30 + $0xc08] ss:$16 sps:$4 sm:$0xff]  }
 0x314   : > { %v10311_v35 = vld [vmem:[%s11136_s30 + $0xc0c] ss:$16 sps:$4 sm:$0xff]   ;;  %v10312_v55 = vld [vmem:[%s11136_s30 + $0xe08] ss:$16 sps:$4 sm:$0xff]  }
 0x315   : > { %7421 = vmatpush1.bf16.msra.mxu0 %v10255_v31  ;;  %v10314_v18 = vld [vmem:[%s11136_s30 + $0xe0c] ss:$16 sps:$4 sm:$0xff]   ;;  %v10315_v31 = vld [vmem:[%s11136_s30 + $0xc28] ss:$16 sps:$4 sm:$0xff]  }
 0x316   : > { %7462 = vmatpush1.bf16.msra.mxu1 %v10258_v36  ;;  %7422 = vmatprep.subr.bf16.mxu0 %v10263_v39  ;;  %v10317_v45 = vld [vmem:[%s11136_s30 + $0xc2c] ss:$16 sps:$4 sm:$0xff]   ;;  %v10318_v36 = vld [vmem:[%s11136_s30 + $0xe28] ss:$16 sps:$4 sm:$0xff]  }
 0x317   : > { %7463 = vmatprep.subr.bf16.mxu1 %v10266_v52  ;;  %v10320_v49 = vld [vmem:[%s11136_s30 + $0xe2c] ss:$16 sps:$4 sm:$0xff]  }
 0x318   : > { %v10323_v39 = vld [vmem:[%s11136_s30 + $0xc4c] ss:$16 sps:$4 sm:$0xff]  }
 0x319   : > { %7423 = vmatpush1.bf16.msra.mxu0 %v10261_v57  ;;  %v10326_v52 = vld [vmem:[%s11136_s30 + $0xe4c] ss:$16 sps:$4 sm:$0xff]  }
 0x31a   : > { %7464 = vmatpush1.bf16.msra.mxu1 %v10264_v54  ;;  %7424 = vmatprep.subr.bf16.mxu0 %v10269_v59  ;;  %v10329_v57 = vld [vmem:[%s11136_s30 + $0xc6c] ss:$16 sps:$4 sm:$0xff]   ;;  %v10327_v59 = vld [vmem:[%s11136_s30 + $0xc68] ss:$16 sps:$4 sm:$0xff]  }
 0x31b   : > { %7465 = vmatprep.subr.bf16.mxu1 %v10272_v8  ;;  %v10332_v54 = vld [vmem:[%s11136_s30 + $0xe6c] ss:$16 sps:$4 sm:$0xff]  }
 0x31c   : > { %v10338_v8 = vld [vmem:[%s11136_s30 + $0xe8c] ss:$16 sps:$4 sm:$0xff]  }
 0x31d   : > { %7425 = vmatpush1.bf16.msra.mxu0 %v10267_v9  ;;  %v10333_v9 = vld [vmem:[%s11136_s30 + $0xc88] ss:$16 sps:$4 sm:$0xff]  }
 0x31e   : > { %7466 = vmatpush1.bf16.msra.mxu1 %v10270_v0  ;;  %7426 = vmatprep.subr.bf16.mxu0 %v10275_v20  ;;  %v10336_v0 = vld [vmem:[%s11136_s30 + $0xe88] ss:$16 sps:$4 sm:$0xff]   ;;  %v10341_v20 = vld [vmem:[%s11136_s30 + $0xcac] ss:$16 sps:$4 sm:$0xff]  }
 0x31f   : > { %7467 = vmatprep.subr.bf16.mxu1 %v10278_v21  ;;  %v10344_v21 = vld [vmem:[%s11136_s30 + $0xeac] ss:$16 sps:$4 sm:$0xff]  }
 0x321   : > { %7427 = vmatpush1.bf16.msra.mxu0 %v10273_v1  ;;  %v10339_v1 = vld [vmem:[%s11136_s30 + $0xca8] ss:$16 sps:$4 sm:$0xff]  }
 0x322   : > { %7468 = vmatpush1.bf16.msra.mxu1 %v10276_v4  ;;  %7428 = vmatprep.subr.bf16.mxu0 %v10281_v37  ;;  %v10342_v4 = vld [vmem:[%s11136_s30 + $0xea8] ss:$16 sps:$4 sm:$0xff]   ;;  %v10347_v37 = vld [vmem:[%s11136_s30 + $0xccc] ss:$16 sps:$4 sm:$0xff]  }
 0x323   : > { %7469 = vmatprep.subr.bf16.mxu1 %v10284_v29  ;;  %v10350_v29 = vld [vmem:[%s11136_s30 + $0xecc] ss:$16 sps:$4 sm:$0xff]  }
 0x325   : > { %7429 = vmatpush1.bf16.msra.mxu0 %v10279_v32 }
 0x326   : > { %7470 = vmatpush1.bf16.msra.mxu1 %v10282_v40  ;;  %7430 = vmatprep.subr.bf16.mxu0 %v10287_v5 }
 0x327   : > { %7471 = vmatprep.subr.bf16.mxu1 %v10290_v13 }
 0x329   : > { %7431 = vmatpush1.bf16.msra.mxu0 %v10285_v16 }
 0x32a   : > { %7472 = vmatpush1.bf16.msra.mxu1 %v10288_v47  ;;  %7432 = vmatprep.subr.bf16.mxu0 %v10293_v17  ;;  %v10345_v47 = vld [vmem:[%s11136_s30 + $0xcc8] ss:$16 sps:$4 sm:$0xff]   ;;  %v438_v17 = vld [vmem:[%s11977_s22] sm:$0xff] }
 0x32b   : > { %7473 = vmatprep.subr.bf16.mxu1 %v10296_v58 }
 0x32d   : > { %7433 = vmatpush1.bf16.msra.mxu0 %v10291_v19  ;;  %v439_v19 = vld [vmem:[%s11977_s22 + $0x8] sm:$0xff] }
 0x32e   : > { %7474 = vmatpush1.bf16.msra.mxu1 %v10294_v22  ;;  %7434 = vmatprep.subr.bf16.mxu0 %v10299_v23 }
 0x32f   : > { %7475 = vmatprep.subr.bf16.mxu1 %v10302_v24  ;;  %v10348_v24 = vld [vmem:[%s11136_s30 + $0xec8] ss:$16 sps:$4 sm:$0xff]  }
 0x331   : > { %7435 = vmatpush1.bf16.msra.mxu0 %v10297_v25 }
 0x332   : > { %7476 = vmatpush1.bf16.msra.mxu1 %v10300_v26  ;;  %7436 = vmatprep.subr.bf16.mxu0 %v10305_v27  ;;  %v10353_v27 = vld [vmem:[%s11136_s30 + $0xcec] ss:$16 sps:$4 sm:$0xff]  }
 0x333   : > { %7477 = vmatprep.subr.bf16.mxu1 %v10308_v33  ;;  %v10356_v33 = vld [vmem:[%s11136_s30 + $0xeec] ss:$16 sps:$4 sm:$0xff]  }
 0x335   : > { %7437 = vmatpush1.bf16.msra.mxu0 %v10303_v34  ;;  %v12148_v34 = vld [vmem:[%s11977_s22 + $0x10] sm:$0xff] }
 0x336   : > { %7478 = vmatpush1.bf16.msra.mxu1 %v10306_v12  ;;  %7488 = vmatprep.subr.bf16.mxu0 %v10311_v35 }
 0x337   : > { %7529 = vmatprep.subr.bf16.mxu1 %v10314_v18  ;;  %v10351_v18 = vld [vmem:[%s11136_s30 + $0xce8] ss:$16 sps:$4 sm:$0xff]  }
 0x338   : > { %7439 = vmatmul.mubr.bf16.vlgmr.msra.gmra.mrb[40].mxu0 %v11415_v42  ;;  %v10321_v42 = vld [vmem:[%s11136_s30 + $0xc48] ss:$16 sps:$4 sm:$0xff]  }
 0x339   : > { %7480 = vmatmul.mubr.bf16.vlgmr.msra.gmra.mrb[40].mxu1 %v11417_v43  ;;  %7489 = vmatpush1.bf16.msra.mxu0 %v10309_v44  ;;  %v10324_v43 = vld [vmem:[%s11136_s30 + $0xe48] ss:$16 sps:$4 sm:$0xff]  }
 0x33a   : > { %7530 = vmatpush1.bf16.msra.mxu1 %v10312_v55  ;;  %7490 = vmatprep.subr.bf16.mxu0 %v10317_v45  ;;  %v10354_v44 = vld [vmem:[%s11136_s30 + $0xee8] ss:$16 sps:$4 sm:$0xff]   ;;  %v10359_v55 = vld [vmem:[%s11136_s30 + $0xd0c] ss:$16 sps:$4 sm:$0xff]  }
 0x33b   : > { %7531 = vmatprep.subr.bf16.mxu1 %v10320_v49  ;;  %7520 = vmatprep.mubr.bf16.mxu0 %v11427_v48  ;;  %v10330_v48 = vld [vmem:[%s11136_s30 + $0xe68] ss:$16 sps:$4 sm:$0xff]   ;;  %v10362_v45 = vld [vmem:[%s11136_s30 + $0xf0c] ss:$16 sps:$4 sm:$0xff]  }
 0x33c   : > { %7561 = vmatprep.mubr.bf16.mxu1 %v11429_v50  ;;  %v10335_v50 = vld [vmem:[%s11136_s30 + $0xc8c] ss:$16 sps:$4 sm:$0xff]   ;;  %v10357_v49 = vld [vmem:[%s11136_s30 + $0xd08] ss:$16 sps:$4 sm:$0xff]  }
 0x33d   : > { %7491 = vmatpush1.bf16.msra.mxu0 %v10315_v31  ;;  %v10360_v31 = vld [vmem:[%s11136_s30 + $0xf08] ss:$16 sps:$4 sm:$0xff]  }
 0x33e   : > { %7532 = vmatpush1.bf16.msra.mxu1 %v10318_v36  ;;  %7492 = vmatprep.subr.bf16.mxu0 %v10323_v39  ;;  %v10365_v36 = vld [vmem:[%s11136_s30 + $0xd2c] ss:$16 sps:$4 sm:$0xff]  }
 0x33f   : > { %7533 = vmatprep.subr.bf16.mxu1 %v10326_v52  ;;  %v10368_v39 = vld [vmem:[%s11136_s30 + $0xf2c] ss:$16 sps:$4 sm:$0xff]   ;;  %v10363_v52 = vld [vmem:[%s11136_s30 + $0xd28] ss:$16 sps:$4 sm:$0xff]  }
 0x341   : > { %7493 = vmatpush1.bf16.msra.mxu0 %v10321_v42  ;;  %v10366_v42 = vld [vmem:[%s11136_s30 + $0xf28] ss:$16 sps:$4 sm:$0xff]  }
 0x342   : > { %7534 = vmatpush1.bf16.msra.mxu1 %v10324_v43  ;;  %7494 = vmatprep.subr.bf16.mxu0 %v10329_v57  ;;  %v10371_v43 = vld [vmem:[%s11136_s30 + $0xd4c] ss:$16 sps:$4 sm:$0xff]  }
 0x343   : > { %7535 = vmatprep.subr.bf16.mxu1 %v10332_v54  ;;  %v10374_v57 = vld [vmem:[%s11136_s30 + $0xf4c] ss:$16 sps:$4 sm:$0xff]   ;;  %v10369_v54 = vld [vmem:[%s11136_s30 + $0xd48] ss:$16 sps:$4 sm:$0xff]  }
 0x345   : > { %7495 = vmatpush1.bf16.msra.mxu0 %v10327_v59  ;;  %v10372_v59 = vld [vmem:[%s11136_s30 + $0xf48] ss:$16 sps:$4 sm:$0xff]  }
 0x346   : > { %7536 = vmatpush1.bf16.msra.mxu1 %v10330_v48  ;;  %7496 = vmatprep.subr.bf16.mxu0 %v10335_v50  ;;  %v10377_v48 = vld [vmem:[%s11136_s30 + $0xd6c] ss:$16 sps:$4 sm:$0xff]  }
 0x347   : > { %7537 = vmatprep.subr.bf16.mxu1 %v10338_v8  ;;  %v10380_v50 = vld [vmem:[%s11136_s30 + $0xf6c] ss:$16 sps:$4 sm:$0xff]   ;;  %v10375_v8 = vld [vmem:[%s11136_s30 + $0xd68] ss:$16 sps:$4 sm:$0xff]  }
 0x349   : > { %7497 = vmatpush1.bf16.msra.mxu0 %v10333_v9  ;;  %v10378_v9 = vld [vmem:[%s11136_s30 + $0xf68] ss:$16 sps:$4 sm:$0xff]  }
 0x34a   : > { %7538 = vmatpush1.bf16.msra.mxu1 %v10336_v0  ;;  %7498 = vmatprep.subr.bf16.mxu0 %v10341_v20  ;;  %v10383_v0 = vld [vmem:[%s11136_s30 + $0xd8c] ss:$16 sps:$4 sm:$0xff]  }
 0x34b   : > { %7539 = vmatprep.subr.bf16.mxu1 %v10344_v21  ;;  %v7194_v32 = vpop.f32.mrb[28].mxu0  ;;  %v10386_v20 = vld [vmem:[%s11136_s30 + $0xf8c] ss:$16 sps:$4 sm:$0xff]   ;;  %v10381_v21 = vld [vmem:[%s11136_s30 + $0xd88] ss:$16 sps:$4 sm:$0xff]  }
 0x34c   : > { %v7235_v40 = vpop.f32.mrb[28].mxu1  ;;  %v7195_v5 = vadd.f32 %v7194_v32, %v12069_v38  ;;  %v7196_v13 = vpop.f32.mrb[29].mxu0  ;;  %v10390_v32 = vld [vmem:[%s11136_s30 + $0xfa8] ss:$16 sps:$4 sm:$0xff]  }
 0x34d   : > { %v7237_v16 = vpop.f32.mrb[29].mxu1  ;;  %v7197_v58 = vadd.f32 %v7196_v13, %v12073_v56  ;;  %v7198_v22 = vpop.f32.mrb[30].mxu0  ;;  %7499 = vmatpush1.bf16.msra.mxu0 %v10339_v1  ;;  %v10384_v1 = vld [vmem:[%s11136_s30 + $0xf88] ss:$16 sps:$4 sm:$0xff]  }
 0x34e   : > { %v7239_v23 = vpop.f32.mrb[30].mxu1  ;;  %7540 = vmatpush1.bf16.msra.mxu1 %v10342_v4  ;;  %v7236_v25 = vadd.f32 %v7235_v40, %v7195_v5  ;;  %v7199_v26 = vpop.f32.mrb[31].mxu0  ;;  %7500 = vmatprep.subr.bf16.mxu0 %v10347_v37  ;;  %v10389_v4 = vld [vmem:[%s11136_s30 + $0xdac] ss:$16 sps:$4 sm:$0xff]   ;;  %v10393_v13 = vld [vmem:[%s11136_s30 + $0xdc8] ss:$16 sps:$4 sm:$0xff]  }
 0x34f   : > { %v7240_v38 = vpop.f32.mrb[31].mxu1  ;;  %7541 = vmatprep.subr.bf16.mxu1 %v10350_v29  ;;  %v7238_v56 = vadd.f32 %v7237_v16, %v7197_v58  ;;  %v10392_v37 = vld [vmem:[%s11136_s30 + $0xfac] ss:$16 sps:$4 sm:$0xff]   ;;  %v10387_v29 = vld [vmem:[%s11136_s30 + $0xda8] ss:$16 sps:$4 sm:$0xff]  }
 0x350   : > { %v7898_v12 = vadd.f32 %v7236_v25, %v438_v17  ;;  %v10395_v40 = vld [vmem:[%s11136_s30 + $0xdcc] ss:$16 sps:$4 sm:$0xff]   ;;  %v10396_v16 = vld [vmem:[%s11136_s30 + $0xfc8] ss:$16 sps:$4 sm:$0xff]  }
 0x351   : > { %v7899_v35 = vadd.f32 %v7238_v56, %v439_v19  ;;  %7501 = vmatpush1.bf16.msra.mxu0 %v10345_v47  ;;  %v10398_v5 = vld [vmem:[%s11136_s30 + $0xfcc] ss:$16 sps:$4 sm:$0xff]   ;;  %v10399_v58 = vld [vmem:[%s11136_s30 + $0xde8] ss:$16 sps:$4 sm:$0xff]  }
 0x352   : > { %7542 = vmatpush1.bf16.msra.mxu1 %v10348_v24  ;;  %7502 = vmatprep.subr.bf16.mxu0 %v10353_v27  ;;  %7902 = vst [vmem:[%s11977_s22] sm:$0xff] %v7898_v12  ;;  %v10401_v47 = vld [vmem:[%s11136_s30 + $0xdec] ss:$16 sps:$4 sm:$0xff]   ;;  %v10402_v19 = vld [vmem:[%s11136_s30 + $0xfe8] ss:$16 sps:$4 sm:$0xff]  }
 0x353   : > { %7543 = vmatprep.subr.bf16.mxu1 %v10356_v33  ;;  %7903 = vst [vmem:[%s11977_s22 + $0x8] sm:$0xff] %v7899_v35  ;;  %v10404_v17 = vld [vmem:[%s11136_s30 + $0xfec] ss:$16 sps:$4 sm:$0xff]   ;;  %v10405_v24 = vld [vmem:[%s11136_s30 + $0x1008] ss:$16 sps:$4 sm:$0xff]  }
 0x354   : > { %v10407_v22 = vld [vmem:[%s11136_s30 + $0x100c] ss:$16 sps:$4 sm:$0xff]   ;;  %v10408_v25 = vld [vmem:[%s11136_s30 + $0x1208] ss:$16 sps:$4 sm:$0xff]  }
 0x355   : > { %7503 = vmatpush1.bf16.msra.mxu0 %v10351_v18  ;;  %v10410_v23 = vld [vmem:[%s11136_s30 + $0x120c] ss:$16 sps:$4 sm:$0xff]   ;;  %v10411_v27 = vld [vmem:[%s11136_s30 + $0x1028] ss:$16 sps:$4 sm:$0xff]  }
 0x356   : > { %7544 = vmatpush1.bf16.msra.mxu1 %v10354_v44  ;;  %7504 = vmatprep.subr.bf16.mxu0 %v10359_v55  ;;  %v10413_v26 = vld [vmem:[%s11136_s30 + $0x102c] ss:$16 sps:$4 sm:$0xff]   ;;  %v10414_v33 = vld [vmem:[%s11136_s30 + $0x1228] ss:$16 sps:$4 sm:$0xff]  }
 0x357   : > { %7545 = vmatprep.subr.bf16.mxu1 %v10362_v45  ;;  %v10416_v38 = vld [vmem:[%s11136_s30 + $0x122c] ss:$16 sps:$4 sm:$0xff]   ;;  %v10423_v44 = vld [vmem:[%s11136_s30 + $0x1068] ss:$16 sps:$4 sm:$0xff]  }
 0x358   : > { %v10419_v56 = vld [vmem:[%s11136_s30 + $0x104c] ss:$16 sps:$4 sm:$0xff]   ;;  %v10429_v45 = vld [vmem:[%s11136_s30 + $0x1088] ss:$16 sps:$4 sm:$0xff]  }
 0x359   : > { %7505 = vmatpush1.bf16.msra.mxu0 %v10357_v49  ;;  %v10422_v12 = vld [vmem:[%s11136_s30 + $0x124c] ss:$16 sps:$4 sm:$0xff]   ;;  %v10432_v49 = vld [vmem:[%s11136_s30 + $0x1288] ss:$16 sps:$4 sm:$0xff]  }
 0x35a   : > { %7546 = vmatpush1.bf16.msra.mxu1 %v10360_v31  ;;  %7506 = vmatprep.subr.bf16.mxu0 %v10365_v36  ;;  %v10425_v35 = vld [vmem:[%s11136_s30 + $0x106c] ss:$16 sps:$4 sm:$0xff]  }
 0x35b   : > { %7547 = vmatprep.subr.bf16.mxu1 %v10368_v39  ;;  %v10428_v18 = vld [vmem:[%s11136_s30 + $0x126c] ss:$16 sps:$4 sm:$0xff]   ;;  %v10435_v39 = vld [vmem:[%s11136_s30 + $0x10a8] ss:$16 sps:$4 sm:$0xff]  }
 0x35c   : > { %v10434_v55 = vld [vmem:[%s11136_s30 + $0x128c] ss:$16 sps:$4 sm:$0xff]  }
 0x35d   : > { %7507 = vmatpush1.bf16.msra.mxu0 %v10363_v52  ;;  %v10437_v31 = vld [vmem:[%s11136_s30 + $0x10ac] ss:$16 sps:$4 sm:$0xff]   ;;  %v10438_v52 = vld [vmem:[%s11136_s30 + $0x12a8] ss:$16 sps:$4 sm:$0xff]  }
 0x35e   : > { %7548 = vmatpush1.bf16.msra.mxu1 %v10366_v42  ;;  %7508 = vmatprep.subr.bf16.mxu0 %v10371_v43  ;;  %v10440_v36 = vld [vmem:[%s11136_s30 + $0x12ac] ss:$16 sps:$4 sm:$0xff]  }
 0x35f   : > { %7549 = vmatprep.subr.bf16.mxu1 %v10374_v57  ;;  %v10443_v42 = vld [vmem:[%s11136_s30 + $0x10cc] ss:$16 sps:$4 sm:$0xff]  }
 0x360   : > { %v10446_v43 = vld [vmem:[%s11136_s30 + $0x12cc] ss:$16 sps:$4 sm:$0xff]  }
 0x361   : > { %7509 = vmatpush1.bf16.msra.mxu0 %v10369_v54 }
 0x362   : > { %7550 = vmatpush1.bf16.msra.mxu1 %v10372_v59  ;;  %7510 = vmatprep.subr.bf16.mxu0 %v10377_v48 }
 0x363   : > { %7551 = vmatprep.subr.bf16.mxu1 %v10380_v50 }
 0x365   : > { %7511 = vmatpush1.bf16.msra.mxu0 %v10375_v8 }
 0x366   : > { %7552 = vmatpush1.bf16.msra.mxu1 %v10378_v9  ;;  %7512 = vmatprep.subr.bf16.mxu0 %v10383_v0 }
 0x367   : > { %7553 = vmatprep.subr.bf16.mxu1 %v10386_v20  ;;  %v10441_v20 = vld [vmem:[%s11136_s30 + $0x10c8] ss:$16 sps:$4 sm:$0xff]  }
 0x369   : > { %7513 = vmatpush1.bf16.msra.mxu0 %v10381_v21  ;;  %v10444_v21 = vld [vmem:[%s11136_s30 + $0x12c8] ss:$16 sps:$4 sm:$0xff]  }
 0x36a   : > { %7554 = vmatpush1.bf16.msra.mxu1 %v10384_v1  ;;  %7514 = vmatprep.subr.bf16.mxu0 %v10389_v4 }
 0x36b   : > { %7555 = vmatprep.subr.bf16.mxu1 %v10392_v37  ;;  %v10449_v37 = vld [vmem:[%s11136_s30 + $0x10ec] ss:$16 sps:$4 sm:$0xff]  }
 0x36d   : > { %7515 = vmatpush1.bf16.msra.mxu0 %v10387_v29  ;;  %v10452_v29 = vld [vmem:[%s11136_s30 + $0x12ec] ss:$16 sps:$4 sm:$0xff]  }
 0x36e   : > { %7556 = vmatpush1.bf16.msra.mxu1 %v10390_v32  ;;  %7516 = vmatprep.subr.bf16.mxu0 %v10395_v40  ;;  %v10447_v32 = vld [vmem:[%s11136_s30 + $0x10e8] ss:$16 sps:$4 sm:$0xff]  }
 0x36f   : > { %7557 = vmatprep.subr.bf16.mxu1 %v10398_v5  ;;  %v10450_v40 = vld [vmem:[%s11136_s30 + $0x12e8] ss:$16 sps:$4 sm:$0xff]   ;;  %v10455_v5 = vld [vmem:[%s11136_s30 + $0x110c] ss:$16 sps:$4 sm:$0xff]  }
 0x371   : > { %7517 = vmatpush1.bf16.msra.mxu0 %v10393_v13  ;;  %v10458_v13 = vld [vmem:[%s11136_s30 + $0x130c] ss:$16 sps:$4 sm:$0xff]  }
 0x372   : > { %7558 = vmatpush1.bf16.msra.mxu1 %v10396_v16  ;;  %7518 = vmatprep.subr.bf16.mxu0 %v10401_v47  ;;  %v10453_v16 = vld [vmem:[%s11136_s30 + $0x1108] ss:$16 sps:$4 sm:$0xff]  }
 0x373   : > { %7559 = vmatprep.subr.bf16.mxu1 %v10404_v17  ;;  %v10456_v47 = vld [vmem:[%s11136_s30 + $0x1308] ss:$16 sps:$4 sm:$0xff]   ;;  %v10461_v17 = vld [vmem:[%s11136_s30 + $0x112c] ss:$16 sps:$4 sm:$0xff]  }
 0x375   : > { %7519 = vmatpush1.bf16.msra.mxu0 %v10399_v58  ;;  %v10464_v58 = vld [vmem:[%s11136_s30 + $0x132c] ss:$16 sps:$4 sm:$0xff]  }
 0x376   : > { %7560 = vmatpush1.bf16.msra.mxu1 %v10402_v19  ;;  %7570 = vmatprep.subr.bf16.mxu0 %v10407_v22  ;;  %v10459_v19 = vld [vmem:[%s11136_s30 + $0x1128] ss:$16 sps:$4 sm:$0xff]  }
 0x377   : > { %7611 = vmatprep.subr.bf16.mxu1 %v10410_v23  ;;  %v10462_v22 = vld [vmem:[%s11136_s30 + $0x1328] ss:$16 sps:$4 sm:$0xff]   ;;  %v10467_v23 = vld [vmem:[%s11136_s30 + $0x114c] ss:$16 sps:$4 sm:$0xff]  }
 0x378   : > { %7521 = vmatmul.mubr.bf16.vlgmr.msra.gmra.mrb[44].mxu0 %v11503_v2  ;;  %v10417_v2 = vld [vmem:[%s11136_s30 + $0x1048] ss:$16 sps:$4 sm:$0xff]  }
 0x379   : > { %7562 = vmatmul.mubr.bf16.vlgmr.msra.gmra.mrb[44].mxu1 %v11505_v3  ;;  %7571 = vmatpush1.bf16.msra.mxu0 %v10405_v24  ;;  %v10420_v3 = vld [vmem:[%s11136_s30 + $0x1248] ss:$16 sps:$4 sm:$0xff]   ;;  %v10470_v24 = vld [vmem:[%s11136_s30 + $0x134c] ss:$16 sps:$4 sm:$0xff]  }
 0x37a   : > { %7612 = vmatpush1.bf16.msra.mxu1 %v10408_v25  ;;  %7572 = vmatprep.subr.bf16.mxu0 %v10413_v26  ;;  %v10465_v25 = vld [vmem:[%s11136_s30 + $0x1148] ss:$16 sps:$4 sm:$0xff]  }
 0x37b   : > { %7613 = vmatprep.subr.bf16.mxu1 %v10416_v38  ;;  %7602 = vmatprep.mubr.bf16.mxu0 %v11515_v10  ;;  %v10426_v10 = vld [vmem:[%s11136_s30 + $0x1268] ss:$16 sps:$4 sm:$0xff]   ;;  %v10473_v38 = vld [vmem:[%s11136_s30 + $0x116c] ss:$16 sps:$4 sm:$0xff]  }
 0x37c   : > { %7643 = vmatprep.mubr.bf16.mxu1 %v11517_v11  ;;  %v10431_v11 = vld [vmem:[%s11136_s30 + $0x108c] ss:$16 sps:$4 sm:$0xff]   ;;  %v10468_v26 = vld [vmem:[%s11136_s30 + $0x1348] ss:$16 sps:$4 sm:$0xff]  }
 0x37d   : > { %7573 = vmatpush1.bf16.msra.mxu0 %v10411_v27  ;;  %v10476_v27 = vld [vmem:[%s11136_s30 + $0x136c] ss:$16 sps:$4 sm:$0xff]  }
 0x37e   : > { %7614 = vmatpush1.bf16.msra.mxu1 %v10414_v33  ;;  %7574 = vmatprep.subr.bf16.mxu0 %v10419_v56  ;;  %v10471_v33 = vld [vmem:[%s11136_s30 + $0x1168] ss:$16 sps:$4 sm:$0xff]  }
 0x37f   : > { %7615 = vmatprep.subr.bf16.mxu1 %v10422_v12  ;;  %v10474_v56 = vld [vmem:[%s11136_s30 + $0x1368] ss:$16 sps:$4 sm:$0xff]   ;;  %v10479_v12 = vld [vmem:[%s11136_s30 + $0x118c] ss:$16 sps:$4 sm:$0xff]  }
 0x381   : > { %7575 = vmatpush1.bf16.msra.mxu0 %v10417_v2  ;;  %v10482_v2 = vld [vmem:[%s11136_s30 + $0x138c] ss:$16 sps:$4 sm:$0xff]  }
 0x382   : > { %7616 = vmatpush1.bf16.msra.mxu1 %v10420_v3  ;;  %7576 = vmatprep.subr.bf16.mxu0 %v10425_v35  ;;  %v10477_v3 = vld [vmem:[%s11136_s30 + $0x1188] ss:$16 sps:$4 sm:$0xff]  }
 0x383   : > { %7617 = vmatprep.subr.bf16.mxu1 %v10428_v18  ;;  %v10480_v35 = vld [vmem:[%s11136_s30 + $0x1388] ss:$16 sps:$4 sm:$0xff]   ;;  %v10485_v18 = vld [vmem:[%s11136_s30 + $0x11ac] ss:$16 sps:$4 sm:$0xff]  }
 0x385   : > { %7577 = vmatpush1.bf16.msra.mxu0 %v10423_v44  ;;  %v10488_v44 = vld [vmem:[%s11136_s30 + $0x13ac] ss:$16 sps:$4 sm:$0xff]  }
 0x386   : > { %7618 = vmatpush1.bf16.msra.mxu1 %v10426_v10  ;;  %7578 = vmatprep.subr.bf16.mxu0 %v10431_v11  ;;  %v10483_v10 = vld [vmem:[%s11136_s30 + $0x11a8] ss:$16 sps:$4 sm:$0xff]  }
 0x387   : > { %7619 = vmatprep.subr.bf16.mxu1 %v10434_v55  ;;  %v10486_v11 = vld [vmem:[%s11136_s30 + $0x13a8] ss:$16 sps:$4 sm:$0xff]   ;;  %v10491_v55 = vld [vmem:[%s11136_s30 + $0x11cc] ss:$16 sps:$4 sm:$0xff]  }
 0x389   : > { %7579 = vmatpush1.bf16.msra.mxu0 %v10429_v45  ;;  %v10494_v45 = vld [vmem:[%s11136_s30 + $0x13cc] ss:$16 sps:$4 sm:$0xff]  }
 0x38a   : > { %7620 = vmatpush1.bf16.msra.mxu1 %v10432_v49  ;;  %7580 = vmatprep.subr.bf16.mxu0 %v10437_v31  ;;  %v10489_v49 = vld [vmem:[%s11136_s30 + $0x11c8] ss:$16 sps:$4 sm:$0xff]  }
 0x38b   : > { %7621 = vmatprep.subr.bf16.mxu1 %v10440_v36  ;;  %v7276_v57 = vpop.f32.mrb[32].mxu0  ;;  %v10492_v31 = vld [vmem:[%s11136_s30 + $0x13c8] ss:$16 sps:$4 sm:$0xff]   ;;  %v10497_v36 = vld [vmem:[%s11136_s30 + $0x11ec] ss:$16 sps:$4 sm:$0xff]  }
 0x38c   : > { %v7317_v54 = vpop.f32.mrb[32].mxu1  ;;  %v7278_v48 = vpop.f32.mrb[33].mxu0 }
 0x38d   : > { %v12216_v59 = vadd.f32 %v7317_v54, %v7276_v57  ;;  %v7319_v50 = vpop.f32.mrb[33].mxu1  ;;  %v7280_v9 = vpop.f32.mrb[34].mxu0  ;;  %7581 = vmatpush1.bf16.msra.mxu0 %v10435_v39  ;;  %v10500_v39 = vld [vmem:[%s11136_s30 + $0x13ec] ss:$16 sps:$4 sm:$0xff]   ;;  %v10501_v54 = vld [vmem:[%s11136_s30 + $0x1408] ss:$16 sps:$4 sm:$0xff]  }
 0x38e   : > { %v12218_v8 = vadd.f32 %v7319_v50, %v7278_v48  ;;  %v7321_v0 = vpop.f32.mrb[34].mxu1  ;;  %7622 = vmatpush1.bf16.msra.mxu1 %v10438_v52  ;;  %v7281_v1 = vpop.f32.mrb[35].mxu0  ;;  %7582 = vmatprep.subr.bf16.mxu0 %v10443_v42  ;;  %v10495_v52 = vld [vmem:[%s11136_s30 + $0x11e8] ss:$16 sps:$4 sm:$0xff]   ;;  %v10506_v57 = vld [vmem:[%s11136_s30 + $0x160c] ss:$16 sps:$4 sm:$0xff]  }
 0x38f   : > { %v7322_v4 = vpop.f32.mrb[35].mxu1  ;;  %7623 = vmatprep.subr.bf16.mxu1 %v10446_v43  ;;  %v10498_v42 = vld [vmem:[%s11136_s30 + $0x13e8] ss:$16 sps:$4 sm:$0xff]   ;;  %v10503_v43 = vld [vmem:[%s11136_s30 + $0x140c] ss:$16 sps:$4 sm:$0xff]  }
 0x390   : > { %v10504_v48 = vld [vmem:[%s11136_s30 + $0x1608] ss:$16 sps:$4 sm:$0xff]   ;;  %v10509_v50 = vld [vmem:[%s11136_s30 + $0x142c] ss:$16 sps:$4 sm:$0xff]  }
 0x391   : > { %7583 = vmatpush1.bf16.msra.mxu0 %v10441_v20  ;;  %v10512_v9 = vld [vmem:[%s11136_s30 + $0x162c] ss:$16 sps:$4 sm:$0xff]   ;;  %v10507_v0 = vld [vmem:[%s11136_s30 + $0x1428] ss:$16 sps:$4 sm:$0xff]  }
 0x392   : > { %7624 = vmatpush1.bf16.msra.mxu1 %v10444_v21  ;;  %7584 = vmatprep.subr.bf16.mxu0 %v10449_v37  ;;  %v10510_v20 = vld [vmem:[%s11136_s30 + $0x1628] ss:$16 sps:$4 sm:$0xff]   ;;  %v10515_v21 = vld [vmem:[%s11136_s30 + $0x144c] ss:$16 sps:$4 sm:$0xff]  }
 0x393   : > { %7625 = vmatprep.subr.bf16.mxu1 %v10452_v29  ;;  %v10518_v1 = vld [vmem:[%s11136_s30 + $0x164c] ss:$16 sps:$4 sm:$0xff]   ;;  %v10519_v29 = vld [vmem:[%s11136_s30 + $0x1468] ss:$16 sps:$4 sm:$0xff]  }
 0x394   : > { %v10521_v4 = vld [vmem:[%s11136_s30 + $0x146c] ss:$16 sps:$4 sm:$0xff]  }
 0x395   : > { %7585 = vmatpush1.bf16.msra.mxu0 %v10447_v32  ;;  %v10524_v37 = vld [vmem:[%s11136_s30 + $0x166c] ss:$16 sps:$4 sm:$0xff]  }
 0x396   : > { %7626 = vmatpush1.bf16.msra.mxu1 %v10450_v40  ;;  %7586 = vmatprep.subr.bf16.mxu0 %v10455_v5  ;;  %v10530_v32 = vld [vmem:[%s11136_s30 + $0x168c] ss:$16 sps:$4 sm:$0xff]   ;;  %v10525_v40 = vld [vmem:[%s11136_s30 + $0x1488] ss:$16 sps:$4 sm:$0xff]  }
 0x397   : > { %7627 = vmatprep.subr.bf16.mxu1 %v10458_v13  ;;  %v10528_v5 = vld [vmem:[%s11136_s30 + $0x1688] ss:$16 sps:$4 sm:$0xff]   ;;  %v10533_v13 = vld [vmem:[%s11136_s30 + $0x14ac] ss:$16 sps:$4 sm:$0xff]  }
 0x399   : > { %7587 = vmatpush1.bf16.msra.mxu0 %v10453_v16  ;;  %v10536_v16 = vld [vmem:[%s11136_s30 + $0x16ac] ss:$16 sps:$4 sm:$0xff]  }
 0x39a   : > { %7628 = vmatpush1.bf16.msra.mxu1 %v10456_v47  ;;  %7588 = vmatprep.subr.bf16.mxu0 %v10461_v17  ;;  %v10531_v47 = vld [vmem:[%s11136_s30 + $0x14a8] ss:$16 sps:$4 sm:$0xff]  }
 0x39b   : > { %7629 = vmatprep.subr.bf16.mxu1 %v10464_v58  ;;  %v10534_v17 = vld [vmem:[%s11136_s30 + $0x16a8] ss:$16 sps:$4 sm:$0xff]   ;;  %v10539_v58 = vld [vmem:[%s11136_s30 + $0x14cc] ss:$16 sps:$4 sm:$0xff]  }
 0x39d   : > { %7589 = vmatpush1.bf16.msra.mxu0 %v10459_v19  ;;  %v10542_v19 = vld [vmem:[%s11136_s30 + $0x16cc] ss:$16 sps:$4 sm:$0xff]  }
 0x39e   : > { %7630 = vmatpush1.bf16.msra.mxu1 %v10462_v22  ;;  %7590 = vmatprep.subr.bf16.mxu0 %v10467_v23 }
 0x39f   : > { %7631 = vmatprep.subr.bf16.mxu1 %v10470_v24 }
 0x3a1   : > { %7591 = vmatpush1.bf16.msra.mxu0 %v10465_v25 }
 0x3a2   : > { %7632 = vmatpush1.bf16.msra.mxu1 %v10468_v26  ;;  %7592 = vmatprep.subr.bf16.mxu0 %v10473_v38 }
 0x3a3   : > { %7633 = vmatprep.subr.bf16.mxu1 %v10476_v27 }
 0x3a5   : > { %7593 = vmatpush1.bf16.msra.mxu0 %v10471_v33 }
 0x3a6   : > { %7634 = vmatpush1.bf16.msra.mxu1 %v10474_v56  ;;  %7594 = vmatprep.subr.bf16.mxu0 %v10479_v12  ;;  %v10537_v56 = vld [vmem:[%s11136_s30 + $0x14c8] ss:$16 sps:$4 sm:$0xff]  }
 0x3a7   : > { %7635 = vmatprep.subr.bf16.mxu1 %v10482_v2  ;;  %v10540_v12 = vld [vmem:[%s11136_s30 + $0x16c8] ss:$16 sps:$4 sm:$0xff]  }
 0x3a9   : > { %7595 = vmatpush1.bf16.msra.mxu0 %v10477_v3 }
 0x3aa   : > { %7636 = vmatpush1.bf16.msra.mxu1 %v10480_v35  ;;  %7596 = vmatprep.subr.bf16.mxu0 %v10485_v18 }
 0x3ab   : > { %7637 = vmatprep.subr.bf16.mxu1 %v10488_v44  ;;  %v10543_v44 = vld [vmem:[%s11136_s30 + $0x14e8] ss:$16 sps:$4 sm:$0xff]  }
 0x3ad   : > { %7597 = vmatpush1.bf16.msra.mxu0 %v10483_v10  ;;  %v10546_v10 = vld [vmem:[%s11136_s30 + $0x16e8] ss:$16 sps:$4 sm:$0xff]  }
 0x3ae   : > { %7638 = vmatpush1.bf16.msra.mxu1 %v10486_v11  ;;  %7598 = vmatprep.subr.bf16.mxu0 %v10491_v55  ;;  %v10551_v11 = vld [vmem:[%s11136_s30 + $0x150c] ss:$16 sps:$4 sm:$0xff]  }
 0x3af   : > { %7639 = vmatprep.subr.bf16.mxu1 %v10494_v45  ;;  %v10554_v55 = vld [vmem:[%s11136_s30 + $0x170c] ss:$16 sps:$4 sm:$0xff]   ;;  %v10549_v45 = vld [vmem:[%s11136_s30 + $0x1508] ss:$16 sps:$4 sm:$0xff]  }
 0x3b1   : > { %7599 = vmatpush1.bf16.msra.mxu0 %v10489_v49  ;;  %v10552_v49 = vld [vmem:[%s11136_s30 + $0x1708] ss:$16 sps:$4 sm:$0xff]  }
 0x3b2   : > { %7640 = vmatpush1.bf16.msra.mxu1 %v10492_v31  ;;  %7600 = vmatprep.subr.bf16.mxu0 %v10497_v36  ;;  %v10557_v31 = vld [vmem:[%s11136_s30 + $0x152c] ss:$16 sps:$4 sm:$0xff]  }
 0x3b3   : > { %7641 = vmatprep.subr.bf16.mxu1 %v10500_v39  ;;  %v10560_v36 = vld [vmem:[%s11136_s30 + $0x172c] ss:$16 sps:$4 sm:$0xff]   ;;  %v10555_v39 = vld [vmem:[%s11136_s30 + $0x1528] ss:$16 sps:$4 sm:$0xff]  }
 0x3b5   : > { %7601 = vmatpush1.bf16.msra.mxu0 %v10495_v52  ;;  %v10558_v52 = vld [vmem:[%s11136_s30 + $0x1728] ss:$16 sps:$4 sm:$0xff]  }
 0x3b6   : > { %7642 = vmatpush1.bf16.msra.mxu1 %v10498_v42  ;;  %7652 = vmatprep.subr.bf16.mxu0 %v10503_v43  ;;  %v10563_v42 = vld [vmem:[%s11136_s30 + $0x154c] ss:$16 sps:$4 sm:$0xff]  }
 0x3b7   : > { %7693 = vmatprep.subr.bf16.mxu1 %v10506_v57  ;;  %v10566_v43 = vld [vmem:[%s11136_s30 + $0x174c] ss:$16 sps:$4 sm:$0xff]   ;;  %v10561_v57 = vld [vmem:[%s11136_s30 + $0x1548] ss:$16 sps:$4 sm:$0xff]  }
 0x3b8   : > { %7603 = vmatmul.mubr.bf16.vlgmr.msra.gmra.mrb[48].mxu0 %v11593_v51  ;;  %v10513_v51 = vld [vmem:[%s11136_s30 + $0x1448] ss:$16 sps:$4 sm:$0xff]  }
 0x3b9   : > { %7644 = vmatmul.mubr.bf16.vlgmr.msra.gmra.mrb[48].mxu1 %v11595_v53  ;;  %7653 = vmatpush1.bf16.msra.mxu0 %v10501_v54  ;;  %v10516_v53 = vld [vmem:[%s11136_s30 + $0x1648] ss:$16 sps:$4 sm:$0xff]  }
 0x3ba   : > { %7694 = vmatpush1.bf16.msra.mxu1 %v10504_v48  ;;  %7654 = vmatprep.subr.bf16.mxu0 %v10509_v50  ;;  %v10564_v54 = vld [vmem:[%s11136_s30 + $0x1748] ss:$16 sps:$4 sm:$0xff]   ;;  %v10569_v48 = vld [vmem:[%s11136_s30 + $0x156c] ss:$16 sps:$4 sm:$0xff]  }
 0x3bb   : > { %7695 = vmatprep.subr.bf16.mxu1 %v10512_v9  ;;  %7684 = vmatprep.mubr.bf16.mxu0 %v11607_v60  ;;  %v10522_v60 = vld [vmem:[%s11136_s30 + $0x1668] ss:$16 sps:$4 sm:$0xff]   ;;  %v10572_v50 = vld [vmem:[%s11136_s30 + $0x176c] ss:$16 sps:$4 sm:$0xff]  }
 0x3bc   : > { %7725 = vmatprep.mubr.bf16.mxu1 %v11609_v61  ;;  %v10527_v61 = vld [vmem:[%s11136_s30 + $0x148c] ss:$16 sps:$4 sm:$0xff]   ;;  %v10567_v9 = vld [vmem:[%s11136_s30 + $0x1568] ss:$16 sps:$4 sm:$0xff]  }
 0x3bd   : > { %7655 = vmatpush1.bf16.msra.mxu0 %v10507_v0  ;;  %v10570_v0 = vld [vmem:[%s11136_s30 + $0x1768] ss:$16 sps:$4 sm:$0xff]  }
 0x3be   : > { %7696 = vmatpush1.bf16.msra.mxu1 %v10510_v20  ;;  %7656 = vmatprep.subr.bf16.mxu0 %v10515_v21  ;;  %v10575_v20 = vld [vmem:[%s11136_s30 + $0x158c] ss:$16 sps:$4 sm:$0xff]  }
 0x3bf   : > { %7697 = vmatprep.subr.bf16.mxu1 %v10518_v1  ;;  %v10578_v21 = vld [vmem:[%s11136_s30 + $0x178c] ss:$16 sps:$4 sm:$0xff]   ;;  %v10573_v1 = vld [vmem:[%s11136_s30 + $0x1588] ss:$16 sps:$4 sm:$0xff]  }
 0x3c1   : > { %7657 = vmatpush1.bf16.msra.mxu0 %v10513_v51  ;;  %v10576_v51 = vld [vmem:[%s11136_s30 + $0x1788] ss:$16 sps:$4 sm:$0xff]  }
 0x3c2   : > { %7698 = vmatpush1.bf16.msra.mxu1 %v10516_v53  ;;  %7658 = vmatprep.subr.bf16.mxu0 %v10521_v4  ;;  %v10581_v53 = vld [vmem:[%s11136_s30 + $0x15ac] ss:$16 sps:$4 sm:$0xff]  }
 0x3c3   : > { %7699 = vmatprep.subr.bf16.mxu1 %v10524_v37  ;;  %v10584_v4 = vld [vmem:[%s11136_s30 + $0x17ac] ss:$16 sps:$4 sm:$0xff]   ;;  %v10579_v37 = vld [vmem:[%s11136_s30 + $0x15a8] ss:$16 sps:$4 sm:$0xff]  }
 0x3c5   : > { %7659 = vmatpush1.bf16.msra.mxu0 %v10519_v29  ;;  %v10582_v29 = vld [vmem:[%s11136_s30 + $0x17a8] ss:$16 sps:$4 sm:$0xff]  }
 0x3c6   : > { %7700 = vmatpush1.bf16.msra.mxu1 %v10522_v60  ;;  %7660 = vmatprep.subr.bf16.mxu0 %v10527_v61  ;;  %v10587_v60 = vld [vmem:[%s11136_s30 + $0x15cc] ss:$16 sps:$4 sm:$0xff]  }
 0x3c7   : > { %7701 = vmatprep.subr.bf16.mxu1 %v10530_v32  ;;  %v10590_v61 = vld [vmem:[%s11136_s30 + $0x17cc] ss:$16 sps:$4 sm:$0xff]   ;;  %v10585_v32 = vld [vmem:[%s11136_s30 + $0x15c8] ss:$16 sps:$4 sm:$0xff]  }
 0x3c9   : > { %7661 = vmatpush1.bf16.msra.mxu0 %v10525_v40  ;;  %v10588_v40 = vld [vmem:[%s11136_s30 + $0x17c8] ss:$16 sps:$4 sm:$0xff]  }
 0x3ca   : > { %7702 = vmatpush1.bf16.msra.mxu1 %v10528_v5  ;;  %7662 = vmatprep.subr.bf16.mxu0 %v10533_v13  ;;  %v10593_v5 = vld [vmem:[%s11136_s30 + $0x15ec] ss:$16 sps:$4 sm:$0xff]  }
 0x3cb   : > { %7703 = vmatprep.subr.bf16.mxu1 %v10536_v16  ;;  %v7358_v22 = vpop.f32.mrb[36].mxu0  ;;  %v10596_v13 = vld [vmem:[%s11136_s30 + $0x17ec] ss:$16 sps:$4 sm:$0xff]   ;;  %v10591_v16 = vld [vmem:[%s11136_s30 + $0x15e8] ss:$16 sps:$4 sm:$0xff]  }
 0x3cc   : > { %v7399_v23 = vpop.f32.mrb[36].mxu1  ;;  %v7359_v24 = vadd.f32 %v7358_v22, %v12216_v59  ;;  %v7360_v25 = vpop.f32.mrb[37].mxu0  ;;  %v10545_v59 = vld [vmem:[%s11136_s30 + $0x14ec] ss:$16 sps:$4 sm:$0xff]   ;;  %v10600_v22 = vld [vmem:[%s11136_s30 + $0x1a08] ss:$16 sps:$4 sm:$0xff]  }
 0x3cd   : > { %v7401_v26 = vpop.f32.mrb[37].mxu1  ;;  %v7361_v38 = vadd.f32 %v7360_v25, %v12218_v8  ;;  %v7362_v27 = vpop.f32.mrb[38].mxu0  ;;  %7663 = vmatpush1.bf16.msra.mxu0 %v10531_v47  ;;  %v10548_v8 = vld [vmem:[%s11136_s30 + $0x16ec] ss:$16 sps:$4 sm:$0xff]   ;;  %v10594_v47 = vld [vmem:[%s11136_s30 + $0x17e8] ss:$16 sps:$4 sm:$0xff]  }
 0x3ce   : > { %v7403_v33 = vpop.f32.mrb[38].mxu1  ;;  %7704 = vmatpush1.bf16.msra.mxu1 %v10534_v17  ;;  %v12292_v2 = vadd.f32 %v7399_v23, %v7359_v24  ;;  %v7363_v3 = vpop.f32.mrb[39].mxu0  ;;  %7664 = vmatprep.subr.bf16.mxu0 %v10539_v58  ;;  %v10599_v17 = vld [vmem:[%s11136_s30 + $0x180c] ss:$16 sps:$4 sm:$0xff]   ;;  %v10603_v25 = vld [vmem:[%s11136_s30 + $0x1828] ss:$16 sps:$4 sm:$0xff]  }
 0x3cf   : > { %v7404_v35 = vpop.f32.mrb[39].mxu1  ;;  %7705 = vmatprep.subr.bf16.mxu1 %v10542_v19  ;;  %v12296_v18 = vadd.f32 %v7401_v26, %v7361_v38  ;;  %v10602_v58 = vld [vmem:[%s11136_s30 + $0x1a0c] ss:$16 sps:$4 sm:$0xff]   ;;  %v10597_v19 = vld [vmem:[%s11136_s30 + $0x1808] ss:$16 sps:$4 sm:$0xff]  }
 0x3d0   : > { %v10605_v23 = vld [vmem:[%s11136_s30 + $0x182c] ss:$16 sps:$4 sm:$0xff]   ;;  %v10606_v26 = vld [vmem:[%s11136_s30 + $0x1a28] ss:$16 sps:$4 sm:$0xff]  }
 0x3d1   : > { %7665 = vmatpush1.bf16.msra.mxu0 %v10537_v56  ;;  %v10608_v24 = vld [vmem:[%s11136_s30 + $0x1a2c] ss:$16 sps:$4 sm:$0xff]   ;;  %v10621_v35 = vld [vmem:[%s11136_s30 + $0x1888] ss:$16 sps:$4 sm:$0xff]  }
 0x3d2   : > { %7706 = vmatpush1.bf16.msra.mxu1 %v10540_v12  ;;  %7666 = vmatprep.subr.bf16.mxu0 %v10545_v59  ;;  %v10611_v38 = vld [vmem:[%s11136_s30 + $0x184c] ss:$16 sps:$4 sm:$0xff]   ;;  %v10615_v12 = vld [vmem:[%s11136_s30 + $0x1868] ss:$16 sps:$4 sm:$0xff]  }
 0x3d3   : > { %7707 = vmatprep.subr.bf16.mxu1 %v10548_v8  ;;  %v10614_v27 = vld [vmem:[%s11136_s30 + $0x1a4c] ss:$16 sps:$4 sm:$0xff]   ;;  %v10624_v59 = vld [vmem:[%s11136_s30 + $0x1a88] ss:$16 sps:$4 sm:$0xff]  }
 0x3d4   : > { %v10617_v33 = vld [vmem:[%s11136_s30 + $0x186c] ss:$16 sps:$4 sm:$0xff]  }
 0x3d5   : > { %7667 = vmatpush1.bf16.msra.mxu0 %v10543_v44  ;;  %v10620_v56 = vld [vmem:[%s11136_s30 + $0x1a6c] ss:$16 sps:$4 sm:$0xff]  }
 0x3d6   : > { %7708 = vmatpush1.bf16.msra.mxu1 %v10546_v10  ;;  %7668 = vmatprep.subr.bf16.mxu0 %v10551_v11  ;;  %v10626_v3 = vld [vmem:[%s11136_s30 + $0x1a8c] ss:$16 sps:$4 sm:$0xff]   ;;  %v10627_v10 = vld [vmem:[%s11136_s30 + $0x18a8] ss:$16 sps:$4 sm:$0xff]  }
 0x3d7   : > { %7709 = vmatprep.subr.bf16.mxu1 %v10554_v55  ;;  %v10629_v8 = vld [vmem:[%s11136_s30 + $0x18ac] ss:$16 sps:$4 sm:$0xff]   ;;  %v10630_v11 = vld [vmem:[%s11136_s30 + $0x1aa8] ss:$16 sps:$4 sm:$0xff]  }
 0x3d8   : > { %v10632_v44 = vld [vmem:[%s11136_s30 + $0x1aac] ss:$16 sps:$4 sm:$0xff]  }
 0x3d9   : > { %7669 = vmatpush1.bf16.msra.mxu0 %v10549_v45  ;;  %v10635_v55 = vld [vmem:[%s11136_s30 + $0x18cc] ss:$16 sps:$4 sm:$0xff]  }
 0x3da   : > { %7710 = vmatpush1.bf16.msra.mxu1 %v10552_v49  ;;  %7670 = vmatprep.subr.bf16.mxu0 %v10557_v31  ;;  %v10638_v45 = vld [vmem:[%s11136_s30 + $0x1acc] ss:$16 sps:$4 sm:$0xff]  }
 0x3db   : > { %7711 = vmatprep.subr.bf16.mxu1 %v10560_v36 }
 0x3dd   : > { %7671 = vmatpush1.bf16.msra.mxu0 %v10555_v39 }
 0x3de   : > { %7712 = vmatpush1.bf16.msra.mxu1 %v10558_v52  ;;  %7672 = vmatprep.subr.bf16.mxu0 %v10563_v42 }
 0x3df   : > { %7713 = vmatprep.subr.bf16.mxu1 %v10566_v43 }
 0x3e1   : > { %7673 = vmatpush1.bf16.msra.mxu0 %v10561_v57 }
 0x3e2   : > { %7714 = vmatpush1.bf16.msra.mxu1 %v10564_v54  ;;  %7674 = vmatprep.subr.bf16.mxu0 %v10569_v48  ;;  %v10633_v54 = vld [vmem:[%s11136_s30 + $0x18c8] ss:$16 sps:$4 sm:$0xff]  }
 0x3e3   : > { %7715 = vmatprep.subr.bf16.mxu1 %v10572_v50  ;;  %v10636_v48 = vld [vmem:[%s11136_s30 + $0x1ac8] ss:$16 sps:$4 sm:$0xff]  }
 0x3e5   : > { %7675 = vmatpush1.bf16.msra.mxu0 %v10567_v9 }
 0x3e6   : > { %7716 = vmatpush1.bf16.msra.mxu1 %v10570_v0  ;;  %7676 = vmatprep.subr.bf16.mxu0 %v10575_v20 }
 0x3e7   : > { %7717 = vmatprep.subr.bf16.mxu1 %v10578_v21  ;;  %v10639_v21 = vld [vmem:[%s11136_s30 + $0x18e8] ss:$16 sps:$4 sm:$0xff]  }
 0x3e9   : > { %7677 = vmatpush1.bf16.msra.mxu0 %v10573_v1  ;;  %v10642_v1 = vld [vmem:[%s11136_s30 + $0x1ae8] ss:$16 sps:$4 sm:$0xff]  }
 0x3ea   : > { %7718 = vmatpush1.bf16.msra.mxu1 %v10576_v51  ;;  %7678 = vmatprep.subr.bf16.mxu0 %v10581_v53  ;;  %v10647_v51 = vld [vmem:[%s11136_s30 + $0x190c] ss:$16 sps:$4 sm:$0xff]  }
 0x3eb   : > { %7719 = vmatprep.subr.bf16.mxu1 %v10584_v4  ;;  %v10650_v53 = vld [vmem:[%s11136_s30 + $0x1b0c] ss:$16 sps:$4 sm:$0xff]   ;;  %v10645_v4 = vld [vmem:[%s11136_s30 + $0x1908] ss:$16 sps:$4 sm:$0xff]  }
 0x3ed   : > { %7679 = vmatpush1.bf16.msra.mxu0 %v10579_v37  ;;  %v10648_v37 = vld [vmem:[%s11136_s30 + $0x1b08] ss:$16 sps:$4 sm:$0xff]  }
 0x3ee   : > { %7720 = vmatpush1.bf16.msra.mxu1 %v10582_v29  ;;  %7680 = vmatprep.subr.bf16.mxu0 %v10587_v60  ;;  %v10653_v29 = vld [vmem:[%s11136_s30 + $0x192c] ss:$16 sps:$4 sm:$0xff]  }
 0x3ef   : > { %7721 = vmatprep.subr.bf16.mxu1 %v10590_v61  ;;  %v10656_v60 = vld [vmem:[%s11136_s30 + $0x1b2c] ss:$16 sps:$4 sm:$0xff]   ;;  %v10651_v61 = vld [vmem:[%s11136_s30 + $0x1928] ss:$16 sps:$4 sm:$0xff]  }
 0x3f1   : > { %7681 = vmatpush1.bf16.msra.mxu0 %v10585_v32  ;;  %v10654_v32 = vld [vmem:[%s11136_s30 + $0x1b28] ss:$16 sps:$4 sm:$0xff]  }
 0x3f2   : > { %7722 = vmatpush1.bf16.msra.mxu1 %v10588_v40  ;;  %7682 = vmatprep.subr.bf16.mxu0 %v10593_v5  ;;  %v10659_v40 = vld [vmem:[%s11136_s30 + $0x194c] ss:$16 sps:$4 sm:$0xff]  }
 0x3f3   : > { %7723 = vmatprep.subr.bf16.mxu1 %v10596_v13  ;;  %v10662_v5 = vld [vmem:[%s11136_s30 + $0x1b4c] ss:$16 sps:$4 sm:$0xff]   ;;  %v10657_v13 = vld [vmem:[%s11136_s30 + $0x1948] ss:$16 sps:$4 sm:$0xff]  }
 0x3f5   : > { %7683 = vmatpush1.bf16.msra.mxu0 %v10591_v16  ;;  %v10660_v16 = vld [vmem:[%s11136_s30 + $0x1b48] ss:$16 sps:$4 sm:$0xff]  }
 0x3f6   : > { %7724 = vmatpush1.bf16.msra.mxu1 %v10594_v47  ;;  %7734 = vmatprep.subr.bf16.mxu0 %v10599_v17  ;;  %v10665_v47 = vld [vmem:[%s11136_s30 + $0x196c] ss:$16 sps:$4 sm:$0xff]  }
 0x3f7   : > { %7775 = vmatprep.subr.bf16.mxu1 %v10602_v58  ;;  %v10668_v17 = vld [vmem:[%s11136_s30 + $0x1b6c] ss:$16 sps:$4 sm:$0xff]   ;;  %v10663_v58 = vld [vmem:[%s11136_s30 + $0x1968] ss:$16 sps:$4 sm:$0xff]  }
 0x3f8   : > { %7685 = vmatmul.mubr.bf16.vlgmr.msra.gmra.mrb[52].mxu0 %v11687_v41  ;;  %v10609_v41 = vld [vmem:[%s11136_s30 + $0x1848] ss:$16 sps:$4 sm:$0xff]  }
 0x3f9   : > { %7726 = vmatmul.mubr.bf16.vlgmr.msra.gmra.mrb[52].mxu1 %v11689_v46  ;;  %7735 = vmatpush1.bf16.msra.mxu0 %v10597_v19  ;;  %v10612_v46 = vld [vmem:[%s11136_s30 + $0x1a48] ss:$16 sps:$4 sm:$0xff]  }
 0x3fa   : > { %7776 = vmatpush1.bf16.msra.mxu1 %v10600_v22  ;;  %7736 = vmatprep.subr.bf16.mxu0 %v10605_v23  ;;  %v10666_v19 = vld [vmem:[%s11136_s30 + $0x1b68] ss:$16 sps:$4 sm:$0xff]   ;;  %v10671_v22 = vld [vmem:[%s11136_s30 + $0x198c] ss:$16 sps:$4 sm:$0xff]  }
 0x3fb   : > { %7777 = vmatprep.subr.bf16.mxu1 %v10608_v24  ;;  %7766 = vmatprep.mubr.bf16.mxu0 %v11701_v62  ;;  %v10618_v62 = vld [vmem:[%s11136_s30 + $0x1a68] ss:$16 sps:$4 sm:$0xff]   ;;  %v10674_v23 = vld [vmem:[%s11136_s30 + $0x1b8c] ss:$16 sps:$4 sm:$0xff]  }
 0x3fc   : > { %7807 = vmatprep.mubr.bf16.mxu1 %v11703_v63  ;;  %v10623_v63 = vld [vmem:[%s11136_s30 + $0x188c] ss:$16 sps:$4 sm:$0xff]   ;;  %v10669_v24 = vld [vmem:[%s11136_s30 + $0x1988] ss:$16 sps:$4 sm:$0xff]  }
 0x3fd   : > { %7737 = vmatpush1.bf16.msra.mxu0 %v10603_v25  ;;  %v10672_v25 = vld [vmem:[%s11136_s30 + $0x1b88] ss:$16 sps:$4 sm:$0xff]  }
 0x3fe   : > { %7778 = vmatpush1.bf16.msra.mxu1 %v10606_v26  ;;  %7738 = vmatprep.subr.bf16.mxu0 %v10611_v38  ;;  %v10677_v26 = vld [vmem:[%s11136_s30 + $0x19ac] ss:$16 sps:$4 sm:$0xff]  }
 0x3ff   : > { %7779 = vmatprep.subr.bf16.mxu1 %v10614_v27  ;;  %v10680_v38 = vld [vmem:[%s11136_s30 + $0x1bac] ss:$16 sps:$4 sm:$0xff]   ;;  %v10675_v27 = vld [vmem:[%s11136_s30 + $0x19a8] ss:$16 sps:$4 sm:$0xff]  }
 0x401   : > { %7739 = vmatpush1.bf16.msra.mxu0 %v10609_v41  ;;  %v10678_v41 = vld [vmem:[%s11136_s30 + $0x1ba8] ss:$16 sps:$4 sm:$0xff]  }
 0x402   : > { %7780 = vmatpush1.bf16.msra.mxu1 %v10612_v46  ;;  %7740 = vmatprep.subr.bf16.mxu0 %v10617_v33  ;;  %v10683_v46 = vld [vmem:[%s11136_s30 + $0x19cc] ss:$16 sps:$4 sm:$0xff]  }
 0x403   : > { %7781 = vmatprep.subr.bf16.mxu1 %v10620_v56  ;;  %v10686_v33 = vld [vmem:[%s11136_s30 + $0x1bcc] ss:$16 sps:$4 sm:$0xff]   ;;  %v10681_v56 = vld [vmem:[%s11136_s30 + $0x19c8] ss:$16 sps:$4 sm:$0xff]  }
 0x405   : > { %7741 = vmatpush1.bf16.msra.mxu0 %v10615_v12  ;;  %v10684_v12 = vld [vmem:[%s11136_s30 + $0x1bc8] ss:$16 sps:$4 sm:$0xff]  }
 0x406   : > { %7782 = vmatpush1.bf16.msra.mxu1 %v10618_v62  ;;  %7742 = vmatprep.subr.bf16.mxu0 %v10623_v63  ;;  %v10689_v62 = vld [vmem:[%s11136_s30 + $0x19ec] ss:$16 sps:$4 sm:$0xff]  }
 0x407   : > { %7783 = vmatprep.subr.bf16.mxu1 %v10626_v3  ;;  %v10692_v63 = vld [vmem:[%s11136_s30 + $0x1bec] ss:$16 sps:$4 sm:$0xff]   ;;  %v10687_v3 = vld [vmem:[%s11136_s30 + $0x19e8] ss:$16 sps:$4 sm:$0xff]  }
 0x409   : > { %7743 = vmatpush1.bf16.msra.mxu0 %v10621_v35  ;;  %v10690_v35 = vld [vmem:[%s11136_s30 + $0x1be8] ss:$16 sps:$4 sm:$0xff]  }
 0x40a   : > { %7784 = vmatpush1.bf16.msra.mxu1 %v10624_v59  ;;  %7744 = vmatprep.subr.bf16.mxu0 %v10629_v8  ;;  %v10695_v59 = vld [vmem:[%s11136_s30 + $0x1c0c] ss:$16 sps:$4 sm:$0xff]  }
 0x40b   : > { %7785 = vmatprep.subr.bf16.mxu1 %v10632_v44  ;;  %v7440_v49 = vpop.f32.mrb[40].mxu0  ;;  %v10698_v8 = vld [vmem:[%s11136_s30 + $0x1e0c] ss:$16 sps:$4 sm:$0xff]   ;;  %v10693_v44 = vld [vmem:[%s11136_s30 + $0x1c08] ss:$16 sps:$4 sm:$0xff]  }
 0x40c   : > { %v7481_v31 = vpop.f32.mrb[40].mxu1  ;;  %v7441_v36 = vadd.f32 %v7440_v49, %v12292_v2  ;;  %v7442_v39 = vpop.f32.mrb[41].mxu0  ;;  %v10641_v2 = vld [vmem:[%s11136_s30 + $0x18ec] ss:$16 sps:$4 sm:$0xff]   ;;  %v10702_v49 = vld [vmem:[%s11136_s30 + $0x1e28] ss:$16 sps:$4 sm:$0xff]  }
 0x40d   : > { %v7483_v52 = vpop.f32.mrb[41].mxu1  ;;  %v7443_v42 = vadd.f32 %v7442_v39, %v12296_v18  ;;  %v7444_v43 = vpop.f32.mrb[42].mxu0  ;;  %7745 = vmatpush1.bf16.msra.mxu0 %v10627_v10  ;;  %v10644_v18 = vld [vmem:[%s11136_s30 + $0x1aec] ss:$16 sps:$4 sm:$0xff]   ;;  %v10696_v10 = vld [vmem:[%s11136_s30 + $0x1e08] ss:$16 sps:$4 sm:$0xff]  }
 0x40e   : > { %v7485_v57 = vpop.f32.mrb[42].mxu1  ;;  %7786 = vmatpush1.bf16.msra.mxu1 %v10630_v11  ;;  %v12366_v50 = vadd.f32 %v7481_v31, %v7441_v36  ;;  %v7445_v9 = vpop.f32.mrb[43].mxu0  ;;  %7746 = vmatprep.subr.bf16.mxu0 %v10635_v55  ;;  %v10701_v11 = vld [vmem:[%s11136_s30 + $0x1c2c] ss:$16 sps:$4 sm:$0xff]  }
 0x40f   : > { %v7486_v0 = vpop.f32.mrb[43].mxu1  ;;  %7787 = vmatprep.subr.bf16.mxu1 %v10638_v45  ;;  %v12370_v20 = vadd.f32 %v7483_v52, %v7443_v42  ;;  %v10704_v55 = vld [vmem:[%s11136_s30 + $0x1e2c] ss:$16 sps:$4 sm:$0xff]   ;;  %v10699_v45 = vld [vmem:[%s11136_s30 + $0x1c28] ss:$16 sps:$4 sm:$0xff]  }
 0x410   : > { %v10707_v31 = vld [vmem:[%s11136_s30 + $0x1c4c] ss:$16 sps:$4 sm:$0xff]   ;;  %v10711_v42 = vld [vmem:[%s11136_s30 + $0x1c68] ss:$16 sps:$4 sm:$0xff]  }
 0x411   : > { %7747 = vmatpush1.bf16.msra.mxu0 %v10633_v54  ;;  %v10710_v36 = vld [vmem:[%s11136_s30 + $0x1e4c] ss:$16 sps:$4 sm:$0xff]   ;;  %v10717_v57 = vld [vmem:[%s11136_s30 + $0x1c88] ss:$16 sps:$4 sm:$0xff]  }
 0x412   : > { %7788 = vmatpush1.bf16.msra.mxu1 %v10636_v48  ;;  %7748 = vmatprep.subr.bf16.mxu0 %v10641_v2  ;;  %v10713_v39 = vld [vmem:[%s11136_s30 + $0x1c6c] ss:$16 sps:$4 sm:$0xff]   ;;  %v10720_v54 = vld [vmem:[%s11136_s30 + $0x1e88] ss:$16 sps:$4 sm:$0xff]  }
 0x413   : > { %7789 = vmatprep.subr.bf16.mxu1 %v10644_v18  ;;  %v10716_v52 = vld [vmem:[%s11136_s30 + $0x1e6c] ss:$16 sps:$4 sm:$0xff]   ;;  %v10723_v0 = vld [vmem:[%s11136_s30 + $0x1ca8] ss:$16 sps:$4 sm:$0xff]  }
 0x414   : > { %v10722_v43 = vld [vmem:[%s11136_s30 + $0x1e8c] ss:$16 sps:$4 sm:$0xff]   ;;  %v10726_v2 = vld [vmem:[%s11136_s30 + $0x1ea8] ss:$16 sps:$4 sm:$0xff]  }
 0x415   : > { %7749 = vmatpush1.bf16.msra.mxu0 %v10639_v21  ;;  %v10725_v48 = vld [vmem:[%s11136_s30 + $0x1cac] ss:$16 sps:$4 sm:$0xff]  }
 0x416   : > { %7790 = vmatpush1.bf16.msra.mxu1 %v10642_v1  ;;  %7750 = vmatprep.subr.bf16.mxu0 %v10647_v51  ;;  %v10728_v9 = vld [vmem:[%s11136_s30 + $0x1eac] ss:$16 sps:$4 sm:$0xff]  }
 0x417   : > { %7791 = vmatprep.subr.bf16.mxu1 %v10650_v53  ;;  %v10731_v18 = vld [vmem:[%s11136_s30 + $0x1ccc] ss:$16 sps:$4 sm:$0xff]  }
 0x418   : > { %v10734_v21 = vld [vmem:[%s11136_s30 + $0x1ecc] ss:$16 sps:$4 sm:$0xff]  }
 0x419   : > { %7751 = vmatpush1.bf16.msra.mxu0 %v10645_v4 }
 0x41a   : > { %7792 = vmatpush1.bf16.msra.mxu1 %v10648_v37  ;;  %7752 = vmatprep.subr.bf16.mxu0 %v10653_v29 }
 0x41b   : > { %7793 = vmatprep.subr.bf16.mxu1 %v10656_v60 }
 0x41d   : > { %7753 = vmatpush1.bf16.msra.mxu0 %v10651_v61 }
 0x41e   : > { %7794 = vmatpush1.bf16.msra.mxu1 %v10654_v32  ;;  %7754 = vmatprep.subr.bf16.mxu0 %v10659_v40  ;;  %v10729_v32 = vld [vmem:[%s11136_s30 + $0x1cc8] ss:$16 sps:$4 sm:$0xff]  }
 0x41f   : > { %7795 = vmatprep.subr.bf16.mxu1 %v10662_v5  ;;  %v10732_v40 = vld [vmem:[%s11136_s30 + $0x1ec8] ss:$16 sps:$4 sm:$0xff]  }
 0x421   : > { %7755 = vmatpush1.bf16.msra.mxu0 %v10657_v13 }
 0x422   : > { %7796 = vmatpush1.bf16.msra.mxu1 %v10660_v16  ;;  %7756 = vmatprep.subr.bf16.mxu0 %v10665_v47 }
 0x423   : > { %7797 = vmatprep.subr.bf16.mxu1 %v10668_v17  ;;  %v10735_v17 = vld [vmem:[%s11136_s30 + $0x1ce8] ss:$16 sps:$4 sm:$0xff]  }
 0x425   : > { %7757 = vmatpush1.bf16.msra.mxu0 %v10663_v58  ;;  %v10738_v58 = vld [vmem:[%s11136_s30 + $0x1ee8] ss:$16 sps:$4 sm:$0xff]  }
 0x426   : > { %7798 = vmatpush1.bf16.msra.mxu1 %v10666_v19  ;;  %7758 = vmatprep.subr.bf16.mxu0 %v10671_v22  ;;  %v10743_v19 = vld [vmem:[%s11136_s30 + $0x1d0c] ss:$16 sps:$4 sm:$0xff]  }
 0x427   : > { %7799 = vmatprep.subr.bf16.mxu1 %v10674_v23  ;;  %v10746_v22 = vld [vmem:[%s11136_s30 + $0x1f0c] ss:$16 sps:$4 sm:$0xff]   ;;  %v10741_v23 = vld [vmem:[%s11136_s30 + $0x1d08] ss:$16 sps:$4 sm:$0xff]  }
 0x429   : > { %7759 = vmatpush1.bf16.msra.mxu0 %v10669_v24  ;;  %v10744_v24 = vld [vmem:[%s11136_s30 + $0x1f08] ss:$16 sps:$4 sm:$0xff]  }
 0x42a   : > { %7800 = vmatpush1.bf16.msra.mxu1 %v10672_v25  ;;  %7760 = vmatprep.subr.bf16.mxu0 %v10677_v26  ;;  %v10749_v25 = vld [vmem:[%s11136_s30 + $0x1d2c] ss:$16 sps:$4 sm:$0xff]  }
 0x42b   : > { %7801 = vmatprep.subr.bf16.mxu1 %v10680_v38  ;;  %v10752_v26 = vld [vmem:[%s11136_s30 + $0x1f2c] ss:$16 sps:$4 sm:$0xff]   ;;  %v10747_v38 = vld [vmem:[%s11136_s30 + $0x1d28] ss:$16 sps:$4 sm:$0xff]  }
 0x42d   : > { %7761 = vmatpush1.bf16.msra.mxu0 %v10675_v27  ;;  %v10750_v27 = vld [vmem:[%s11136_s30 + $0x1f28] ss:$16 sps:$4 sm:$0xff]  }
 0x42e   : > { %7802 = vmatpush1.bf16.msra.mxu1 %v10678_v41  ;;  %7762 = vmatprep.subr.bf16.mxu0 %v10683_v46  ;;  %v10755_v41 = vld [vmem:[%s11136_s30 + $0x1d4c] ss:$16 sps:$4 sm:$0xff]  }
 0x42f   : > { %7803 = vmatprep.subr.bf16.mxu1 %v10686_v33  ;;  %v10758_v46 = vld [vmem:[%s11136_s30 + $0x1f4c] ss:$16 sps:$4 sm:$0xff]   ;;  %v10753_v33 = vld [vmem:[%s11136_s30 + $0x1d48] ss:$16 sps:$4 sm:$0xff]  }
 0x431   : > { %7763 = vmatpush1.bf16.msra.mxu0 %v10681_v56  ;;  %v10756_v56 = vld [vmem:[%s11136_s30 + $0x1f48] ss:$16 sps:$4 sm:$0xff]  }
 0x432   : > { %7804 = vmatpush1.bf16.msra.mxu1 %v10684_v12  ;;  %7764 = vmatprep.subr.bf16.mxu0 %v10689_v62  ;;  %v10761_v12 = vld [vmem:[%s11136_s30 + $0x1d6c] ss:$16 sps:$4 sm:$0xff]  }
 0x433   : > { %7805 = vmatprep.subr.bf16.mxu1 %v10692_v63  ;;  %v10764_v62 = vld [vmem:[%s11136_s30 + $0x1f6c] ss:$16 sps:$4 sm:$0xff]   ;;  %v10759_v63 = vld [vmem:[%s11136_s30 + $0x1d68] ss:$16 sps:$4 sm:$0xff]  }
 0x435   : > { %7765 = vmatpush1.bf16.msra.mxu0 %v10687_v3  ;;  %v10762_v3 = vld [vmem:[%s11136_s30 + $0x1f68] ss:$16 sps:$4 sm:$0xff]  }
 0x436   : > { %7806 = vmatpush1.bf16.msra.mxu1 %v10690_v35  ;;  %7816 = vmatprep.subr.bf16.mxu0 %v10695_v59  ;;  %v10767_v35 = vld [vmem:[%s11136_s30 + $0x1d8c] ss:$16 sps:$4 sm:$0xff]  }
 0x437   : > { %7857 = vmatprep.subr.bf16.mxu1 %v10698_v8  ;;  %v10770_v59 = vld [vmem:[%s11136_s30 + $0x1f8c] ss:$16 sps:$4 sm:$0xff]   ;;  %v10765_v8 = vld [vmem:[%s11136_s30 + $0x1d88] ss:$16 sps:$4 sm:$0xff]  }
 0x438   : > { %7767 = vmatmul.mubr.bf16.vlgmr.msra.gmra.mrb[56].mxu0 %v11789_v6  ;;  %v10705_v6 = vld [vmem:[%s11136_s30 + $0x1c48] ss:$16 sps:$4 sm:$0xff]  }
 0x439   : > { %7808 = vmatmul.mubr.bf16.vlgmr.msra.gmra.mrb[56].mxu1 %v11791_v7  ;;  %7817 = vmatpush1.bf16.msra.mxu0 %v10693_v44  ;;  %v10708_v7 = vld [vmem:[%s11136_s30 + $0x1e48] ss:$16 sps:$4 sm:$0xff]  }
 0x43a   : > { %7858 = vmatpush1.bf16.msra.mxu1 %v10696_v10  ;;  %7818 = vmatprep.subr.bf16.mxu0 %v10701_v11  ;;  %v10768_v44 = vld [vmem:[%s11136_s30 + $0x1f88] ss:$16 sps:$4 sm:$0xff]   ;;  %v10773_v10 = vld [vmem:[%s11136_s30 + $0x1dac] ss:$16 sps:$4 sm:$0xff]  }
 0x43b   : > { %7859 = vmatprep.subr.bf16.mxu1 %v10704_v55  ;;  %7848 = vmatprep.mubr.bf16.mxu0 %v11795_v14  ;;  %v10714_v14 = vld [vmem:[%s11136_s30 + $0x1e68] ss:$16 sps:$4 sm:$0xff]   ;;  %v10776_v11 = vld [vmem:[%s11136_s30 + $0x1fac] ss:$16 sps:$4 sm:$0xff]  }
 0x43c   : > { %7889 = vmatprep.mubr.bf16.mxu1 %v11797_v15  ;;  %v10719_v15 = vld [vmem:[%s11136_s30 + $0x1c8c] ss:$16 sps:$4 sm:$0xff]   ;;  %v10771_v55 = vld [vmem:[%s11136_s30 + $0x1da8] ss:$16 sps:$4 sm:$0xff]  }
 0x43d   : > { %7819 = vmatpush1.bf16.msra.mxu0 %v10699_v45  ;;  %v10774_v45 = vld [vmem:[%s11136_s30 + $0x1fa8] ss:$16 sps:$4 sm:$0xff]  }
 0x43e   : > { %7860 = vmatpush1.bf16.msra.mxu1 %v10702_v49  ;;  %7820 = vmatprep.subr.bf16.mxu0 %v10707_v31  ;;  %v10779_v49 = vld [vmem:[%s11136_s30 + $0x1dcc] ss:$16 sps:$4 sm:$0xff]  }
 0x43f   : > { %7861 = vmatprep.subr.bf16.mxu1 %v10710_v36  ;;  %v10782_v31 = vld [vmem:[%s11136_s30 + $0x1fcc] ss:$16 sps:$4 sm:$0xff]   ;;  %v10777_v36 = vld [vmem:[%s11136_s30 + $0x1dc8] ss:$16 sps:$4 sm:$0xff]  }
 0x441   : > { %7821 = vmatpush1.bf16.msra.mxu0 %v10705_v6  ;;  %v10780_v6 = vld [vmem:[%s11136_s30 + $0x1fc8] ss:$16 sps:$4 sm:$0xff]  }
 0x442   : > { %7862 = vmatpush1.bf16.msra.mxu1 %v10708_v7  ;;  %7822 = vmatprep.subr.bf16.mxu0 %v10713_v39  ;;  %v10785_v7 = vld [vmem:[%s11136_s30 + $0x1dec] ss:$16 sps:$4 sm:$0xff]  }
 0x443   : > { %7863 = vmatprep.subr.bf16.mxu1 %v10716_v52  ;;  %v10788_v39 = vld [vmem:[%s11136_s30 + $0x1fec] ss:$16 sps:$4 sm:$0xff]   ;;  %v10783_v52 = vld [vmem:[%s11136_s30 + $0x1de8] ss:$16 sps:$4 sm:$0xff]  }
 0x445   : > { %7823 = vmatpush1.bf16.msra.mxu0 %v10711_v42  ;;  %v10786_v42 = vld [vmem:[%s11136_s30 + $0x1fe8] ss:$16 sps:$4 sm:$0xff]  }
 0x446   : > { %7864 = vmatpush1.bf16.msra.mxu1 %v10714_v14  ;;  %7824 = vmatprep.subr.bf16.mxu0 %v10719_v15 }
 0x447   : > { %7865 = vmatprep.subr.bf16.mxu1 %v10722_v43 }
 0x449   : > { %7825 = vmatpush1.bf16.msra.mxu0 %v10717_v57 }
 0x44a   : > { %7866 = vmatpush1.bf16.msra.mxu1 %v10720_v54  ;;  %7826 = vmatprep.subr.bf16.mxu0 %v10725_v48 }
 0x44b   : > { %7867 = vmatprep.subr.bf16.mxu1 %v10728_v9  ;;  %v7522_v1 = vpop.f32.mrb[44].mxu0 }
 0x44c   : > { %v7563_v51 = vpop.f32.mrb[44].mxu1  ;;  %v7523_v53 = vadd.f32 %v7522_v1, %v12366_v50  ;;  %v7524_v4 = vpop.f32.mrb[45].mxu0  ;;  %v10737_v50 = vld [vmem:[%s11136_s30 + $0x1cec] ss:$16 sps:$4 sm:$0xff]  }
 0x44d   : > { %v7565_v37 = vpop.f32.mrb[45].mxu1  ;;  %v7525_v29 = vadd.f32 %v7524_v4, %v12370_v20  ;;  %v7526_v60 = vpop.f32.mrb[46].mxu0  ;;  %7827 = vmatpush1.bf16.msra.mxu0 %v10723_v0  ;;  %v10740_v20 = vld [vmem:[%s11136_s30 + $0x1eec] ss:$16 sps:$4 sm:$0xff]  }
 0x44e   : > { %v7567_v61 = vpop.f32.mrb[46].mxu1  ;;  %7868 = vmatpush1.bf16.msra.mxu1 %v10726_v2  ;;  %v12440_v5 = vadd.f32 %v7563_v51, %v7523_v53  ;;  %v7527_v13 = vpop.f32.mrb[47].mxu0  ;;  %7828 = vmatprep.subr.bf16.mxu0 %v10731_v18 }
 0x44f   : > { %v7568_v16 = vpop.f32.mrb[47].mxu1  ;;  %7869 = vmatprep.subr.bf16.mxu1 %v10734_v21  ;;  %v12444_v47 = vadd.f32 %v7565_v37, %v7525_v29 }
 0x451   : > { %7829 = vmatpush1.bf16.msra.mxu0 %v10729_v32 }
 0x452   : > { %7870 = vmatpush1.bf16.msra.mxu1 %v10732_v40  ;;  %7830 = vmatprep.subr.bf16.mxu0 %v10737_v50 }
 0x453   : > { %7871 = vmatprep.subr.bf16.mxu1 %v10740_v20 }
 0x455   : > { %7831 = vmatpush1.bf16.msra.mxu0 %v10735_v17 }
 0x456   : > { %7872 = vmatpush1.bf16.msra.mxu1 %v10738_v58  ;;  %7832 = vmatprep.subr.bf16.mxu0 %v10743_v19 }
 0x457   : > { %7873 = vmatprep.subr.bf16.mxu1 %v10746_v22 }
 0x459   : > { %7833 = vmatpush1.bf16.msra.mxu0 %v10741_v23 }
 0x45a   : > { %7874 = vmatpush1.bf16.msra.mxu1 %v10744_v24  ;;  %7834 = vmatprep.subr.bf16.mxu0 %v10749_v25 }
 0x45b   : > { %7875 = vmatprep.subr.bf16.mxu1 %v10752_v26  ;;  %v7915_v26 = vlaneseq }
 0x45d   : > { %7835 = vmatpush1.bf16.msra.mxu0 %v10747_v38 }
 0x45e   : > { %7876 = vmatpush1.bf16.msra.mxu1 %v10750_v27  ;;  %7836 = vmatprep.subr.bf16.mxu0 %v10755_v41 }
 0x45f   : > { %7877 = vmatprep.subr.bf16.mxu1 %v10758_v46 }
 0x461   : > { %7837 = vmatpush1.bf16.msra.mxu0 %v10753_v33 }
 0x462   : > { %7878 = vmatpush1.bf16.msra.mxu1 %v10756_v56  ;;  %7838 = vmatprep.subr.bf16.mxu0 %v10761_v12 }
 0x463   : > { %7879 = vmatprep.subr.bf16.mxu1 %v10764_v62 }
 0x465   : > { %7839 = vmatpush1.bf16.msra.mxu0 %v10759_v63 }
 0x466   : > { %7880 = vmatpush1.bf16.msra.mxu1 %v10762_v3  ;;  %7840 = vmatprep.subr.bf16.mxu0 %v10767_v35  ;;  %v7916_v3 = vshrl.u32 %v7915_v26, 7 }
 0x467   : > { %7881 = vmatprep.subr.bf16.mxu1 %v10770_v59 }
 0x469   : > { %7841 = vmatpush1.bf16.msra.mxu0 %v10765_v8 }
 0x46a   : > { %7882 = vmatpush1.bf16.msra.mxu1 %v10768_v44  ;;  %7842 = vmatprep.subr.bf16.mxu0 %v10773_v10  ;;  %v7929_v10 = vsub.s32 3, %v7916_v3 }
 0x46b   : > { %7883 = vmatprep.subr.bf16.mxu1 %v10776_v11  ;;  %v7913_v11 = vld [vmem:[%s11147_s7] sm:$0xf] }
 0x46d   : > { %7843 = vmatpush1.bf16.msra.mxu0 %v10771_v55  ;;  %v7917_v55 = vsub.s32 0, %v7916_v3 }
 0x46e   : > { %7884 = vmatpush1.bf16.msra.mxu1 %v10774_v45  ;;  %7844 = vmatprep.subr.bf16.mxu0 %v10779_v49  ;;  %v7921_v45 = vsub.s32 1, %v7916_v3  ;;  %v7925_v49 = vsub.s32 2, %v7916_v3 }
 0x46f   : > { %7885 = vmatprep.subr.bf16.mxu1 %v10782_v31  ;;  %v7930_v31 = vrot.slane %v7913_v11, %v7929_v10 }
 0x471   : > { %7845 = vmatpush1.bf16.msra.mxu0 %v10777_v36  ;;  %v7918_v36 = vrot.slane %v7913_v11, %v7917_v55 }
 0x472   : > { %7886 = vmatpush1.bf16.msra.mxu1 %v10780_v6  ;;  %7846 = vmatprep.subr.bf16.mxu0 %v10785_v7  ;;  %v7922_v6 = vrot.slane %v7913_v11, %v7921_v45  ;;  %v7926_v7 = vrot.slane %v7913_v11, %v7925_v49 }
 0x473   : > { %7887 = vmatprep.subr.bf16.mxu1 %v10788_v39  ;;  %v7939_v39 = vld [vmem:[%s294_s18] sm:$0xf] }
 0x475   : > { %7847 = vmatpush1.bf16.msra.mxu0 %v10783_v52  ;;  %v7944_v52 = vrot.slane %v7939_v39, %v7917_v55 }
 0x476   : > { %7888 = vmatpush1.bf16.msra.mxu1 %v10786_v42  ;;  %v7948_v42 = vrot.slane %v7939_v39, %v7921_v45 }
 0x478   : > { %7849 = vmatmul.mubr.bf16.vlgmr.msra.gmra.mrb[60].mxu0 %v11877_v28 }
 0x479   : > { %7890 = vmatmul.mubr.bf16.vlgmr.msra.gmra.mrb[60].mxu1 %v11879_v30 }
 0x48b   : > { %v7604_v14 = vpop.f32.mrb[48].mxu0 }
 0x48c   : > { %v7645_v15 = vpop.f32.mrb[48].mxu1  ;;  %v7605_v43 = vadd.f32 %v7604_v14, %v12440_v5  ;;  %v7606_v57 = vpop.f32.mrb[49].mxu0  ;;  %v7909_v14 = vld [vmem:[%s11977_s22] sm:$0xff] }
 0x48d   : > { %v7647_v54 = vpop.f32.mrb[49].mxu1  ;;  %v7607_v48 = vadd.f32 %v7606_v57, %v12444_v47  ;;  %v7608_v9 = vpop.f32.mrb[50].mxu0 }
 0x48e   : > { %v7649_v0 = vpop.f32.mrb[50].mxu1  ;;  %v7646_v2 = vadd.f32 %v7645_v15, %v7605_v43  ;;  %v7609_v18 = vpop.f32.mrb[51].mxu0  ;;  %v7910_v15 = vld [vmem:[%s11977_s22 + $0x8] sm:$0xff] }
 0x48f   : > { %v7650_v21 = vpop.f32.mrb[51].mxu1  ;;  %v7648_v1 = vadd.f32 %v7647_v54, %v7607_v48  ;;  %v7956_v54 = vrot.slane %v7939_v39, %v7929_v10  ;;  %v7935_v48 = vmul.f32 %v7918_v36, %v7909_v14  ;;  %v7936_v9 = vmul.f32 %v7922_v6, %v7910_v15 }
 0x491   : > { %v7962_v18 = vadd.f32 %v7948_v42, %v7936_v9 }
 0x4cb   : > { %v7686_v51 = vpop.f32.mrb[52].mxu0 }
 0x4cc   : > { %v7727_v53 = vpop.f32.mrb[52].mxu1  ;;  %v7687_v4 = vadd.f32 %v7686_v51, %v7646_v2  ;;  %v7688_v28 = vpop.f32.mrb[53].mxu0  ;;  %v7961_v2 = vadd.f32 %v7944_v52, %v7935_v48 }
 0x4cd   : > { %v7729_v37 = vpop.f32.mrb[53].mxu1  ;;  %v7689_v30 = vadd.f32 %v7688_v28, %v7648_v1  ;;  %v7690_v29 = vpop.f32.mrb[54].mxu0 }
 0x4ce   : > { %v7731_v60 = vpop.f32.mrb[54].mxu1  ;;  %v7728_v61 = vadd.f32 %v7727_v53, %v7687_v4  ;;  %v7691_v32 = vpop.f32.mrb[55].mxu0  ;;  %v7965_v51 = vmax.f32 %v7961_v2, 0.0  ;;  %v7966_v53 = vmax.f32 %v7962_v18, 0.0 }
 0x4cf   : > { %v7732_v40 = vpop.f32.mrb[55].mxu1  ;;  %v7730_v5 = vadd.f32 %v7729_v37, %v7689_v30 }
 0x4d0   : > { %7969 = vst [vmem:[%s11977_s22] sm:$0xff] %v7965_v51  ;;  %7970 = vst [vmem:[%s11977_s22 + $0x8] sm:$0xff] %v7966_v53 }
 0x50b   : > { %v7768_v13 = vpop.f32.mrb[56].mxu0 }
 0x50c   : > { %v7809_v16 = vpop.f32.mrb[56].mxu1  ;;  %v7769_v50 = vadd.f32 %v7768_v13, %v7728_v61  ;;  %v7770_v20 = vpop.f32.mrb[57].mxu0 }
 0x50d   : > { %v7811_v47 = vpop.f32.mrb[57].mxu1  ;;  %v7771_v17 = vadd.f32 %v7770_v20, %v7730_v5  ;;  %v7772_v58 = vpop.f32.mrb[58].mxu0 }
 0x50e   : > { %v7813_v19 = vpop.f32.mrb[58].mxu1  ;;  %v7810_v22 = vadd.f32 %v7809_v16, %v7769_v50  ;;  %v7773_v23 = vpop.f32.mrb[59].mxu0 }
 0x50f   : > { %v7814_v24 = vpop.f32.mrb[59].mxu1  ;;  %v7812_v25 = vadd.f32 %v7811_v47, %v7771_v17 }
 0x54b   : > { %v7850_v38 = vpop.f32.mrb[60].mxu0 }
 0x54c   : > { %v7891_v27 = vpop.f32.mrb[60].mxu1  ;;  %v7851_v41 = vadd.f32 %v7850_v38, %v7810_v22  ;;  %v7852_v46 = vpop.f32.mrb[61].mxu0 }
 0x54d   : > { %v7893_v33 = vpop.f32.mrb[61].mxu1  ;;  %v7853_v56 = vadd.f32 %v7852_v46, %v7812_v25  ;;  %v7854_v12 = vpop.f32.mrb[62].mxu0 }
 0x54e   : > { %v7895_v62 = vpop.f32.mrb[62].mxu1  ;;  %v7892_v63 = vadd.f32 %v7891_v27, %v7851_v41  ;;  %v7855_v35 = vpop.f32.mrb[63].mxu0 }
 0x54f   : > { %v7896_v59 = vpop.f32.mrb[63].mxu1  ;;  %v7894_v8 = vadd.f32 %v7893_v33, %v7853_v56 }
 0x550   : > { %v7900_v44 = vadd.f32 %v7892_v63, %v12148_v34  ;;  %v7952_v34 = vrot.slane %v7939_v39, %v7925_v49 }
 0x551   : > { %7905 = vst [vmem:[%s11977_s22 + $0x18] sm:$0xff] %v7894_v8  ;;  %v7938_v57 = vmul.f32 %v7930_v31, %v7894_v8 }
 0x552   : > { %7904 = vst [vmem:[%s11977_s22 + $0x10] sm:$0xff] %v7900_v44 }
 0x553   : > { %v7964_v1 = vadd.f32 %v7956_v54, %v7938_v57 }
 0x555   : > { %v7968_v28 = vmax.f32 %v7964_v1, 0.0 }
 0x557   : > { %7972 = vst [vmem:[%s11977_s22 + $0x18] sm:$0xff] %v7968_v28 }
 0x559   : > { %v7911_v43 = vld [vmem:[%s11977_s22 + $0x10] sm:$0xff] }
 0x55a   : > { %v7937_v0 = vmul.f32 %v7926_v7, %v7911_v43 }
 0x55c   : > { %v7963_v21 = vadd.f32 %v7952_v34, %v7937_v0 }
 0x55e   : > { %v7967_v4 = vmax.f32 %v7963_v21, 0.0 }
 0x560   : > { %7971 = vst [vmem:[%s11977_s22 + $0x10] sm:$0xff] %v7967_v4 }
 0x561 PF: > { %s20_s20 = sadd.s32 1, %s10933_s20   ;;  %s12539_s1 = sld [smem:[#allocation9_spill]] }
 0x562   : > { %p17_p1 = scmp.ge.s32.totalorder %s20_s20, 4   ;;  %s12540_s15 = smov %s10917_s16 }
 0x563   : > { %s12541_s16 = smov %s10921_s17  ;;  %s12542_s17 = smov %s11014_s26 }
 0x564   : > { %s12543_s18 = smov %s10929_s19  ;;  %19 = sbr.rel (!%p17_p1) target bundleno = 9 (0x9), region = 111 }
 0x567   : > { %s12544_s19 = smov %s12539_s1 }
 0x56b   :  { %8003 = vsyncpa [#allocation3], 1 }
 0x56c   :  { %8005 = vsyncpa [#allocation3 + $0x1], 1 }
 0x56d   :  { %8006 = vsyncpa [#allocation5], 1 }
 0x56e   :  { %8008 = vsyncpa [#allocation5 + $0x1], 1 }

</bundles_post_ra>
